<compile_context>
chip_gen: v7x
topology: tpu7x:2x2x1
jax: 0.10.0
libtpu: 0.0.40
codegen_flags: <defaults>
</compile_context>

<pallas_src>
from functools import partial

import jax
import jax.numpy as jnp
from jax import lax
from jax.experimental import pallas as pl
from jax.experimental.pallas import tpu as pltpu


def svd_noise_kernel(num_heads, head_dim, b_tile,
                     u_ref, ut_ref, s_ref, vh_ref,
                     w1a_ref, b1a_ref, w1b_ref, b1b_ref,
                     w2a_ref, b2a_ref, w2b_ref, b2b_ref,
                     w3_ref, b3_ref,
                     wq_ref, wk_ref, wv_ref, wp_ref, bp_ref,
                     w4a_ref, b4a_ref, w4b_ref, b4b_ref,
                     pred_ref):
    f32 = jnp.float32
    bf16 = jnp.bfloat16
    BT = b_tile
    N = vh_ref.shape[1]
    C = N
    dn_r = (((1,), (1,)), ((), ()))   # contract lhs dim1 with rhs dim1 (A @ B^T)

    Vh = vh_ref[...]                              # (BT, N, N) f32
    s = s_ref[...].reshape(BT, N)                 # (BT, N)    f32

    # --- mlp1(U^T) + mlp2(Vh): stacked over all BT*N token rows --------------
    ut_flat = ut_ref[...].reshape(BT * N, N).astype(bf16)
    vh_flat = Vh.reshape(BT * N, N).astype(bf16)

    h1 = jnp.dot(ut_flat, w1a_ref[...], preferred_element_type=f32) + b1a_ref[...]
    h1 = jnp.maximum(h1, 0.0)
    h1 = jnp.dot(h1.astype(bf16), w1b_ref[...], preferred_element_type=f32) + b1b_ref[...]

    h2 = jnp.dot(vh_flat, w2a_ref[...], preferred_element_type=f32) + b2a_ref[...]
    h2 = jnp.maximum(h2, 0.0)
    h2 = jnp.dot(h2.astype(bf16), w2b_ref[...], preferred_element_type=f32) + b2b_ref[...]

    hsum = h1 + h2                                               # (BT*N, C) f32

    # --- mlp3(s): one row per example -----------------------------------------
    h3 = jnp.dot(s.astype(bf16), w3_ref[...], preferred_element_type=f32) + b3_ref[...]   # (BT, C)

    # --- per-example multi-head attention + token mean ------------------------
    scale = head_dim ** -0.5
    means = []
    for bi in range(BT):
        tok = hsum[bi * N:(bi + 1) * N, :] + h3[bi:bi + 1, :]    # (N, C) f32
        tb = tok.astype(bf16)
        y = jnp.zeros((N, C), f32)
        for h in range(num_heads):
            # per-head weights were pre-split (and head_dim zero-padded to 128
            # lanes) in the wrapper -> no lane-offset slicing of qkv here.
            qh = jnp.dot(tb, wq_ref[h], preferred_element_type=f32)   # (N, HDp)
            kh = jnp.dot(tb, wk_ref[h], preferred_element_type=f32)
            vv = jnp.dot(tb, wv_ref[h], preferred_element_type=f32)
            scores = lax.dot_general(qh.astype(bf16), kh.astype(bf16), dn_r,
                                     preferred_element_type=f32) * scale  # (N, N)
            mx = jnp.max(scores, axis=-1, keepdims=True)
            ex = jnp.exp(scores - mx)
            p = ex * pl.reciprocal(jnp.sum(ex, axis=-1, keepdims=True), approx=True)
            oh = jnp.dot(p.astype(bf16), vv.astype(bf16),
                         preferred_element_type=f32)                  # (N, HDp)
            # accumulate through the per-head proj slice (replaces the concat)
            y = y + jnp.dot(oh.astype(bf16), wp_ref[h], preferred_element_type=f32)
        y = y + bp_ref[...]
        means.append(jnp.mean(y, axis=0, keepdims=True))              # (1, C)
    m = jnp.concatenate(means, axis=0) if BT > 1 else means[0]        # (BT, C)

    # --- mlp4(mean) + s  -> new singular values --------------------------------
    g = jnp.dot(m.astype(bf16), w4a_ref[...], preferred_element_type=f32) + b4a_ref[...]
    g = jnp.maximum(g, 0.0)
    new_s = jnp.dot(g.astype(bf16), w4b_ref[...],
                    preferred_element_type=f32) + b4b_ref[...] + s    # (BT, N)

    # --- pred = U @ diag(new_s) @ Vh == (U * new_s) @ Vh, kept in f32 -----------
    for bi in range(BT):
        scaled = u_ref[bi] * new_s[bi:bi + 1, :]
        pred_ref[bi] = jnp.dot(scaled, Vh[bi], preferred_element_type=f32)


def make_params(key, resolution, in_channels=4, out_channels=4):
    """Deterministic synthetic parameters (same shapes as the torch module),
    stored as (in_dim, out_dim) weights and (1, out_dim) biases, f32."""
    _in = int(resolution * in_channels // 2)
    _out = int(resolution * out_channels // 2)
    keys = iter(jax.random.split(key, 32))

    def lin(din, dout, bias=True):
        sc = 1.0 / (din ** 0.5)
        w = jax.random.uniform(next(keys), (din, dout), jnp.float32, -sc, sc)
        if not bias:
            return (w,)
        b = jax.random.uniform(next(keys), (1, dout), jnp.float32, -sc, sc)
        return (w, b)

    params = []
    params += lin(_in, 64) + lin(64, _out)        # mlp1
    params += lin(_in, 64) + lin(64, _out)        # mlp2
    params += lin(_in, _out)                      # mlp3
    params += lin(_out, 3 * _out, bias=False)     # attention.qkv (qkv_bias=False)
    params += lin(_out, _out)                     # attention.proj
    params += lin(_out, 1024) + lin(1024, _out)   # mlp4
    # NOTE: self.bn (BatchNorm2d) is defined in the torch module but never used
    # in forward(), so it has no parameters here.
    return list(params)


def _prepare_params(params, N, num_heads, head_dim):
    """Re-layout parameters for the kernel: zero-pad narrow lane dims to 128,
    split qkv / proj per head, cast matmul weights to bf16 (biases stay f32)."""
    (w1a, b1a, w1b, b1b,
     w2a, b2a, w2b, b2b,
     w3, b3,
     wqkv,
     wp, bp,
     w4a, b4a, w4b, b4b) = params
    C = N
    bf16, f32 = jnp.bfloat16, jnp.float32
    HID = max(128, ((w1a.shape[1] + 127) // 128) * 128)   # mlp hidden 64 -> 128
    HDP = ((head_dim + 127) // 128) * 128                 # head_dim -> 128

    pad_c = lambda a, to: jnp.pad(a, ((0, 0), (0, to - a.shape[1])))
    pad_r = lambda a, to: jnp.pad(a, ((0, to - a.shape[0]), (0, 0)))

    def split_heads(w_cols):   # (C, C) -> (num_heads, C, HDP), zero-padded head dim
        wh = w_cols.reshape(C, num_heads, head_dim).transpose(1, 0, 2)
        return jnp.pad(wh, ((0, 0), (0, 0), (0, HDP - head_dim))).astype(bf16)

    wq = split_heads(wqkv[:, 0:C])
    wk = split_heads(wqkv[:, C:2 * C])
    wv = split_heads(wqkv[:, 2 * C:3 * C])
    wp_h = jnp.pad(wp.reshape(num_heads, head_dim, C),
                   ((0, 0), (0, HDP - head_dim), (0, 0))).astype(bf16)

    return [
        pad_c(w1a, HID).astype(bf16), pad_c(b1a, HID).astype(f32),
        pad_r(w1b, HID).astype(bf16), b1b.astype(f32),
        pad_c(w2a, HID).astype(bf16), pad_c(b2a, HID).astype(f32),
        pad_r(w2b, HID).astype(bf16), b2b.astype(f32),
        w3.astype(bf16), b3.astype(f32),
        wq, wk, wv, wp_h, bp.astype(f32),
        w4a.astype(bf16), b4a.astype(f32), w4b.astype(bf16), b4b.astype(f32),
    ]


def svd_noise_unet(x, params, num_heads=8, max_b_tile=8):
    b, c, h, w = x.shape
    assert c == 4, "module assumes 4 channels (a=2, c=2 rearrange)"
    assert h == w, "rearranged matrix must be square for the SVD reconstruction"

    # rearrange 'b (a c) h w -> b (a h) (c w)', a=2, c=2
    xm = x.reshape(b, 2, 2, h, w).transpose(0, 1, 3, 2, 4).reshape(b, 2 * h, 2 * w)
    N = 2 * h
    assert N % num_heads == 0
    head_dim = N // num_heads

    # TODO(synk): SVD has no Pallas/Mosaic primitive; computed in plain JAX (XLA).
    U, s, Vh = jnp.linalg.svd(xm.astype(jnp.float32), full_matrices=True)
    Ut = jnp.swapaxes(U, 1, 2)   # precompute U^T in XLA -> no in-kernel transpose
    s3 = s.reshape(b, 1, N)

    prepped = _prepare_params(params, N, num_heads, head_dim)

    # Largest batch tile (<= max_b_tile) dividing b: stacks MLP / mlp4 rows and
    # amortizes per-grid-step overhead.  (On v7x with larger b, the leftover
    # grid steps still land on both TensorCores via the "parallel" axis.)
    b_tile = 1
    for t in range(1, min(b, max_b_tile) + 1):
        if b % t == 0:
            b_tile = t
    grid = (b // b_tile,)

    def batch_spec(tail):
        nd = len(tail)
        return pl.BlockSpec((b_tile,) + tail, lambda i, nd=nd: (i,) + (0,) * nd)

    def weight_spec(shape):
        nd = len(shape)
        return pl.BlockSpec(shape, lambda i, nd=nd: (0,) * nd)

    in_specs = [batch_spec((N, N)),      # U
                batch_spec((N, N)),      # U^T
                batch_spec((1, N)),      # s
                batch_spec((N, N))]      # Vh
    in_specs += [weight_spec(p.shape) for p in prepped]

    # advisory cost estimate so XLA schedules the SVD / reshapes around the call
    hid = prepped[0].shape[-1]
    hdp = prepped[10].shape[-1]
    flops = int(b * (8 * N * N * hid + 2 * N * N
                     + num_heads * 12 * N * N * hdp
                     + 4 * N * 1024 + 2 * N * N * N))
    transcendentals = int(b * num_heads * (N * N + N))
    param_bytes = sum(int(p.size) * p.dtype.itemsize for p in prepped)
    bytes_accessed = int(param_bytes + b * (4 * N * N + N) * 4)

    kern = partial(svd_noise_kernel, num_heads, head_dim, b_tile)

    pred = pl.pallas_call(
        kern,
        out_shape=jax.ShapeDtypeStruct((b, N, N), jnp.float32),
        grid=grid,
        in_specs=in_specs,
        out_specs=pl.BlockSpec((b_tile, N, N), lambda i: (i, 0, 0)),
        compiler_params=pltpu.CompilerParams(
            dimension_semantics=("parallel",),
            vmem_limit_bytes=48 * 1024 * 1024),
        cost_estimate=pl.CostEstimate(flops=flops,
                                      transcendentals=transcendentals,
                                      bytes_accessed=bytes_accessed),
    )(U, Ut, s3, Vh, *prepped)

    # rearrange back 'b (a h) (c w) -> b (a c) h w', a=2, c=2
    out = pred.reshape(b, 2, h, 2, w).transpose(0, 1, 3, 2, 4).reshape(b, 4, h, w)
    return out


if __name__ == "__main__":
    key = jax.random.PRNGKey(0)
    kx, kp = jax.random.split(key)

    b, c, hh, ww = 2, 4, 16, 16            # small shapes: resolution = 16 -> N = 32
    x = jax.random.normal(kx, (b, c, hh, ww), jnp.float32)
    params = make_params(kp, resolution=hh, in_channels=c, out_channels=c)

    out = svd_noise_unet(x, params)
    out = jax.block_until_ready(out)
    assert out.shape == (b, c, hh, ww), out.shape
    assert jnp.all(jnp.isfinite(out))
    print("KERNEL_OK")
</pallas_src>

<mosaic_0001>
module attributes {stable_mosaic.version = 11 : i64} {
  func.func @svd_noise_kernel(%arg0: i32, %arg1: memref<2x32x32xf32, #tpu.memory_space<vmem>>, %arg2: memref<2x32x32xf32, #tpu.memory_space<vmem>>, %arg3: memref<2x1x32xf32, #tpu.memory_space<vmem>>, %arg4: memref<2x32x32xf32, #tpu.memory_space<vmem>>, %arg5: memref<32x128xbf16, #tpu.memory_space<vmem>>, %arg6: memref<1x128xf32, #tpu.memory_space<vmem>>, %arg7: memref<128x32xbf16, #tpu.memory_space<vmem>>, %arg8: memref<1x32xf32, #tpu.memory_space<vmem>>, %arg9: memref<32x128xbf16, #tpu.memory_space<vmem>>, %arg10: memref<1x128xf32, #tpu.memory_space<vmem>>, %arg11: memref<128x32xbf16, #tpu.memory_space<vmem>>, %arg12: memref<1x32xf32, #tpu.memory_space<vmem>>, %arg13: memref<32x32xbf16, #tpu.memory_space<vmem>>, %arg14: memref<1x32xf32, #tpu.memory_space<vmem>>, %arg15: memref<8x32x128xbf16, #tpu.memory_space<vmem>>, %arg16: memref<8x32x128xbf16, #tpu.memory_space<vmem>>, %arg17: memref<8x32x128xbf16, #tpu.memory_space<vmem>>, %arg18: memref<8x128x32xbf16, #tpu.memory_space<vmem>>, %arg19: memref<1x32xf32, #tpu.memory_space<vmem>>, %arg20: memref<32x1024xbf16, #tpu.memory_space<vmem>>, %arg21: memref<1x1024xf32, #tpu.memory_space<vmem>>, %arg22: memref<1024x32xbf16, #tpu.memory_space<vmem>>, %arg23: memref<1x32xf32, #tpu.memory_space<vmem>>, %arg24: memref<2x32x32xf32, #tpu.memory_space<vmem>>) attributes {dimension_semantics = [#tpu.dimension_semantics<parallel>], iteration_bounds = array<i64: 1>, scalar_prefetch = 0 : i64, scratch_operands = 0 : i64, tpu.core_type = #tpu.core_type<tc>, window_params = [{transform_indices = @transform_0, window_bounds = array<i64: 2, 32, 32>}, {transform_indices = @transform_1, window_bounds = array<i64: 2, 32, 32>}, {transform_indices = @transform_2, window_bounds = array<i64: 2, 1, 32>}, {transform_indices = @transform_3, window_bounds = array<i64: 2, 32, 32>}, {pipeline_mode = #tpu.pipeline_mode<synchronous>, transform_indices = @transform_4, window_bounds = array<i64: 32, 128>}, {pipeline_mode = #tpu.pipeline_mode<synchronous>, transform_indices = @transform_5, window_bounds = array<i64: 1, 128>}, {pipeline_mode = #tpu.pipeline_mode<synchronous>, transform_indices = @transform_6, window_bounds = array<i64: 128, 32>}, {pipeline_mode = #tpu.pipeline_mode<synchronous>, transform_indices = @transform_7, window_bounds = array<i64: 1, 32>}, {pipeline_mode = #tpu.pipeline_mode<synchronous>, transform_indices = @transform_8, window_bounds = array<i64: 32, 128>}, {pipeline_mode = #tpu.pipeline_mode<synchronous>, transform_indices = @transform_9, window_bounds = array<i64: 1, 128>}, {pipeline_mode = #tpu.pipeline_mode<synchronous>, transform_indices = @transform_10, window_bounds = array<i64: 128, 32>}, {pipeline_mode = #tpu.pipeline_mode<synchronous>, transform_indices = @transform_11, window_bounds = array<i64: 1, 32>}, {pipeline_mode = #tpu.pipeline_mode<synchronous>, transform_indices = @transform_12, window_bounds = array<i64: 32, 32>}, {pipeline_mode = #tpu.pipeline_mode<synchronous>, transform_indices = @transform_13, window_bounds = array<i64: 1, 32>}, {pipeline_mode = #tpu.pipeline_mode<synchronous>, transform_indices = @transform_14, window_bounds = array<i64: 8, 32, 128>}, {pipeline_mode = #tpu.pipeline_mode<synchronous>, transform_indices = @transform_15, window_bounds = array<i64: 8, 32, 128>}, {pipeline_mode = #tpu.pipeline_mode<synchronous>, transform_indices = @transform_16, window_bounds = array<i64: 8, 32, 128>}, {pipeline_mode = #tpu.pipeline_mode<synchronous>, transform_indices = @transform_17, window_bounds = array<i64: 8, 128, 32>}, {pipeline_mode = #tpu.pipeline_mode<synchronous>, transform_indices = @transform_18, window_bounds = array<i64: 1, 32>}, {pipeline_mode = #tpu.pipeline_mode<synchronous>, transform_indices = @transform_19, window_bounds = array<i64: 32, 1024>}, {pipeline_mode = #tpu.pipeline_mode<synchronous>, transform_indices = @transform_20, window_bounds = array<i64: 1, 1024>}, {pipeline_mode = #tpu.pipeline_mode<synchronous>, transform_indices = @transform_21, window_bounds = array<i64: 1024, 32>}, {pipeline_mode = #tpu.pipeline_mode<synchronous>, transform_indices = @transform_22, window_bounds = array<i64: 1, 32>}, {transform_indices = @transform_23, window_bounds = array<i64: 2, 32, 32>}]} {
    %c0 = arith.constant 0 : index
    %c0_0 = arith.constant 0 : index
    %c0_1 = arith.constant 0 : index
    %0 = vector.load %arg4[%c0, %c0_0, %c0_1] : memref<2x32x32xf32, #tpu.memory_space<vmem>>, vector<2x32x32xf32>
    %c0_2 = arith.constant 0 : index
    %c0_3 = arith.constant 0 : index
    %c0_4 = arith.constant 0 : index
    %1 = vector.load %arg3[%c0_2, %c0_3, %c0_4] : memref<2x1x32xf32, #tpu.memory_space<vmem>>, vector<2x1x32xf32>
    %2 = vector.shape_cast %1 : vector<2x1x32xf32> to vector<2x32xf32>
    %c0_5 = arith.constant 0 : index
    %c0_6 = arith.constant 0 : index
    %c0_7 = arith.constant 0 : index
    %3 = vector.load %arg2[%c0_5, %c0_6, %c0_7] : memref<2x32x32xf32, #tpu.memory_space<vmem>>, vector<2x32x32xf32>
    %4 = vector.shape_cast %3 : vector<2x32x32xf32> to vector<64x32xf32>
    %5 = arith.truncf %4 : vector<64x32xf32> to vector<64x32xbf16>
    %6 = vector.shape_cast %0 : vector<2x32x32xf32> to vector<64x32xf32>
    %7 = arith.truncf %6 : vector<64x32xf32> to vector<64x32xbf16>
    %c0_8 = arith.constant 0 : index
    %c0_9 = arith.constant 0 : index
    %8 = vector.load %arg5[%c0_8, %c0_9] : memref<32x128xbf16, #tpu.memory_space<vmem>>, vector<32x128xbf16>
    %cst = arith.constant dense<0.000000e+00> : vector<64x128xf32>
    %9 = tpu.matmul %5, %8, %cst {dimension_numbers = #tpu.dot_dimension_numbers<[1], [0], [0], [1], [0, 0, 1, 1], [], []>} : vector<64x32xbf16>, vector<32x128xbf16>, vector<64x128xf32> -> vector<64x128xf32>
    %c0_10 = arith.constant 0 : index
    %c0_11 = arith.constant 0 : index
    %10 = vector.load %arg6[%c0_10, %c0_11] : memref<1x128xf32, #tpu.memory_space<vmem>>, vector<1x128xf32>
    %11 = vector.broadcast %10 : vector<1x128xf32> to vector<64x128xf32>
    %12 = arith.addf %9, %11 : vector<64x128xf32>
    %cst_12 = arith.constant 0.000000e+00 : f32
    %13 = vector.broadcast %cst_12 : f32 to vector<64x128xf32>
    %14 = arith.maximumf %12, %13 : vector<64x128xf32>
    %15 = arith.truncf %14 : vector<64x128xf32> to vector<64x128xbf16>
    %c0_13 = arith.constant 0 : index
    %c0_14 = arith.constant 0 : index
    %16 = vector.load %arg7[%c0_13, %c0_14] : memref<128x32xbf16, #tpu.memory_space<vmem>>, vector<128x32xbf16>
    %cst_15 = arith.constant dense<0.000000e+00> : vector<64x32xf32>
    %17 = tpu.matmul %15, %16, %cst_15 {dimension_numbers = #tpu.dot_dimension_numbers<[1], [0], [0], [1], [0, 0, 1, 1], [], []>} : vector<64x128xbf16>, vector<128x32xbf16>, vector<64x32xf32> -> vector<64x32xf32>
    %c0_16 = arith.constant 0 : index
    %c0_17 = arith.constant 0 : index
    %18 = vector.load %arg8[%c0_16, %c0_17] : memref<1x32xf32, #tpu.memory_space<vmem>>, vector<1x32xf32>
    %19 = vector.broadcast %18 : vector<1x32xf32> to vector<64x32xf32>
    %20 = arith.addf %17, %19 : vector<64x32xf32>
    %c0_18 = arith.constant 0 : index
    %c0_19 = arith.constant 0 : index
    %21 = vector.load %arg9[%c0_18, %c0_19] : memref<32x128xbf16, #tpu.memory_space<vmem>>, vector<32x128xbf16>
    %cst_20 = arith.constant dense<0.000000e+00> : vector<64x128xf32>
    %22 = tpu.matmul %7, %21, %cst_20 {dimension_numbers = #tpu.dot_dimension_numbers<[1], [0], [0], [1], [0, 0, 1, 1], [], []>} : vector<64x32xbf16>, vector<32x128xbf16>, vector<64x128xf32> -> vector<64x128xf32>
    %c0_21 = arith.constant 0 : index
    %c0_22 = arith.constant 0 : index
    %23 = vector.load %arg10[%c0_21, %c0_22] : memref<1x128xf32, #tpu.memory_space<vmem>>, vector<1x128xf32>
    %24 = vector.broadcast %23 : vector<1x128xf32> to vector<64x128xf32>
    %25 = arith.addf %22, %24 : vector<64x128xf32>
    %cst_23 = arith.constant 0.000000e+00 : f32
    %26 = vector.broadcast %cst_23 : f32 to vector<64x128xf32>
    %27 = arith.maximumf %25, %26 : vector<64x128xf32>
    %28 = arith.truncf %27 : vector<64x128xf32> to vector<64x128xbf16>
    %c0_24 = arith.constant 0 : index
    %c0_25 = arith.constant 0 : index
    %29 = vector.load %arg11[%c0_24, %c0_25] : memref<128x32xbf16, #tpu.memory_space<vmem>>, vector<128x32xbf16>
    %cst_26 = arith.constant dense<0.000000e+00> : vector<64x32xf32>
    %30 = tpu.matmul %28, %29, %cst_26 {dimension_numbers = #tpu.dot_dimension_numbers<[1], [0], [0], [1], [0, 0, 1, 1], [], []>} : vector<64x128xbf16>, vector<128x32xbf16>, vector<64x32xf32> -> vector<64x32xf32>
    %c0_27 = arith.constant 0 : index
    %c0_28 = arith.constant 0 : index
    %31 = vector.load %arg12[%c0_27, %c0_28] : memref<1x32xf32, #tpu.memory_space<vmem>>, vector<1x32xf32>
    %32 = vector.broadcast %31 : vector<1x32xf32> to vector<64x32xf32>
    %33 = arith.addf %30, %32 : vector<64x32xf32>
    %34 = arith.addf %20, %33 : vector<64x32xf32>
    %35 = arith.truncf %2 : vector<2x32xf32> to vector<2x32xbf16>
    %c0_29 = arith.constant 0 : index
    %c0_30 = arith.constant 0 : index
    %36 = vector.load %arg13[%c0_29, %c0_30] : memref<32x32xbf16, #tpu.memory_space<vmem>>, vector<32x32xbf16>
    %cst_31 = arith.constant dense<0.000000e+00> : vector<2x32xf32>
    %37 = tpu.matmul %35, %36, %cst_31 {dimension_numbers = #tpu.dot_dimension_numbers<[1], [0], [0], [1], [0, 0, 1, 1], [], []>} : vector<2x32xbf16>, vector<32x32xbf16>, vector<2x32xf32> -> vector<2x32xf32>
    %c0_32 = arith.constant 0 : index
    %c0_33 = arith.constant 0 : index
    %38 = vector.load %arg14[%c0_32, %c0_33] : memref<1x32xf32, #tpu.memory_space<vmem>>, vector<1x32xf32>
    %39 = vector.broadcast %38 : vector<1x32xf32> to vector<2x32xf32>
    %40 = arith.addf %37, %39 : vector<2x32xf32>
    %41 = vector.extract_strided_slice %34 {offsets = [0, 0], sizes = [32, 32], strides = [1, 1]} : vector<64x32xf32> to vector<32x32xf32>
    %42 = vector.extract_strided_slice %40 {offsets = [0, 0], sizes = [1, 32], strides = [1, 1]} : vector<2x32xf32> to vector<1x32xf32>
    %43 = vector.broadcast %42 : vector<1x32xf32> to vector<32x32xf32>
    %44 = arith.addf %41, %43 : vector<32x32xf32>
    %45 = arith.truncf %44 : vector<32x32xf32> to vector<32x32xbf16>
    %cst_34 = arith.constant 0.000000e+00 : f32
    %46 = vector.broadcast %cst_34 : f32 to vector<32x32xf32>
    %c0_35 = arith.constant 0 : index
    %c0_36 = arith.constant 0 : index
    %c0_37 = arith.constant 0 : index
    %47 = vector.load %arg15[%c0_35, %c0_36, %c0_37] : memref<8x32x128xbf16, #tpu.memory_space<vmem>>, vector<1x32x128xbf16>
    %48 = vector.shape_cast %47 : vector<1x32x128xbf16> to vector<32x128xbf16>
    %cst_38 = arith.constant dense<0.000000e+00> : vector<32x128xf32>
    %49 = tpu.matmul %45, %48, %cst_38 {dimension_numbers = #tpu.dot_dimension_numbers<[1], [0], [0], [1], [0, 0, 1, 1], [], []>} : vector<32x32xbf16>, vector<32x128xbf16>, vector<32x128xf32> -> vector<32x128xf32>
    %c0_39 = arith.constant 0 : index
    %c0_40 = arith.constant 0 : index
    %c0_41 = arith.constant 0 : index
    %50 = vector.load %arg16[%c0_39, %c0_40, %c0_41] : memref<8x32x128xbf16, #tpu.memory_space<vmem>>, vector<1x32x128xbf16>
    %51 = vector.shape_cast %50 : vector<1x32x128xbf16> to vector<32x128xbf16>
    %cst_42 = arith.constant dense<0.000000e+00> : vector<32x128xf32>
    %52 = tpu.matmul %45, %51, %cst_42 {dimension_numbers = #tpu.dot_dimension_numbers<[1], [0], [0], [1], [0, 0, 1, 1], [], []>} : vector<32x32xbf16>, vector<32x128xbf16>, vector<32x128xf32> -> vector<32x128xf32>
    %c0_43 = arith.constant 0 : index
    %c0_44 = arith.constant 0 : index
    %c0_45 = arith.constant 0 : index
    %53 = vector.load %arg17[%c0_43, %c0_44, %c0_45] : memref<8x32x128xbf16, #tpu.memory_space<vmem>>, vector<1x32x128xbf16>
    %54 = vector.shape_cast %53 : vector<1x32x128xbf16> to vector<32x128xbf16>
    %cst_46 = arith.constant dense<0.000000e+00> : vector<32x128xf32>
    %55 = tpu.matmul %45, %54, %cst_46 {dimension_numbers = #tpu.dot_dimension_numbers<[1], [0], [0], [1], [0, 0, 1, 1], [], []>} : vector<32x32xbf16>, vector<32x128xbf16>, vector<32x128xf32> -> vector<32x128xf32>
    %56 = arith.truncf %49 : vector<32x128xf32> to vector<32x128xbf16>
    %57 = arith.truncf %52 : vector<32x128xf32> to vector<32x128xbf16>
    %cst_47 = arith.constant dense<0.000000e+00> : vector<32x32xf32>
    %58 = tpu.matmul %56, %57, %cst_47 {dimension_numbers = #tpu.dot_dimension_numbers<[1], [1], [0], [0], [0, 0, 1, 0], [], []>} : vector<32x128xbf16>, vector<32x128xbf16>, vector<32x32xf32> -> vector<32x32xf32>
    %cst_48 = arith.constant 5.000000e-01 : f32
    %59 = vector.broadcast %cst_48 : f32 to vector<32x32xf32>
    %60 = arith.mulf %58, %59 : vector<32x32xf32>
    %cst_49 = arith.constant dense<0xFF800000> : vector<32xf32>
    %61 = vector.multi_reduction <maximumf>, %60, %cst_49 [1] : vector<32x32xf32> to vector<32xf32>
    %62 = vector.shape_cast %61 : vector<32xf32> to vector<32x1xf32>
    %63 = vector.broadcast %62 : vector<32x1xf32> to vector<32x32xf32>
    %64 = arith.subf %60, %63 : vector<32x32xf32>
    %65 = math.exp %64 : vector<32x32xf32>
    %cst_50 = arith.constant dense<0.000000e+00> : vector<32xf32>
    %66 = vector.multi_reduction <add>, %65, %cst_50 [1] : vector<32x32xf32> to vector<32xf32>
    %67 = vector.shape_cast %66 : vector<32xf32> to vector<32x1xf32>
    %68 = tpu.reciprocal %67 {approx = true} : vector<32x1xf32> -> vector<32x1xf32>
    %69 = vector.broadcast %68 : vector<32x1xf32> to vector<32x32xf32>
    %70 = arith.mulf %65, %69 : vector<32x32xf32>
    %71 = arith.truncf %70 : vector<32x32xf32> to vector<32x32xbf16>
    %72 = arith.truncf %55 : vector<32x128xf32> to vector<32x128xbf16>
    %cst_51 = arith.constant dense<0.000000e+00> : vector<32x128xf32>
    %73 = tpu.matmul %71, %72, %cst_51 {dimension_numbers = #tpu.dot_dimension_numbers<[1], [0], [0], [1], [0, 0, 1, 1], [], []>} : vector<32x32xbf16>, vector<32x128xbf16>, vector<32x128xf32> -> vector<32x128xf32>
    %74 = arith.truncf %73 : vector<32x128xf32> to vector<32x128xbf16>
    %c0_52 = arith.constant 0 : index
    %c0_53 = arith.constant 0 : index
    %c0_54 = arith.constant 0 : index
    %75 = vector.load %arg18[%c0_52, %c0_53, %c0_54] : memref<8x128x32xbf16, #tpu.memory_space<vmem>>, vector<1x128x32xbf16>
    %76 = vector.shape_cast %75 : vector<1x128x32xbf16> to vector<128x32xbf16>
    %cst_55 = arith.constant dense<0.000000e+00> : vector<32x32xf32>
    %77 = tpu.matmul %74, %76, %cst_55 {dimension_numbers = #tpu.dot_dimension_numbers<[1], [0], [0], [1], [0, 0, 1, 1], [], []>} : vector<32x128xbf16>, vector<128x32xbf16>, vector<32x32xf32> -> vector<32x32xf32>
    %78 = arith.addf %46, %77 : vector<32x32xf32>
    %c1 = arith.constant 1 : index
    %c0_56 = arith.constant 0 : index
    %c0_57 = arith.constant 0 : index
    %79 = vector.load %arg15[%c1, %c0_56, %c0_57] : memref<8x32x128xbf16, #tpu.memory_space<vmem>>, vector<1x32x128xbf16>
    %80 = vector.shape_cast %79 : vector<1x32x128xbf16> to vector<32x128xbf16>
    %cst_58 = arith.constant dense<0.000000e+00> : vector<32x128xf32>
    %81 = tpu.matmul %45, %80, %cst_58 {dimension_numbers = #tpu.dot_dimension_numbers<[1], [0], [0], [1], [0, 0, 1, 1], [], []>} : vector<32x32xbf16>, vector<32x128xbf16>, vector<32x128xf32> -> vector<32x128xf32>
    %c1_59 = arith.constant 1 : index
    %c0_60 = arith.constant 0 : index
    %c0_61 = arith.constant 0 : index
    %82 = vector.load %arg16[%c1_59, %c0_60, %c0_61] : memref<8x32x128xbf16, #tpu.memory_space<vmem>>, vector<1x32x128xbf16>
    %83 = vector.shape_cast %82 : vector<1x32x128xbf16> to vector<32x128xbf16>
    %cst_62 = arith.constant dense<0.000000e+00> : vector<32x128xf32>
    %84 = tpu.matmul %45, %83, %cst_62 {dimension_numbers = #tpu.dot_dimension_numbers<[1], [0], [0], [1], [0, 0, 1, 1], [], []>} : vector<32x32xbf16>, vector<32x128xbf16>, vector<32x128xf32> -> vector<32x128xf32>
    %c1_63 = arith.constant 1 : index
    %c0_64 = arith.constant 0 : index
    %c0_65 = arith.constant 0 : index
    %85 = vector.load %arg17[%c1_63, %c0_64, %c0_65] : memref<8x32x128xbf16, #tpu.memory_space<vmem>>, vector<1x32x128xbf16>
    %86 = vector.shape_cast %85 : vector<1x32x128xbf16> to vector<32x128xbf16>
    %cst_66 = arith.constant dense<0.000000e+00> : vector<32x128xf32>
    %87 = tpu.matmul %45, %86, %cst_66 {dimension_numbers = #tpu.dot_dimension_numbers<[1], [0], [0], [1], [0, 0, 1, 1], [], []>} : vector<32x32xbf16>, vector<32x128xbf16>, vector<32x128xf32> -> vector<32x128xf32>
    %88 = arith.truncf %81 : vector<32x128xf32> to vector<32x128xbf16>
    %89 = arith.truncf %84 : vector<32x128xf32> to vector<32x128xbf16>
    %cst_67 = arith.constant dense<0.000000e+00> : vector<32x32xf32>
    %90 = tpu.matmul %88, %89, %cst_67 {dimension_numbers = #tpu.dot_dimension_numbers<[1], [1], [0], [0], [0, 0, 1, 0], [], []>} : vector<32x128xbf16>, vector<32x128xbf16>, vector<32x32xf32> -> vector<32x32xf32>
    %cst_68 = arith.constant 5.000000e-01 : f32
    %91 = vector.broadcast %cst_68 : f32 to vector<32x32xf32>
    %92 = arith.mulf %90, %91 : vector<32x32xf32>
    %cst_69 = arith.constant dense<0xFF800000> : vector<32xf32>
    %93 = vector.multi_reduction <maximumf>, %92, %cst_69 [1] : vector<32x32xf32> to vector<32xf32>
    %94 = vector.shape_cast %93 : vector<32xf32> to vector<32x1xf32>
    %95 = vector.broadcast %94 : vector<32x1xf32> to vector<32x32xf32>
    %96 = arith.subf %92, %95 : vector<32x32xf32>
    %97 = math.exp %96 : vector<32x32xf32>
    %cst_70 = arith.constant dense<0.000000e+00> : vector<32xf32>
    %98 = vector.multi_reduction <add>, %97, %cst_70 [1] : vector<32x32xf32> to vector<32xf32>
    %99 = vector.shape_cast %98 : vector<32xf32> to vector<32x1xf32>
    %100 = tpu.reciprocal %99 {approx = true} : vector<32x1xf32> -> vector<32x1xf32>
    %101 = vector.broadcast %100 : vector<32x1xf32> to vector<32x32xf32>
    %102 = arith.mulf %97, %101 : vector<32x32xf32>
    %103 = arith.truncf %102 : vector<32x32xf32> to vector<32x32xbf16>
    %104 = arith.truncf %87 : vector<32x128xf32> to vector<32x128xbf16>
    %cst_71 = arith.constant dense<0.000000e+00> : vector<32x128xf32>
    %105 = tpu.matmul %103, %104, %cst_71 {dimension_numbers = #tpu.dot_dimension_numbers<[1], [0], [0], [1], [0, 0, 1, 1], [], []>} : vector<32x32xbf16>, vector<32x128xbf16>, vector<32x128xf32> -> vector<32x128xf32>
    %106 = arith.truncf %105 : vector<32x128xf32> to vector<32x128xbf16>
    %c1_72 = arith.constant 1 : index
    %c0_73 = arith.constant 0 : index
    %c0_74 = arith.constant 0 : index
    %107 = vector.load %arg18[%c1_72, %c0_73, %c0_74] : memref<8x128x32xbf16, #tpu.memory_space<vmem>>, vector<1x128x32xbf16>
    %108 = vector.shape_cast %107 : vector<1x128x32xbf16> to vector<128x32xbf16>
    %cst_75 = arith.constant dense<0.000000e+00> : vector<32x32xf32>
    %109 = tpu.matmul %106, %108, %cst_75 {dimension_numbers = #tpu.dot_dimension_numbers<[1], [0], [0], [1], [0, 0, 1, 1], [], []>} : vector<32x128xbf16>, vector<128x32xbf16>, vector<32x32xf32> -> vector<32x32xf32>
    %110 = arith.addf %78, %109 : vector<32x32xf32>
    %c2 = arith.constant 2 : index
    %c0_76 = arith.constant 0 : index
    %c0_77 = arith.constant 0 : index
    %111 = vector.load %arg15[%c2, %c0_76, %c0_77] : memref<8x32x128xbf16, #tpu.memory_space<vmem>>, vector<1x32x128xbf16>
    %112 = vector.shape_cast %111 : vector<1x32x128xbf16> to vector<32x128xbf16>
    %cst_78 = arith.constant dense<0.000000e+00> : vector<32x128xf32>
    %113 = tpu.matmul %45, %112, %cst_78 {dimension_numbers = #tpu.dot_dimension_numbers<[1], [0], [0], [1], [0, 0, 1, 1], [], []>} : vector<32x32xbf16>, vector<32x128xbf16>, vector<32x128xf32> -> vector<32x128xf32>
    %c2_79 = arith.constant 2 : index
    %c0_80 = arith.constant 0 : index
    %c0_81 = arith.constant 0 : index
    %114 = vector.load %arg16[%c2_79, %c0_80, %c0_81] : memref<8x32x128xbf16, #tpu.memory_space<vmem>>, vector<1x32x128xbf16>
    %115 = vector.shape_cast %114 : vector<1x32x128xbf16> to vector<32x128xbf16>
    %cst_82 = arith.constant dense<0.000000e+00> : vector<32x128xf32>
    %116 = tpu.matmul %45, %115, %cst_82 {dimension_numbers = #tpu.dot_dimension_numbers<[1], [0], [0], [1], [0, 0, 1, 1], [], []>} : vector<32x32xbf16>, vector<32x128xbf16>, vector<32x128xf32> -> vector<32x128xf32>
    %c2_83 = arith.constant 2 : index
    %c0_84 = arith.constant 0 : index
    %c0_85 = arith.constant 0 : index
    %117 = vector.load %arg17[%c2_83, %c0_84, %c0_85] : memref<8x32x128xbf16, #tpu.memory_space<vmem>>, vector<1x32x128xbf16>
    %118 = vector.shape_cast %117 : vector<1x32x128xbf16> to vector<32x128xbf16>
    %cst_86 = arith.constant dense<0.000000e+00> : vector<32x128xf32>
    %119 = tpu.matmul %45, %118, %cst_86 {dimension_numbers = #tpu.dot_dimension_numbers<[1], [0], [0], [1], [0, 0, 1, 1], [], []>} : vector<32x32xbf16>, vector<32x128xbf16>, vector<32x128xf32> -> vector<32x128xf32>
    %120 = arith.truncf %113 : vector<32x128xf32> to vector<32x128xbf16>
    %121 = arith.truncf %116 : vector<32x128xf32> to vector<32x128xbf16>
    %cst_87 = arith.constant dense<0.000000e+00> : vector<32x32xf32>
    %122 = tpu.matmul %120, %121, %cst_87 {dimension_numbers = #tpu.dot_dimension_numbers<[1], [1], [0], [0], [0, 0, 1, 0], [], []>} : vector<32x128xbf16>, vector<32x128xbf16>, vector<32x32xf32> -> vector<32x32xf32>
    %cst_88 = arith.constant 5.000000e-01 : f32
    %123 = vector.broadcast %cst_88 : f32 to vector<32x32xf32>
    %124 = arith.mulf %122, %123 : vector<32x32xf32>
    %cst_89 = arith.constant dense<0xFF800000> : vector<32xf32>
    %125 = vector.multi_reduction <maximumf>, %124, %cst_89 [1] : vector<32x32xf32> to vector<32xf32>
    %126 = vector.shape_cast %125 : vector<32xf32> to vector<32x1xf32>
    %127 = vector.broadcast %126 : vector<32x1xf32> to vector<32x32xf32>
    %128 = arith.subf %124, %127 : vector<32x32xf32>
    %129 = math.exp %128 : vector<32x32xf32>
    %cst_90 = arith.constant dense<0.000000e+00> : vector<32xf32>
    %130 = vector.multi_reduction <add>, %129, %cst_90 [1] : vector<32x32xf32> to vector<32xf32>
    %131 = vector.shape_cast %130 : vector<32xf32> to vector<32x1xf32>
    %132 = tpu.reciprocal %131 {approx = true} : vector<32x1xf32> -> vector<32x1xf32>
    %133 = vector.broadcast %132 : vector<32x1xf32> to vector<32x32xf32>
    %134 = arith.mulf %129, %133 : vector<32x32xf32>
    %135 = arith.truncf %134 : vector<32x32xf32> to vector<32x32xbf16>
    %136 = arith.truncf %119 : vector<32x128xf32> to vector<32x128xbf16>
    %cst_91 = arith.constant dense<0.000000e+00> : vector<32x128xf32>
    %137 = tpu.matmul %135, %136, %cst_91 {dimension_numbers = #tpu.dot_dimension_numbers<[1], [0], [0], [1], [0, 0, 1, 1], [], []>} : vector<32x32xbf16>, vector<32x128xbf16>, vector<32x128xf32> -> vector<32x128xf32>
    %138 = arith.truncf %137 : vector<32x128xf32> to vector<32x128xbf16>
    %c2_92 = arith.constant 2 : index
    %c0_93 = arith.constant 0 : index
    %c0_94 = arith.constant 0 : index
    %139 = vector.load %arg18[%c2_92, %c0_93, %c0_94] : memref<8x128x32xbf16, #tpu.memory_space<vmem>>, vector<1x128x32xbf16>
    %140 = vector.shape_cast %139 : vector<1x128x32xbf16> to vector<128x32xbf16>
    %cst_95 = arith.constant dense<0.000000e+00> : vector<32x32xf32>
    %141 = tpu.matmul %138, %140, %cst_95 {dimension_numbers = #tpu.dot_dimension_numbers<[1], [0], [0], [1], [0, 0, 1, 1], [], []>} : vector<32x128xbf16>, vector<128x32xbf16>, vector<32x32xf32> -> vector<32x32xf32>
    %142 = arith.addf %110, %141 : vector<32x32xf32>
    %c3 = arith.constant 3 : index
    %c0_96 = arith.constant 0 : index
    %c0_97 = arith.constant 0 : index
    %143 = vector.load %arg15[%c3, %c0_96, %c0_97] : memref<8x32x128xbf16, #tpu.memory_space<vmem>>, vector<1x32x128xbf16>
    %144 = vector.shape_cast %143 : vector<1x32x128xbf16> to vector<32x128xbf16>
    %cst_98 = arith.constant dense<0.000000e+00> : vector<32x128xf32>
    %145 = tpu.matmul %45, %144, %cst_98 {dimension_numbers = #tpu.dot_dimension_numbers<[1], [0], [0], [1], [0, 0, 1, 1], [], []>} : vector<32x32xbf16>, vector<32x128xbf16>, vector<32x128xf32> -> vector<32x128xf32>
    %c3_99 = arith.constant 3 : index
    %c0_100 = arith.constant 0 : index
    %c0_101 = arith.constant 0 : index
    %146 = vector.load %arg16[%c3_99, %c0_100, %c0_101] : memref<8x32x128xbf16, #tpu.memory_space<vmem>>, vector<1x32x128xbf16>
    %147 = vector.shape_cast %146 : vector<1x32x128xbf16> to vector<32x128xbf16>
    %cst_102 = arith.constant dense<0.000000e+00> : vector<32x128xf32>
    %148 = tpu.matmul %45, %147, %cst_102 {dimension_numbers = #tpu.dot_dimension_numbers<[1], [0], [0], [1], [0, 0, 1, 1], [], []>} : vector<32x32xbf16>, vector<32x128xbf16>, vector<32x128xf32> -> vector<32x128xf32>
    %c3_103 = arith.constant 3 : index
    %c0_104 = arith.constant 0 : index
    %c0_105 = arith.constant 0 : index
    %149 = vector.load %arg17[%c3_103, %c0_104, %c0_105] : memref<8x32x128xbf16, #tpu.memory_space<vmem>>, vector<1x32x128xbf16>
    %150 = vector.shape_cast %149 : vector<1x32x128xbf16> to vector<32x128xbf16>
    %cst_106 = arith.constant dense<0.000000e+00> : vector<32x128xf32>
    %151 = tpu.matmul %45, %150, %cst_106 {dimension_numbers = #tpu.dot_dimension_numbers<[1], [0], [0], [1], [0, 0, 1, 1], [], []>} : vector<32x32xbf16>, vector<32x128xbf16>, vector<32x128xf32> -> vector<32x128xf32>
    %152 = arith.truncf %145 : vector<32x128xf32> to vector<32x128xbf16>
    %153 = arith.truncf %148 : vector<32x128xf32> to vector<32x128xbf16>
    %cst_107 = arith.constant dense<0.000000e+00> : vector<32x32xf32>
    %154 = tpu.matmul %152, %153, %cst_107 {dimension_numbers = #tpu.dot_dimension_numbers<[1], [1], [0], [0], [0, 0, 1, 0], [], []>} : vector<32x128xbf16>, vector<32x128xbf16>, vector<32x32xf32> -> vector<32x32xf32>
    %cst_108 = arith.constant 5.000000e-01 : f32
    %155 = vector.broadcast %cst_108 : f32 to vector<32x32xf32>
    %156 = arith.mulf %154, %155 : vector<32x32xf32>
    %cst_109 = arith.constant dense<0xFF800000> : vector<32xf32>
    %157 = vector.multi_reduction <maximumf>, %156, %cst_109 [1] : vector<32x32xf32> to vector<32xf32>
    %158 = vector.shape_cast %157 : vector<32xf32> to vector<32x1xf32>
    %159 = vector.broadcast %158 : vector<32x1xf32> to vector<32x32xf32>
    %160 = arith.subf %156, %159 : vector<32x32xf32>
    %161 = math.exp %160 : vector<32x32xf32>
    %cst_110 = arith.constant dense<0.000000e+00> : vector<32xf32>
    %162 = vector.multi_reduction <add>, %161, %cst_110 [1] : vector<32x32xf32> to vector<32xf32>
    %163 = vector.shape_cast %162 : vector<32xf32> to vector<32x1xf32>
    %164 = tpu.reciprocal %163 {approx = true} : vector<32x1xf32> -> vector<32x1xf32>
    %165 = vector.broadcast %164 : vector<32x1xf32> to vector<32x32xf32>
    %166 = arith.mulf %161, %165 : vector<32x32xf32>
    %167 = arith.truncf %166 : vector<32x32xf32> to vector<32x32xbf16>
    %168 = arith.truncf %151 : vector<32x128xf32> to vector<32x128xbf16>
    %cst_111 = arith.constant dense<0.000000e+00> : vector<32x128xf32>
    %169 = tpu.matmul %167, %168, %cst_111 {dimension_numbers = #tpu.dot_dimension_numbers<[1], [0], [0], [1], [0, 0, 1, 1], [], []>} : vector<32x32xbf16>, vector<32x128xbf16>, vector<32x128xf32> -> vector<32x128xf32>
    %170 = arith.truncf %169 : vector<32x128xf32> to vector<32x128xbf16>
    %c3_112 = arith.constant 3 : index
    %c0_113 = arith.constant 0 : index
    %c0_114 = arith.constant 0 : index
    %171 = vector.load %arg18[%c3_112, %c0_113, %c0_114] : memref<8x128x32xbf16, #tpu.memory_space<vmem>>, vector<1x128x32xbf16>
    %172 = vector.shape_cast %171 : vector<1x128x32xbf16> to vector<128x32xbf16>
    %cst_115 = arith.constant dense<0.000000e+00> : vector<32x32xf32>
    %173 = tpu.matmul %170, %172, %cst_115 {dimension_numbers = #tpu.dot_dimension_numbers<[1], [0], [0], [1], [0, 0, 1, 1], [], []>} : vector<32x128xbf16>, vector<128x32xbf16>, vector<32x32xf32> -> vector<32x32xf32>
    %174 = arith.addf %142, %173 : vector<32x32xf32>
    %c4 = arith.constant 4 : index
    %c0_116 = arith.constant 0 : index
    %c0_117 = arith.constant 0 : index
    %175 = vector.load %arg15[%c4, %c0_116, %c0_117] : memref<8x32x128xbf16, #tpu.memory_space<vmem>>, vector<1x32x128xbf16>
    %176 = vector.shape_cast %175 : vector<1x32x128xbf16> to vector<32x128xbf16>
    %cst_118 = arith.constant dense<0.000000e+00> : vector<32x128xf32>
    %177 = tpu.matmul %45, %176, %cst_118 {dimension_numbers = #tpu.dot_dimension_numbers<[1], [0], [0], [1], [0, 0, 1, 1], [], []>} : vector<32x32xbf16>, vector<32x128xbf16>, vector<32x128xf32> -> vector<32x128xf32>
    %c4_119 = arith.constant 4 : index
    %c0_120 = arith.constant 0 : index
    %c0_121 = arith.constant 0 : index
    %178 = vector.load %arg16[%c4_119, %c0_120, %c0_121] : memref<8x32x128xbf16, #tpu.memory_space<vmem>>, vector<1x32x128xbf16>
    %179 = vector.shape_cast %178 : vector<1x32x128xbf16> to vector<32x128xbf16>
    %cst_122 = arith.constant dense<0.000000e+00> : vector<32x128xf32>
    %180 = tpu.matmul %45, %179, %cst_122 {dimension_numbers = #tpu.dot_dimension_numbers<[1], [0], [0], [1], [0, 0, 1, 1], [], []>} : vector<32x32xbf16>, vector<32x128xbf16>, vector<32x128xf32> -> vector<32x128xf32>
    %c4_123 = arith.constant 4 : index
    %c0_124 = arith.constant 0 : index
    %c0_125 = arith.constant 0 : index
    %181 = vector.load %arg17[%c4_123, %c0_124, %c0_125] : memref<8x32x128xbf16, #tpu.memory_space<vmem>>, vector<1x32x128xbf16>
    %182 = vector.shape_cast %181 : vector<1x32x128xbf16> to vector<32x128xbf16>
    %cst_126 = arith.constant dense<0.000000e+00> : vector<32x128xf32>
    %183 = tpu.matmul %45, %182, %cst_126 {dimension_numbers = #tpu.dot_dimension_numbers<[1], [0], [0], [1], [0, 0, 1, 1], [], []>} : vector<32x32xbf16>, vector<32x128xbf16>, vector<32x128xf32> -> vector<32x128xf32>
    %184 = arith.truncf %177 : vector<32x128xf32> to vector<32x128xbf16>
    %185 = arith.truncf %180 : vector<32x128xf32> to vector<32x128xbf16>
    %cst_127 = arith.constant dense<0.000000e+00> : vector<32x32xf32>
    %186 = tpu.matmul %184, %185, %cst_127 {dimension_numbers = #tpu.dot_dimension_numbers<[1], [1], [0], [0], [0, 0, 1, 0], [], []>} : vector<32x128xbf16>, vector<32x128xbf16>, vector<32x32xf32> -> vector<32x32xf32>
    %cst_128 = arith.constant 5.000000e-01 : f32
    %187 = vector.broadcast %cst_128 : f32 to vector<32x32xf32>
    %188 = arith.mulf %186, %187 : vector<32x32xf32>
    %cst_129 = arith.constant dense<0xFF800000> : vector<32xf32>
    %189 = vector.multi_reduction <maximumf>, %188, %cst_129 [1] : vector<32x32xf32> to vector<32xf32>
    %190 = vector.shape_cast %189 : vector<32xf32> to vector<32x1xf32>
    %191 = vector.broadcast %190 : vector<32x1xf32> to vector<32x32xf32>
    %192 = arith.subf %188, %191 : vector<32x32xf32>
    %193 = math.exp %192 : vector<32x32xf32>
    %cst_130 = arith.constant dense<0.000000e+00> : vector<32xf32>
    %194 = vector.multi_reduction <add>, %193, %cst_130 [1] : vector<32x32xf32> to vector<32xf32>
    %195 = vector.shape_cast %194 : vector<32xf32> to vector<32x1xf32>
    %196 = tpu.reciprocal %195 {approx = true} : vector<32x1xf32> -> vector<32x1xf32>
    %197 = vector.broadcast %196 : vector<32x1xf32> to vector<32x32xf32>
    %198 = arith.mulf %193, %197 : vector<32x32xf32>
    %199 = arith.truncf %198 : vector<32x32xf32> to vector<32x32xbf16>
    %200 = arith.truncf %183 : vector<32x128xf32> to vector<32x128xbf16>
    %cst_131 = arith.constant dense<0.000000e+00> : vector<32x128xf32>
    %201 = tpu.matmul %199, %200, %cst_131 {dimension_numbers = #tpu.dot_dimension_numbers<[1], [0], [0], [1], [0, 0, 1, 1], [], []>} : vector<32x32xbf16>, vector<32x128xbf16>, vector<32x128xf32> -> vector<32x128xf32>
    %202 = arith.truncf %201 : vector<32x128xf32> to vector<32x128xbf16>
    %c4_132 = arith.constant 4 : index
    %c0_133 = arith.constant 0 : index
    %c0_134 = arith.constant 0 : index
    %203 = vector.load %arg18[%c4_132, %c0_133, %c0_134] : memref<8x128x32xbf16, #tpu.memory_space<vmem>>, vector<1x128x32xbf16>
    %204 = vector.shape_cast %203 : vector<1x128x32xbf16> to vector<128x32xbf16>
    %cst_135 = arith.constant dense<0.000000e+00> : vector<32x32xf32>
    %205 = tpu.matmul %202, %204, %cst_135 {dimension_numbers = #tpu.dot_dimension_numbers<[1], [0], [0], [1], [0, 0, 1, 1], [], []>} : vector<32x128xbf16>, vector<128x32xbf16>, vector<32x32xf32> -> vector<32x32xf32>
    %206 = arith.addf %174, %205 : vector<32x32xf32>
    %c5 = arith.constant 5 : index
    %c0_136 = arith.constant 0 : index
    %c0_137 = arith.constant 0 : index
    %207 = vector.load %arg15[%c5, %c0_136, %c0_137] : memref<8x32x128xbf16, #tpu.memory_space<vmem>>, vector<1x32x128xbf16>
    %208 = vector.shape_cast %207 : vector<1x32x128xbf16> to vector<32x128xbf16>
    %cst_138 = arith.constant dense<0.000000e+00> : vector<32x128xf32>
    %209 = tpu.matmul %45, %208, %cst_138 {dimension_numbers = #tpu.dot_dimension_numbers<[1], [0], [0], [1], [0, 0, 1, 1], [], []>} : vector<32x32xbf16>, vector<32x128xbf16>, vector<32x128xf32> -> vector<32x128xf32>
    %c5_139 = arith.constant 5 : index
    %c0_140 = arith.constant 0 : index
    %c0_141 = arith.constant 0 : index
    %210 = vector.load %arg16[%c5_139, %c0_140, %c0_141] : memref<8x32x128xbf16, #tpu.memory_space<vmem>>, vector<1x32x128xbf16>
    %211 = vector.shape_cast %210 : vector<1x32x128xbf16> to vector<32x128xbf16>
    %cst_142 = arith.constant dense<0.000000e+00> : vector<32x128xf32>
    %212 = tpu.matmul %45, %211, %cst_142 {dimension_numbers = #tpu.dot_dimension_numbers<[1], [0], [0], [1], [0, 0, 1, 1], [], []>} : vector<32x32xbf16>, vector<32x128xbf16>, vector<32x128xf32> -> vector<32x128xf32>
    %c5_143 = arith.constant 5 : index
    %c0_144 = arith.constant 0 : index
    %c0_145 = arith.constant 0 : index
    %213 = vector.load %arg17[%c5_143, %c0_144, %c0_145] : memref<8x32x128xbf16, #tpu.memory_space<vmem>>, vector<1x32x128xbf16>
    %214 = vector.shape_cast %213 : vector<1x32x128xbf16> to vector<32x128xbf16>
    %cst_146 = arith.constant dense<0.000000e+00> : vector<32x128xf32>
    %215 = tpu.matmul %45, %214, %cst_146 {dimension_numbers = #tpu.dot_dimension_numbers<[1], [0], [0], [1], [0, 0, 1, 1], [], []>} : vector<32x32xbf16>, vector<32x128xbf16>, vector<32x128xf32> -> vector<32x128xf32>
    %216 = arith.truncf %209 : vector<32x128xf32> to vector<32x128xbf16>
    %217 = arith.truncf %212 : vector<32x128xf32> to vector<32x128xbf16>
    %cst_147 = arith.constant dense<0.000000e+00> : vector<32x32xf32>
    %218 = tpu.matmul %216, %217, %cst_147 {dimension_numbers = #tpu.dot_dimension_numbers<[1], [1], [0], [0], [0, 0, 1, 0], [], []>} : vector<32x128xbf16>, vector<32x128xbf16>, vector<32x32xf32> -> vector<32x32xf32>
    %cst_148 = arith.constant 5.000000e-01 : f32
    %219 = vector.broadcast %cst_148 : f32 to vector<32x32xf32>
    %220 = arith.mulf %218, %219 : vector<32x32xf32>
    %cst_149 = arith.constant dense<0xFF800000> : vector<32xf32>
    %221 = vector.multi_reduction <maximumf>, %220, %cst_149 [1] : vector<32x32xf32> to vector<32xf32>
    %222 = vector.shape_cast %221 : vector<32xf32> to vector<32x1xf32>
    %223 = vector.broadcast %222 : vector<32x1xf32> to vector<32x32xf32>
    %224 = arith.subf %220, %223 : vector<32x32xf32>
    %225 = math.exp %224 : vector<32x32xf32>
    %cst_150 = arith.constant dense<0.000000e+00> : vector<32xf32>
    %226 = vector.multi_reduction <add>, %225, %cst_150 [1] : vector<32x32xf32> to vector<32xf32>
    %227 = vector.shape_cast %226 : vector<32xf32> to vector<32x1xf32>
    %228 = tpu.reciprocal %227 {approx = true} : vector<32x1xf32> -> vector<32x1xf32>
    %229 = vector.broadcast %228 : vector<32x1xf32> to vector<32x32xf32>
    %230 = arith.mulf %225, %229 : vector<32x32xf32>
    %231 = arith.truncf %230 : vector<32x32xf32> to vector<32x32xbf16>
    %232 = arith.truncf %215 : vector<32x128xf32> to vector<32x128xbf16>
    %cst_151 = arith.constant dense<0.000000e+00> : vector<32x128xf32>
    %233 = tpu.matmul %231, %232, %cst_151 {dimension_numbers = #tpu.dot_dimension_numbers<[1], [0], [0], [1], [0, 0, 1, 1], [], []>} : vector<32x32xbf16>, vector<32x128xbf16>, vector<32x128xf32> -> vector<32x128xf32>
    %234 = arith.truncf %233 : vector<32x128xf32> to vector<32x128xbf16>
    %c5_152 = arith.constant 5 : index
    %c0_153 = arith.constant 0 : index
    %c0_154 = arith.constant 0 : index
    %235 = vector.load %arg18[%c5_152, %c0_153, %c0_154] : memref<8x128x32xbf16, #tpu.memory_space<vmem>>, vector<1x128x32xbf16>
    %236 = vector.shape_cast %235 : vector<1x128x32xbf16> to vector<128x32xbf16>
    %cst_155 = arith.constant dense<0.000000e+00> : vector<32x32xf32>
    %237 = tpu.matmul %234, %236, %cst_155 {dimension_numbers = #tpu.dot_dimension_numbers<[1], [0], [0], [1], [0, 0, 1, 1], [], []>} : vector<32x128xbf16>, vector<128x32xbf16>, vector<32x32xf32> -> vector<32x32xf32>
    %238 = arith.addf %206, %237 : vector<32x32xf32>
    %c6 = arith.constant 6 : index
    %c0_156 = arith.constant 0 : index
    %c0_157 = arith.constant 0 : index
    %239 = vector.load %arg15[%c6, %c0_156, %c0_157] : memref<8x32x128xbf16, #tpu.memory_space<vmem>>, vector<1x32x128xbf16>
    %240 = vector.shape_cast %239 : vector<1x32x128xbf16> to vector<32x128xbf16>
    %cst_158 = arith.constant dense<0.000000e+00> : vector<32x128xf32>
    %241 = tpu.matmul %45, %240, %cst_158 {dimension_numbers = #tpu.dot_dimension_numbers<[1], [0], [0], [1], [0, 0, 1, 1], [], []>} : vector<32x32xbf16>, vector<32x128xbf16>, vector<32x128xf32> -> vector<32x128xf32>
    %c6_159 = arith.constant 6 : index
    %c0_160 = arith.constant 0 : index
    %c0_161 = arith.constant 0 : index
    %242 = vector.load %arg16[%c6_159, %c0_160, %c0_161] : memref<8x32x128xbf16, #tpu.memory_space<vmem>>, vector<1x32x128xbf16>
    %243 = vector.shape_cast %242 : vector<1x32x128xbf16> to vector<32x128xbf16>
    %cst_162 = arith.constant dense<0.000000e+00> : vector<32x128xf32>
    %244 = tpu.matmul %45, %243, %cst_162 {dimension_numbers = #tpu.dot_dimension_numbers<[1], [0], [0], [1], [0, 0, 1, 1], [], []>} : vector<32x32xbf16>, vector<32x128xbf16>, vector<32x128xf32> -> vector<32x128xf32>
    %c6_163 = arith.constant 6 : index
    %c0_164 = arith.constant 0 : index
    %c0_165 = arith.constant 0 : index
    %245 = vector.load %arg17[%c6_163, %c0_164, %c0_165] : memref<8x32x128xbf16, #tpu.memory_space<vmem>>, vector<1x32x128xbf16>
    %246 = vector.shape_cast %245 : vector<1x32x128xbf16> to vector<32x128xbf16>
    %cst_166 = arith.constant dense<0.000000e+00> : vector<32x128xf32>
    %247 = tpu.matmul %45, %246, %cst_166 {dimension_numbers = #tpu.dot_dimension_numbers<[1], [0], [0], [1], [0, 0, 1, 1], [], []>} : vector<32x32xbf16>, vector<32x128xbf16>, vector<32x128xf32> -> vector<32x128xf32>
    %248 = arith.truncf %241 : vector<32x128xf32> to vector<32x128xbf16>
    %249 = arith.truncf %244 : vector<32x128xf32> to vector<32x128xbf16>
    %cst_167 = arith.constant dense<0.000000e+00> : vector<32x32xf32>
    %250 = tpu.matmul %248, %249, %cst_167 {dimension_numbers = #tpu.dot_dimension_numbers<[1], [1], [0], [0], [0, 0, 1, 0], [], []>} : vector<32x128xbf16>, vector<32x128xbf16>, vector<32x32xf32> -> vector<32x32xf32>
    %cst_168 = arith.constant 5.000000e-01 : f32
    %251 = vector.broadcast %cst_168 : f32 to vector<32x32xf32>
    %252 = arith.mulf %250, %251 : vector<32x32xf32>
    %cst_169 = arith.constant dense<0xFF800000> : vector<32xf32>
    %253 = vector.multi_reduction <maximumf>, %252, %cst_169 [1] : vector<32x32xf32> to vector<32xf32>
    %254 = vector.shape_cast %253 : vector<32xf32> to vector<32x1xf32>
    %255 = vector.broadcast %254 : vector<32x1xf32> to vector<32x32xf32>
    %256 = arith.subf %252, %255 : vector<32x32xf32>
    %257 = math.exp %256 : vector<32x32xf32>
    %cst_170 = arith.constant dense<0.000000e+00> : vector<32xf32>
    %258 = vector.multi_reduction <add>, %257, %cst_170 [1] : vector<32x32xf32> to vector<32xf32>
    %259 = vector.shape_cast %258 : vector<32xf32> to vector<32x1xf32>
    %260 = tpu.reciprocal %259 {approx = true} : vector<32x1xf32> -> vector<32x1xf32>
    %261 = vector.broadcast %260 : vector<32x1xf32> to vector<32x32xf32>
    %262 = arith.mulf %257, %261 : vector<32x32xf32>
    %263 = arith.truncf %262 : vector<32x32xf32> to vector<32x32xbf16>
    %264 = arith.truncf %247 : vector<32x128xf32> to vector<32x128xbf16>
    %cst_171 = arith.constant dense<0.000000e+00> : vector<32x128xf32>
    %265 = tpu.matmul %263, %264, %cst_171 {dimension_numbers = #tpu.dot_dimension_numbers<[1], [0], [0], [1], [0, 0, 1, 1], [], []>} : vector<32x32xbf16>, vector<32x128xbf16>, vector<32x128xf32> -> vector<32x128xf32>
    %266 = arith.truncf %265 : vector<32x128xf32> to vector<32x128xbf16>
    %c6_172 = arith.constant 6 : index
    %c0_173 = arith.constant 0 : index
    %c0_174 = arith.constant 0 : index
    %267 = vector.load %arg18[%c6_172, %c0_173, %c0_174] : memref<8x128x32xbf16, #tpu.memory_space<vmem>>, vector<1x128x32xbf16>
    %268 = vector.shape_cast %267 : vector<1x128x32xbf16> to vector<128x32xbf16>
    %cst_175 = arith.constant dense<0.000000e+00> : vector<32x32xf32>
    %269 = tpu.matmul %266, %268, %cst_175 {dimension_numbers = #tpu.dot_dimension_numbers<[1], [0], [0], [1], [0, 0, 1, 1], [], []>} : vector<32x128xbf16>, vector<128x32xbf16>, vector<32x32xf32> -> vector<32x32xf32>
    %270 = arith.addf %238, %269 : vector<32x32xf32>
    %c7 = arith.constant 7 : index
    %c0_176 = arith.constant 0 : index
    %c0_177 = arith.constant 0 : index
    %271 = vector.load %arg15[%c7, %c0_176, %c0_177] : memref<8x32x128xbf16, #tpu.memory_space<vmem>>, vector<1x32x128xbf16>
    %272 = vector.shape_cast %271 : vector<1x32x128xbf16> to vector<32x128xbf16>
    %cst_178 = arith.constant dense<0.000000e+00> : vector<32x128xf32>
    %273 = tpu.matmul %45, %272, %cst_178 {dimension_numbers = #tpu.dot_dimension_numbers<[1], [0], [0], [1], [0, 0, 1, 1], [], []>} : vector<32x32xbf16>, vector<32x128xbf16>, vector<32x128xf32> -> vector<32x128xf32>
    %c7_179 = arith.constant 7 : index
    %c0_180 = arith.constant 0 : index
    %c0_181 = arith.constant 0 : index
    %274 = vector.load %arg16[%c7_179, %c0_180, %c0_181] : memref<8x32x128xbf16, #tpu.memory_space<vmem>>, vector<1x32x128xbf16>
    %275 = vector.shape_cast %274 : vector<1x32x128xbf16> to vector<32x128xbf16>
    %cst_182 = arith.constant dense<0.000000e+00> : vector<32x128xf32>
    %276 = tpu.matmul %45, %275, %cst_182 {dimension_numbers = #tpu.dot_dimension_numbers<[1], [0], [0], [1], [0, 0, 1, 1], [], []>} : vector<32x32xbf16>, vector<32x128xbf16>, vector<32x128xf32> -> vector<32x128xf32>
    %c7_183 = arith.constant 7 : index
    %c0_184 = arith.constant 0 : index
    %c0_185 = arith.constant 0 : index
    %277 = vector.load %arg17[%c7_183, %c0_184, %c0_185] : memref<8x32x128xbf16, #tpu.memory_space<vmem>>, vector<1x32x128xbf16>
    %278 = vector.shape_cast %277 : vector<1x32x128xbf16> to vector<32x128xbf16>
    %cst_186 = arith.constant dense<0.000000e+00> : vector<32x128xf32>
    %279 = tpu.matmul %45, %278, %cst_186 {dimension_numbers = #tpu.dot_dimension_numbers<[1], [0], [0], [1], [0, 0, 1, 1], [], []>} : vector<32x32xbf16>, vector<32x128xbf16>, vector<32x128xf32> -> vector<32x128xf32>
    %280 = arith.truncf %273 : vector<32x128xf32> to vector<32x128xbf16>
    %281 = arith.truncf %276 : vector<32x128xf32> to vector<32x128xbf16>
    %cst_187 = arith.constant dense<0.000000e+00> : vector<32x32xf32>
    %282 = tpu.matmul %280, %281, %cst_187 {dimension_numbers = #tpu.dot_dimension_numbers<[1], [1], [0], [0], [0, 0, 1, 0], [], []>} : vector<32x128xbf16>, vector<32x128xbf16>, vector<32x32xf32> -> vector<32x32xf32>
    %cst_188 = arith.constant 5.000000e-01 : f32
    %283 = vector.broadcast %cst_188 : f32 to vector<32x32xf32>
    %284 = arith.mulf %282, %283 : vector<32x32xf32>
    %cst_189 = arith.constant dense<0xFF800000> : vector<32xf32>
    %285 = vector.multi_reduction <maximumf>, %284, %cst_189 [1] : vector<32x32xf32> to vector<32xf32>
    %286 = vector.shape_cast %285 : vector<32xf32> to vector<32x1xf32>
    %287 = vector.broadcast %286 : vector<32x1xf32> to vector<32x32xf32>
    %288 = arith.subf %284, %287 : vector<32x32xf32>
    %289 = math.exp %288 : vector<32x32xf32>
    %cst_190 = arith.constant dense<0.000000e+00> : vector<32xf32>
    %290 = vector.multi_reduction <add>, %289, %cst_190 [1] : vector<32x32xf32> to vector<32xf32>
    %291 = vector.shape_cast %290 : vector<32xf32> to vector<32x1xf32>
    %292 = tpu.reciprocal %291 {approx = true} : vector<32x1xf32> -> vector<32x1xf32>
    %293 = vector.broadcast %292 : vector<32x1xf32> to vector<32x32xf32>
    %294 = arith.mulf %289, %293 : vector<32x32xf32>
    %295 = arith.truncf %294 : vector<32x32xf32> to vector<32x32xbf16>
    %296 = arith.truncf %279 : vector<32x128xf32> to vector<32x128xbf16>
    %cst_191 = arith.constant dense<0.000000e+00> : vector<32x128xf32>
    %297 = tpu.matmul %295, %296, %cst_191 {dimension_numbers = #tpu.dot_dimension_numbers<[1], [0], [0], [1], [0, 0, 1, 1], [], []>} : vector<32x32xbf16>, vector<32x128xbf16>, vector<32x128xf32> -> vector<32x128xf32>
    %298 = arith.truncf %297 : vector<32x128xf32> to vector<32x128xbf16>
    %c7_192 = arith.constant 7 : index
    %c0_193 = arith.constant 0 : index
    %c0_194 = arith.constant 0 : index
    %299 = vector.load %arg18[%c7_192, %c0_193, %c0_194] : memref<8x128x32xbf16, #tpu.memory_space<vmem>>, vector<1x128x32xbf16>
    %300 = vector.shape_cast %299 : vector<1x128x32xbf16> to vector<128x32xbf16>
    %cst_195 = arith.constant dense<0.000000e+00> : vector<32x32xf32>
    %301 = tpu.matmul %298, %300, %cst_195 {dimension_numbers = #tpu.dot_dimension_numbers<[1], [0], [0], [1], [0, 0, 1, 1], [], []>} : vector<32x128xbf16>, vector<128x32xbf16>, vector<32x32xf32> -> vector<32x32xf32>
    %302 = arith.addf %270, %301 : vector<32x32xf32>
    %c0_196 = arith.constant 0 : index
    %c0_197 = arith.constant 0 : index
    %303 = vector.load %arg19[%c0_196, %c0_197] : memref<1x32xf32, #tpu.memory_space<vmem>>, vector<1x32xf32>
    %304 = vector.broadcast %303 : vector<1x32xf32> to vector<32x32xf32>
    %305 = arith.addf %302, %304 : vector<32x32xf32>
    %cst_198 = arith.constant dense<0.000000e+00> : vector<32xf32>
    %306 = vector.multi_reduction <add>, %305, %cst_198 [0] : vector<32x32xf32> to vector<32xf32>
    %307 = vector.shape_cast %306 : vector<32xf32> to vector<1x32xf32>
    %cst_199 = arith.constant 3.200000e+01 : f32
    %308 = vector.broadcast %cst_199 : f32 to vector<1x32xf32>
    %309 = arith.divf %307, %308 : vector<1x32xf32>
    %310 = vector.extract_strided_slice %34 {offsets = [32, 0], sizes = [32, 32], strides = [1, 1]} : vector<64x32xf32> to vector<32x32xf32>
    %311 = vector.extract_strided_slice %40 {offsets = [1, 0], sizes = [1, 32], strides = [1, 1]} : vector<2x32xf32> to vector<1x32xf32>
    %312 = vector.broadcast %311 : vector<1x32xf32> to vector<32x32xf32>
    %313 = arith.addf %310, %312 : vector<32x32xf32>
    %314 = arith.truncf %313 : vector<32x32xf32> to vector<32x32xbf16>
    %cst_200 = arith.constant 0.000000e+00 : f32
    %315 = vector.broadcast %cst_200 : f32 to vector<32x32xf32>
    %c0_201 = arith.constant 0 : index
    %c0_202 = arith.constant 0 : index
    %c0_203 = arith.constant 0 : index
    %316 = vector.load %arg15[%c0_201, %c0_202, %c0_203] : memref<8x32x128xbf16, #tpu.memory_space<vmem>>, vector<1x32x128xbf16>
    %317 = vector.shape_cast %316 : vector<1x32x128xbf16> to vector<32x128xbf16>
    %cst_204 = arith.constant dense<0.000000e+00> : vector<32x128xf32>
    %318 = tpu.matmul %314, %317, %cst_204 {dimension_numbers = #tpu.dot_dimension_numbers<[1], [0], [0], [1], [0, 0, 1, 1], [], []>} : vector<32x32xbf16>, vector<32x128xbf16>, vector<32x128xf32> -> vector<32x128xf32>
    %c0_205 = arith.constant 0 : index
    %c0_206 = arith.constant 0 : index
    %c0_207 = arith.constant 0 : index
    %319 = vector.load %arg16[%c0_205, %c0_206, %c0_207] : memref<8x32x128xbf16, #tpu.memory_space<vmem>>, vector<1x32x128xbf16>
    %320 = vector.shape_cast %319 : vector<1x32x128xbf16> to vector<32x128xbf16>
    %cst_208 = arith.constant dense<0.000000e+00> : vector<32x128xf32>
    %321 = tpu.matmul %314, %320, %cst_208 {dimension_numbers = #tpu.dot_dimension_numbers<[1], [0], [0], [1], [0, 0, 1, 1], [], []>} : vector<32x32xbf16>, vector<32x128xbf16>, vector<32x128xf32> -> vector<32x128xf32>
    %c0_209 = arith.constant 0 : index
    %c0_210 = arith.constant 0 : index
    %c0_211 = arith.constant 0 : index
    %322 = vector.load %arg17[%c0_209, %c0_210, %c0_211] : memref<8x32x128xbf16, #tpu.memory_space<vmem>>, vector<1x32x128xbf16>
    %323 = vector.shape_cast %322 : vector<1x32x128xbf16> to vector<32x128xbf16>
    %cst_212 = arith.constant dense<0.000000e+00> : vector<32x128xf32>
    %324 = tpu.matmul %314, %323, %cst_212 {dimension_numbers = #tpu.dot_dimension_numbers<[1], [0], [0], [1], [0, 0, 1, 1], [], []>} : vector<32x32xbf16>, vector<32x128xbf16>, vector<32x128xf32> -> vector<32x128xf32>
    %325 = arith.truncf %318 : vector<32x128xf32> to vector<32x128xbf16>
    %326 = arith.truncf %321 : vector<32x128xf32> to vector<32x128xbf16>
    %cst_213 = arith.constant dense<0.000000e+00> : vector<32x32xf32>
    %327 = tpu.matmul %325, %326, %cst_213 {dimension_numbers = #tpu.dot_dimension_numbers<[1], [1], [0], [0], [0, 0, 1, 0], [], []>} : vector<32x128xbf16>, vector<32x128xbf16>, vector<32x32xf32> -> vector<32x32xf32>
    %cst_214 = arith.constant 5.000000e-01 : f32
    %328 = vector.broadcast %cst_214 : f32 to vector<32x32xf32>
    %329 = arith.mulf %327, %328 : vector<32x32xf32>
    %cst_215 = arith.constant dense<0xFF800000> : vector<32xf32>
    %330 = vector.multi_reduction <maximumf>, %329, %cst_215 [1] : vector<32x32xf32> to vector<32xf32>
    %331 = vector.shape_cast %330 : vector<32xf32> to vector<32x1xf32>
    %332 = vector.broadcast %331 : vector<32x1xf32> to vector<32x32xf32>
    %333 = arith.subf %329, %332 : vector<32x32xf32>
    %334 = math.exp %333 : vector<32x32xf32>
    %cst_216 = arith.constant dense<0.000000e+00> : vector<32xf32>
    %335 = vector.multi_reduction <add>, %334, %cst_216 [1] : vector<32x32xf32> to vector<32xf32>
    %336 = vector.shape_cast %335 : vector<32xf32> to vector<32x1xf32>
    %337 = tpu.reciprocal %336 {approx = true} : vector<32x1xf32> -> vector<32x1xf32>
    %338 = vector.broadcast %337 : vector<32x1xf32> to vector<32x32xf32>
    %339 = arith.mulf %334, %338 : vector<32x32xf32>
    %340 = arith.truncf %339 : vector<32x32xf32> to vector<32x32xbf16>
    %341 = arith.truncf %324 : vector<32x128xf32> to vector<32x128xbf16>
    %cst_217 = arith.constant dense<0.000000e+00> : vector<32x128xf32>
    %342 = tpu.matmul %340, %341, %cst_217 {dimension_numbers = #tpu.dot_dimension_numbers<[1], [0], [0], [1], [0, 0, 1, 1], [], []>} : vector<32x32xbf16>, vector<32x128xbf16>, vector<32x128xf32> -> vector<32x128xf32>
    %343 = arith.truncf %342 : vector<32x128xf32> to vector<32x128xbf16>
    %c0_218 = arith.constant 0 : index
    %c0_219 = arith.constant 0 : index
    %c0_220 = arith.constant 0 : index
    %344 = vector.load %arg18[%c0_218, %c0_219, %c0_220] : memref<8x128x32xbf16, #tpu.memory_space<vmem>>, vector<1x128x32xbf16>
    %345 = vector.shape_cast %344 : vector<1x128x32xbf16> to vector<128x32xbf16>
    %cst_221 = arith.constant dense<0.000000e+00> : vector<32x32xf32>
    %346 = tpu.matmul %343, %345, %cst_221 {dimension_numbers = #tpu.dot_dimension_numbers<[1], [0], [0], [1], [0, 0, 1, 1], [], []>} : vector<32x128xbf16>, vector<128x32xbf16>, vector<32x32xf32> -> vector<32x32xf32>
    %347 = arith.addf %315, %346 : vector<32x32xf32>
    %c1_222 = arith.constant 1 : index
    %c0_223 = arith.constant 0 : index
    %c0_224 = arith.constant 0 : index
    %348 = vector.load %arg15[%c1_222, %c0_223, %c0_224] : memref<8x32x128xbf16, #tpu.memory_space<vmem>>, vector<1x32x128xbf16>
    %349 = vector.shape_cast %348 : vector<1x32x128xbf16> to vector<32x128xbf16>
    %cst_225 = arith.constant dense<0.000000e+00> : vector<32x128xf32>
    %350 = tpu.matmul %314, %349, %cst_225 {dimension_numbers = #tpu.dot_dimension_numbers<[1], [0], [0], [1], [0, 0, 1, 1], [], []>} : vector<32x32xbf16>, vector<32x128xbf16>, vector<32x128xf32> -> vector<32x128xf32>
    %c1_226 = arith.constant 1 : index
    %c0_227 = arith.constant 0 : index
    %c0_228 = arith.constant 0 : index
    %351 = vector.load %arg16[%c1_226, %c0_227, %c0_228] : memref<8x32x128xbf16, #tpu.memory_space<vmem>>, vector<1x32x128xbf16>
    %352 = vector.shape_cast %351 : vector<1x32x128xbf16> to vector<32x128xbf16>
    %cst_229 = arith.constant dense<0.000000e+00> : vector<32x128xf32>
    %353 = tpu.matmul %314, %352, %cst_229 {dimension_numbers = #tpu.dot_dimension_numbers<[1], [0], [0], [1], [0, 0, 1, 1], [], []>} : vector<32x32xbf16>, vector<32x128xbf16>, vector<32x128xf32> -> vector<32x128xf32>
    %c1_230 = arith.constant 1 : index
    %c0_231 = arith.constant 0 : index
    %c0_232 = arith.constant 0 : index
    %354 = vector.load %arg17[%c1_230, %c0_231, %c0_232] : memref<8x32x128xbf16, #tpu.memory_space<vmem>>, vector<1x32x128xbf16>
    %355 = vector.shape_cast %354 : vector<1x32x128xbf16> to vector<32x128xbf16>
    %cst_233 = arith.constant dense<0.000000e+00> : vector<32x128xf32>
    %356 = tpu.matmul %314, %355, %cst_233 {dimension_numbers = #tpu.dot_dimension_numbers<[1], [0], [0], [1], [0, 0, 1, 1], [], []>} : vector<32x32xbf16>, vector<32x128xbf16>, vector<32x128xf32> -> vector<32x128xf32>
    %357 = arith.truncf %350 : vector<32x128xf32> to vector<32x128xbf16>
    %358 = arith.truncf %353 : vector<32x128xf32> to vector<32x128xbf16>
    %cst_234 = arith.constant dense<0.000000e+00> : vector<32x32xf32>
    %359 = tpu.matmul %357, %358, %cst_234 {dimension_numbers = #tpu.dot_dimension_numbers<[1], [1], [0], [0], [0, 0, 1, 0], [], []>} : vector<32x128xbf16>, vector<32x128xbf16>, vector<32x32xf32> -> vector<32x32xf32>
    %cst_235 = arith.constant 5.000000e-01 : f32
    %360 = vector.broadcast %cst_235 : f32 to vector<32x32xf32>
    %361 = arith.mulf %359, %360 : vector<32x32xf32>
    %cst_236 = arith.constant dense<0xFF800000> : vector<32xf32>
    %362 = vector.multi_reduction <maximumf>, %361, %cst_236 [1] : vector<32x32xf32> to vector<32xf32>
    %363 = vector.shape_cast %362 : vector<32xf32> to vector<32x1xf32>
    %364 = vector.broadcast %363 : vector<32x1xf32> to vector<32x32xf32>
    %365 = arith.subf %361, %364 : vector<32x32xf32>
    %366 = math.exp %365 : vector<32x32xf32>
    %cst_237 = arith.constant dense<0.000000e+00> : vector<32xf32>
    %367 = vector.multi_reduction <add>, %366, %cst_237 [1] : vector<32x32xf32> to vector<32xf32>
    %368 = vector.shape_cast %367 : vector<32xf32> to vector<32x1xf32>
    %369 = tpu.reciprocal %368 {approx = true} : vector<32x1xf32> -> vector<32x1xf32>
    %370 = vector.broadcast %369 : vector<32x1xf32> to vector<32x32xf32>
    %371 = arith.mulf %366, %370 : vector<32x32xf32>
    %372 = arith.truncf %371 : vector<32x32xf32> to vector<32x32xbf16>
    %373 = arith.truncf %356 : vector<32x128xf32> to vector<32x128xbf16>
    %cst_238 = arith.constant dense<0.000000e+00> : vector<32x128xf32>
    %374 = tpu.matmul %372, %373, %cst_238 {dimension_numbers = #tpu.dot_dimension_numbers<[1], [0], [0], [1], [0, 0, 1, 1], [], []>} : vector<32x32xbf16>, vector<32x128xbf16>, vector<32x128xf32> -> vector<32x128xf32>
    %375 = arith.truncf %374 : vector<32x128xf32> to vector<32x128xbf16>
    %c1_239 = arith.constant 1 : index
    %c0_240 = arith.constant 0 : index
    %c0_241 = arith.constant 0 : index
    %376 = vector.load %arg18[%c1_239, %c0_240, %c0_241] : memref<8x128x32xbf16, #tpu.memory_space<vmem>>, vector<1x128x32xbf16>
    %377 = vector.shape_cast %376 : vector<1x128x32xbf16> to vector<128x32xbf16>
    %cst_242 = arith.constant dense<0.000000e+00> : vector<32x32xf32>
    %378 = tpu.matmul %375, %377, %cst_242 {dimension_numbers = #tpu.dot_dimension_numbers<[1], [0], [0], [1], [0, 0, 1, 1], [], []>} : vector<32x128xbf16>, vector<128x32xbf16>, vector<32x32xf32> -> vector<32x32xf32>
    %379 = arith.addf %347, %378 : vector<32x32xf32>
    %c2_243 = arith.constant 2 : index
    %c0_244 = arith.constant 0 : index
    %c0_245 = arith.constant 0 : index
    %380 = vector.load %arg15[%c2_243, %c0_244, %c0_245] : memref<8x32x128xbf16, #tpu.memory_space<vmem>>, vector<1x32x128xbf16>
    %381 = vector.shape_cast %380 : vector<1x32x128xbf16> to vector<32x128xbf16>
    %cst_246 = arith.constant dense<0.000000e+00> : vector<32x128xf32>
    %382 = tpu.matmul %314, %381, %cst_246 {dimension_numbers = #tpu.dot_dimension_numbers<[1], [0], [0], [1], [0, 0, 1, 1], [], []>} : vector<32x32xbf16>, vector<32x128xbf16>, vector<32x128xf32> -> vector<32x128xf32>
    %c2_247 = arith.constant 2 : index
    %c0_248 = arith.constant 0 : index
    %c0_249 = arith.constant 0 : index
    %383 = vector.load %arg16[%c2_247, %c0_248, %c0_249] : memref<8x32x128xbf16, #tpu.memory_space<vmem>>, vector<1x32x128xbf16>
    %384 = vector.shape_cast %383 : vector<1x32x128xbf16> to vector<32x128xbf16>
    %cst_250 = arith.constant dense<0.000000e+00> : vector<32x128xf32>
    %385 = tpu.matmul %314, %384, %cst_250 {dimension_numbers = #tpu.dot_dimension_numbers<[1], [0], [0], [1], [0, 0, 1, 1], [], []>} : vector<32x32xbf16>, vector<32x128xbf16>, vector<32x128xf32> -> vector<32x128xf32>
    %c2_251 = arith.constant 2 : index
    %c0_252 = arith.constant 0 : index
    %c0_253 = arith.constant 0 : index
    %386 = vector.load %arg17[%c2_251, %c0_252, %c0_253] : memref<8x32x128xbf16, #tpu.memory_space<vmem>>, vector<1x32x128xbf16>
    %387 = vector.shape_cast %386 : vector<1x32x128xbf16> to vector<32x128xbf16>
    %cst_254 = arith.constant dense<0.000000e+00> : vector<32x128xf32>
    %388 = tpu.matmul %314, %387, %cst_254 {dimension_numbers = #tpu.dot_dimension_numbers<[1], [0], [0], [1], [0, 0, 1, 1], [], []>} : vector<32x32xbf16>, vector<32x128xbf16>, vector<32x128xf32> -> vector<32x128xf32>
    %389 = arith.truncf %382 : vector<32x128xf32> to vector<32x128xbf16>
    %390 = arith.truncf %385 : vector<32x128xf32> to vector<32x128xbf16>
    %cst_255 = arith.constant dense<0.000000e+00> : vector<32x32xf32>
    %391 = tpu.matmul %389, %390, %cst_255 {dimension_numbers = #tpu.dot_dimension_numbers<[1], [1], [0], [0], [0, 0, 1, 0], [], []>} : vector<32x128xbf16>, vector<32x128xbf16>, vector<32x32xf32> -> vector<32x32xf32>
    %cst_256 = arith.constant 5.000000e-01 : f32
    %392 = vector.broadcast %cst_256 : f32 to vector<32x32xf32>
    %393 = arith.mulf %391, %392 : vector<32x32xf32>
    %cst_257 = arith.constant dense<0xFF800000> : vector<32xf32>
    %394 = vector.multi_reduction <maximumf>, %393, %cst_257 [1] : vector<32x32xf32> to vector<32xf32>
    %395 = vector.shape_cast %394 : vector<32xf32> to vector<32x1xf32>
    %396 = vector.broadcast %395 : vector<32x1xf32> to vector<32x32xf32>
    %397 = arith.subf %393, %396 : vector<32x32xf32>
    %398 = math.exp %397 : vector<32x32xf32>
    %cst_258 = arith.constant dense<0.000000e+00> : vector<32xf32>
    %399 = vector.multi_reduction <add>, %398, %cst_258 [1] : vector<32x32xf32> to vector<32xf32>
    %400 = vector.shape_cast %399 : vector<32xf32> to vector<32x1xf32>
    %401 = tpu.reciprocal %400 {approx = true} : vector<32x1xf32> -> vector<32x1xf32>
    %402 = vector.broadcast %401 : vector<32x1xf32> to vector<32x32xf32>
    %403 = arith.mulf %398, %402 : vector<32x32xf32>
    %404 = arith.truncf %403 : vector<32x32xf32> to vector<32x32xbf16>
    %405 = arith.truncf %388 : vector<32x128xf32> to vector<32x128xbf16>
    %cst_259 = arith.constant dense<0.000000e+00> : vector<32x128xf32>
    %406 = tpu.matmul %404, %405, %cst_259 {dimension_numbers = #tpu.dot_dimension_numbers<[1], [0], [0], [1], [0, 0, 1, 1], [], []>} : vector<32x32xbf16>, vector<32x128xbf16>, vector<32x128xf32> -> vector<32x128xf32>
    %407 = arith.truncf %406 : vector<32x128xf32> to vector<32x128xbf16>
    %c2_260 = arith.constant 2 : index
    %c0_261 = arith.constant 0 : index
    %c0_262 = arith.constant 0 : index
    %408 = vector.load %arg18[%c2_260, %c0_261, %c0_262] : memref<8x128x32xbf16, #tpu.memory_space<vmem>>, vector<1x128x32xbf16>
    %409 = vector.shape_cast %408 : vector<1x128x32xbf16> to vector<128x32xbf16>
    %cst_263 = arith.constant dense<0.000000e+00> : vector<32x32xf32>
    %410 = tpu.matmul %407, %409, %cst_263 {dimension_numbers = #tpu.dot_dimension_numbers<[1], [0], [0], [1], [0, 0, 1, 1], [], []>} : vector<32x128xbf16>, vector<128x32xbf16>, vector<32x32xf32> -> vector<32x32xf32>
    %411 = arith.addf %379, %410 : vector<32x32xf32>
    %c3_264 = arith.constant 3 : index
    %c0_265 = arith.constant 0 : index
    %c0_266 = arith.constant 0 : index
    %412 = vector.load %arg15[%c3_264, %c0_265, %c0_266] : memref<8x32x128xbf16, #tpu.memory_space<vmem>>, vector<1x32x128xbf16>
    %413 = vector.shape_cast %412 : vector<1x32x128xbf16> to vector<32x128xbf16>
    %cst_267 = arith.constant dense<0.000000e+00> : vector<32x128xf32>
    %414 = tpu.matmul %314, %413, %cst_267 {dimension_numbers = #tpu.dot_dimension_numbers<[1], [0], [0], [1], [0, 0, 1, 1], [], []>} : vector<32x32xbf16>, vector<32x128xbf16>, vector<32x128xf32> -> vector<32x128xf32>
    %c3_268 = arith.constant 3 : index
    %c0_269 = arith.constant 0 : index
    %c0_270 = arith.constant 0 : index
    %415 = vector.load %arg16[%c3_268, %c0_269, %c0_270] : memref<8x32x128xbf16, #tpu.memory_space<vmem>>, vector<1x32x128xbf16>
    %416 = vector.shape_cast %415 : vector<1x32x128xbf16> to vector<32x128xbf16>
    %cst_271 = arith.constant dense<0.000000e+00> : vector<32x128xf32>
    %417 = tpu.matmul %314, %416, %cst_271 {dimension_numbers = #tpu.dot_dimension_numbers<[1], [0], [0], [1], [0, 0, 1, 1], [], []>} : vector<32x32xbf16>, vector<32x128xbf16>, vector<32x128xf32> -> vector<32x128xf32>
    %c3_272 = arith.constant 3 : index
    %c0_273 = arith.constant 0 : index
    %c0_274 = arith.constant 0 : index
    %418 = vector.load %arg17[%c3_272, %c0_273, %c0_274] : memref<8x32x128xbf16, #tpu.memory_space<vmem>>, vector<1x32x128xbf16>
    %419 = vector.shape_cast %418 : vector<1x32x128xbf16> to vector<32x128xbf16>
    %cst_275 = arith.constant dense<0.000000e+00> : vector<32x128xf32>
    %420 = tpu.matmul %314, %419, %cst_275 {dimension_numbers = #tpu.dot_dimension_numbers<[1], [0], [0], [1], [0, 0, 1, 1], [], []>} : vector<32x32xbf16>, vector<32x128xbf16>, vector<32x128xf32> -> vector<32x128xf32>
    %421 = arith.truncf %414 : vector<32x128xf32> to vector<32x128xbf16>
    %422 = arith.truncf %417 : vector<32x128xf32> to vector<32x128xbf16>
    %cst_276 = arith.constant dense<0.000000e+00> : vector<32x32xf32>
    %423 = tpu.matmul %421, %422, %cst_276 {dimension_numbers = #tpu.dot_dimension_numbers<[1], [1], [0], [0], [0, 0, 1, 0], [], []>} : vector<32x128xbf16>, vector<32x128xbf16>, vector<32x32xf32> -> vector<32x32xf32>
    %cst_277 = arith.constant 5.000000e-01 : f32
    %424 = vector.broadcast %cst_277 : f32 to vector<32x32xf32>
    %425 = arith.mulf %423, %424 : vector<32x32xf32>
    %cst_278 = arith.constant dense<0xFF800000> : vector<32xf32>
    %426 = vector.multi_reduction <maximumf>, %425, %cst_278 [1] : vector<32x32xf32> to vector<32xf32>
    %427 = vector.shape_cast %426 : vector<32xf32> to vector<32x1xf32>
    %428 = vector.broadcast %427 : vector<32x1xf32> to vector<32x32xf32>
    %429 = arith.subf %425, %428 : vector<32x32xf32>
    %430 = math.exp %429 : vector<32x32xf32>
    %cst_279 = arith.constant dense<0.000000e+00> : vector<32xf32>
    %431 = vector.multi_reduction <add>, %430, %cst_279 [1] : vector<32x32xf32> to vector<32xf32>
    %432 = vector.shape_cast %431 : vector<32xf32> to vector<32x1xf32>
    %433 = tpu.reciprocal %432 {approx = true} : vector<32x1xf32> -> vector<32x1xf32>
    %434 = vector.broadcast %433 : vector<32x1xf32> to vector<32x32xf32>
    %435 = arith.mulf %430, %434 : vector<32x32xf32>
    %436 = arith.truncf %435 : vector<32x32xf32> to vector<32x32xbf16>
    %437 = arith.truncf %420 : vector<32x128xf32> to vector<32x128xbf16>
    %cst_280 = arith.constant dense<0.000000e+00> : vector<32x128xf32>
    %438 = tpu.matmul %436, %437, %cst_280 {dimension_numbers = #tpu.dot_dimension_numbers<[1], [0], [0], [1], [0, 0, 1, 1], [], []>} : vector<32x32xbf16>, vector<32x128xbf16>, vector<32x128xf32> -> vector<32x128xf32>
    %439 = arith.truncf %438 : vector<32x128xf32> to vector<32x128xbf16>
    %c3_281 = arith.constant 3 : index
    %c0_282 = arith.constant 0 : index
    %c0_283 = arith.constant 0 : index
    %440 = vector.load %arg18[%c3_281, %c0_282, %c0_283] : memref<8x128x32xbf16, #tpu.memory_space<vmem>>, vector<1x128x32xbf16>
    %441 = vector.shape_cast %440 : vector<1x128x32xbf16> to vector<128x32xbf16>
    %cst_284 = arith.constant dense<0.000000e+00> : vector<32x32xf32>
    %442 = tpu.matmul %439, %441, %cst_284 {dimension_numbers = #tpu.dot_dimension_numbers<[1], [0], [0], [1], [0, 0, 1, 1], [], []>} : vector<32x128xbf16>, vector<128x32xbf16>, vector<32x32xf32> -> vector<32x32xf32>
    %443 = arith.addf %411, %442 : vector<32x32xf32>
    %c4_285 = arith.constant 4 : index
    %c0_286 = arith.constant 0 : index
    %c0_287 = arith.constant 0 : index
    %444 = vector.load %arg15[%c4_285, %c0_286, %c0_287] : memref<8x32x128xbf16, #tpu.memory_space<vmem>>, vector<1x32x128xbf16>
    %445 = vector.shape_cast %444 : vector<1x32x128xbf16> to vector<32x128xbf16>
    %cst_288 = arith.constant dense<0.000000e+00> : vector<32x128xf32>
    %446 = tpu.matmul %314, %445, %cst_288 {dimension_numbers = #tpu.dot_dimension_numbers<[1], [0], [0], [1], [0, 0, 1, 1], [], []>} : vector<32x32xbf16>, vector<32x128xbf16>, vector<32x128xf32> -> vector<32x128xf32>
    %c4_289 = arith.constant 4 : index
    %c0_290 = arith.constant 0 : index
    %c0_291 = arith.constant 0 : index
    %447 = vector.load %arg16[%c4_289, %c0_290, %c0_291] : memref<8x32x128xbf16, #tpu.memory_space<vmem>>, vector<1x32x128xbf16>
    %448 = vector.shape_cast %447 : vector<1x32x128xbf16> to vector<32x128xbf16>
    %cst_292 = arith.constant dense<0.000000e+00> : vector<32x128xf32>
    %449 = tpu.matmul %314, %448, %cst_292 {dimension_numbers = #tpu.dot_dimension_numbers<[1], [0], [0], [1], [0, 0, 1, 1], [], []>} : vector<32x32xbf16>, vector<32x128xbf16>, vector<32x128xf32> -> vector<32x128xf32>
    %c4_293 = arith.constant 4 : index
    %c0_294 = arith.constant 0 : index
    %c0_295 = arith.constant 0 : index
    %450 = vector.load %arg17[%c4_293, %c0_294, %c0_295] : memref<8x32x128xbf16, #tpu.memory_space<vmem>>, vector<1x32x128xbf16>
    %451 = vector.shape_cast %450 : vector<1x32x128xbf16> to vector<32x128xbf16>
    %cst_296 = arith.constant dense<0.000000e+00> : vector<32x128xf32>
    %452 = tpu.matmul %314, %451, %cst_296 {dimension_numbers = #tpu.dot_dimension_numbers<[1], [0], [0], [1], [0, 0, 1, 1], [], []>} : vector<32x32xbf16>, vector<32x128xbf16>, vector<32x128xf32> -> vector<32x128xf32>
    %453 = arith.truncf %446 : vector<32x128xf32> to vector<32x128xbf16>
    %454 = arith.truncf %449 : vector<32x128xf32> to vector<32x128xbf16>
    %cst_297 = arith.constant dense<0.000000e+00> : vector<32x32xf32>
    %455 = tpu.matmul %453, %454, %cst_297 {dimension_numbers = #tpu.dot_dimension_numbers<[1], [1], [0], [0], [0, 0, 1, 0], [], []>} : vector<32x128xbf16>, vector<32x128xbf16>, vector<32x32xf32> -> vector<32x32xf32>
    %cst_298 = arith.constant 5.000000e-01 : f32
    %456 = vector.broadcast %cst_298 : f32 to vector<32x32xf32>
    %457 = arith.mulf %455, %456 : vector<32x32xf32>
    %cst_299 = arith.constant dense<0xFF800000> : vector<32xf32>
    %458 = vector.multi_reduction <maximumf>, %457, %cst_299 [1] : vector<32x32xf32> to vector<32xf32>
    %459 = vector.shape_cast %458 : vector<32xf32> to vector<32x1xf32>
    %460 = vector.broadcast %459 : vector<32x1xf32> to vector<32x32xf32>
    %461 = arith.subf %457, %460 : vector<32x32xf32>
    %462 = math.exp %461 : vector<32x32xf32>
    %cst_300 = arith.constant dense<0.000000e+00> : vector<32xf32>
    %463 = vector.multi_reduction <add>, %462, %cst_300 [1] : vector<32x32xf32> to vector<32xf32>
    %464 = vector.shape_cast %463 : vector<32xf32> to vector<32x1xf32>
    %465 = tpu.reciprocal %464 {approx = true} : vector<32x1xf32> -> vector<32x1xf32>
    %466 = vector.broadcast %465 : vector<32x1xf32> to vector<32x32xf32>
    %467 = arith.mulf %462, %466 : vector<32x32xf32>
    %468 = arith.truncf %467 : vector<32x32xf32> to vector<32x32xbf16>
    %469 = arith.truncf %452 : vector<32x128xf32> to vector<32x128xbf16>
    %cst_301 = arith.constant dense<0.000000e+00> : vector<32x128xf32>
    %470 = tpu.matmul %468, %469, %cst_301 {dimension_numbers = #tpu.dot_dimension_numbers<[1], [0], [0], [1], [0, 0, 1, 1], [], []>} : vector<32x32xbf16>, vector<32x128xbf16>, vector<32x128xf32> -> vector<32x128xf32>
    %471 = arith.truncf %470 : vector<32x128xf32> to vector<32x128xbf16>
    %c4_302 = arith.constant 4 : index
    %c0_303 = arith.constant 0 : index
    %c0_304 = arith.constant 0 : index
    %472 = vector.load %arg18[%c4_302, %c0_303, %c0_304] : memref<8x128x32xbf16, #tpu.memory_space<vmem>>, vector<1x128x32xbf16>
    %473 = vector.shape_cast %472 : vector<1x128x32xbf16> to vector<128x32xbf16>
    %cst_305 = arith.constant dense<0.000000e+00> : vector<32x32xf32>
    %474 = tpu.matmul %471, %473, %cst_305 {dimension_numbers = #tpu.dot_dimension_numbers<[1], [0], [0], [1], [0, 0, 1, 1], [], []>} : vector<32x128xbf16>, vector<128x32xbf16>, vector<32x32xf32> -> vector<32x32xf32>
    %475 = arith.addf %443, %474 : vector<32x32xf32>
    %c5_306 = arith.constant 5 : index
    %c0_307 = arith.constant 0 : index
    %c0_308 = arith.constant 0 : index
    %476 = vector.load %arg15[%c5_306, %c0_307, %c0_308] : memref<8x32x128xbf16, #tpu.memory_space<vmem>>, vector<1x32x128xbf16>
    %477 = vector.shape_cast %476 : vector<1x32x128xbf16> to vector<32x128xbf16>
    %cst_309 = arith.constant dense<0.000000e+00> : vector<32x128xf32>
    %478 = tpu.matmul %314, %477, %cst_309 {dimension_numbers = #tpu.dot_dimension_numbers<[1], [0], [0], [1], [0, 0, 1, 1], [], []>} : vector<32x32xbf16>, vector<32x128xbf16>, vector<32x128xf32> -> vector<32x128xf32>
    %c5_310 = arith.constant 5 : index
    %c0_311 = arith.constant 0 : index
    %c0_312 = arith.constant 0 : index
    %479 = vector.load %arg16[%c5_310, %c0_311, %c0_312] : memref<8x32x128xbf16, #tpu.memory_space<vmem>>, vector<1x32x128xbf16>
    %480 = vector.shape_cast %479 : vector<1x32x128xbf16> to vector<32x128xbf16>
    %cst_313 = arith.constant dense<0.000000e+00> : vector<32x128xf32>
    %481 = tpu.matmul %314, %480, %cst_313 {dimension_numbers = #tpu.dot_dimension_numbers<[1], [0], [0], [1], [0, 0, 1, 1], [], []>} : vector<32x32xbf16>, vector<32x128xbf16>, vector<32x128xf32> -> vector<32x128xf32>
    %c5_314 = arith.constant 5 : index
    %c0_315 = arith.constant 0 : index
    %c0_316 = arith.constant 0 : index
    %482 = vector.load %arg17[%c5_314, %c0_315, %c0_316] : memref<8x32x128xbf16, #tpu.memory_space<vmem>>, vector<1x32x128xbf16>
    %483 = vector.shape_cast %482 : vector<1x32x128xbf16> to vector<32x128xbf16>
    %cst_317 = arith.constant dense<0.000000e+00> : vector<32x128xf32>
    %484 = tpu.matmul %314, %483, %cst_317 {dimension_numbers = #tpu.dot_dimension_numbers<[1], [0], [0], [1], [0, 0, 1, 1], [], []>} : vector<32x32xbf16>, vector<32x128xbf16>, vector<32x128xf32> -> vector<32x128xf32>
    %485 = arith.truncf %478 : vector<32x128xf32> to vector<32x128xbf16>
    %486 = arith.truncf %481 : vector<32x128xf32> to vector<32x128xbf16>
    %cst_318 = arith.constant dense<0.000000e+00> : vector<32x32xf32>
    %487 = tpu.matmul %485, %486, %cst_318 {dimension_numbers = #tpu.dot_dimension_numbers<[1], [1], [0], [0], [0, 0, 1, 0], [], []>} : vector<32x128xbf16>, vector<32x128xbf16>, vector<32x32xf32> -> vector<32x32xf32>
    %cst_319 = arith.constant 5.000000e-01 : f32
    %488 = vector.broadcast %cst_319 : f32 to vector<32x32xf32>
    %489 = arith.mulf %487, %488 : vector<32x32xf32>
    %cst_320 = arith.constant dense<0xFF800000> : vector<32xf32>
    %490 = vector.multi_reduction <maximumf>, %489, %cst_320 [1] : vector<32x32xf32> to vector<32xf32>
    %491 = vector.shape_cast %490 : vector<32xf32> to vector<32x1xf32>
    %492 = vector.broadcast %491 : vector<32x1xf32> to vector<32x32xf32>
    %493 = arith.subf %489, %492 : vector<32x32xf32>
    %494 = math.exp %493 : vector<32x32xf32>
    %cst_321 = arith.constant dense<0.000000e+00> : vector<32xf32>
    %495 = vector.multi_reduction <add>, %494, %cst_321 [1] : vector<32x32xf32> to vector<32xf32>
    %496 = vector.shape_cast %495 : vector<32xf32> to vector<32x1xf32>
    %497 = tpu.reciprocal %496 {approx = true} : vector<32x1xf32> -> vector<32x1xf32>
    %498 = vector.broadcast %497 : vector<32x1xf32> to vector<32x32xf32>
    %499 = arith.mulf %494, %498 : vector<32x32xf32>
    %500 = arith.truncf %499 : vector<32x32xf32> to vector<32x32xbf16>
    %501 = arith.truncf %484 : vector<32x128xf32> to vector<32x128xbf16>
    %cst_322 = arith.constant dense<0.000000e+00> : vector<32x128xf32>
    %502 = tpu.matmul %500, %501, %cst_322 {dimension_numbers = #tpu.dot_dimension_numbers<[1], [0], [0], [1], [0, 0, 1, 1], [], []>} : vector<32x32xbf16>, vector<32x128xbf16>, vector<32x128xf32> -> vector<32x128xf32>
    %503 = arith.truncf %502 : vector<32x128xf32> to vector<32x128xbf16>
    %c5_323 = arith.constant 5 : index
    %c0_324 = arith.constant 0 : index
    %c0_325 = arith.constant 0 : index
    %504 = vector.load %arg18[%c5_323, %c0_324, %c0_325] : memref<8x128x32xbf16, #tpu.memory_space<vmem>>, vector<1x128x32xbf16>
    %505 = vector.shape_cast %504 : vector<1x128x32xbf16> to vector<128x32xbf16>
    %cst_326 = arith.constant dense<0.000000e+00> : vector<32x32xf32>
    %506 = tpu.matmul %503, %505, %cst_326 {dimension_numbers = #tpu.dot_dimension_numbers<[1], [0], [0], [1], [0, 0, 1, 1], [], []>} : vector<32x128xbf16>, vector<128x32xbf16>, vector<32x32xf32> -> vector<32x32xf32>
    %507 = arith.addf %475, %506 : vector<32x32xf32>
    %c6_327 = arith.constant 6 : index
    %c0_328 = arith.constant 0 : index
    %c0_329 = arith.constant 0 : index
    %508 = vector.load %arg15[%c6_327, %c0_328, %c0_329] : memref<8x32x128xbf16, #tpu.memory_space<vmem>>, vector<1x32x128xbf16>
    %509 = vector.shape_cast %508 : vector<1x32x128xbf16> to vector<32x128xbf16>
    %cst_330 = arith.constant dense<0.000000e+00> : vector<32x128xf32>
    %510 = tpu.matmul %314, %509, %cst_330 {dimension_numbers = #tpu.dot_dimension_numbers<[1], [0], [0], [1], [0, 0, 1, 1], [], []>} : vector<32x32xbf16>, vector<32x128xbf16>, vector<32x128xf32> -> vector<32x128xf32>
    %c6_331 = arith.constant 6 : index
    %c0_332 = arith.constant 0 : index
    %c0_333 = arith.constant 0 : index
    %511 = vector.load %arg16[%c6_331, %c0_332, %c0_333] : memref<8x32x128xbf16, #tpu.memory_space<vmem>>, vector<1x32x128xbf16>
    %512 = vector.shape_cast %511 : vector<1x32x128xbf16> to vector<32x128xbf16>
    %cst_334 = arith.constant dense<0.000000e+00> : vector<32x128xf32>
    %513 = tpu.matmul %314, %512, %cst_334 {dimension_numbers = #tpu.dot_dimension_numbers<[1], [0], [0], [1], [0, 0, 1, 1], [], []>} : vector<32x32xbf16>, vector<32x128xbf16>, vector<32x128xf32> -> vector<32x128xf32>
    %c6_335 = arith.constant 6 : index
    %c0_336 = arith.constant 0 : index
    %c0_337 = arith.constant 0 : index
    %514 = vector.load %arg17[%c6_335, %c0_336, %c0_337] : memref<8x32x128xbf16, #tpu.memory_space<vmem>>, vector<1x32x128xbf16>
    %515 = vector.shape_cast %514 : vector<1x32x128xbf16> to vector<32x128xbf16>
    %cst_338 = arith.constant dense<0.000000e+00> : vector<32x128xf32>
    %516 = tpu.matmul %314, %515, %cst_338 {dimension_numbers = #tpu.dot_dimension_numbers<[1], [0], [0], [1], [0, 0, 1, 1], [], []>} : vector<32x32xbf16>, vector<32x128xbf16>, vector<32x128xf32> -> vector<32x128xf32>
    %517 = arith.truncf %510 : vector<32x128xf32> to vector<32x128xbf16>
    %518 = arith.truncf %513 : vector<32x128xf32> to vector<32x128xbf16>
    %cst_339 = arith.constant dense<0.000000e+00> : vector<32x32xf32>
    %519 = tpu.matmul %517, %518, %cst_339 {dimension_numbers = #tpu.dot_dimension_numbers<[1], [1], [0], [0], [0, 0, 1, 0], [], []>} : vector<32x128xbf16>, vector<32x128xbf16>, vector<32x32xf32> -> vector<32x32xf32>
    %cst_340 = arith.constant 5.000000e-01 : f32
    %520 = vector.broadcast %cst_340 : f32 to vector<32x32xf32>
    %521 = arith.mulf %519, %520 : vector<32x32xf32>
    %cst_341 = arith.constant dense<0xFF800000> : vector<32xf32>
    %522 = vector.multi_reduction <maximumf>, %521, %cst_341 [1] : vector<32x32xf32> to vector<32xf32>
    %523 = vector.shape_cast %522 : vector<32xf32> to vector<32x1xf32>
    %524 = vector.broadcast %523 : vector<32x1xf32> to vector<32x32xf32>
    %525 = arith.subf %521, %524 : vector<32x32xf32>
    %526 = math.exp %525 : vector<32x32xf32>
    %cst_342 = arith.constant dense<0.000000e+00> : vector<32xf32>
    %527 = vector.multi_reduction <add>, %526, %cst_342 [1] : vector<32x32xf32> to vector<32xf32>
    %528 = vector.shape_cast %527 : vector<32xf32> to vector<32x1xf32>
    %529 = tpu.reciprocal %528 {approx = true} : vector<32x1xf32> -> vector<32x1xf32>
    %530 = vector.broadcast %529 : vector<32x1xf32> to vector<32x32xf32>
    %531 = arith.mulf %526, %530 : vector<32x32xf32>
    %532 = arith.truncf %531 : vector<32x32xf32> to vector<32x32xbf16>
    %533 = arith.truncf %516 : vector<32x128xf32> to vector<32x128xbf16>
    %cst_343 = arith.constant dense<0.000000e+00> : vector<32x128xf32>
    %534 = tpu.matmul %532, %533, %cst_343 {dimension_numbers = #tpu.dot_dimension_numbers<[1], [0], [0], [1], [0, 0, 1, 1], [], []>} : vector<32x32xbf16>, vector<32x128xbf16>, vector<32x128xf32> -> vector<32x128xf32>
    %535 = arith.truncf %534 : vector<32x128xf32> to vector<32x128xbf16>
    %c6_344 = arith.constant 6 : index
    %c0_345 = arith.constant 0 : index
    %c0_346 = arith.constant 0 : index
    %536 = vector.load %arg18[%c6_344, %c0_345, %c0_346] : memref<8x128x32xbf16, #tpu.memory_space<vmem>>, vector<1x128x32xbf16>
    %537 = vector.shape_cast %536 : vector<1x128x32xbf16> to vector<128x32xbf16>
    %cst_347 = arith.constant dense<0.000000e+00> : vector<32x32xf32>
    %538 = tpu.matmul %535, %537, %cst_347 {dimension_numbers = #tpu.dot_dimension_numbers<[1], [0], [0], [1], [0, 0, 1, 1], [], []>} : vector<32x128xbf16>, vector<128x32xbf16>, vector<32x32xf32> -> vector<32x32xf32>
    %539 = arith.addf %507, %538 : vector<32x32xf32>
    %c7_348 = arith.constant 7 : index
    %c0_349 = arith.constant 0 : index
    %c0_350 = arith.constant 0 : index
    %540 = vector.load %arg15[%c7_348, %c0_349, %c0_350] : memref<8x32x128xbf16, #tpu.memory_space<vmem>>, vector<1x32x128xbf16>
    %541 = vector.shape_cast %540 : vector<1x32x128xbf16> to vector<32x128xbf16>
    %cst_351 = arith.constant dense<0.000000e+00> : vector<32x128xf32>
    %542 = tpu.matmul %314, %541, %cst_351 {dimension_numbers = #tpu.dot_dimension_numbers<[1], [0], [0], [1], [0, 0, 1, 1], [], []>} : vector<32x32xbf16>, vector<32x128xbf16>, vector<32x128xf32> -> vector<32x128xf32>
    %c7_352 = arith.constant 7 : index
    %c0_353 = arith.constant 0 : index
    %c0_354 = arith.constant 0 : index
    %543 = vector.load %arg16[%c7_352, %c0_353, %c0_354] : memref<8x32x128xbf16, #tpu.memory_space<vmem>>, vector<1x32x128xbf16>
    %544 = vector.shape_cast %543 : vector<1x32x128xbf16> to vector<32x128xbf16>
    %cst_355 = arith.constant dense<0.000000e+00> : vector<32x128xf32>
    %545 = tpu.matmul %314, %544, %cst_355 {dimension_numbers = #tpu.dot_dimension_numbers<[1], [0], [0], [1], [0, 0, 1, 1], [], []>} : vector<32x32xbf16>, vector<32x128xbf16>, vector<32x128xf32> -> vector<32x128xf32>
    %c7_356 = arith.constant 7 : index
    %c0_357 = arith.constant 0 : index
    %c0_358 = arith.constant 0 : index
    %546 = vector.load %arg17[%c7_356, %c0_357, %c0_358] : memref<8x32x128xbf16, #tpu.memory_space<vmem>>, vector<1x32x128xbf16>
    %547 = vector.shape_cast %546 : vector<1x32x128xbf16> to vector<32x128xbf16>
    %cst_359 = arith.constant dense<0.000000e+00> : vector<32x128xf32>
    %548 = tpu.matmul %314, %547, %cst_359 {dimension_numbers = #tpu.dot_dimension_numbers<[1], [0], [0], [1], [0, 0, 1, 1], [], []>} : vector<32x32xbf16>, vector<32x128xbf16>, vector<32x128xf32> -> vector<32x128xf32>
    %549 = arith.truncf %542 : vector<32x128xf32> to vector<32x128xbf16>
    %550 = arith.truncf %545 : vector<32x128xf32> to vector<32x128xbf16>
    %cst_360 = arith.constant dense<0.000000e+00> : vector<32x32xf32>
    %551 = tpu.matmul %549, %550, %cst_360 {dimension_numbers = #tpu.dot_dimension_numbers<[1], [1], [0], [0], [0, 0, 1, 0], [], []>} : vector<32x128xbf16>, vector<32x128xbf16>, vector<32x32xf32> -> vector<32x32xf32>
    %cst_361 = arith.constant 5.000000e-01 : f32
    %552 = vector.broadcast %cst_361 : f32 to vector<32x32xf32>
    %553 = arith.mulf %551, %552 : vector<32x32xf32>
    %cst_362 = arith.constant dense<0xFF800000> : vector<32xf32>
    %554 = vector.multi_reduction <maximumf>, %553, %cst_362 [1] : vector<32x32xf32> to vector<32xf32>
    %555 = vector.shape_cast %554 : vector<32xf32> to vector<32x1xf32>
    %556 = vector.broadcast %555 : vector<32x1xf32> to vector<32x32xf32>
    %557 = arith.subf %553, %556 : vector<32x32xf32>
    %558 = math.exp %557 : vector<32x32xf32>
    %cst_363 = arith.constant dense<0.000000e+00> : vector<32xf32>
    %559 = vector.multi_reduction <add>, %558, %cst_363 [1] : vector<32x32xf32> to vector<32xf32>
    %560 = vector.shape_cast %559 : vector<32xf32> to vector<32x1xf32>
    %561 = tpu.reciprocal %560 {approx = true} : vector<32x1xf32> -> vector<32x1xf32>
    %562 = vector.broadcast %561 : vector<32x1xf32> to vector<32x32xf32>
    %563 = arith.mulf %558, %562 : vector<32x32xf32>
    %564 = arith.truncf %563 : vector<32x32xf32> to vector<32x32xbf16>
    %565 = arith.truncf %548 : vector<32x128xf32> to vector<32x128xbf16>
    %cst_364 = arith.constant dense<0.000000e+00> : vector<32x128xf32>
    %566 = tpu.matmul %564, %565, %cst_364 {dimension_numbers = #tpu.dot_dimension_numbers<[1], [0], [0], [1], [0, 0, 1, 1], [], []>} : vector<32x32xbf16>, vector<32x128xbf16>, vector<32x128xf32> -> vector<32x128xf32>
    %567 = arith.truncf %566 : vector<32x128xf32> to vector<32x128xbf16>
    %c7_365 = arith.constant 7 : index
    %c0_366 = arith.constant 0 : index
    %c0_367 = arith.constant 0 : index
    %568 = vector.load %arg18[%c7_365, %c0_366, %c0_367] : memref<8x128x32xbf16, #tpu.memory_space<vmem>>, vector<1x128x32xbf16>
    %569 = vector.shape_cast %568 : vector<1x128x32xbf16> to vector<128x32xbf16>
    %cst_368 = arith.constant dense<0.000000e+00> : vector<32x32xf32>
    %570 = tpu.matmul %567, %569, %cst_368 {dimension_numbers = #tpu.dot_dimension_numbers<[1], [0], [0], [1], [0, 0, 1, 1], [], []>} : vector<32x128xbf16>, vector<128x32xbf16>, vector<32x32xf32> -> vector<32x32xf32>
    %571 = arith.addf %539, %570 : vector<32x32xf32>
    %c0_369 = arith.constant 0 : index
    %c0_370 = arith.constant 0 : index
    %572 = vector.load %arg19[%c0_369, %c0_370] : memref<1x32xf32, #tpu.memory_space<vmem>>, vector<1x32xf32>
    %573 = vector.broadcast %572 : vector<1x32xf32> to vector<32x32xf32>
    %574 = arith.addf %571, %573 : vector<32x32xf32>
    %cst_371 = arith.constant dense<0.000000e+00> : vector<32xf32>
    %575 = vector.multi_reduction <add>, %574, %cst_371 [0] : vector<32x32xf32> to vector<32xf32>
    %576 = vector.shape_cast %575 : vector<32xf32> to vector<1x32xf32>
    %cst_372 = arith.constant 3.200000e+01 : f32
    %577 = vector.broadcast %cst_372 : f32 to vector<1x32xf32>
    %578 = arith.divf %576, %577 : vector<1x32xf32>
    %579 = tpu.concatenate %309, %578 in 0 : vector<1x32xf32>, vector<1x32xf32> -> vector<2x32xf32>
    %580 = arith.truncf %579 : vector<2x32xf32> to vector<2x32xbf16>
    %c0_373 = arith.constant 0 : index
    %c0_374 = arith.constant 0 : index
    %581 = vector.load %arg20[%c0_373, %c0_374] : memref<32x1024xbf16, #tpu.memory_space<vmem>>, vector<32x1024xbf16>
    %cst_375 = arith.constant dense<0.000000e+00> : vector<2x1024xf32>
    %582 = tpu.matmul %580, %581, %cst_375 {dimension_numbers = #tpu.dot_dimension_numbers<[1], [0], [0], [1], [0, 0, 1, 1], [], []>} : vector<2x32xbf16>, vector<32x1024xbf16>, vector<2x1024xf32> -> vector<2x1024xf32>
    %c0_376 = arith.constant 0 : index
    %c0_377 = arith.constant 0 : index
    %583 = vector.load %arg21[%c0_376, %c0_377] : memref<1x1024xf32, #tpu.memory_space<vmem>>, vector<1x1024xf32>
    %584 = vector.broadcast %583 : vector<1x1024xf32> to vector<2x1024xf32>
    %585 = arith.addf %582, %584 : vector<2x1024xf32>
    %cst_378 = arith.constant 0.000000e+00 : f32
    %586 = vector.broadcast %cst_378 : f32 to vector<2x1024xf32>
    %587 = arith.maximumf %585, %586 : vector<2x1024xf32>
    %588 = arith.truncf %587 : vector<2x1024xf32> to vector<2x1024xbf16>
    %c0_379 = arith.constant 0 : index
    %c0_380 = arith.constant 0 : index
    %589 = vector.load %arg22[%c0_379, %c0_380] : memref<1024x32xbf16, #tpu.memory_space<vmem>>, vector<1024x32xbf16>
    %cst_381 = arith.constant dense<0.000000e+00> : vector<2x32xf32>
    %590 = tpu.matmul %588, %589, %cst_381 {dimension_numbers = #tpu.dot_dimension_numbers<[1], [0], [0], [1], [0, 0, 1, 1], [], []>} : vector<2x1024xbf16>, vector<1024x32xbf16>, vector<2x32xf32> -> vector<2x32xf32>
    %c0_382 = arith.constant 0 : index
    %c0_383 = arith.constant 0 : index
    %591 = vector.load %arg23[%c0_382, %c0_383] : memref<1x32xf32, #tpu.memory_space<vmem>>, vector<1x32xf32>
    %592 = vector.broadcast %591 : vector<1x32xf32> to vector<2x32xf32>
    %593 = arith.addf %590, %592 : vector<2x32xf32>
    %594 = arith.addf %593, %2 : vector<2x32xf32>
    %c0_384 = arith.constant 0 : index
    %c0_385 = arith.constant 0 : index
    %c0_386 = arith.constant 0 : index
    %595 = vector.load %arg1[%c0_384, %c0_385, %c0_386] : memref<2x32x32xf32, #tpu.memory_space<vmem>>, vector<1x32x32xf32>
    %596 = vector.shape_cast %595 : vector<1x32x32xf32> to vector<32x32xf32>
    %597 = vector.extract_strided_slice %594 {offsets = [0, 0], sizes = [1, 32], strides = [1, 1]} : vector<2x32xf32> to vector<1x32xf32>
    %598 = vector.broadcast %597 : vector<1x32xf32> to vector<32x32xf32>
    %599 = arith.mulf %596, %598 : vector<32x32xf32>
    %600 = vector.extract_strided_slice %0 {offsets = [0, 0, 0], sizes = [1, 32, 32], strides = [1, 1, 1]} : vector<2x32x32xf32> to vector<1x32x32xf32>
    %601 = vector.shape_cast %600 : vector<1x32x32xf32> to vector<32x32xf32>
    %cst_387 = arith.constant dense<0.000000e+00> : vector<32x32xf32>
    %602 = tpu.matmul %599, %601, %cst_387 {dimension_numbers = #tpu.dot_dimension_numbers<[1], [0], [0], [1], [0, 0, 1, 1], [], []>} : vector<32x32xf32>, vector<32x32xf32>, vector<32x32xf32> -> vector<32x32xf32>
    %c0_388 = arith.constant 0 : index
    %c0_389 = arith.constant 0 : index
    %c0_390 = arith.constant 0 : index
    %603 = vector.load %arg24[%c0_388, %c0_389, %c0_390] : memref<2x32x32xf32, #tpu.memory_space<vmem>>, vector<1x32x32xf32>
    %604 = vector.shape_cast %603 : vector<1x32x32xf32> to vector<32x32xf32>
    %605 = vector.shape_cast %602 : vector<32x32xf32> to vector<1x32x32xf32>
    tpu.vector_store %arg24[%c0_388, %c0_389, %c0_390], %605 {strides = array<i32>} : memref<2x32x32xf32, #tpu.memory_space<vmem>>, vector<1x32x32xf32>,
    %c1_391 = arith.constant 1 : index
    %c0_392 = arith.constant 0 : index
    %c0_393 = arith.constant 0 : index
    %606 = vector.load %arg1[%c1_391, %c0_392, %c0_393] : memref<2x32x32xf32, #tpu.memory_space<vmem>>, vector<1x32x32xf32>
    %607 = vector.shape_cast %606 : vector<1x32x32xf32> to vector<32x32xf32>
    %608 = vector.extract_strided_slice %594 {offsets = [1, 0], sizes = [1, 32], strides = [1, 1]} : vector<2x32xf32> to vector<1x32xf32>
    %609 = vector.broadcast %608 : vector<1x32xf32> to vector<32x32xf32>
    %610 = arith.mulf %607, %609 : vector<32x32xf32>
    %611 = vector.extract_strided_slice %0 {offsets = [1, 0, 0], sizes = [1, 32, 32], strides = [1, 1, 1]} : vector<2x32x32xf32> to vector<1x32x32xf32>
    %612 = vector.shape_cast %611 : vector<1x32x32xf32> to vector<32x32xf32>
    %cst_394 = arith.constant dense<0.000000e+00> : vector<32x32xf32>
    %613 = tpu.matmul %610, %612, %cst_394 {dimension_numbers = #tpu.dot_dimension_numbers<[1], [0], [0], [1], [0, 0, 1, 1], [], []>} : vector<32x32xf32>, vector<32x32xf32>, vector<32x32xf32> -> vector<32x32xf32>
    %c1_395 = arith.constant 1 : index
    %c0_396 = arith.constant 0 : index
    %c0_397 = arith.constant 0 : index
    %614 = vector.load %arg24[%c1_395, %c0_396, %c0_397] : memref<2x32x32xf32, #tpu.memory_space<vmem>>, vector<1x32x32xf32>
    %615 = vector.shape_cast %614 : vector<1x32x32xf32> to vector<32x32xf32>
    %616 = vector.shape_cast %613 : vector<32x32xf32> to vector<1x32x32xf32>
    tpu.vector_store %arg24[%c1_395, %c0_396, %c0_397], %616 {strides = array<i32>} : memref<2x32x32xf32, #tpu.memory_space<vmem>>, vector<1x32x32xf32>,
    return
  }
  func.func @transform_0(%arg0: i32) -> (i32, i32, i32) {
    %c0_i32 = arith.constant 0 : i32
    %c0_i32_0 = arith.constant 0 : i32
    %c0_i32_1 = arith.constant 0 : i32
    return %arg0, %c0_i32, %c0_i32_0 : i32, i32, i32
  }
  func.func @transform_1(%arg0: i32) -> (i32, i32, i32) {
    %c0_i32 = arith.constant 0 : i32
    %c0_i32_0 = arith.constant 0 : i32
    %c0_i32_1 = arith.constant 0 : i32
    return %arg0, %c0_i32, %c0_i32_0 : i32, i32, i32
  }
  func.func @transform_2(%arg0: i32) -> (i32, i32, i32) {
    %c0_i32 = arith.constant 0 : i32
    %c0_i32_0 = arith.constant 0 : i32
    %c0_i32_1 = arith.constant 0 : i32
    return %arg0, %c0_i32, %c0_i32_0 : i32, i32, i32
  }
  func.func @transform_3(%arg0: i32) -> (i32, i32, i32) {
    %c0_i32 = arith.constant 0 : i32
    %c0_i32_0 = arith.constant 0 : i32
    %c0_i32_1 = arith.constant 0 : i32
    return %arg0, %c0_i32, %c0_i32_0 : i32, i32, i32
  }
  func.func @transform_4(%arg0: i32) -> (i32, i32) {
    %c0_i32 = arith.constant 0 : i32
    %c0_i32_0 = arith.constant 0 : i32
    %c0_i32_1 = arith.constant 0 : i32
    return %c0_i32, %c0_i32_0 : i32, i32
  }
  func.func @transform_5(%arg0: i32) -> (i32, i32) {
    %c0_i32 = arith.constant 0 : i32
    %c0_i32_0 = arith.constant 0 : i32
    %c0_i32_1 = arith.constant 0 : i32
    return %c0_i32, %c0_i32_0 : i32, i32
  }
  func.func @transform_6(%arg0: i32) -> (i32, i32) {
    %c0_i32 = arith.constant 0 : i32
    %c0_i32_0 = arith.constant 0 : i32
    %c0_i32_1 = arith.constant 0 : i32
    return %c0_i32, %c0_i32_0 : i32, i32
  }
  func.func @transform_7(%arg0: i32) -> (i32, i32) {
    %c0_i32 = arith.constant 0 : i32
    %c0_i32_0 = arith.constant 0 : i32
    %c0_i32_1 = arith.constant 0 : i32
    return %c0_i32, %c0_i32_0 : i32, i32
  }
  func.func @transform_8(%arg0: i32) -> (i32, i32) {
    %c0_i32 = arith.constant 0 : i32
    %c0_i32_0 = arith.constant 0 : i32
    %c0_i32_1 = arith.constant 0 : i32
    return %c0_i32, %c0_i32_0 : i32, i32
  }
  func.func @transform_9(%arg0: i32) -> (i32, i32) {
    %c0_i32 = arith.constant 0 : i32
    %c0_i32_0 = arith.constant 0 : i32
    %c0_i32_1 = arith.constant 0 : i32
    return %c0_i32, %c0_i32_0 : i32, i32
  }
  func.func @transform_10(%arg0: i32) -> (i32, i32) {
    %c0_i32 = arith.constant 0 : i32
    %c0_i32_0 = arith.constant 0 : i32
    %c0_i32_1 = arith.constant 0 : i32
    return %c0_i32, %c0_i32_0 : i32, i32
  }
  func.func @transform_11(%arg0: i32) -> (i32, i32) {
    %c0_i32 = arith.constant 0 : i32
    %c0_i32_0 = arith.constant 0 : i32
    %c0_i32_1 = arith.constant 0 : i32
    return %c0_i32, %c0_i32_0 : i32, i32
  }
  func.func @transform_12(%arg0: i32) -> (i32, i32) {
    %c0_i32 = arith.constant 0 : i32
    %c0_i32_0 = arith.constant 0 : i32
    %c0_i32_1 = arith.constant 0 : i32
    return %c0_i32, %c0_i32_0 : i32, i32
  }
  func.func @transform_13(%arg0: i32) -> (i32, i32) {
    %c0_i32 = arith.constant 0 : i32
    %c0_i32_0 = arith.constant 0 : i32
    %c0_i32_1 = arith.constant 0 : i32
    return %c0_i32, %c0_i32_0 : i32, i32
  }
  func.func @transform_14(%arg0: i32) -> (i32, i32, i32) {
    %c0_i32 = arith.constant 0 : i32
    %c0_i32_0 = arith.constant 0 : i32
    %c0_i32_1 = arith.constant 0 : i32
    %c0_i32_2 = arith.constant 0 : i32
    return %c0_i32, %c0_i32_0, %c0_i32_1 : i32, i32, i32
  }
  func.func @transform_15(%arg0: i32) -> (i32, i32, i32) {
    %c0_i32 = arith.constant 0 : i32
    %c0_i32_0 = arith.constant 0 : i32
    %c0_i32_1 = arith.constant 0 : i32
    %c0_i32_2 = arith.constant 0 : i32
    return %c0_i32, %c0_i32_0, %c0_i32_1 : i32, i32, i32
  }
  func.func @transform_16(%arg0: i32) -> (i32, i32, i32) {
    %c0_i32 = arith.constant 0 : i32
    %c0_i32_0 = arith.constant 0 : i32
    %c0_i32_1 = arith.constant 0 : i32
    %c0_i32_2 = arith.constant 0 : i32
    return %c0_i32, %c0_i32_0, %c0_i32_1 : i32, i32, i32
  }
  func.func @transform_17(%arg0: i32) -> (i32, i32, i32) {
    %c0_i32 = arith.constant 0 : i32
    %c0_i32_0 = arith.constant 0 : i32
    %c0_i32_1 = arith.constant 0 : i32
    %c0_i32_2 = arith.constant 0 : i32
    return %c0_i32, %c0_i32_0, %c0_i32_1 : i32, i32, i32
  }
  func.func @transform_18(%arg0: i32) -> (i32, i32) {
    %c0_i32 = arith.constant 0 : i32
    %c0_i32_0 = arith.constant 0 : i32
    %c0_i32_1 = arith.constant 0 : i32
    return %c0_i32, %c0_i32_0 : i32, i32
  }
  func.func @transform_19(%arg0: i32) -> (i32, i32) {
    %c0_i32 = arith.constant 0 : i32
    %c0_i32_0 = arith.constant 0 : i32
    %c0_i32_1 = arith.constant 0 : i32
    return %c0_i32, %c0_i32_0 : i32, i32
  }
  func.func @transform_20(%arg0: i32) -> (i32, i32) {
    %c0_i32 = arith.constant 0 : i32
    %c0_i32_0 = arith.constant 0 : i32
    %c0_i32_1 = arith.constant 0 : i32
    return %c0_i32, %c0_i32_0 : i32, i32
  }
  func.func @transform_21(%arg0: i32) -> (i32, i32) {
    %c0_i32 = arith.constant 0 : i32
    %c0_i32_0 = arith.constant 0 : i32
    %c0_i32_1 = arith.constant 0 : i32
    return %c0_i32, %c0_i32_0 : i32, i32
  }
  func.func @transform_22(%arg0: i32) -> (i32, i32) {
    %c0_i32 = arith.constant 0 : i32
    %c0_i32_0 = arith.constant 0 : i32
    %c0_i32_1 = arith.constant 0 : i32
    return %c0_i32, %c0_i32_0 : i32, i32
  }
  func.func @transform_23(%arg0: i32) -> (i32, i32, i32) {
    %c0_i32 = arith.constant 0 : i32
    %c0_i32_0 = arith.constant 0 : i32
    %c0_i32_1 = arith.constant 0 : i32
    return %arg0, %c0_i32, %c0_i32_0 : i32, i32, i32
  }
}

</mosaic_0001>

<bundles_post_ra>
// kernel: tpu_custom_call.1
= control target key start
LH: loop header
LB: loop body
LE: loop exit
PB: predicated region body
PF: predicated region fallthrough
CT: control target
= control target key end

     0   :  { %s13859_s0 = inlined_call_operand.vmem [shape: f32[2,32,32], index: 0, kind: input, shape index: {}]   ;;  %s13860_s1 = inlined_call_operand.vmem [shape: f32[2,32,32], index: 1, kind: input, shape index: {}]   ;;  %s13861_s2 = inlined_call_operand.vmem [shape: f32[2,1,32], index: 2, kind: input, shape index: {}]   ;;  %s13862_s3 = inlined_call_operand.vmem [shape: f32[2,32,32], index: 3, kind: input, shape index: {}]   ;;  %s13863_s4 = inlined_call_operand.vmem [shape: bf16[32,128], index: 4, kind: input, shape index: {}]   ;;  %s13864_s5 = inlined_call_operand.vmem [shape: f32[1,128], index: 5, kind: input, shape index: {}]   ;;  %s13865_s6 = inlined_call_operand.vmem [shape: bf16[128,32], index: 6, kind: input, shape index: {}]   ;;  %s13866_s7 = inlined_call_operand.vmem [shape: f32[1,32], index: 7, kind: input, shape index: {}]   ;;  %s13867_s8 = inlined_call_operand.vmem [shape: bf16[32,128], index: 8, kind: input, shape index: {}]   ;;  %s13868_s9 = inlined_call_operand.vmem [shape: f32[1,128], index: 9, kind: input, shape index: {}]   ;;  %s13869_s10 = inlined_call_operand.vmem [shape: bf16[128,32], index: 10, kind: input, shape index: {}]   ;;  %s13870_s11 = inlined_call_operand.vmem [shape: f32[1,32], index: 11, kind: input, shape index: {}]   ;;  %s13871_s12 = inlined_call_operand.vmem [shape: bf16[32,32], index: 12, kind: input, shape index: {}]   ;;  %s13872_s13 = inlined_call_operand.vmem [shape: f32[1,32], index: 13, kind: input, shape index: {}]   ;;  %s13873_s14 = inlined_call_operand.vmem [shape: bf16[8,32,128], index: 14, kind: input, shape index: {}]   ;;  %s13874_s15 = inlined_call_operand.vmem [shape: bf16[8,32,128], index: 15, kind: input, shape index: {}]   ;;  %s13875_s16 = inlined_call_operand.vmem [shape: bf16[8,32,128], index: 16, kind: input, shape index: {}]   ;;  %s13876_s17 = inlined_call_operand.vmem [shape: bf16[8,128,32], index: 17, kind: input, shape index: {}]   ;;  %s13877_s18 = inlined_call_operand.vmem [shape: f32[1,32], index: 18, kind: input, shape index: {}]   ;;  %s13878_s19 = inlined_call_operand.vmem [shape: bf16[32,1024], index: 19, kind: input, shape index: {}]   ;;  %s13879_s20 = inlined_call_operand.vmem [shape: f32[1,1024], index: 20, kind: input, shape index: {}]   ;;  %s13880_s21 = inlined_call_operand.vmem [shape: bf16[1024,32], index: 21, kind: input, shape index: {}]   ;;  %s13881_s22 = inlined_call_operand.vmem [shape: f32[1,32], index: 22, kind: input, shape index: {}]   ;;  %s13882_s23 = inlined_call_operand.hbm [shape: f32[2,32,32], index: 23, kind: output, shape index: {}]  }
   0x1   :  { %13889 = sst [smem:[#allocation5_spill]] %s13859_s0 }
   0x2   :  { %13890 = sst [smem:[#allocation6_spill]] %s13860_s1 }
   0x3   :  { %13891 = sst [smem:[#allocation7_spill]] %s13861_s2 }
   0x4   :  { %13892 = sst [smem:[#allocation8_spill]] %s13862_s3 }
   0x5   :  { %13893 = sst [smem:[#allocation9_spill]] %s13863_s4 }
   0x6   :  { %13894 = sst [smem:[#allocation10_spill]] %s13864_s5 }
   0x7   :  { %13895 = sst [smem:[#allocation11_spill]] %s13865_s6 }
   0x8   :  { %13896 = sst [smem:[#allocation12_spill]] %s13866_s7 }
   0x9   :  { %s13897_s24 = sld [smem:[#allocation9_spill]]  ;;  %s13898_s2 = sld [smem:[#allocation6_spill]]  ;;  %vm125_vm0 = vcmask 261120   ;;  %v11091_v7 = vld [vmem:[%s13867_s8] sm:$0xff]   ;;  %v11092_v12 = vld [vmem:[%s13867_s8 + $0x8] sm:$0xff]   ;;  %v11682_v38 = vmov 0.0  }
   0xa   :  { %s13899_s0 = sld [smem:[#allocation8_spill]]  ;;  %v11101_v36 = vld [vmem:[%s13869_s10] sm:$0xff]   ;;  %s13901_s26 = sld [smem:[#allocation7_spill]]  ;;  %v11109_v44 = vld [vmem:[%s13871_s12 + $0x8] sm:$0xff]   ;;  %vm625_vm1 = vcmask 1041409   ;;  %vm11683_vm2 = vmmov 0  }
   0xb   :  { %v11106_v37 = vld [vmem:[%s13871_s12] sm:$0xff]  }
   0xf   :  { %v11089_v0 = vld [vmem:[%s13897_s24] sm:$0xff]   ;;  %v11090_v1 = vld [vmem:[%s13897_s24 + $0x8] sm:$0xff]   ;;  %v88_v4 = vld [vmem:[%s13898_s2 + $0x10] sm:$0xff]  ;;  %s13900_s24 = sld [smem:[#allocation11_spill]] }
  0x10   :  { %9918 = vmatprep.subr.bf16.mxu0 %v11089_v0  ;;  %v86_v2 = vld [vmem:[%s13898_s2] sm:$0xff]  ;;  %v87_v3 = vld [vmem:[%s13898_s2 + $0x8] sm:$0xff]  ;;  %v89_v6 = vld [vmem:[%s13898_s2 + $0x18] sm:$0xff] }
  0x11   :  { %9919 = vmatpush3.bf16.msra.mxu0 %v11089_v0  ;;  %v94_v5 = vpack.c.bf16 %v87_v3, %v86_v2  ;;  %v90_v8 = vld [vmem:[%s13898_s2 + $0x20] sm:$0xff]  ;;  %v91_v9 = vld [vmem:[%s13898_s2 + $0x28] sm:$0xff]  ;;  %v95_v10 = vpack.c.bf16 %v89_v6, %v88_v4  ;;  %v92_v13 = vld [vmem:[%s13898_s2 + $0x30] sm:$0xff] }
  0x12   :  { %9920 = vmatprep.subr.bf16.mxu0 %v11090_v1  ;;  %v96_v11 = vpack.c.bf16 %v91_v9, %v90_v8  ;;  %v93_v14 = vld [vmem:[%s13898_s2 + $0x38] sm:$0xff]  ;;  %v76_v15 = vld [vmem:[%s13899_s0] sm:$0xff]  ;;  %v77_v18 = vld [vmem:[%s13899_s0 + $0x8] sm:$0xff] }
  0x13   :  { %9922 = vmatprep.mubr.msk.bf16.mxu0 %vm125_vm0, %v94_v5  ;;  %v97_v19 = vpack.c.bf16 %v93_v14, %v92_v13  ;;  %v11863_v21 = vpack.c.bf16 %v77_v18, %v76_v15  ;;  %v78_v23 = vld [vmem:[%s13899_s0 + $0x10] sm:$0xff]  ;;  %v79_v24 = vld [vmem:[%s13899_s0 + $0x18] sm:$0xff]  ;;  %v80_v25 = vld [vmem:[%s13899_s0 + $0x20] sm:$0xff] }
  0x14   :  { %v81_v26 = vld [vmem:[%s13899_s0 + $0x28] sm:$0xff]  ;;  %v11886_v28 = vpack.c.bf16 %v79_v24, %v78_v23  ;;  %v82_v31 = vld [vmem:[%s13899_s0 + $0x30] sm:$0xff]  ;;  %v83_v32 = vld [vmem:[%s13899_s0 + $0x38] sm:$0xff] }
  0x15   :  { %9921 = vmatpush3.bf16.msra.mxu0 %v11090_v1  ;;  %v11093_v16 = vld [vmem:[%s13900_s24] sm:$0xff]   ;;  %v11094_v17 = vld [vmem:[%s13900_s24 + $0x8] sm:$0xff]   ;;  %v11095_v20 = vld [vmem:[%s13900_s24 + $0x10] sm:$0xff]   ;;  %v11888_v29 = vpack.c.bf16 %v81_v26, %v80_v25  ;;  %v11903_v33 = vpack.c.bf16 %v83_v32, %v82_v31 }
  0x16   :  { %9954 = vmatprep.subr.bf16.mxu0 %v11091_v7  ;;  %9930 = vmatprep.subr.bf16.mxu1 %v11093_v16  ;;  %v11096_v22 = vld [vmem:[%s13900_s24 + $0x18] sm:$0xff]   ;;  %v11097_v27 = vld [vmem:[%s13900_s24 + $0x20] sm:$0xff]   ;;  %v11098_v30 = vld [vmem:[%s13900_s24 + $0x28] sm:$0xff]  }
  0x17   :  { %9931 = vmatpush3.bf16.msra.mxu1 %v11093_v16  ;;  %v11099_v34 = vld [vmem:[%s13900_s24 + $0x30] sm:$0xff]   ;;  %v11100_v35 = vld [vmem:[%s13900_s24 + $0x38] sm:$0xff]   ;;  %v85_v39 = vld [vmem:[%s13901_s26 + $0x1] sm:$0x1] }
  0x18   :  { %9923 = vmatmul.mubr.msk.bf16.vlgmr.msra.gmra.mrb[0].mxu0 %vm125_vm0, %v95_v10  ;;  %9932 = vmatprep.subr.bf16.mxu1 %v11094_v17  ;;  %v608_v40 = vpack.c.bf16 %v85_v39, %v85_v39  ;;  %v84_v41 = vld [vmem:[%s13901_s26] sm:$0x1] }
  0x19   :  { %9955 = vmatpush3.bf16.msra.mxu0 %v11091_v7  ;;  %9926 = vmatprep.mubr.msk.bf16.mxu0 %vm125_vm0, %v96_v11  ;;  %v607_v42 = vpack.c.bf16 %v84_v41, %v84_v41 }
  0x1a   :  { %9956 = vmatprep.subr.bf16.mxu0 %v11092_v12  ;;  %v623_v43 = vunpack.c.l.b16 %v608_v40 }
  0x1b   :  { %9933 = vmatpush3.bf16.msra.mxu1 %v11094_v17  ;;  %v622_v45 = vunpack.c.l.b16 %v607_v42 }
  0x1c   :  { %9934 = vmatprep.subr.bf16.mxu1 %v11095_v20  ;;  %v624_v46 = vrot.slane %v623_v43, 7 }
  0x1d   :  { %9957 = vmatpush3.bf16.msra.mxu0 %v11092_v12 }
  0x1e   :  { %9990 = vmatprep.subr.bf16.mxu0 %v11682_v38  ;;  %v626_v47 = vsel %vm625_vm1, %v624_v46, %v622_v45 }
  0x1f   :  { %9935 = vmatpush3.bf16.msra.mxu1 %v11095_v20  ;;  %v627_v48 = vpack.c.b16 %v626_v47, %v626_v47 }
  0x20   :  { %9927 = vmatmul.mubr.msk.bf16.gmra.mrb[4].mxu0 %vm125_vm0, %v97_v19  ;;  %9936 = vmatprep.subr.bf16.mxu1 %v11096_v22 }
  0x21   :  { %9958 = vmatprep.mubr.msk.bf16.mxu0 %vm125_vm0, %v11863_v21 }
  0x23   :  { %9937 = vmatpush3.bf16.msra.mxu1 %v11096_v22 }
  0x24   :  { %9938 = vmatprep.subr.bf16.mxu1 %v11097_v27 }
  0x27   :  { %9939 = vmatpush3.bf16.msra.mxu1 %v11097_v27 }
  0x28   :  { %9959 = vmatmul.mubr.msk.bf16.vlgmr.msra.gmra.mrb[8].mxu0 %vm125_vm0, %v11886_v28  ;;  %9940 = vmatprep.subr.bf16.mxu1 %v11098_v30 }
  0x29   :  { %9962 = vmatprep.mubr.msk.bf16.mxu0 %vm125_vm0, %v11888_v29  ;;  %9991 = vmatpush3.bf16.msra.mxu0 %v11106_v37 }
  0x2a   :  { %9992 = vmatprep.subr.bf16.mxu0 %v11682_v38 }
  0x2b   :  { %9941 = vmatpush3.bf16.msra.mxu1 %v11098_v30 }
  0x2c   :  { %9942 = vmatprep.subr.bf16.mxu1 %v11099_v34 }
  0x2d   :  { %9993 = vmatpush3.bf16.msra.mxu0 %v11109_v44 }
  0x2f   :  { %9943 = vmatpush3.bf16.msra.mxu1 %v11099_v34 }
  0x30   :  { %9963 = vmatmul.mubr.msk.bf16.gmra.mrb[12].mxu0 %vm125_vm0, %v11903_v33  ;;  %9944 = vmatprep.subr.bf16.mxu1 %v11100_v35 }
  0x31   :  { %9994 = vmatprep.mubr.msk.bf16.mxu0 %vm11683_vm2, %v11682_v38 }
  0x33   :  { %9945 = vmatpush3.bf16.msra.mxu1 %v11100_v35 }
  0x34   :  { %9966 = vmatprep.subr.bf16.mxu1 %v11101_v36 }
  0x38   :  { %9995 = vmatmul.mubr.msk.bf16.vlgmr.msra.gmra.mrb[16].mxu0 %vm125_vm0, %v627_v48 }
  0x39   :  { %28 = vsyncpa [#allocation3], 0  ;;  %s13902_s3 = sld [smem:[#allocation10_spill]]  ;;  %v11102_v1 = vld [vmem:[%s13869_s10 + $0x8] sm:$0xff]   ;;  %v11103_v11 = vld [vmem:[%s13869_s10 + $0x10] sm:$0xff]   ;;  %vm7459_vm3 = vcmask 1040384  }
  0x3a   :  { %v8741_v14 = vld [vmem:[%s13868_s9] ss:$0 sm:$0xff]  ;;  %v11104_v18 = vld [vmem:[%s13869_s10 + $0x18] sm:$0xff]   ;;  %v11107_v38 = vld [vmem:[%s13869_s10 + $0x28] sm:$0xff]   ;;  %s13903_s9 = sld [smem:[#allocation12_spill]]  ;;  %s13904_s7 = sld [smem:[#allocation5_spill]] }
  0x3b   :  { %v11105_v31 = vld [vmem:[%s13869_s10 + $0x20] sm:$0xff]   ;;  %v11108_v48 = vld [vmem:[%s13869_s10 + $0x30] sm:$0xff]  }
  0x3f   :  { %v8725_v49 = vld [vmem:[%s13902_s3] ss:$0 sm:$0xff] }
  0xeb   :  { %v9924_v50 = vpop.f32.mrb[0].mxu0 }
  0xec   :  { %v181_v51 = vadd.f32 %v9924_v50, %v8725_v49  ;;  %v172_v52 = vpop.f32.mrb[1].mxu0 }
  0xed   :  { %v173_v53 = vadd.f32 %v8725_v49, %v172_v52  ;;  %v9925_v54 = vpop.f32.mrb[2].mxu0 }
  0xee   :  { %v184_v55 = vadd.f32 %v9925_v54, %v8725_v49  ;;  %v175_v56 = vpop.f32.mrb[3].mxu0  ;;  %v205_v58 = vmax.f32 %v181_v51, 0.0 }
  0xef   :  { %v176_v57 = vadd.f32 %v8725_v49, %v175_v56  ;;  %v203_v60 = vmax.f32 %v173_v53, 0.0  ;;  %v11110_v53 = vld [vmem:[%s13869_s10 + $0x38] sm:$0xff]  }
  0xf0   :  { %v206_v59 = vmax.f32 %v184_v55, 0.0 }
  0xf1   :  { %v204_v61 = vmax.f32 %v176_v57, 0.0 }
  0xf2   :  { %v212_v62 = vpack.c.bf16 %v206_v59, %v205_v58  ;;  %v11111_v58 = vld [vmem:[%s13873_s14] sm:$0xff]   ;;  %v11112_v59 = vld [vmem:[%s13873_s14 + $0x8] sm:$0xff]  }
  0xf3   :  { %v211_v63 = vpack.c.bf16 %v204_v61, %v203_v60  ;;  %v9928_v0 = vpop.f32.mrb[4].mxu0  ;;  %9998 = vmatprep.subr.bf16.mxu0 %v11111_v58  ;;  %v11113_v60 = vld [vmem:[%s13874_s15] sm:$0xff]   ;;  %v683_v61 = vlaneseq }
  0xf4   :  { %v197_v2 = vadd.f32 %v9928_v0, %v8725_v49  ;;  %v188_v3 = vpop.f32.mrb[5].mxu0  ;;  %9999 = vmatpush3.bf16.msra.mxu0 %v11111_v58  ;;  %v8732_v0 = vld [vmem:[%s13903_s9] ss:$0 sm:$0xff]  ;;  %s11686_s9 = smov [#allocation2]  }
  0xf5   :  { %9946 = vmatprep.mubr.bf16.mxu1 %v211_v63  ;;  %v189_v4 = vadd.f32 %v8725_v49, %v188_v3  ;;  %v9929_v5 = vpop.f32.mrb[6].mxu0  ;;  %10000 = vmatprep.subr.bf16.mxu0 %v11112_v59  ;;  %v8757_v63 = vld [vmem:[%s13872_s13] ss:$0 sm:$0xff] }
  0xf6   :  { %9947 = vmatmul.mubr.bf16.vlgmr.msra.gmra.mrb[0].mxu1 %v212_v62  ;;  %v209_v6 = vmax.f32 %v197_v2, 0.0  ;;  %v200_v7 = vadd.f32 %v9929_v5, %v8725_v49  ;;  %v191_v8 = vpop.f32.mrb[7].mxu0  ;;  %v11965_v62 = vshrl.u32 %v683_v61, 7 }
  0xf7   :  { %9967 = vmatpush3.bf16.msra.mxu1 %v11101_v36  ;;  %v207_v9 = vmax.f32 %v189_v4, 0.0  ;;  %v192_v10 = vadd.f32 %v8725_v49, %v191_v8 }
  0xf8   :  { %9968 = vmatprep.subr.bf16.mxu1 %v11102_v1  ;;  %v210_v12 = vmax.f32 %v200_v7, 0.0  ;;  %10001 = vmatpush3.bf16.msra.mxu0 %v11112_v59  ;;  %v11977_v3 = vsub.s32 0, %v11965_v62 }
  0xf9   :  { %v208_v13 = vmax.f32 %v192_v10, 0.0  ;;  %10006 = vmatprep.subr.bf16.mxu0 %v11113_v60 }
  0xfa   :  { %v214_v15 = vpack.c.bf16 %v210_v12, %v209_v6 }
  0xfb   :  { %9969 = vmatpush3.bf16.msra.mxu1 %v11102_v1  ;;  %v213_v16 = vpack.c.bf16 %v208_v13, %v207_v9  ;;  %v9960_v17 = vpop.f32.mrb[8].mxu0  ;;  %v8748_v1 = vld [vmem:[%s13870_s11] ss:$0 sm:$0xff] }
  0xfc   :  { %9970 = vmatprep.subr.bf16.mxu1 %v11103_v11  ;;  %v429_v19 = vadd.f32 %v9960_v17, %v8741_v14  ;;  %v420_v20 = vpop.f32.mrb[9].mxu0  ;;  %v11008_v4 = vadd.f32 %v8748_v1, %v8732_v0 }
  0xfd   :  { %9950 = vmatprep.mubr.bf16.mxu1 %v213_v16  ;;  %v421_v22 = vadd.f32 %v8741_v14, %v420_v20  ;;  %v9961_v23 = vpop.f32.mrb[10].mxu0  ;;  %v11981_v16 = vsub.s32 1, %v11965_v62 }
  0xfe   :  { %v453_v24 = vmax.f32 %v429_v19, 0.0  ;;  %9951 = vmatmul.mubr.bf16.gmra.mrb[4].mxu1 %v214_v15  ;;  %v432_v25 = vadd.f32 %v9961_v23, %v8741_v14  ;;  %v423_v26 = vpop.f32.mrb[11].mxu0 }
  0xff   :  { %9971 = vmatpush3.bf16.msra.mxu1 %v11103_v11  ;;  %v451_v27 = vmax.f32 %v421_v22, 0.0  ;;  %v424_v30 = vadd.f32 %v8741_v14, %v423_v26 }
 0x100   :  { %9972 = vmatprep.subr.bf16.mxu1 %v11104_v18  ;;  %v454_v32 = vmax.f32 %v432_v25, 0.0 }
 0x101   :  { %v452_v34 = vmax.f32 %v424_v30, 0.0  ;;  %v11114_v30 = vld [vmem:[%s13874_s15 + $0x8] sm:$0xff]  }
 0x102   :  { %v460_v35 = vpack.c.bf16 %v454_v32, %v453_v24 }
 0x103   :  { %9973 = vmatpush3.bf16.msra.mxu1 %v11104_v18  ;;  %v459_v36 = vpack.c.bf16 %v452_v34, %v451_v27  ;;  %v9964_v37 = vpop.f32.mrb[12].mxu0 }
 0x104   :  { %9974 = vmatprep.subr.bf16.mxu1 %v11105_v31  ;;  %v445_v39 = vadd.f32 %v9964_v37, %v8741_v14  ;;  %v436_v40 = vpop.f32.mrb[13].mxu0 }
 0x105   :  { %9982 = vmatprep.mubr.bf16.mxu1 %v459_v36  ;;  %v437_v41 = vadd.f32 %v8741_v14, %v436_v40  ;;  %v9965_v42 = vpop.f32.mrb[14].mxu0  ;;  %v11115_v40 = vld [vmem:[%s13875_s16] sm:$0xff]  }
 0x106   :  { %v457_v43 = vmax.f32 %v445_v39, 0.0  ;;  %v448_v44 = vadd.f32 %v9965_v42, %v8741_v14  ;;  %v439_v45 = vpop.f32.mrb[15].mxu0 }
 0x107   :  { %9975 = vmatpush3.bf16.msra.mxu1 %v11105_v31  ;;  %v455_v46 = vmax.f32 %v437_v41, 0.0  ;;  %v440_v47 = vadd.f32 %v8741_v14, %v439_v45 }
 0x108   :  { %9976 = vmatprep.subr.bf16.mxu1 %v11107_v38  ;;  %v458_v49 = vmax.f32 %v448_v44, 0.0  ;;  %v11116_v44 = vld [vmem:[%s13875_s16 + $0x8] sm:$0xff]  }
 0x109   :  { %v456_v50 = vmax.f32 %v440_v47, 0.0 }
 0x10a   :  { %v462_v51 = vpack.c.bf16 %v458_v49, %v457_v43 }
 0x10b   :  { %9977 = vmatpush3.bf16.msra.mxu1 %v11107_v38  ;;  %v461_v52 = vpack.c.bf16 %v456_v50, %v455_v46  ;;  %v677_v54 = vpop.f32.mrb[16].mxu0 }
 0x10c   :  { %9978 = vmatprep.subr.bf16.mxu1 %v11108_v48  ;;  %v9996_v55 = vpop.f32.mrb[17].mxu0  ;;  %v678_v2 = vadd.f32 %v8757_v63, %v677_v54 }
 0x10d   :  { %v680_v56 = vpop.f32.mrb[18].mxu0 }
 0x10e   :  { %v9997_v57 = vpop.f32.mrb[19].mxu0  ;;  %v686_v6 = vrot.slane %v678_v2, %v11977_v3  ;;  %v4540_v25 = vrot.slane %v678_v2, %v11981_v16  ;;  %v11119_v2 = vld [vmem:[%s13875_s16 + $0x10] sm:$0xff]  }
 0x10f   :  { %9979 = vmatpush3.bf16.msra.mxu1 %v11108_v48 }
 0x110   :  { %9980 = vmatprep.subr.bf16.mxu1 %v11110_v53 }
 0x113   :  { %9981 = vmatpush3.bf16.msra.mxu1 %v11110_v53 }
 0x116   :  { %9983 = vmatmul.mubr.bf16.vlgmr.msra.gmra.mrb[0].mxu1 %v460_v35 }
 0x117   :  { %9986 = vmatprep.mubr.bf16.mxu1 %v461_v52 }
 0x11e   :  { %9987 = vmatmul.mubr.bf16.gmra.mrb[4].mxu1 %v462_v51 }
 0x1e9   :  { %v9984_v5 = vpop.f32.mrb[0].mxu1 }
 0x1ea   :  { %v11002_v7 = vadd.f32 %v9984_v5, %v8732_v0  ;;  %v568_v8 = vpop.f32.mrb[1].mxu1 }
 0x1eb   :  { %v11004_v9 = vadd.f32 %v8732_v0, %v568_v8  ;;  %v9985_v10 = vpop.f32.mrb[2].mxu1  ;;  %v11117_v0 = vld [vmem:[%s13873_s14 + $0x10] sm:$0xff]  }
 0x1ec   :  { %v11003_v11 = vadd.f32 %v11002_v7, %v8748_v1  ;;  %v11007_v12 = vadd.f32 %v11008_v4, %v9985_v10  ;;  %v571_v13 = vpop.f32.mrb[3].mxu1 }
 0x1ed   :  { %v11005_v14 = vadd.f32 %v11004_v9, %v8748_v1  ;;  %v11009_v15 = vadd.f32 %v11008_v4, %v571_v13  ;;  %v11118_v1 = vld [vmem:[%s13873_s14 + $0x18] sm:$0xff]  }
 0x1ee   :  { %v689_v17 = vadd.f32 %v11003_v11, %v686_v6  ;;  %v690_v18 = vadd.f32 %v11007_v12, %v686_v6 }
 0x1ef   :  { %v687_v19 = vadd.f32 %v11005_v14, %v686_v6  ;;  %v688_v20 = vadd.f32 %v11009_v15, %v686_v6 }
 0x1f0   :  { %v11983_v22 = vpack.c.bf16 %v690_v18, %v689_v17 }
 0x1f1   :  { %v11985_v23 = vpack.c.bf16 %v688_v20, %v687_v19  ;;  %v9988_v24 = vpop.f32.mrb[4].mxu1 }
 0x1f2   :  { %v11011_v26 = vadd.f32 %v11008_v4, %v9988_v24  ;;  %v584_v27 = vpop.f32.mrb[5].mxu1 }
 0x1f3   :  { %v11013_v31 = vadd.f32 %v11008_v4, %v584_v27  ;;  %v9989_v32 = vpop.f32.mrb[6].mxu1  ;;  %10002 = vmatprep.mubr.msk.bf16.mxu0 %vm125_vm0, %v11985_v23 }
 0x1f4   :  { %v4543_v34 = vadd.f32 %v11011_v26, %v4540_v25  ;;  %v11015_v35 = vadd.f32 %v11008_v4, %v9989_v32  ;;  %v587_v36 = vpop.f32.mrb[7].mxu1  ;;  %10003 = vmatmul.mubr.msk.bf16.vlgmr.msra.gmra.mrb[20].mxu0 %vm125_vm0, %v11983_v22 }
 0x1f5   :  { %v4541_v37 = vadd.f32 %v11013_v31, %v4540_v25  ;;  %v11017_v38 = vadd.f32 %v11008_v4, %v587_v36  ;;  %10007 = vmatpush3.bf16.msra.mxu0 %v11113_v60  ;;  %10010 = vmatprep.mubr.msk.bf16.mxu0 %vm125_vm0, %v11985_v23  ;;  %v11120_v4 = vld [vmem:[%s13875_s16 + $0x18] sm:$0xff]  }
 0x1f6   :  { %v4544_v39 = vadd.f32 %v11015_v35, %v4540_v25  ;;  %10008 = vmatprep.subr.bf16.mxu0 %v11114_v30 }
 0x1f7   :  { %v4542_v41 = vadd.f32 %v11017_v38, %v4540_v25 }
 0x1f8   :  { %v12000_v42 = vpack.c.bf16 %v4544_v39, %v4543_v34 }
 0x1f9   :  { %v12002_v43 = vpack.c.bf16 %v4542_v41, %v4541_v37  ;;  %10009 = vmatpush3.bf16.msra.mxu0 %v11114_v30 }
 0x1fa   :  { %10014 = vmatprep.subr.bf16.mxu0 %v11115_v40 }
 0x1fc   :  { %10011 = vmatmul.mubr.msk.bf16.vlgmr.msra.gmra.mrb[24].mxu0 %vm125_vm0, %v11983_v22 }
 0x1fd   :  { %10015 = vmatpush3.bf16.msra.mxu0 %v11115_v40  ;;  %10018 = vmatprep.mubr.msk.bf16.mxu0 %vm125_vm0, %v11985_v23 }
 0x1fe   :  { %10016 = vmatprep.subr.bf16.mxu0 %v11116_v44 }
 0x201   :  { %10017 = vmatpush3.bf16.msra.mxu0 %v11116_v44 }
 0x204   :  { %10019 = vmatmul.mubr.msk.bf16.vlgmr.msra.gmra.mrb[28].mxu0 %vm125_vm0, %v11983_v22 }
 0x2c7   :  { %v10004_v45 = vpop.f32.mrb[20].mxu0 }
 0x2c8   :  { %v749_v46 = vpop.f32.mrb[21].mxu0 }
 0x2c9   :  { %v10005_v47 = vpop.f32.mrb[22].mxu0 }
 0x2ca   :  { %v895_v48 = vpack.c.bf16 %v10005_v47, %v10004_v45  ;;  %v752_v49 = vpop.f32.mrb[23].mxu0 }
 0x2cb   :  { %v894_v50 = vpack.c.bf16 %v752_v49, %v749_v46 }
 0x2cd   :  { %10026 = vmatprep.mubr.bf16.mxu0 %v894_v50 }
 0x2cf   :  { %v10012_v51 = vpop.f32.mrb[24].mxu0 }
 0x2d0   :  { %v814_v52 = vpop.f32.mrb[25].mxu0 }
 0x2d1   :  { %v10013_v53 = vpop.f32.mrb[26].mxu0 }
 0x2d2   :  { %v897_v54 = vpack.c.bf16 %v10013_v53, %v10012_v51  ;;  %v817_v55 = vpop.f32.mrb[27].mxu0 }
 0x2d3   :  { %v896_v56 = vpack.c.bf16 %v817_v55, %v814_v52 }
 0x2d5   :  { %10022 = vmatprep.subr.bf16.mxu0 %v896_v56 }
 0x2d6   :  { %10023 = vmatpush3.bf16.xpose.msra.mxu0 %v896_v56 }
 0x2d7   :  { %v10020_v57 = vpop.f32.mrb[28].mxu0  ;;  %10024 = vmatprep.subr.bf16.mxu0 %v897_v54 }
 0x2d8   :  { %v879_v58 = vpop.f32.mrb[29].mxu0 }
 0x2d9   :  { %v10021_v59 = vpop.f32.mrb[30].mxu0 }
 0x2da   :  { %v998_v60 = vpack.c.bf16 %v10021_v59, %v10020_v57  ;;  %v882_v61 = vpop.f32.mrb[31].mxu0 }
 0x2db   :  { %v997_v63 = vpack.c.bf16 %v882_v61, %v879_v58  ;;  %v11121_v58 = vld [vmem:[%s13874_s15 + $0x10] sm:$0xff]  }
 0x2dd   :  { %10030 = vmatprep.subr.bf16.mxu1 %v997_v63 }
 0x2de   :  { %10025 = vmatpush3.bf16.xpose.msra.mxu0 %v897_v54  ;;  %10031 = vmatpush3.bf16.msra.mxu1 %v997_v63 }
 0x2df   :  { %10032 = vmatprep.subr.bf16.mxu1 %v998_v60  ;;  %10038 = vmatprep.subr.bf16.mxu0 %v11117_v0 }
 0x2e2   :  { %10033 = vmatpush3.bf16.msra.mxu1 %v998_v60 }
 0x2e3   :  { %10046 = vmatprep.subr.bf16.mxu1 %v11121_v58 }
 0x2e5   :  { %10027 = vmatmul.mubr.bf16.vlgmr.msra.gmra.mrb[32].mxu0 %v895_v48 }
 0x2e6   :  { %10039 = vmatpush3.bf16.msra.mxu0 %v11117_v0  ;;  %10042 = vmatprep.mubr.msk.bf16.mxu0 %vm125_vm0, %v11985_v23 }
 0x2e7   :  { %10040 = vmatprep.subr.bf16.mxu0 %v11118_v1 }
 0x2ea   :  { %10041 = vmatpush3.bf16.msra.mxu0 %v11118_v1 }
 0x2eb   :  { %10054 = vmatprep.subr.bf16.mxu0 %v11119_v2 }
 0x2ed   :  { %10043 = vmatmul.mubr.msk.bf16.vlgmr.msra.gmra.mrb[36].mxu0 %vm125_vm0, %v11983_v22 }
 0x2ee   :  { %10055 = vmatpush3.bf16.msra.mxu0 %v11119_v2  ;;  %10058 = vmatprep.mubr.msk.bf16.mxu0 %vm125_vm0, %v11985_v23 }
 0x2ef   :  { %10056 = vmatprep.subr.bf16.mxu0 %v11120_v4 }
 0x2f2   :  { %10057 = vmatpush3.bf16.msra.mxu0 %v11120_v4 }
 0x2f5   :  { %10059 = vmatmul.mubr.msk.bf16.vlgmr.msra.gmra.mrb[40].mxu0 %vm125_vm0, %v11983_v22 }
 0x3b8   :  { %v10028_v5 = vpop.f32.mrb[32].mxu0 }
 0x3b9   :  { %v949_v6 = vmul.f32 0.5, %v10028_v5  ;;  %v932_v7 = vpop.f32.mrb[33].mxu0 }
 0x3ba   :  { %v947_v8 = vmul.f32 0.5, %v932_v7  ;;  %v10029_v9 = vpop.f32.mrb[34].mxu0 }
 0x3bb   :  { %v950_v10 = vmul.f32 0.5, %v10029_v9  ;;  %v935_v11 = vpop.f32.mrb[35].mxu0  ;;  %v957_v12 = vsel %vm125_vm0, %v949_v6, -inf }
 0x3bc   :  { %v948_v13 = vmul.f32 0.5, %v935_v11  ;;  %958 = vmax.xlane.f32.xlu1 %v957_v12  ;;  %v951_v14 = vsel %vm125_vm0, %v947_v8, -inf  ;;  %v11122_v11 = vld [vmem:[%s13874_s15 + $0x18] sm:$0xff]  }
 0x3bd   :  { %952 = vmax.xlane.f32.xlu0 %v951_v14  ;;  %v960_v15 = vsel %vm125_vm0, %v950_v10, -inf }
 0x3be   :  { %v954_v18 = vsel %vm125_vm0, %v948_v13, -inf }
 0x3c0   :  { %961 = vmax.xlane.f32.xlu1 %v960_v15  ;;  %v12036_v17 = vpop.f32.mrb[36].mxu0 }
 0x3c1   :  { %v12039_v19 = vpop.f32.mrb[37].mxu0  ;;  %955 = vmax.xlane.f32.xlu0 %v954_v18 }
 0x3c2   :  { %v12041_v20 = vpop.f32.mrb[38].mxu0 }
 0x3c3   :  { %v1271_v24 = vpack.c.bf16 %v12041_v20, %v12036_v17  ;;  %v12045_v25 = vpop.f32.mrb[39].mxu0  ;;  %v11127_v17 = vld [vmem:[%s13875_s16 + $0x20] sm:$0xff]   ;;  %v11128_v20 = vld [vmem:[%s13875_s16 + $0x28] sm:$0xff]  }
 0x3c4   :  { %v1270_v26 = vpack.c.bf16 %v12045_v25, %v12039_v19 }
 0x3c8   :  { %v10060_v27 = vpop.f32.mrb[40].mxu0 }
 0x3c9   :  { %v1255_v30 = vpop.f32.mrb[41].mxu0 }
 0x3ca   :  { %v10061_v31 = vpop.f32.mrb[42].mxu0 }
 0x3cb   :  { %v1374_v32 = vpack.c.bf16 %v10061_v31, %v10060_v27  ;;  %v1258_v34 = vpop.f32.mrb[43].mxu0 }
 0x3cc   :  { %v1373_v35 = vpack.c.bf16 %v1258_v34, %v1255_v30 }
 0x3ce   :  { %10070 = vmatprep.subr.bf16.mxu0 %v1373_v35 }
 0x3cf   :  { %10071 = vmatpush3.bf16.msra.mxu0 %v1373_v35  ;;  %v11124_v35 = vld [vmem:[%s13873_s14 + $0x28] sm:$0xff]  }
 0x3d0   :  { %10072 = vmatprep.subr.bf16.mxu0 %v1374_v32 }
 0x3d3   :  { %10073 = vmatpush3.bf16.msra.mxu0 %v1374_v32 }
 0x449   :  { %v959_v36 = vpop.xlane.xlu1 %958 }
 0x44a   :  { %v965_v37 = vsub.f32 %v949_v6, %v959_v36  ;;  %v953_v38 = vpop.xlane.xlu0 %952  ;;  %v11125_v36 = vld [vmem:[%s13874_s15 + $0x20] sm:$0xff]  }
 0x44b   :  { %v963_v39 = vsub.f32 %v947_v8, %v953_v38 }
 0x44c   :  { %v971_v40 = vmul.f32 1.442695, %v965_v37  ;;  %v11126_v37 = vld [vmem:[%s13874_s15 + $0x28] sm:$0xff]  }
 0x44d   :  { %v967_v41 = vmul.f32 1.442695, %v963_v39  ;;  %v962_v44 = vpop.xlane.xlu1 %961 }
 0x44e   :  { %v966_v45 = vsub.f32 %v950_v10, %v962_v44  ;;  %v956_v46 = vpop.xlane.xlu0 %955 }
 0x44f   :  { %11287 = vpow2.f32 %v967_v41  ;;  %v964_v47 = vsub.f32 %v948_v13, %v956_v46 }
 0x450   :  { %11289 = vpow2.f32 %v971_v40  ;;  %v973_v48 = vmul.f32 1.442695, %v966_v45 }
 0x451   :  { %v969_v49 = vmul.f32 1.442695, %v964_v47 }
 0x453   :  { %11291 = vpow2.f32 %v969_v49 }
 0x454   :  { %11293 = vpow2.f32 %v973_v48 }
 0x459   :  { %v11288_v50 = vpop.eup %11287 }
 0x45a   :  { %v975_v51 = vsel %vm125_vm0, %v11288_v50, 0.0  ;;  %v11290_v52 = vpop.eup %11289 }
 0x45b   :  { %976 = vadd.xlane.f32.xlu0 %v975_v51  ;;  %v981_v54 = vsel %vm125_vm0, %v11290_v52, 0.0 }
 0x45d   :  { %v11292_v53 = vpop.eup %11291 }
 0x45e   :  { %v978_v55 = vsel %vm125_vm0, %v11292_v53, 0.0  ;;  %v11294_v56 = vpop.eup %11293 }
 0x45f   :  { %982 = vadd.xlane.f32.xlu0 %v981_v54  ;;  %979 = vadd.xlane.f32.xlu1 %v978_v55  ;;  %v984_v57 = vsel %vm125_vm0, %v11294_v56, 0.0 }
 0x463   :  { %985 = vadd.xlane.f32.xlu1 %v984_v57 }
 0x4e8   :  { %v977_v59 = vpop.xlane.xlu0 %976 }
 0x4e9   :  { %11295 = vrcp.f32 %v977_v59 }
 0x4ec   :  { %v980_v60 = vpop.xlane.xlu1 %979  ;;  %v983_v61 = vpop.xlane.xlu0 %982 }
 0x4ed   :  { %11297 = vrcp.f32 %v980_v60 }
 0x4ee   :  { %11299 = vrcp.f32 %v983_v61 }
 0x4f0   :  { %v986_v63 = vpop.xlane.xlu1 %985 }
 0x4f1   :  { %11301 = vrcp.f32 %v986_v63 }
 0x4f3   :  { %v11296_v0 = vpop.eup %11295 }
 0x4f4   :  { %v991_v2 = vmul.f32 %v11296_v0, %v11288_v50 }
 0x4f7   :  { %v11298_v1 = vpop.eup %11297 }
 0x4f8   :  { %v992_v4 = vmul.f32 %v11298_v1, %v11292_v53  ;;  %v11300_v5 = vpop.eup %11299 }
 0x4f9   :  { %v993_v8 = vmul.f32 %v11300_v5, %v11290_v52 }
 0x4fa   :  { %v995_v6 = vpack.c.bf16 %v992_v4, %v991_v2 }
 0x4fb   :  { %v11302_v7 = vpop.eup %11301 }
 0x4fc   :  { %v994_v9 = vmul.f32 %v11302_v7, %v11294_v56  ;;  %10034 = vmatprep.mubr.msk.bf16.mxu1 %vm125_vm0, %v995_v6 }
 0x4fe   :  { %v996_v10 = vpack.c.bf16 %v994_v9, %v993_v8 }
 0x500   :  { %10035 = vmatmul.mubr.msk.bf16.vlgmr.msra.gmra.mrb[8].mxu1 %vm125_vm0, %v996_v10 }
 0x501   :  { %10047 = vmatpush3.bf16.msra.mxu1 %v11121_v58  ;;  %10050 = vmatprep.mubr.msk.bf16.mxu1 %vm125_vm0, %v11985_v23 }
 0x502   :  { %10048 = vmatprep.subr.bf16.mxu1 %v11122_v11 }
 0x505   :  { %10049 = vmatpush3.bf16.msra.mxu1 %v11122_v11 }
 0x508   :  { %10051 = vmatmul.mubr.msk.bf16.vlgmr.msra.gmra.mrb[12].mxu1 %vm125_vm0, %v11983_v22 }
 0x509   :  { %10066 = vmatprep.mubr.bf16.mxu1 %v1270_v26  ;;  %v11123_v26 = vld [vmem:[%s13873_s14 + $0x20] sm:$0xff]  }
 0x5d3   :  { %v12068_v12 = vpop.f32.mrb[8].mxu1 }
 0x5d4   :  { %v12070_v13 = vpop.f32.mrb[9].mxu1 }
 0x5d5   :  { %v12072_v14 = vpop.f32.mrb[10].mxu1 }
 0x5d6   :  { %v1055_v15 = vpack.c.bf16 %v12072_v14, %v12068_v12  ;;  %v12076_v18 = vpop.f32.mrb[11].mxu1  ;;  %v11167_v12 = vld [vmem:[%s13876_s17 + $0xa0] sm:$0xff]   ;;  %v11168_v14 = vld [vmem:[%s13876_s17 + $0xa8] sm:$0xff]  }
 0x5d7   :  { %v1054_v27 = vpack.c.bf16 %v12076_v18, %v12070_v13  ;;  %v11160_v13 = vld [vmem:[%s13876_s17 + $0x28] sm:$0xff]   ;;  %v11161_v18 = vld [vmem:[%s13876_s17 + $0x30] sm:$0xff]  }
 0x5db   :  { %v10052_v30 = vpop.f32.mrb[12].mxu1 }
 0x5dc   :  { %v1189_v31 = vpop.f32.mrb[13].mxu1 }
 0x5dd   :  { %v10053_v32 = vpop.f32.mrb[14].mxu1 }
 0x5de   :  { %v1273_v34 = vpack.c.bf16 %v10053_v32, %v10052_v30  ;;  %v1192_v19 = vpop.f32.mrb[15].mxu1 }
 0x5df   :  { %v1272_v25 = vpack.c.bf16 %v1192_v19, %v1189_v31 }
 0x5e1   :  { %10062 = vmatprep.subr.bf16.mxu1 %v1272_v25 }
 0x5e2   :  { %10063 = vmatpush3.bf16.xpose.msra.mxu1 %v1272_v25 }
 0x5e3   :  { %10064 = vmatprep.subr.bf16.mxu1 %v1273_v34 }
 0x5ea   :  { %10065 = vmatpush3.bf16.xpose.msra.mxu1 %v1273_v34 }
 0x5eb   :  { %10118 = vmatprep.subr.bf16.mxu1 %v11123_v26 }
 0x5f1   :  { %10067 = vmatmul.mubr.bf16.vlgmr.msra.gmra.mrb[16].mxu1 %v1271_v24 }
 0x5f2   :  { %10119 = vmatpush3.bf16.msra.mxu1 %v11123_v26  ;;  %10122 = vmatprep.mubr.msk.bf16.mxu1 %vm125_vm0, %v11985_v23 }
 0x5f3   :  { %10120 = vmatprep.subr.bf16.mxu1 %v11124_v35 }
 0x5f6   :  { %10121 = vmatpush3.bf16.msra.mxu1 %v11124_v35 }
 0x5f7   :  { %10126 = vmatprep.subr.bf16.mxu1 %v11125_v36 }
 0x5f9   :  { %10123 = vmatmul.mubr.msk.bf16.vlgmr.msra.gmra.mrb[20].mxu1 %vm125_vm0, %v11983_v22 }
 0x5fa   :  { %10127 = vmatpush3.bf16.msra.mxu1 %v11125_v36  ;;  %10130 = vmatprep.mubr.msk.bf16.mxu1 %vm125_vm0, %v11985_v23 }
 0x5fb   :  { %10128 = vmatprep.subr.bf16.mxu1 %v11126_v37 }
 0x5fe   :  { %10129 = vmatpush3.bf16.msra.mxu1 %v11126_v37 }
 0x5ff   :  { %10134 = vmatprep.subr.bf16.mxu1 %v11127_v17 }
 0x601   :  { %10131 = vmatmul.mubr.msk.bf16.vlgmr.msra.gmra.mrb[24].mxu1 %vm125_vm0, %v11983_v22 }
 0x602   :  { %10135 = vmatpush3.bf16.msra.mxu1 %v11127_v17  ;;  %10138 = vmatprep.mubr.msk.bf16.mxu1 %vm125_vm0, %v11985_v23 }
 0x603   :  { %10136 = vmatprep.subr.bf16.mxu1 %v11128_v20 }
 0x606   :  { %10137 = vmatpush3.bf16.msra.mxu1 %v11128_v20 }
 0x609   :  { %10139 = vmatmul.mubr.msk.bf16.vlgmr.msra.gmra.mrb[28].mxu1 %vm125_vm0, %v11983_v22 }
 0x6c4   :  { %v12113_v24 = vpop.f32.mrb[16].mxu1 }
 0x6c5   :  { %v12115_v38 = vpop.f32.mrb[17].mxu1 }
 0x6c6   :  { %v12117_v39 = vpop.f32.mrb[18].mxu1 }
 0x6c7   :  { %v12119_v40 = vpop.f32.mrb[19].mxu1 }
 0x6cc   :  { %v10124_v41 = vpop.f32.mrb[20].mxu1 }
 0x6cd   :  { %v1694_v44 = vpop.f32.mrb[21].mxu1 }
 0x6ce   :  { %v10125_v45 = vpop.f32.mrb[22].mxu1 }
 0x6cf   :  { %v1842_v46 = vpack.c.bf16 %v10125_v45, %v10124_v41  ;;  %v1697_v47 = vpop.f32.mrb[23].mxu1 }
 0x6d0   :  { %v1841_v48 = vpack.c.bf16 %v1697_v47, %v1694_v44 }
 0x6d2   :  { %10146 = vmatprep.mubr.bf16.mxu1 %v1841_v48 }
 0x6d4   :  { %v10132_v49 = vpop.f32.mrb[24].mxu1 }
 0x6d5   :  { %v1760_v50 = vpop.f32.mrb[25].mxu1 }
 0x6d6   :  { %v10133_v51 = vpop.f32.mrb[26].mxu1 }
 0x6d7   :  { %v1844_v52 = vpack.c.bf16 %v10133_v51, %v10132_v49  ;;  %v1763_v53 = vpop.f32.mrb[27].mxu1 }
 0x6d8   :  { %v1843_v54 = vpack.c.bf16 %v1763_v53, %v1760_v50  ;;  %v11129_v50 = vld [vmem:[%s13873_s14 + $0x30] sm:$0xff]  }
 0x6da   :  { %10142 = vmatprep.subr.bf16.mxu1 %v1843_v54 }
 0x6db   :  { %10143 = vmatpush3.bf16.xpose.msra.mxu1 %v1843_v54 }
 0x6dc   :  { %v10140_v55 = vpop.f32.mrb[28].mxu1  ;;  %10144 = vmatprep.subr.bf16.mxu1 %v1844_v52 }
 0x6dd   :  { %v1826_v56 = vpop.f32.mrb[29].mxu1 }
 0x6de   :  { %v10141_v57 = vpop.f32.mrb[30].mxu1 }
 0x6df   :  { %v1945_v58 = vpack.c.bf16 %v10141_v57, %v10140_v55  ;;  %v1829_v59 = vpop.f32.mrb[31].mxu1 }
 0x6e0   :  { %v1944_v60 = vpack.c.bf16 %v1829_v59, %v1826_v56 }
 0x6e3   :  { %10145 = vmatpush3.bf16.xpose.msra.mxu1 %v1844_v52 }
 0x6e4   :  { %10150 = vmatprep.subr.bf16.mxu1 %v1944_v60 }
 0x6ea   :  { %10147 = vmatmul.mubr.bf16.vlgmr.msra.gmra.mrb[32].mxu1 %v1842_v46 }
 0x6eb   :  { %10151 = vmatpush3.bf16.msra.mxu1 %v1944_v60 }
 0x6ec   :  { %10152 = vmatprep.subr.bf16.mxu1 %v1945_v58 }
 0x6ef   :  { %10153 = vmatpush3.bf16.msra.mxu1 %v1945_v58 }
 0x6f0   :  { %10178 = vmatprep.subr.bf16.mxu1 %v11129_v50 }
 0x7bd   :  { %v10148_v61 = vpop.f32.mrb[32].mxu1 }
 0x7be   :  { %v1879_v63 = vpop.f32.mrb[33].mxu1  ;;  %v1896_v4 = vmul.f32 0.5, %v10148_v61 }
 0x7bf   :  { %v1894_v0 = vmul.f32 0.5, %v1879_v63  ;;  %v10149_v1 = vpop.f32.mrb[34].mxu1 }
 0x7c0   :  { %v1882_v2 = vpop.f32.mrb[35].mxu1  ;;  %v1897_v7 = vmul.f32 0.5, %v10149_v1  ;;  %v1904_v9 = vsel %vm125_vm0, %v1896_v4, -inf }
 0x7c1   :  { %v1895_v5 = vmul.f32 0.5, %v1882_v2  ;;  %v1898_v6 = vsel %vm125_vm0, %v1894_v0, -inf  ;;  %v11130_v2 = vld [vmem:[%s13873_s14 + $0x38] sm:$0xff]  }
 0x7c2   :  { %1899 = vmax.xlane.f32.xlu0 %v1898_v6  ;;  %v1907_v10 = vsel %vm125_vm0, %v1897_v7, -inf  ;;  %v11133_v6 = vld [vmem:[%s13875_s16 + $0x30] sm:$0xff]  }
 0x7c3   :  { %v1901_v8 = vsel %vm125_vm0, %v1895_v5, -inf }
 0x7c4   :  { %1902 = vmax.xlane.f32.xlu1 %v1901_v8 }
 0x7c6   :  { %1905 = vmax.xlane.f32.xlu0 %v1904_v9 }
 0x7c8   :  { %1908 = vmax.xlane.f32.xlu1 %v1907_v10 }
 0x84f   :  { %v1900_v11 = vpop.xlane.xlu0 %1899 }
 0x850   :  { %v1910_v30 = vsub.f32 %v1894_v0, %v1900_v11 }
 0x851   :  { %v1903_v31 = vpop.xlane.xlu1 %1902 }
 0x852   :  { %v1914_v32 = vmul.f32 1.442695, %v1910_v30  ;;  %v1911_v34 = vsub.f32 %v1895_v5, %v1903_v31  ;;  %v11132_v5 = vld [vmem:[%s13874_s15 + $0x38] sm:$0xff]  }
 0x853   :  { %v1906_v19 = vpop.xlane.xlu0 %1905 }
 0x854   :  { %11303 = vpow2.f32 %v1914_v32  ;;  %v1916_v25 = vmul.f32 1.442695, %v1911_v34  ;;  %v1912_v26 = vsub.f32 %v1896_v4, %v1906_v19  ;;  %v11131_v4 = vld [vmem:[%s13874_s15 + $0x30] sm:$0xff]  }
 0x855   :  { %v1909_v35 = vpop.xlane.xlu1 %1908 }
 0x856   :  { %11305 = vpow2.f32 %v1916_v25  ;;  %v1918_v36 = vmul.f32 1.442695, %v1912_v26  ;;  %v1913_v37 = vsub.f32 %v1897_v7, %v1909_v35  ;;  %v11134_v7 = vld [vmem:[%s13875_s16 + $0x38] sm:$0xff]  }
 0x858   :  { %11307 = vpow2.f32 %v1918_v36  ;;  %v1920_v17 = vmul.f32 1.442695, %v1913_v37 }
 0x85a   :  { %11309 = vpow2.f32 %v1920_v17 }
 0x85e   :  { %v11304_v20 = vpop.eup %11303 }
 0x85f   :  { %v1922_v41 = vsel %vm125_vm0, %v11304_v20, 0.0 }
 0x860   :  { %v11306_v44 = vpop.eup %11305  ;;  %1923 = vadd.xlane.f32.xlu0 %v1922_v41 }
 0x861   :  { %v1925_v45 = vsel %vm125_vm0, %v11306_v44, 0.0 }
 0x862   :  { %v11308_v46 = vpop.eup %11307  ;;  %1926 = vadd.xlane.f32.xlu1 %v1925_v45 }
 0x863   :  { %v1928_v47 = vsel %vm125_vm0, %v11308_v46, 0.0 }
 0x864   :  { %v11310_v48 = vpop.eup %11309  ;;  %1929 = vadd.xlane.f32.xlu0 %v1928_v47 }
 0x865   :  { %v1931_v49 = vsel %vm125_vm0, %v11310_v48, 0.0 }
 0x866   :  { %1932 = vadd.xlane.f32.xlu1 %v1931_v49 }
 0x8ed   :  { %v1924_v51 = vpop.xlane.xlu0 %1923 }
 0x8ee   :  { %11311 = vrcp.f32 %v1924_v51 }
 0x8ef   :  { %v1927_v52 = vpop.xlane.xlu1 %1926 }
 0x8f0   :  { %11313 = vrcp.f32 %v1927_v52 }
 0x8f1   :  { %v1930_v53 = vpop.xlane.xlu0 %1929 }
 0x8f2   :  { %11315 = vrcp.f32 %v1930_v53 }
 0x8f3   :  { %v1933_v54 = vpop.xlane.xlu1 %1932 }
 0x8f4   :  { %11317 = vrcp.f32 %v1933_v54 }
 0x8f8   :  { %v11312_v55 = vpop.eup %11311 }
 0x8f9   :  { %v1938_v57 = vmul.f32 %v11312_v55, %v11304_v20 }
 0x8fa   :  { %v11314_v56 = vpop.eup %11313 }
 0x8fb   :  { %v1939_v58 = vmul.f32 %v11314_v56, %v11306_v44 }
 0x8fc   :  { %v11316_v59 = vpop.eup %11315 }
 0x8fd   :  { %v1942_v60 = vpack.c.bf16 %v1939_v58, %v1938_v57  ;;  %v1940_v63 = vmul.f32 %v11316_v59, %v11308_v46 }
 0x8fe   :  { %v11318_v61 = vpop.eup %11317 }
 0x8ff   :  { %v1941_v0 = vmul.f32 %v11318_v61, %v11310_v48  ;;  %10154 = vmatprep.mubr.msk.bf16.mxu1 %vm125_vm0, %v1942_v60 }
 0x901   :  { %v1943_v1 = vpack.c.bf16 %v1941_v0, %v1940_v63 }
 0x903   :  { %10155 = vmatmul.mubr.msk.bf16.vlgmr.msra.gmra.mrb[36].mxu1 %vm125_vm0, %v1943_v1 }
 0x904   :  { %10179 = vmatpush3.bf16.msra.mxu1 %v11129_v50  ;;  %10182 = vmatprep.mubr.msk.bf16.mxu1 %vm125_vm0, %v11985_v23 }
 0x905   :  { %10180 = vmatprep.subr.bf16.mxu1 %v11130_v2 }
 0x908   :  { %10181 = vmatpush3.bf16.msra.mxu1 %v11130_v2 }
 0x909   :  { %10186 = vmatprep.subr.bf16.mxu1 %v11131_v4 }
 0x90b   :  { %10183 = vmatmul.mubr.msk.bf16.vlgmr.msra.gmra.mrb[40].mxu1 %vm125_vm0, %v11983_v22 }
 0x90c   :  { %10187 = vmatpush3.bf16.msra.mxu1 %v11131_v4  ;;  %10190 = vmatprep.mubr.msk.bf16.mxu1 %vm125_vm0, %v11985_v23 }
 0x90d   :  { %10188 = vmatprep.subr.bf16.mxu1 %v11132_v5 }
 0x910   :  { %10189 = vmatpush3.bf16.msra.mxu1 %v11132_v5 }
 0x911   :  { %10194 = vmatprep.subr.bf16.mxu1 %v11133_v6 }
 0x913   :  { %10191 = vmatmul.mubr.msk.bf16.vlgmr.msra.gmra.mrb[44].mxu1 %vm125_vm0, %v11983_v22 }
 0x914   :  { %10195 = vmatpush3.bf16.msra.mxu1 %v11133_v6  ;;  %10198 = vmatprep.mubr.msk.bf16.mxu1 %vm125_vm0, %v11985_v23 }
 0x915   :  { %10196 = vmatprep.subr.bf16.mxu1 %v11134_v7 }
 0x918   :  { %10197 = vmatpush3.bf16.msra.mxu1 %v11134_v7 }
 0x91b   :  { %10199 = vmatmul.mubr.msk.bf16.vlgmr.msra.gmra.mrb[48].mxu1 %vm125_vm0, %v11983_v22 }
 0x9d6   :  { %v12161_v8 = vpop.f32.mrb[36].mxu1 }
 0x9d7   :  { %v12163_v9 = vpop.f32.mrb[37].mxu1 }
 0x9d8   :  { %v12165_v10 = vpop.f32.mrb[38].mxu1 }
 0x9d9   :  { %v2002_v11 = vpack.c.bf16 %v12165_v10, %v12161_v8  ;;  %v12169_v30 = vpop.f32.mrb[39].mxu1  ;;  %v11175_v8 = vld [vmem:[%s13876_s17 + $0xe0] sm:$0xff]  }
 0x9da   :  { %v2001_v31 = vpack.c.bf16 %v12169_v30, %v12163_v9  ;;  %v11170_v9 = vld [vmem:[%s13876_s17 + $0xb8] sm:$0xff]   ;;  %v11171_v30 = vld [vmem:[%s13876_s17 + $0xc0] sm:$0xff]  }
 0x9de   :  { %v10184_v32 = vpop.f32.mrb[40].mxu1 }
 0x9df   :  { %v2172_v34 = vpop.f32.mrb[41].mxu1 }
 0x9e0   :  { %v10185_v19 = vpop.f32.mrb[42].mxu1 }
 0x9e1   :  { %v2320_v25 = vpack.c.bf16 %v10185_v19, %v10184_v32  ;;  %v2175_v26 = vpop.f32.mrb[43].mxu1 }
 0x9e2   :  { %v2319_v35 = vpack.c.bf16 %v2175_v26, %v2172_v34 }
 0x9e4   :  { %10206 = vmatprep.mubr.bf16.mxu1 %v2319_v35 }
 0x9e6   :  { %v10192_v36 = vpop.f32.mrb[44].mxu1 }
 0x9e7   :  { %v2238_v37 = vpop.f32.mrb[45].mxu1 }
 0x9e8   :  { %v10193_v17 = vpop.f32.mrb[46].mxu1 }
 0x9e9   :  { %v2322_v20 = vpack.c.bf16 %v10193_v17, %v10192_v36  ;;  %v2241_v41 = vpop.f32.mrb[47].mxu1 }
 0x9ea   :  { %v2321_v44 = vpack.c.bf16 %v2241_v41, %v2238_v37 }
 0x9ec   :  { %10202 = vmatprep.subr.bf16.mxu1 %v2321_v44 }
 0x9ed   :  { %10203 = vmatpush3.bf16.xpose.msra.mxu1 %v2321_v44  ;;  %v1323_v44 = vmul.f32 0.5, %v12115_v38 }
 0x9ee   :  { %v10200_v45 = vpop.f32.mrb[48].mxu1  ;;  %10204 = vmatprep.subr.bf16.mxu1 %v2322_v20 }
 0x9ef   :  { %v2304_v46 = vpop.f32.mrb[49].mxu1 }
 0x9f0   :  { %v10201_v47 = vpop.f32.mrb[50].mxu1 }
 0x9f1   :  { %v2423_v48 = vpack.c.bf16 %v10201_v47, %v10200_v45  ;;  %v2307_v49 = vpop.f32.mrb[51].mxu1  ;;  %v1324_v47 = vmul.f32 0.5, %v12119_v40  ;;  %v11135_v40 = vld [vmem:[%s13873_s14 + $0x40] sm:$0xff]  }
 0x9f2   :  { %v2422_v50 = vpack.c.bf16 %v2307_v49, %v2304_v46  ;;  %v1325_v49 = vmul.f32 0.5, %v12113_v24 }
 0x9f5   :  { %10205 = vmatpush3.bf16.xpose.msra.mxu1 %v2322_v20 }
 0x9f6   :  { %10210 = vmatprep.subr.bf16.mxu1 %v2422_v50 }
 0x9fc   :  { %10207 = vmatmul.mubr.bf16.vlgmr.msra.gmra.mrb[52].mxu1 %v2320_v25 }
 0x9fd   :  { %10211 = vmatpush3.bf16.msra.mxu1 %v2422_v50  ;;  %v1330_v50 = vsel %vm125_vm0, %v1324_v47, -inf }
 0x9fe   :  { %10212 = vmatprep.subr.bf16.mxu1 %v2423_v48 }
 0xa01   :  { %10213 = vmatpush3.bf16.msra.mxu1 %v2423_v48  ;;  %v1327_v48 = vsel %vm125_vm0, %v1323_v44, -inf }
 0xa02   :  { %10238 = vmatprep.subr.bf16.mxu1 %v11135_v40 }
 0xacf   :  { %v10208_v51 = vpop.f32.mrb[52].mxu1 }
 0xad0   :  { %v2357_v52 = vpop.f32.mrb[53].mxu1  ;;  %v2374_v56 = vmul.f32 0.5, %v10208_v51  ;;  %v1326_v51 = vmul.f32 0.5, %v12117_v39 }
 0xad1   :  { %v2372_v53 = vmul.f32 0.5, %v2357_v52  ;;  %v10209_v54 = vpop.f32.mrb[54].mxu1  ;;  %v1333_v52 = vsel %vm125_vm0, %v1325_v49, -inf }
 0xad2   :  { %v2360_v55 = vpop.f32.mrb[55].mxu1  ;;  %v2375_v59 = vmul.f32 0.5, %v10209_v54  ;;  %v2382_v61 = vsel %vm125_vm0, %v2374_v56, -inf  ;;  %v1336_v38 = vsel %vm125_vm0, %v1326_v51, -inf }
 0xad3   :  { %v2373_v57 = vmul.f32 0.5, %v2360_v55  ;;  %v2376_v58 = vsel %vm125_vm0, %v2372_v53, -inf }
 0xad4   :  { %2377 = vmax.xlane.f32.xlu0 %v2376_v58  ;;  %v2385_v63 = vsel %vm125_vm0, %v2375_v59, -inf }
 0xad5   :  { %v2379_v60 = vsel %vm125_vm0, %v2373_v57, -inf }
 0xad6   :  { %2380 = vmax.xlane.f32.xlu1 %v2379_v60 }
 0xad8   :  { %2383 = vmax.xlane.f32.xlu0 %v2382_v61 }
 0xada   :  { %2386 = vmax.xlane.f32.xlu1 %v2385_v63 }
 0xb61   :  { %v2378_v0 = vpop.xlane.xlu0 %2377 }
 0xb62   :  { %v2388_v1 = vsub.f32 %v2372_v53, %v2378_v0 }
 0xb63   :  { %v2381_v2 = vpop.xlane.xlu1 %2380 }
 0xb64   :  { %v2392_v4 = vmul.f32 1.442695, %v2388_v1  ;;  %v2389_v5 = vsub.f32 %v2373_v57, %v2381_v2 }
 0xb65   :  { %v2384_v6 = vpop.xlane.xlu0 %2383 }
 0xb66   :  { %11319 = vpow2.f32 %v2392_v4  ;;  %v2394_v7 = vmul.f32 1.442695, %v2389_v5  ;;  %v2390_v32 = vsub.f32 %v2374_v56, %v2384_v6 }
 0xb67   :  { %v2387_v34 = vpop.xlane.xlu1 %2386 }
 0xb68   :  { %11321 = vpow2.f32 %v2394_v7  ;;  %v2396_v19 = vmul.f32 1.442695, %v2390_v32  ;;  %v2391_v25 = vsub.f32 %v2375_v59, %v2387_v34 }
 0xb6a   :  { %11323 = vpow2.f32 %v2396_v19  ;;  %v2398_v26 = vmul.f32 1.442695, %v2391_v25 }
 0xb6c   :  { %11325 = vpow2.f32 %v2398_v26 }
 0xb70   :  { %v11320_v35 = vpop.eup %11319 }
 0xb71   :  { %v2400_v36 = vsel %vm125_vm0, %v11320_v35, 0.0 }
 0xb72   :  { %v11322_v37 = vpop.eup %11321  ;;  %2401 = vadd.xlane.f32.xlu0 %v2400_v36 }
 0xb73   :  { %v2403_v17 = vsel %vm125_vm0, %v11322_v37, 0.0 }
 0xb74   :  { %v11324_v20 = vpop.eup %11323  ;;  %2404 = vadd.xlane.f32.xlu1 %v2403_v17 }
 0xb75   :  { %v2406_v41 = vsel %vm125_vm0, %v11324_v20, 0.0 }
 0xb76   :  { %v11326_v45 = vpop.eup %11325  ;;  %2407 = vadd.xlane.f32.xlu0 %v2406_v41  ;;  %v11136_v41 = vld [vmem:[%s13873_s14 + $0x48] sm:$0xff]  }
 0xb77   :  { %v2409_v46 = vsel %vm125_vm0, %v11326_v45, 0.0 }
 0xb78   :  { %2410 = vadd.xlane.f32.xlu1 %v2409_v46 }
 0xb7a   :  { %1328 = vmax.xlane.f32.xlu0 %v1327_v48  ;;  %v11138_v48 = vld [vmem:[%s13874_s15 + $0x48] sm:$0xff]  }
 0xb7c   :  { %1331 = vmax.xlane.f32.xlu1 %v1330_v50 }
 0xb7e   :  { %1334 = vmax.xlane.f32.xlu0 %v1333_v52  ;;  %v11140_v52 = vld [vmem:[%s13875_s16 + $0x48] sm:$0xff]  }
 0xb80   :  { %1337 = vmax.xlane.f32.xlu1 %v1336_v38 }
 0xbff   :  { %v2402_v53 = vpop.xlane.xlu0 %2401 }
 0xc00   :  { %11327 = vrcp.f32 %v2402_v53 }
 0xc01   :  { %v2405_v24 = vpop.xlane.xlu1 %2404 }
 0xc02   :  { %11329 = vrcp.f32 %v2405_v24 }
 0xc03   :  { %v2408_v54 = vpop.xlane.xlu0 %2407 }
 0xc04   :  { %11331 = vrcp.f32 %v2408_v54 }
 0xc05   :  { %v2411_v55 = vpop.xlane.xlu1 %2410 }
 0xc06   :  { %11333 = vrcp.f32 %v2411_v55 }
 0xc07   :  { %v1329_v39 = vpop.xlane.xlu0 %1328 }
 0xc08   :  { %v1339_v56 = vsub.f32 %v1323_v44, %v1329_v39 }
 0xc09   :  { %v1332_v57 = vpop.xlane.xlu1 %1331 }
 0xc0a   :  { %v11328_v58 = vpop.eup %11327  ;;  %v1343_v59 = vmul.f32 1.442695, %v1339_v56  ;;  %v1340_v60 = vsub.f32 %v1324_v47, %v1332_v57 }
 0xc0b   :  { %v1335_v61 = vpop.xlane.xlu0 %1334  ;;  %v2416_v4 = vmul.f32 %v11328_v58, %v11320_v35 }
 0xc0c   :  { %v11330_v63 = vpop.eup %11329  ;;  %11335 = vpow2.f32 %v1343_v59  ;;  %v1345_v0 = vmul.f32 1.442695, %v1340_v60  ;;  %v1341_v1 = vsub.f32 %v1325_v49, %v1335_v61 }
 0xc0d   :  { %v1338_v2 = vpop.xlane.xlu1 %1337  ;;  %v2417_v5 = vmul.f32 %v11330_v63, %v11322_v37 }
 0xc0e   :  { %v11332_v6 = vpop.eup %11331  ;;  %11337 = vpow2.f32 %v1345_v0  ;;  %v1347_v7 = vmul.f32 1.442695, %v1341_v1  ;;  %v1342_v32 = vsub.f32 %v1326_v51, %v1338_v2  ;;  %v11139_v51 = vld [vmem:[%s13875_s16 + $0x40] sm:$0xff]   ;;  %v11148_v1 = vld [vmem:[%s13876_s17 + $0x48] sm:$0xff]   ;;  %v11149_v2 = vld [vmem:[%s13876_s17 + $0x50] sm:$0xff]  }
 0xc0f   :  { %v2420_v34 = vpack.c.bf16 %v2417_v5, %v2416_v4  ;;  %v2418_v26 = vmul.f32 %v11332_v6, %v11324_v20  ;;  %v11137_v20 = vld [vmem:[%s13874_s15 + $0x40] sm:$0xff]   ;;  %v11150_v4 = vld [vmem:[%s13876_s17 + $0x58] sm:$0xff]   ;;  %v11152_v6 = vld [vmem:[%s13876_s17 + $0x68] sm:$0xff]  }
 0xc10   :  { %v11334_v19 = vpop.eup %11333  ;;  %11339 = vpow2.f32 %v1347_v7  ;;  %v1349_v25 = vmul.f32 1.442695, %v1342_v32  ;;  %v11151_v5 = vld [vmem:[%s13876_s17 + $0x60] sm:$0xff]   ;;  %v11153_v7 = vld [vmem:[%s13876_s17 + $0x70] sm:$0xff]  }
 0xc11   :  { %v2419_v36 = vmul.f32 %v11334_v19, %v11326_v45  ;;  %10214 = vmatprep.mubr.msk.bf16.mxu1 %vm125_vm0, %v2420_v34 }
 0xc12   :  { %11341 = vpow2.f32 %v1349_v25 }
 0xc13   :  { %v2421_v17 = vpack.c.bf16 %v2419_v36, %v2418_v26 }
 0xc15   :  { %10215 = vmatmul.mubr.msk.bf16.vlgmr.msra.gmra.mrb[56].mxu1 %vm125_vm0, %v2421_v17 }
 0xc16   :  { %v11336_v35 = vpop.eup %11335  ;;  %10239 = vmatpush3.bf16.msra.mxu1 %v11135_v40  ;;  %10242 = vmatprep.mubr.msk.bf16.mxu1 %vm125_vm0, %v11985_v23  ;;  %v11147_v40 = vld [vmem:[%s13876_s17 + $0x40] sm:$0xff]  }
 0xc17   :  { %v1351_v37 = vsel %vm125_vm0, %v11336_v35, 0.0  ;;  %10240 = vmatprep.subr.bf16.mxu1 %v11136_v41  ;;  %10078 = vmatprep.subr.bf16.mxu0 %v11147_v40 }
 0xc18   :  { %v11338_v44 = vpop.eup %11337  ;;  %1352 = vadd.xlane.f32.xlu0 %v1351_v37 }
 0xc19   :  { %v1354_v45 = vsel %vm125_vm0, %v11338_v44, 0.0 }
 0xc1a   :  { %v11340_v46 = vpop.eup %11339  ;;  %10241 = vmatpush3.bf16.msra.mxu1 %v11136_v41  ;;  %1355 = vadd.xlane.f32.xlu1 %v1354_v45 }
 0xc1b   :  { %v1357_v47 = vsel %vm125_vm0, %v11340_v46, 0.0  ;;  %10246 = vmatprep.subr.bf16.mxu1 %v11137_v20 }
 0xc1c   :  { %v11342_v49 = vpop.eup %11341  ;;  %1358 = vadd.xlane.f32.xlu0 %v1357_v47 }
 0xc1d   :  { %10243 = vmatmul.mubr.msk.bf16.vlgmr.msra.gmra.mrb[60].mxu1 %vm125_vm0, %v11983_v22  ;;  %v1360_v50 = vsel %vm125_vm0, %v11342_v49, 0.0 }
 0xc1e   :  { %10247 = vmatpush3.bf16.msra.mxu1 %v11137_v20  ;;  %10250 = vmatprep.mubr.msk.bf16.mxu1 %vm125_vm0, %v11985_v23 }
 0xc1f   :  { %1361 = vadd.xlane.f32.xlu1 %v1360_v50  ;;  %10248 = vmatprep.subr.bf16.mxu1 %v11138_v48 }
 0xc22   :  { %10249 = vmatpush3.bf16.msra.mxu1 %v11138_v48 }
 0xc23   :  { %10254 = vmatprep.subr.bf16.mxu1 %v11139_v51 }
 0xc25   :  { %10251 = vmatmul.mubr.msk.bf16.vlgmr.msra.gmra.mrb[64].mxu1 %vm125_vm0, %v11983_v22 }
 0xc26   :  { %10255 = vmatpush3.bf16.msra.mxu1 %v11139_v51  ;;  %10258 = vmatprep.mubr.msk.bf16.mxu1 %vm125_vm0, %v11985_v23 }
 0xc27   :  { %10256 = vmatprep.subr.bf16.mxu1 %v11140_v52 }
 0xc2a   :  { %10257 = vmatpush3.bf16.msra.mxu1 %v11140_v52 }
 0xc2d   :  { %10259 = vmatmul.mubr.msk.bf16.vlgmr.msra.gmra.mrb[68].mxu1 %vm125_vm0, %v11983_v22 }
 0xca5   :  { %v1353_v38 = vpop.xlane.xlu0 %1352 }
 0xca6   :  { %11343 = vrcp.f32 %v1353_v38 }
 0xca7   :  { %v1356_v53 = vpop.xlane.xlu1 %1355 }
 0xca8   :  { %11345 = vrcp.f32 %v1356_v53 }
 0xca9   :  { %v1359_v24 = vpop.xlane.xlu0 %1358 }
 0xcaa   :  { %11347 = vrcp.f32 %v1359_v24 }
 0xcac   :  { %v1362_v54 = vpop.xlane.xlu1 %1361 }
 0xcad   :  { %11349 = vrcp.f32 %v1362_v54  ;;  %v11141_v54 = vld [vmem:[%s13873_s14 + $0x50] sm:$0xff]  }
 0xcb0   :  { %v11344_v55 = vpop.eup %11343 }
 0xcb1   :  { %v1367_v56 = vmul.f32 %v11344_v55, %v11336_v35  ;;  %v11142_v55 = vld [vmem:[%s13873_s14 + $0x58] sm:$0xff]  }
 0xcb2   :  { %v11346_v39 = vpop.eup %11345 }
 0xcb3   :  { %v1368_v57 = vmul.f32 %v11346_v39, %v11338_v44  ;;  %v11154_v39 = vld [vmem:[%s13876_s17 + $0x78] sm:$0xff]  }
 0xcb4   :  { %v11348_v58 = vpop.eup %11347 }
 0xcb5   :  { %v1371_v59 = vpack.c.bf16 %v1368_v57, %v1367_v56  ;;  %v1369_v61 = vmul.f32 %v11348_v58, %v11340_v46  ;;  %v11143_v56 = vld [vmem:[%s13874_s15 + $0x50] sm:$0xff]   ;;  %v11155_v57 = vld [vmem:[%s13876_s17] sm:$0xff]   ;;  %v11144_v58 = vld [vmem:[%s13874_s15 + $0x58] sm:$0xff]  }
 0xcb7   :  { %v11350_v60 = vpop.eup %11349  ;;  %10074 = vmatprep.mubr.msk.bf16.mxu0 %vm125_vm0, %v1371_v59  ;;  %v11145_v59 = vld [vmem:[%s13875_s16 + $0x50] sm:$0xff]  }
 0xcb8   :  { %v1370_v63 = vmul.f32 %v11350_v60, %v11342_v49  ;;  %v11146_v60 = vld [vmem:[%s13875_s16 + $0x58] sm:$0xff]  }
 0xcba   :  { %v1372_v0 = vpack.c.bf16 %v1370_v63, %v1369_v61 }
 0xcbc   :  { %10075 = vmatmul.mubr.msk.bf16.vlgmr.msra.gmra.mrb[44].mxu0 %vm125_vm0, %v1372_v0 }
 0xcbd   :  { %10079 = vmatpush3.bf16.msra.mxu0 %v11147_v40 }
 0xcbe   :  { %10080 = vmatprep.subr.bf16.mxu0 %v11148_v1 }
 0xcc1   :  { %10081 = vmatpush3.bf16.msra.mxu0 %v11148_v1 }
 0xcc2   :  { %10082 = vmatprep.subr.bf16.mxu0 %v11149_v2 }
 0xcc5   :  { %10083 = vmatpush3.bf16.msra.mxu0 %v11149_v2 }
 0xcc6   :  { %10084 = vmatprep.subr.bf16.mxu0 %v11150_v4 }
 0xcc9   :  { %10085 = vmatpush3.bf16.msra.mxu0 %v11150_v4 }
 0xcca   :  { %10086 = vmatprep.subr.bf16.mxu0 %v11151_v5 }
 0xccd   :  { %10087 = vmatpush3.bf16.msra.mxu0 %v11151_v5  ;;  %v11156_v5 = vld [vmem:[%s13876_s17 + $0x8] sm:$0xff]  }
 0xcce   :  { %10088 = vmatprep.subr.bf16.mxu0 %v11152_v6 }
 0xcd1   :  { %10089 = vmatpush3.bf16.msra.mxu0 %v11152_v6  ;;  %v11157_v6 = vld [vmem:[%s13876_s17 + $0x10] sm:$0xff]  }
 0xcd2   :  { %10090 = vmatprep.subr.bf16.mxu0 %v11153_v7 }
 0xcd5   :  { %10091 = vmatpush3.bf16.msra.mxu0 %v11153_v7  ;;  %v11158_v7 = vld [vmem:[%s13876_s17 + $0x18] sm:$0xff]  }
 0xcd6   :  { %10092 = vmatprep.subr.bf16.mxu0 %v11154_v39 }
 0xcd9   :  { %10093 = vmatpush3.bf16.msra.mxu0 %v11154_v39 }
 0xcda   :  { %10098 = vmatprep.subr.bf16.mxu0 %v11155_v57 }
 0xce8   :  { %v12248_v32 = vpop.f32.mrb[56].mxu1 }
 0xce9   :  { %v12250_v34 = vpop.f32.mrb[57].mxu1 }
 0xcea   :  { %v12252_v19 = vpop.f32.mrb[58].mxu1 }
 0xceb   :  { %v2480_v25 = vpack.c.bf16 %v12252_v19, %v12248_v32  ;;  %v12256_v26 = vpop.f32.mrb[59].mxu1  ;;  %v11179_v32 = vld [vmem:[%s13873_s14 + $0x60] sm:$0xff]   ;;  %v11180_v19 = vld [vmem:[%s13873_s14 + $0x68] sm:$0xff]  }
 0xcec   :  { %v2479_v36 = vpack.c.bf16 %v12256_v26, %v12250_v34 }
 0xcf0   :  { %v10244_v17 = vpop.f32.mrb[60].mxu1 }
 0xcf1   :  { %v2650_v41 = vpop.f32.mrb[61].mxu1 }
 0xcf2   :  { %v10245_v35 = vpop.f32.mrb[62].mxu1 }
 0xcf3   :  { %v2798_v37 = vpack.c.bf16 %v10245_v35, %v10244_v17  ;;  %v2653_v20 = vpop.f32.mrb[63].mxu1  ;;  %v11159_v17 = vld [vmem:[%s13876_s17 + $0x20] sm:$0xff]   ;;  %v11164_v35 = vld [vmem:[%s13876_s17 + $0x88] sm:$0xff]  }
 0xcf4   :  { %v2797_v44 = vpack.c.bf16 %v2653_v20, %v2650_v41  ;;  %v11163_v41 = vld [vmem:[%s13876_s17 + $0x80] sm:$0xff]   ;;  %v11166_v20 = vld [vmem:[%s13876_s17 + $0x98] sm:$0xff]  }
 0xcf6   :  { %10266 = vmatprep.mubr.bf16.mxu1 %v2797_v44  ;;  %v11173_v44 = vld [vmem:[%s13876_s17 + $0xd0] sm:$0xff]  }
 0xcf8   :  { %v10252_v45 = vpop.f32.mrb[64].mxu1 }
 0xcf9   :  { %v2716_v46 = vpop.f32.mrb[65].mxu1 }
 0xcfa   :  { %v10253_v47 = vpop.f32.mrb[66].mxu1 }
 0xcfb   :  { %v2800_v48 = vpack.c.bf16 %v10253_v47, %v10252_v45  ;;  %v2719_v49 = vpop.f32.mrb[67].mxu1  ;;  %v11174_v45 = vld [vmem:[%s13876_s17 + $0xd8] sm:$0xff]  }
 0xcfc   :  { %v2799_v50 = vpack.c.bf16 %v2719_v49, %v2716_v46  ;;  %v11176_v46 = vld [vmem:[%s13876_s17 + $0xe8] sm:$0xff]  }
 0xcfe   :  { %10262 = vmatprep.subr.bf16.mxu1 %v2799_v50 }
 0xcff   :  { %10263 = vmatpush3.bf16.xpose.msra.mxu1 %v2799_v50 }
 0xd00   :  { %v10260_v51 = vpop.f32.mrb[68].mxu1  ;;  %10264 = vmatprep.subr.bf16.mxu1 %v2800_v48 }
 0xd01   :  { %v2782_v52 = vpop.f32.mrb[69].mxu1 }
 0xd02   :  { %v10261_v38 = vpop.f32.mrb[70].mxu1 }
 0xd03   :  { %v12260_v40 = vpack.c.bf16 %v10261_v38, %v10260_v51  ;;  %v2785_v53 = vpop.f32.mrb[71].mxu1 }
 0xd04   :  { %v12262_v24 = vpack.c.bf16 %v2785_v53, %v2782_v52  ;;  %v11177_v52 = vld [vmem:[%s13876_s17 + $0xf0] sm:$0xff]  }
 0xd07   :  { %10265 = vmatpush3.bf16.xpose.msra.mxu1 %v2800_v48 }
 0xd08   :  { %10298 = vmatprep.subr.bf16.mxu1 %v11141_v54 }
 0xd0e   :  { %10267 = vmatmul.mubr.bf16.vlgmr.msra.gmra.mrb[72].mxu1 %v2798_v37  ;;  %v11165_v37 = vld [vmem:[%s13876_s17 + $0x90] sm:$0xff]  }
 0xd0f   :  { %10299 = vmatpush3.bf16.msra.mxu1 %v11141_v54  ;;  %10302 = vmatprep.mubr.msk.bf16.mxu1 %vm125_vm0, %v11985_v23 }
 0xd10   :  { %10300 = vmatprep.subr.bf16.mxu1 %v11142_v55 }
 0xd13   :  { %10301 = vmatpush3.bf16.msra.mxu1 %v11142_v55 }
 0xd14   :  { %10306 = vmatprep.subr.bf16.mxu1 %v11143_v56 }
 0xd16   :  { %10303 = vmatmul.mubr.msk.bf16.vlgmr.msra.gmra.mrb[76].mxu1 %vm125_vm0, %v11983_v22 }
 0xd17   :  { %10307 = vmatpush3.bf16.msra.mxu1 %v11143_v56  ;;  %10310 = vmatprep.mubr.msk.bf16.mxu1 %vm125_vm0, %v11985_v23 }
 0xd18   :  { %10308 = vmatprep.subr.bf16.mxu1 %v11144_v58 }
 0xd1b   :  { %10309 = vmatpush3.bf16.msra.mxu1 %v11144_v58  ;;  %v11178_v58 = vld [vmem:[%s13876_s17 + $0xf8] sm:$0xff]  }
 0xd1c   :  { %10314 = vmatprep.subr.bf16.mxu1 %v11145_v59 }
 0xd1e   :  { %10311 = vmatmul.mubr.msk.bf16.vlgmr.msra.gmra.mrb[80].mxu1 %vm125_vm0, %v11983_v22 }
 0xd1f   :  { %10315 = vmatpush3.bf16.msra.mxu1 %v11145_v59  ;;  %10318 = vmatprep.mubr.msk.bf16.mxu1 %vm125_vm0, %v11985_v23 }
 0xd20   :  { %10316 = vmatprep.subr.bf16.mxu1 %v11146_v60 }
 0xd23   :  { %10317 = vmatpush3.bf16.msra.mxu1 %v11146_v60 }
 0xd26   :  { %10319 = vmatmul.mubr.msk.bf16.vlgmr.msra.gmra.mrb[84].mxu1 %vm125_vm0, %v11983_v22 }
 0xd8f   :  { %v10076_v61 = vpop.f32.mrb[44].mxu0 }
 0xd90   :  { %v1415_v63 = vpop.f32.mrb[45].mxu0 }
 0xd91   :  { %v10077_v0 = vpop.f32.mrb[46].mxu0 }
 0xd92   :  { %v1431_v1 = vpack.c.bf16 %v10077_v0, %v10076_v61  ;;  %v1418_v2 = vpop.f32.mrb[47].mxu0 }
 0xd93   :  { %v1430_v4 = vpack.c.bf16 %v1418_v2, %v1415_v63 }
 0xd95   :  { %10094 = vmatprep.mubr.bf16.mxu0 %v1430_v4 }
 0xd96   :  { %10095 = vmatmul.mubr.bf16.vlgmr.msra.gmra.mrb[48].mxu0 %v1431_v1 }
 0xd97   :  { %10099 = vmatpush3.bf16.msra.mxu0 %v11155_v57  ;;  %10114 = vmatprep.mubr.bf16.mxu0 %v1054_v27  ;;  %v11162_v27 = vld [vmem:[%s13876_s17 + $0x38] sm:$0xff]  }
 0xd98   :  { %10100 = vmatprep.subr.bf16.mxu0 %v11156_v5 }
 0xd9b   :  { %10101 = vmatpush3.bf16.msra.mxu0 %v11156_v5 }
 0xd9c   :  { %10102 = vmatprep.subr.bf16.mxu0 %v11157_v6 }
 0xd9f   :  { %10103 = vmatpush3.bf16.msra.mxu0 %v11157_v6 }
 0xda0   :  { %10104 = vmatprep.subr.bf16.mxu0 %v11158_v7 }
 0xda3   :  { %10105 = vmatpush3.bf16.msra.mxu0 %v11158_v7 }
 0xda4   :  { %10106 = vmatprep.subr.bf16.mxu0 %v11159_v17 }
 0xda7   :  { %10107 = vmatpush3.bf16.msra.mxu0 %v11159_v17 }
 0xda8   :  { %10108 = vmatprep.subr.bf16.mxu0 %v11160_v13 }
 0xdab   :  { %10109 = vmatpush3.bf16.msra.mxu0 %v11160_v13 }
 0xdac   :  { %10110 = vmatprep.subr.bf16.mxu0 %v11161_v18 }
 0xdaf   :  { %10111 = vmatpush3.bf16.msra.mxu0 %v11161_v18  ;;  %v11184_v18 = vld [vmem:[%s13875_s16 + $0x68] sm:$0xff]  }
 0xdb0   :  { %10112 = vmatprep.subr.bf16.mxu0 %v11162_v27 }
 0xdb3   :  { %10113 = vmatpush3.bf16.msra.mxu0 %v11162_v27 }
 0xdb4   :  { %10158 = vmatprep.subr.bf16.mxu0 %v11163_v41 }
 0xdb6   :  { %10115 = vmatmul.mubr.bf16.vlgmr.msra.gmra.mrb[48].mxu0 %v1055_v15  ;;  %v11169_v15 = vld [vmem:[%s13876_s17 + $0xb0] sm:$0xff]  }
 0xdb7   :  { %10159 = vmatpush3.bf16.msra.mxu0 %v11163_v41  ;;  %10174 = vmatprep.mubr.bf16.mxu0 %v2001_v31  ;;  %v11172_v31 = vld [vmem:[%s13876_s17 + $0xc8] sm:$0xff]  }
 0xdb8   :  { %10160 = vmatprep.subr.bf16.mxu0 %v11164_v35 }
 0xdbb   :  { %10161 = vmatpush3.bf16.msra.mxu0 %v11164_v35 }
 0xdbc   :  { %10162 = vmatprep.subr.bf16.mxu0 %v11165_v37 }
 0xdbf   :  { %10163 = vmatpush3.bf16.msra.mxu0 %v11165_v37 }
 0xdc0   :  { %10164 = vmatprep.subr.bf16.mxu0 %v11166_v20 }
 0xdc3   :  { %10165 = vmatpush3.bf16.msra.mxu0 %v11166_v20 }
 0xdc4   :  { %10166 = vmatprep.subr.bf16.mxu0 %v11167_v12 }
 0xdc7   :  { %10167 = vmatpush3.bf16.msra.mxu0 %v11167_v12 }
 0xdc8   :  { %10168 = vmatprep.subr.bf16.mxu0 %v11168_v14 }
 0xdcb   :  { %10169 = vmatpush3.bf16.msra.mxu0 %v11168_v14 }
 0xdcc   :  { %10170 = vmatprep.subr.bf16.mxu0 %v11169_v15 }
 0xdcf   :  { %10171 = vmatpush3.bf16.msra.mxu0 %v11169_v15 }
 0xdd0   :  { %10172 = vmatprep.subr.bf16.mxu0 %v11170_v9 }
 0xdd3   :  { %10173 = vmatpush3.bf16.msra.mxu0 %v11170_v9 }
 0xdd4   :  { %10218 = vmatprep.subr.bf16.mxu0 %v11171_v30 }
 0xdd6   :  { %10175 = vmatmul.mubr.bf16.vlgmr.msra.gmra.mrb[48].mxu0 %v2002_v11 }
 0xdd7   :  { %10219 = vmatpush3.bf16.msra.mxu0 %v11171_v30  ;;  %10234 = vmatprep.mubr.bf16.mxu0 %v2479_v36 }
 0xdd8   :  { %10220 = vmatprep.subr.bf16.mxu0 %v11172_v31 }
 0xddb   :  { %10221 = vmatpush3.bf16.msra.mxu0 %v11172_v31 }
 0xddc   :  { %10222 = vmatprep.subr.bf16.mxu0 %v11173_v44 }
 0xddf   :  { %10223 = vmatpush3.bf16.msra.mxu0 %v11173_v44 }
 0xde0   :  { %10224 = vmatprep.subr.bf16.mxu0 %v11174_v45 }
 0xde1   :  { %v10268_v10 = vpop.f32.mrb[72].mxu1 }
 0xde2   :  { %v2835_v11 = vpop.f32.mrb[73].mxu1  ;;  %v12380_v47 = vmul.f32 0.5, %v10268_v10 }
 0xde3   :  { %10225 = vmatpush3.bf16.msra.mxu0 %v11174_v45  ;;  %v12375_v34 = vmul.f32 0.5, %v2835_v11  ;;  %v10269_v26 = vpop.f32.mrb[74].mxu1 }
 0xde4   :  { %10226 = vmatprep.subr.bf16.mxu0 %v11175_v8  ;;  %v2838_v36 = vpop.f32.mrb[75].mxu1  ;;  %v12386_v50 = vmul.f32 0.5, %v10269_v26  ;;  %v2860_v53 = vsel %vm125_vm0, %v12380_v47, -inf }
 0xde5   :  { %v12382_v48 = vmul.f32 0.5, %v2838_v36  ;;  %v2854_v49 = vsel %vm125_vm0, %v12375_v34, -inf }
 0xde6   :  { %2855 = vmax.xlane.f32.xlu0 %v2854_v49  ;;  %v2863_v39 = vsel %vm125_vm0, %v12386_v50, -inf }
 0xde7   :  { %10227 = vmatpush3.bf16.msra.mxu0 %v11175_v8  ;;  %v2857_v51 = vsel %vm125_vm0, %v12382_v48, -inf }
 0xde8   :  { %2858 = vmax.xlane.f32.xlu1 %v2857_v51  ;;  %10228 = vmatprep.subr.bf16.mxu0 %v11176_v46 }
 0xde9   :  { %v10304_v38 = vpop.f32.mrb[76].mxu1 }
 0xdea   :  { %2861 = vmax.xlane.f32.xlu0 %v2860_v53  ;;  %v3128_v54 = vpop.f32.mrb[77].mxu1 }
 0xdeb   :  { %10229 = vmatpush3.bf16.msra.mxu0 %v11176_v46  ;;  %v10305_v55 = vpop.f32.mrb[78].mxu1 }
 0xdec   :  { %v3276_v56 = vpack.c.bf16 %v10305_v55, %v10304_v38  ;;  %v3131_v57 = vpop.f32.mrb[79].mxu1  ;;  %2864 = vmax.xlane.f32.xlu1 %v2863_v39  ;;  %10230 = vmatprep.subr.bf16.mxu0 %v11177_v52 }
 0xded   :  { %v3275_v59 = vpack.c.bf16 %v3131_v57, %v3128_v54 }
 0xdef   :  { %10231 = vmatpush3.bf16.msra.mxu0 %v11177_v52  ;;  %10326 = vmatprep.mubr.bf16.mxu1 %v3275_v59 }
 0xdf0   :  { %10232 = vmatprep.subr.bf16.mxu0 %v11178_v58 }
 0xdf1   :  { %v10312_v60 = vpop.f32.mrb[80].mxu1 }
 0xdf2   :  { %v3194_v61 = vpop.f32.mrb[81].mxu1 }
 0xdf3   :  { %10233 = vmatpush3.bf16.msra.mxu0 %v11178_v58  ;;  %v10313_v63 = vpop.f32.mrb[82].mxu1 }
 0xdf4   :  { %10270 = vmatprep.subr.bf16.mxu0 %v12262_v24  ;;  %v3278_v0 = vpack.c.bf16 %v10313_v63, %v10312_v60  ;;  %v3197_v1 = vpop.f32.mrb[83].mxu1 }
 0xdf5   :  { %v3277_v2 = vpack.c.bf16 %v3197_v1, %v3194_v61 }
 0xdf6   :  { %10235 = vmatmul.mubr.bf16.vlgmr.msra.gmra.mrb[48].mxu0 %v2480_v25  ;;  %v11181_v25 = vld [vmem:[%s13874_s15 + $0x60] sm:$0xff]  }
 0xdf7   :  { %10271 = vmatpush3.bf16.msra.mxu0 %v12262_v24  ;;  %10322 = vmatprep.subr.bf16.mxu1 %v3277_v2  ;;  %v11183_v24 = vld [vmem:[%s13875_s16 + $0x60] sm:$0xff]  }
 0xdf8   :  { %10272 = vmatprep.subr.bf16.mxu0 %v12260_v40  ;;  %10323 = vmatpush3.bf16.xpose.msra.mxu1 %v3277_v2 }
 0xdf9   :  { %v10320_v4 = vpop.f32.mrb[84].mxu1  ;;  %10324 = vmatprep.subr.bf16.mxu1 %v3278_v0 }
 0xdfa   :  { %v3260_v5 = vpop.f32.mrb[85].mxu1 }
 0xdfb   :  { %10273 = vmatpush3.bf16.msra.mxu0 %v12260_v40  ;;  %v10321_v6 = vpop.f32.mrb[86].mxu1  ;;  %v11182_v40 = vld [vmem:[%s13874_s15 + $0x68] sm:$0xff]  }
 0xdfc   :  { %v12407_v7 = vpack.c.bf16 %v10321_v6, %v10320_v4  ;;  %v3263_v17 = vpop.f32.mrb[87].mxu1 }
 0xdfd   :  { %v12409_v13 = vpack.c.bf16 %v3263_v17, %v3260_v5 }
 0xe00   :  { %10325 = vmatpush3.bf16.xpose.msra.mxu1 %v3278_v0 }
 0xe01   :  { %10358 = vmatprep.subr.bf16.mxu1 %v11179_v32 }
 0xe07   :  { %10327 = vmatmul.mubr.bf16.vlgmr.msra.gmra.mrb[88].mxu1 %v3276_v56 }
 0xe08   :  { %10359 = vmatpush3.bf16.msra.mxu1 %v11179_v32  ;;  %10362 = vmatprep.mubr.msk.bf16.mxu1 %vm125_vm0, %v11985_v23 }
 0xe09   :  { %10360 = vmatprep.subr.bf16.mxu1 %v11180_v19 }
 0xe0c   :  { %10361 = vmatpush3.bf16.msra.mxu1 %v11180_v19 }
 0xe0d   :  { %10366 = vmatprep.subr.bf16.mxu1 %v11181_v25 }
 0xe0f   :  { %10363 = vmatmul.mubr.msk.bf16.vlgmr.msra.gmra.mrb[92].mxu1 %vm125_vm0, %v11983_v22 }
 0xe10   :  { %10367 = vmatpush3.bf16.msra.mxu1 %v11181_v25  ;;  %10370 = vmatprep.mubr.msk.bf16.mxu1 %vm125_vm0, %v11985_v23 }
 0xe11   :  { %10368 = vmatprep.subr.bf16.mxu1 %v11182_v40 }
 0xe14   :  { %10369 = vmatpush3.bf16.msra.mxu1 %v11182_v40 }
 0xe15   :  { %10374 = vmatprep.subr.bf16.mxu1 %v11183_v24 }
 0xe17   :  { %10371 = vmatmul.mubr.msk.bf16.vlgmr.msra.gmra.mrb[96].mxu1 %vm125_vm0, %v11983_v22 }
 0xe18   :  { %10375 = vmatpush3.bf16.msra.mxu1 %v11183_v24  ;;  %10378 = vmatprep.mubr.msk.bf16.mxu1 %vm125_vm0, %v11985_v23 }
 0xe19   :  { %10376 = vmatprep.subr.bf16.mxu1 %v11184_v18 }
 0xe1c   :  { %10377 = vmatpush3.bf16.msra.mxu1 %v11184_v18 }
 0xe1f   :  { %10379 = vmatmul.mubr.msk.bf16.vlgmr.msra.gmra.mrb[100].mxu1 %vm125_vm0, %v11983_v22 }
 0xe73   :  { %v2856_v27 = vpop.xlane.xlu0 %2855 }
 0xe74   :  { %v2866_v41 = vsub.f32 %v12375_v34, %v2856_v27  ;;  %v11185_v27 = vld [vmem:[%s13873_s14 + $0x70] sm:$0xff]  }
 0xe75   :  { %v2859_v35 = vpop.xlane.xlu1 %2858 }
 0xe76   :  { %v2870_v37 = vmul.f32 1.442695, %v2866_v41  ;;  %v2867_v20 = vsub.f32 %v12382_v48, %v2859_v35  ;;  %v11186_v41 = vld [vmem:[%s13873_s14 + $0x78] sm:$0xff]   ;;  %v11187_v35 = vld [vmem:[%s13874_s15 + $0x70] sm:$0xff]  }
 0xe77   :  { %v2862_v12 = vpop.xlane.xlu0 %2861 }
 0xe78   :  { %11351 = vpow2.f32 %v2870_v37  ;;  %v2872_v14 = vmul.f32 1.442695, %v2867_v20  ;;  %v2868_v15 = vsub.f32 %v12380_v47, %v2862_v12  ;;  %v12464_v47 = vld [vmem:[%s13876_s17 + $0x100] sm:$0xff]   ;;  %v11188_v37 = vld [vmem:[%s13874_s15 + $0x78] sm:$0xff]   ;;  %v11189_v20 = vld [vmem:[%s13875_s16 + $0x70] sm:$0xff]  }
 0xe79   :  { %v2865_v9 = vpop.xlane.xlu1 %2864  ;;  %10278 = vmatprep.subr.bf16.mxu0 %v12464_v47  ;;  %v11190_v12 = vld [vmem:[%s13875_s16 + $0x78] sm:$0xff]  }
 0xe7a   :  { %11353 = vpow2.f32 %v2872_v14  ;;  %v2874_v30 = vmul.f32 1.442695, %v2868_v15  ;;  %v2869_v31 = vsub.f32 %v12386_v50, %v2865_v9 }
 0xe7c   :  { %11355 = vpow2.f32 %v2874_v30  ;;  %v2876_v44 = vmul.f32 1.442695, %v2869_v31 }
 0xe7e   :  { %11357 = vpow2.f32 %v2876_v44 }
 0xe82   :  { %v12445_v45 = vpop.eup %11351 }
 0xe83   :  { %v2878_v8 = vsel %vm125_vm0, %v12445_v45, 0.0 }
 0xe84   :  { %v12449_v10 = vpop.eup %11353  ;;  %2879 = vadd.xlane.f32.xlu0 %v2878_v8 }
 0xe85   :  { %v2881_v11 = vsel %vm125_vm0, %v12449_v10, 0.0 }
 0xe86   :  { %v12453_v34 = vpop.eup %11355  ;;  %2882 = vadd.xlane.f32.xlu1 %v2881_v11 }
 0xe87   :  { %v2884_v26 = vsel %vm125_vm0, %v12453_v34, 0.0 }
 0xe88   :  { %v12457_v36 = vpop.eup %11357  ;;  %2885 = vadd.xlane.f32.xlu0 %v2884_v26 }
 0xe89   :  { %v2887_v46 = vsel %vm125_vm0, %v12457_v36, 0.0 }
 0xe8a   :  { %2888 = vadd.xlane.f32.xlu1 %v2887_v46 }
 0xeda   :  { %v10328_v48 = vpop.f32.mrb[88].mxu1 }
 0xedb   :  { %v3313_v49 = vpop.f32.mrb[89].mxu1  ;;  %v12469_v38 = vmul.f32 0.5, %v10328_v48 }
 0xedc   :  { %v12467_v50 = vmul.f32 0.5, %v3313_v49  ;;  %v10329_v51 = vpop.f32.mrb[90].mxu1 }
 0xedd   :  { %v3316_v52 = vpop.f32.mrb[91].mxu1  ;;  %v12475_v55 = vmul.f32 0.5, %v10329_v51  ;;  %v3338_v57 = vsel %vm125_vm0, %v12469_v38, -inf }
 0xede   :  { %v12471_v53 = vmul.f32 0.5, %v3316_v52  ;;  %v3332_v54 = vsel %vm125_vm0, %v12467_v50, -inf  ;;  %v11198_v52 = vld [vmem:[%s13876_s17 + $0x138] sm:$0xff]  }
 0xedf   :  { %3333 = vmax.xlane.f32.xlu0 %v3332_v54  ;;  %v3341_v60 = vsel %vm125_vm0, %v12475_v55, -inf }
 0xee0   :  { %v3335_v39 = vsel %vm125_vm0, %v12471_v53, -inf }
 0xee1   :  { %3336 = vmax.xlane.f32.xlu1 %v3335_v39 }
 0xee2   :  { %v10364_v56 = vpop.f32.mrb[92].mxu1 }
 0xee3   :  { %3339 = vmax.xlane.f32.xlu0 %v3338_v57  ;;  %v3606_v58 = vpop.f32.mrb[93].mxu1 }
 0xee4   :  { %v10365_v59 = vpop.f32.mrb[94].mxu1 }
 0xee5   :  { %v3754_v61 = vpack.c.bf16 %v10365_v59, %v10364_v56  ;;  %v3609_v63 = vpop.f32.mrb[95].mxu1  ;;  %3342 = vmax.xlane.f32.xlu1 %v3341_v60 }
 0xee6   :  { %v3753_v0 = vpack.c.bf16 %v3609_v63, %v3606_v58 }
 0xee8   :  { %10386 = vmatprep.mubr.bf16.mxu1 %v3753_v0 }
 0xeea   :  { %v10372_v1 = vpop.f32.mrb[96].mxu1 }
 0xeeb   :  { %v3672_v2 = vpop.f32.mrb[97].mxu1 }
 0xeec   :  { %v10373_v4 = vpop.f32.mrb[98].mxu1 }
 0xeed   :  { %v3756_v5 = vpack.c.bf16 %v10373_v4, %v10372_v1  ;;  %v3675_v6 = vpop.f32.mrb[99].mxu1 }
 0xeee   :  { %v3755_v17 = vpack.c.bf16 %v3675_v6, %v3672_v2 }
 0xef0   :  { %10382 = vmatprep.subr.bf16.mxu1 %v3755_v17 }
 0xef1   :  { %10383 = vmatpush3.bf16.xpose.msra.mxu1 %v3755_v17 }
 0xef2   :  { %v10380_v32 = vpop.f32.mrb[100].mxu1  ;;  %10384 = vmatprep.subr.bf16.mxu1 %v3756_v5 }
 0xef3   :  { %v3738_v19 = vpop.f32.mrb[101].mxu1 }
 0xef4   :  { %v10381_v25 = vpop.f32.mrb[102].mxu1 }
 0xef5   :  { %v12483_v40 = vpack.c.bf16 %v10381_v25, %v10380_v32  ;;  %v3741_v24 = vpop.f32.mrb[103].mxu1 }
 0xef6   :  { %v12485_v18 = vpack.c.bf16 %v3741_v24, %v3738_v19 }
 0xef9   :  { %10385 = vmatpush3.bf16.xpose.msra.mxu1 %v3756_v5 }
 0xefa   :  { %10418 = vmatprep.subr.bf16.mxu1 %v11185_v27 }
 0xf00   :  { %10387 = vmatmul.mubr.bf16.vlgmr.msra.gmra.mrb[104].mxu1 %v3754_v61 }
 0xf01   :  { %10419 = vmatpush3.bf16.msra.mxu1 %v11185_v27  ;;  %10422 = vmatprep.mubr.msk.bf16.mxu1 %vm125_vm0, %v11985_v23 }
 0xf02   :  { %10420 = vmatprep.subr.bf16.mxu1 %v11186_v41 }
 0xf05   :  { %10421 = vmatpush3.bf16.msra.mxu1 %v11186_v41 }
 0xf06   :  { %10426 = vmatprep.subr.bf16.mxu1 %v11187_v35 }
 0xf08   :  { %10423 = vmatmul.mubr.msk.bf16.vlgmr.msra.gmra.mrb[108].mxu1 %vm125_vm0, %v11983_v22 }
 0xf09   :  { %10427 = vmatpush3.bf16.msra.mxu1 %v11187_v35  ;;  %10430 = vmatprep.mubr.msk.bf16.mxu1 %vm125_vm0, %v11985_v23 }
 0xf0a   :  { %10428 = vmatprep.subr.bf16.mxu1 %v11188_v37 }
 0xf0d   :  { %10429 = vmatpush3.bf16.msra.mxu1 %v11188_v37 }
 0xf0e   :  { %10434 = vmatprep.subr.bf16.mxu1 %v11189_v20 }
 0xf10   :  { %10431 = vmatmul.mubr.msk.bf16.vlgmr.msra.gmra.mrb[112].mxu1 %vm125_vm0, %v11983_v22 }
 0xf11   :  { %v2880_v14 = vpop.xlane.xlu0 %2879  ;;  %10435 = vmatpush3.bf16.msra.mxu1 %v11189_v20  ;;  %10438 = vmatprep.mubr.msk.bf16.mxu1 %vm125_vm0, %v11985_v23 }
 0xf12   :  { %11359 = vrcp.f32 %v2880_v14  ;;  %10436 = vmatprep.subr.bf16.mxu1 %v11190_v12 }
 0xf13   :  { %v2883_v15 = vpop.xlane.xlu1 %2882 }
 0xf14   :  { %11361 = vrcp.f32 %v2883_v15 }
 0xf15   :  { %v2886_v9 = vpop.xlane.xlu0 %2885  ;;  %10437 = vmatpush3.bf16.msra.mxu1 %v11190_v12 }
 0xf16   :  { %11363 = vrcp.f32 %v2886_v9 }
 0xf17   :  { %v2889_v30 = vpop.xlane.xlu1 %2888 }
 0xf18   :  { %11365 = vrcp.f32 %v2889_v30  ;;  %10439 = vmatmul.mubr.msk.bf16.vlgmr.msra.gmra.mrb[116].mxu1 %vm125_vm0, %v11983_v22  ;;  %v11192_v22 = vld [vmem:[%s13876_s17 + $0x108] sm:$0xff]  }
 0xf1c   :  { %v11360_v31 = vpop.eup %11359 }
 0xf1d   :  { %v2894_v8 = vmul.f32 %v11360_v31, %v12445_v45  ;;  %v11193_v45 = vld [vmem:[%s13876_s17 + $0x110] sm:$0xff]  }
 0xf1e   :  { %v11362_v44 = vpop.eup %11361 }
 0xf1f   :  { %v2895_v11 = vmul.f32 %v11362_v44, %v12449_v10  ;;  %v11194_v10 = vld [vmem:[%s13876_s17 + $0x118] sm:$0xff]  }
 0xf20   :  { %v11364_v26 = vpop.eup %11363 }
 0xf21   :  { %v2898_v23 = vpack.c.bf16 %v2895_v11, %v2894_v8  ;;  %v2896_v48 = vmul.f32 %v11364_v26, %v12453_v34  ;;  %v11195_v34 = vld [vmem:[%s13876_s17 + $0x120] sm:$0xff]  }
 0xf22   :  { %v11366_v46 = vpop.eup %11365 }
 0xf23   :  { %v2897_v49 = vmul.f32 %v11366_v46, %v12457_v36  ;;  %10274 = vmatprep.mubr.msk.bf16.mxu0 %vm125_vm0, %v2898_v23  ;;  %v11196_v36 = vld [vmem:[%s13876_s17 + $0x128] sm:$0xff]  }
 0xf25   :  { %v2899_v51 = vpack.c.bf16 %v2897_v49, %v2896_v48 }
 0xf27   :  { %10275 = vmatmul.mubr.msk.bf16.vlgmr.msra.gmra.mrb[52].mxu0 %vm125_vm0, %v2899_v51 }
 0xf28   :  { %10279 = vmatpush3.bf16.msra.mxu0 %v12464_v47  ;;  %v11197_v47 = vld [vmem:[%s13876_s17 + $0x130] sm:$0xff]  }
 0xf29   :  { %10280 = vmatprep.subr.bf16.mxu0 %v11192_v22 }
 0xf2c   :  { %10281 = vmatpush3.bf16.msra.mxu0 %v11192_v22 }
 0xf2d   :  { %10282 = vmatprep.subr.bf16.mxu0 %v11193_v45 }
 0xf30   :  { %10283 = vmatpush3.bf16.msra.mxu0 %v11193_v45 }
 0xf31   :  { %10284 = vmatprep.subr.bf16.mxu0 %v11194_v10 }
 0xf34   :  { %10285 = vmatpush3.bf16.msra.mxu0 %v11194_v10 }
 0xf35   :  { %10286 = vmatprep.subr.bf16.mxu0 %v11195_v34 }
 0xf38   :  { %10287 = vmatpush3.bf16.msra.mxu0 %v11195_v34 }
 0xf39   :  { %10288 = vmatprep.subr.bf16.mxu0 %v11196_v36 }
 0xf3c   :  { %10289 = vmatpush3.bf16.msra.mxu0 %v11196_v36 }
 0xf3d   :  { %10290 = vmatprep.subr.bf16.mxu0 %v11197_v47 }
 0xf40   :  { %10291 = vmatpush3.bf16.msra.mxu0 %v11197_v47 }
 0xf41   :  { %10292 = vmatprep.subr.bf16.mxu0 %v11198_v52 }
 0xf44   :  { %10293 = vmatpush3.bf16.msra.mxu0 %v11198_v52  ;;  %v11543_v52 = vld [vmem:[%s13873_s14] sm:$0xff]  }
 0xf45   :  { %10330 = vmatprep.subr.bf16.mxu0 %v12409_v13 }
 0xf6c   :  { %v3334_v54 = vpop.xlane.xlu0 %3333 }
 0xf6d   :  { %v3344_v39 = vsub.f32 %v12467_v50, %v3334_v54 }
 0xf6e   :  { %v3337_v56 = vpop.xlane.xlu1 %3336 }
 0xf6f   :  { %v3348_v57 = vmul.f32 1.442695, %v3344_v39  ;;  %v3345_v58 = vsub.f32 %v12471_v53, %v3337_v56  ;;  %v11544_v56 = vld [vmem:[%s13873_s14 + $0x8] sm:$0xff]  }
 0xf70   :  { %v3340_v59 = vpop.xlane.xlu0 %3339 }
 0xf71   :  { %11367 = vpow2.f32 %v3348_v57  ;;  %v3350_v60 = vmul.f32 1.442695, %v3345_v58  ;;  %v3346_v61 = vsub.f32 %v12469_v38, %v3340_v59 }
 0xf72   :  { %v3343_v63 = vpop.xlane.xlu1 %3342 }
 0xf73   :  { %11369 = vpow2.f32 %v3350_v60  ;;  %v3352_v0 = vmul.f32 1.442695, %v3346_v61  ;;  %v3347_v1 = vsub.f32 %v12475_v55, %v3343_v63  ;;  %v11545_v61 = vld [vmem:[%s13874_s15] sm:$0xff]  }
 0xf74   :  { %v11199_v63 = vld [vmem:[%s13876_s17 + $0x140] sm:$0xff]  }
 0xf75   :  { %11371 = vpow2.f32 %v3352_v0  ;;  %v3354_v2 = vmul.f32 1.442695, %v3347_v1  ;;  %v11546_v0 = vld [vmem:[%s13874_s15 + $0x8] sm:$0xff]  }
 0xf77   :  { %11373 = vpow2.f32 %v3354_v2 }
 0xf7b   :  { %v12550_v4 = vpop.eup %11367 }
 0xf7c   :  { %v3356_v50 = vsel %vm125_vm0, %v12550_v4, 0.0 }
 0xf7d   :  { %v12554_v5 = vpop.eup %11369  ;;  %3357 = vadd.xlane.f32.xlu0 %v3356_v50 }
 0xf7e   :  { %v3359_v53 = vsel %vm125_vm0, %v12554_v5, 0.0 }
 0xf7f   :  { %v12558_v38 = vpop.eup %11371  ;;  %3360 = vadd.xlane.f32.xlu1 %v3359_v53 }
 0xf80   :  { %v3362_v55 = vsel %vm125_vm0, %v12558_v38, 0.0 }
 0xf81   :  { %v12562_v6 = vpop.eup %11373  ;;  %3363 = vadd.xlane.f32.xlu0 %v3362_v55 }
 0xf82   :  { %v3365_v17 = vsel %vm125_vm0, %v12562_v6, 0.0 }
 0xf83   :  { %3366 = vadd.xlane.f32.xlu1 %v3365_v17 }
 0xfd3   :  { %v10388_v32 = vpop.f32.mrb[104].mxu1 }
 0xfd4   :  { %v3791_v19 = vpop.f32.mrb[105].mxu1  ;;  %v12568_v41 = vmul.f32 0.5, %v10388_v32 }
 0xfd5   :  { %v12566_v25 = vmul.f32 0.5, %v3791_v19  ;;  %v10389_v24 = vpop.f32.mrb[106].mxu1 }
 0xfd6   :  { %v3794_v27 = vpop.f32.mrb[107].mxu1  ;;  %v12574_v20 = vmul.f32 0.5, %v10389_v24  ;;  %v3816_v15 = vsel %vm125_vm0, %v12568_v41, -inf }
 0xfd7   :  { %v12570_v35 = vmul.f32 0.5, %v3794_v27  ;;  %v3810_v37 = vsel %vm125_vm0, %v12566_v25, -inf }
 0xfd8   :  { %3811 = vmax.xlane.f32.xlu0 %v3810_v37  ;;  %v3819_v31 = vsel %vm125_vm0, %v12574_v20, -inf }
 0xfd9   :  { %v3813_v12 = vsel %vm125_vm0, %v12570_v35, -inf }
 0xfda   :  { %3814 = vmax.xlane.f32.xlu1 %v3813_v12 }
 0xfdb   :  { %v10424_v14 = vpop.f32.mrb[108].mxu1 }
 0xfdc   :  { %3817 = vmax.xlane.f32.xlu0 %v3816_v15  ;;  %v4084_v9 = vpop.f32.mrb[109].mxu1 }
 0xfdd   :  { %v10425_v30 = vpop.f32.mrb[110].mxu1 }
 0xfde   :  { %v4232_v44 = vpack.c.bf16 %v10425_v30, %v10424_v14  ;;  %v4087_v8 = vpop.f32.mrb[111].mxu1  ;;  %3820 = vmax.xlane.f32.xlu1 %v3819_v31  ;;  %v11205_v30 = vld [vmem:[%s13876_s17 + $0x170] sm:$0xff]   ;;  %v11206_v31 = vld [vmem:[%s13876_s17 + $0x178] sm:$0xff]  }
 0xfdf   :  { %v4231_v11 = vpack.c.bf16 %v4087_v8, %v4084_v9  ;;  %v11200_v9 = vld [vmem:[%s13876_s17 + $0x148] sm:$0xff]  }
 0xfe1   :  { %10446 = vmatprep.mubr.bf16.mxu1 %v4231_v11 }
 0xfe3   :  { %v10432_v26 = vpop.f32.mrb[112].mxu1 }
 0xfe4   :  { %v4150_v23 = vpop.f32.mrb[113].mxu1 }
 0xfe5   :  { %v10433_v46 = vpop.f32.mrb[114].mxu1 }
 0xfe6   :  { %v4234_v48 = vpack.c.bf16 %v10433_v46, %v10432_v26  ;;  %v4153_v49 = vpop.f32.mrb[115].mxu1 }
 0xfe7   :  { %v4233_v51 = vpack.c.bf16 %v4153_v49, %v4150_v23 }
 0xfe9   :  { %10442 = vmatprep.subr.bf16.mxu1 %v4233_v51 }
 0xfea   :  { %10443 = vmatpush3.bf16.xpose.msra.mxu1 %v4233_v51 }
 0xfeb   :  { %v10440_v22 = vpop.f32.mrb[116].mxu1  ;;  %10444 = vmatprep.subr.bf16.mxu1 %v4234_v48 }
 0xfec   :  { %v4216_v45 = vpop.f32.mrb[117].mxu1 }
 0xfed   :  { %v10441_v10 = vpop.f32.mrb[118].mxu1 }
 0xfee   :  { %v12582_v34 = vpack.c.bf16 %v10441_v10, %v10440_v22  ;;  %v4219_v36 = vpop.f32.mrb[119].mxu1 }
 0xfef   :  { %v12584_v47 = vpack.c.bf16 %v4219_v36, %v4216_v45 }
 0xff2   :  { %10445 = vmatpush3.bf16.xpose.msra.mxu1 %v4234_v48 }
 0xff3   :  { %10478 = vmatprep.subr.bf16.mxu1 %v11543_v52 }
 0xff9   :  { %10447 = vmatmul.mubr.bf16.vlgmr.msra.gmra.mrb[120].mxu1 %v4232_v44 }
 0xffa   :  { %v10276_v54 = vpop.f32.mrb[52].mxu0  ;;  %10479 = vmatpush3.bf16.msra.mxu1 %v11543_v52  ;;  %10482 = vmatprep.mubr.msk.bf16.mxu1 %vm125_vm0, %v12002_v43 }
 0xffb   :  { %v2942_v39 = vpop.f32.mrb[53].mxu0  ;;  %10480 = vmatprep.subr.bf16.mxu1 %v11544_v56 }
 0xffc   :  { %v10277_v57 = vpop.f32.mrb[54].mxu0 }
 0xffd   :  { %v2958_v58 = vpack.c.bf16 %v10277_v57, %v10276_v54  ;;  %v2945_v59 = vpop.f32.mrb[55].mxu0 }
 0xffe   :  { %v2957_v60 = vpack.c.bf16 %v2945_v59, %v2942_v39  ;;  %10481 = vmatpush3.bf16.msra.mxu1 %v11544_v56 }
 0xfff   :  { %10486 = vmatprep.subr.bf16.mxu1 %v11545_v61 }
0x1000   :  { %10294 = vmatprep.mubr.bf16.mxu0 %v2957_v60 }
0x1001   :  { %10295 = vmatmul.mubr.bf16.vlgmr.msra.gmra.mrb[48].mxu0 %v2958_v58  ;;  %10483 = vmatmul.mubr.msk.bf16.vlgmr.msra.gmra.mrb[124].mxu1 %vm125_vm0, %v12000_v42 }
0x1002   :  { %10331 = vmatpush3.bf16.msra.mxu0 %v12409_v13  ;;  %10487 = vmatpush3.bf16.msra.mxu1 %v11545_v61  ;;  %v11547_v13 = vld [vmem:[%s13875_s16] sm:$0xff]  }
0x1003   :  { %10332 = vmatprep.subr.bf16.mxu0 %v12407_v7  ;;  %10490 = vmatprep.mubr.msk.bf16.mxu1 %vm125_vm0, %v12002_v43 }
0x1004   :  { %10488 = vmatprep.subr.bf16.mxu1 %v11546_v0 }
0x1006   :  { %10333 = vmatpush3.bf16.msra.mxu0 %v12407_v7  ;;  %10489 = vmatpush3.bf16.msra.mxu1 %v11546_v0  ;;  %v11548_v7 = vld [vmem:[%s13875_s16 + $0x8] sm:$0xff]  }
0x1007   :  { %10494 = vmatprep.subr.bf16.mxu1 %v11547_v13  ;;  %10338 = vmatprep.subr.bf16.mxu0 %v11199_v63 }
0x1009   :  { %10491 = vmatmul.mubr.msk.bf16.vlgmr.msra.gmra.mrb[128].mxu1 %vm125_vm0, %v12000_v42 }
0x100a   :  { %v3358_v1 = vpop.xlane.xlu0 %3357  ;;  %10495 = vmatpush3.bf16.msra.mxu1 %v11547_v13  ;;  %10498 = vmatprep.mubr.msk.bf16.mxu1 %vm125_vm0, %v12002_v43 }
0x100b   :  { %11375 = vrcp.f32 %v3358_v1  ;;  %10496 = vmatprep.subr.bf16.mxu1 %v11548_v7 }
0x100c   :  { %v3361_v2 = vpop.xlane.xlu1 %3360 }
0x100d   :  { %11377 = vrcp.f32 %v3361_v2 }
0x100e   :  { %v3364_v50 = vpop.xlane.xlu0 %3363  ;;  %10497 = vmatpush3.bf16.msra.mxu1 %v11548_v7 }
0x100f   :  { %11379 = vrcp.f32 %v3364_v50 }
0x1010   :  { %v3367_v53 = vpop.xlane.xlu1 %3366 }
0x1011   :  { %11381 = vrcp.f32 %v3367_v53  ;;  %10499 = vmatmul.mubr.msk.bf16.vlgmr.msra.gmra.mrb[132].mxu1 %vm125_vm0, %v12000_v42 }
0x1015   :  { %v11376_v55 = vpop.eup %11375 }
0x1016   :  { %v3372_v32 = vmul.f32 %v11376_v55, %v12550_v4  ;;  %v11201_v4 = vld [vmem:[%s13876_s17 + $0x150] sm:$0xff]  }
0x1017   :  { %v11378_v17 = vpop.eup %11377 }
0x1018   :  { %v3373_v19 = vmul.f32 %v11378_v17, %v12554_v5  ;;  %v11202_v5 = vld [vmem:[%s13876_s17 + $0x158] sm:$0xff]  }
0x1019   :  { %v11380_v24 = vpop.eup %11379 }
0x101a   :  { %v3376_v27 = vpack.c.bf16 %v3373_v19, %v3372_v32  ;;  %v3374_v12 = vmul.f32 %v11380_v24, %v12558_v38  ;;  %v11203_v38 = vld [vmem:[%s13876_s17 + $0x160] sm:$0xff]  }
0x101b   :  { %v11382_v37 = vpop.eup %11381 }
0x101c   :  { %v3375_v14 = vmul.f32 %v11382_v37, %v12562_v6  ;;  %10334 = vmatprep.mubr.msk.bf16.mxu0 %vm125_vm0, %v3376_v27  ;;  %v11204_v6 = vld [vmem:[%s13876_s17 + $0x168] sm:$0xff]  }
0x101e   :  { %v3377_v15 = vpack.c.bf16 %v3375_v14, %v3374_v12 }
0x1020   :  { %10335 = vmatmul.mubr.msk.bf16.vlgmr.msra.gmra.mrb[56].mxu0 %vm125_vm0, %v3377_v15 }
0x1021   :  { %10339 = vmatpush3.bf16.msra.mxu0 %v11199_v63 }
0x1022   :  { %10340 = vmatprep.subr.bf16.mxu0 %v11200_v9 }
0x1025   :  { %10341 = vmatpush3.bf16.msra.mxu0 %v11200_v9 }
0x1026   :  { %10342 = vmatprep.subr.bf16.mxu0 %v11201_v4 }
0x1029   :  { %10343 = vmatpush3.bf16.msra.mxu0 %v11201_v4 }
0x102a   :  { %10344 = vmatprep.subr.bf16.mxu0 %v11202_v5 }
0x102d   :  { %10345 = vmatpush3.bf16.msra.mxu0 %v11202_v5 }
0x102e   :  { %10346 = vmatprep.subr.bf16.mxu0 %v11203_v38 }
0x1031   :  { %10347 = vmatpush3.bf16.msra.mxu0 %v11203_v38 }
0x1032   :  { %10348 = vmatprep.subr.bf16.mxu0 %v11204_v6 }
0x1035   :  { %10349 = vmatpush3.bf16.msra.mxu0 %v11204_v6 }
0x1036   :  { %10350 = vmatprep.subr.bf16.mxu0 %v11205_v30 }
0x1039   :  { %10351 = vmatpush3.bf16.msra.mxu0 %v11205_v30 }
0x103a   :  { %10352 = vmatprep.subr.bf16.mxu0 %v11206_v31 }
0x103d   :  { %10353 = vmatpush3.bf16.msra.mxu0 %v11206_v31  ;;  %v11549_v31 = vld [vmem:[%s13874_s15 + $0x10] sm:$0xff]  }
0x103e   :  { %10390 = vmatprep.subr.bf16.mxu0 %v12485_v18 }
0x1065   :  { %v3812_v44 = vpop.xlane.xlu0 %3811 }
0x1066   :  { %v3822_v8 = vsub.f32 %v12566_v25, %v3812_v44 }
0x1067   :  { %v3815_v11 = vpop.xlane.xlu1 %3814 }
0x1068   :  { %v3826_v26 = vmul.f32 1.442695, %v3822_v8  ;;  %v3823_v23 = vsub.f32 %v12570_v35, %v3815_v11  ;;  %v11550_v11 = vld [vmem:[%s13874_s15 + $0x18] sm:$0xff]  }
0x1069   :  { %v3818_v46 = vpop.xlane.xlu0 %3817 }
0x106a   :  { %11383 = vpow2.f32 %v3826_v26  ;;  %v3828_v48 = vmul.f32 1.442695, %v3823_v23  ;;  %v3824_v49 = vsub.f32 %v12568_v41, %v3818_v46 }
0x106b   :  { %v3821_v51 = vpop.xlane.xlu1 %3820 }
0x106c   :  { %11385 = vpow2.f32 %v3828_v48  ;;  %v3830_v22 = vmul.f32 1.442695, %v3824_v49  ;;  %v3825_v45 = vsub.f32 %v12574_v20, %v3821_v51  ;;  %v11207_v49 = vld [vmem:[%s13876_s17 + $0x180] sm:$0xff]  }
0x106e   :  { %11387 = vpow2.f32 %v3830_v22  ;;  %v3832_v10 = vmul.f32 1.442695, %v3825_v45 }
0x1070   :  { %11389 = vpow2.f32 %v3832_v10 }
0x1074   :  { %v12654_v36 = vpop.eup %11383 }
0x1075   :  { %v3834_v25 = vsel %vm125_vm0, %v12654_v36, 0.0 }
0x1076   :  { %v12658_v52 = vpop.eup %11385  ;;  %3835 = vadd.xlane.f32.xlu0 %v3834_v25 }
0x1077   :  { %v3837_v35 = vsel %vm125_vm0, %v12658_v52, 0.0 }
0x1078   :  { %v12662_v41 = vpop.eup %11387  ;;  %3838 = vadd.xlane.f32.xlu1 %v3837_v35 }
0x1079   :  { %v3840_v20 = vsel %vm125_vm0, %v12662_v41, 0.0 }
0x107a   :  { %v12666_v54 = vpop.eup %11389  ;;  %3841 = vadd.xlane.f32.xlu0 %v3840_v20 }
0x107b   :  { %v3843_v39 = vsel %vm125_vm0, %v12666_v54, 0.0 }
0x107c   :  { %3844 = vadd.xlane.f32.xlu1 %v3843_v39 }
0x10cc   :  { %v10448_v56 = vpop.f32.mrb[120].mxu1 }
0x10cd   :  { %v4269_v57 = vpop.f32.mrb[121].mxu1  ;;  %v12672_v61 = vmul.f32 0.5, %v10448_v56 }
0x10ce   :  { %v12670_v58 = vmul.f32 0.5, %v4269_v57  ;;  %v10449_v59 = vpop.f32.mrb[122].mxu1 }
0x10cf   :  { %v4272_v60 = vpop.f32.mrb[123].mxu1  ;;  %v12678_v13 = vmul.f32 0.5, %v10449_v59  ;;  %v4294_v2 = vsel %vm125_vm0, %v12672_v61, -inf }
0x10d0   :  { %v12674_v63 = vmul.f32 0.5, %v4272_v60  ;;  %v4288_v0 = vsel %vm125_vm0, %v12670_v58, -inf }
0x10d1   :  { %4289 = vmax.xlane.f32.xlu0 %v4288_v0  ;;  %v4297_v55 = vsel %vm125_vm0, %v12678_v13, -inf  ;;  %v11208_v0 = vld [vmem:[%s13876_s17 + $0x188] sm:$0xff]  }
0x10d2   :  { %v4291_v1 = vsel %vm125_vm0, %v12674_v63, -inf }
0x10d3   :  { %4292 = vmax.xlane.f32.xlu1 %v4291_v1  ;;  %v11213_v1 = vld [vmem:[%s13876_s17 + $0x1b0] sm:$0xff]  }
0x10d4   :  { %v10484_v7 = vpop.f32.mrb[124].mxu1 }
0x10d5   :  { %4295 = vmax.xlane.f32.xlu0 %v4294_v2  ;;  %v4587_v50 = vpop.f32.mrb[125].mxu1 }
0x10d6   :  { %v10485_v53 = vpop.f32.mrb[126].mxu1 }
0x10d7   :  { %v4701_v17 = vpack.c.bf16 %v10485_v53, %v10484_v7  ;;  %4298 = vmax.xlane.f32.xlu1 %v4297_v55  ;;  %v4590_v32 = vpop.f32.mrb[127].mxu1  ;;  %v11214_v7 = vld [vmem:[%s13876_s17 + $0x1b8] sm:$0xff]  }
0x10d8   :  { %v4700_v19 = vpack.c.bf16 %v4590_v32, %v4587_v50 }
0x10da   :  { %10506 = vmatprep.mubr.bf16.mxu1 %v4700_v19 }
0x10dc   :  { %v10492_v24 = vpop.f32.mrb[128].mxu1 }
0x10dd   :  { %v4636_v27 = vpop.f32.mrb[129].mxu1 }
0x10de   :  { %v10493_v37 = vpop.f32.mrb[130].mxu1 }
0x10df   :  { %v4703_v12 = vpack.c.bf16 %v10493_v37, %v10492_v24  ;;  %v4639_v14 = vpop.f32.mrb[131].mxu1 }
0x10e0   :  { %v4702_v15 = vpack.c.bf16 %v4639_v14, %v4636_v27 }
0x10e2   :  { %10502 = vmatprep.subr.bf16.mxu1 %v4702_v15 }
0x10e3   :  { %10503 = vmatpush3.bf16.xpose.msra.mxu1 %v4702_v15 }
0x10e4   :  { %v10500_v9 = vpop.f32.mrb[132].mxu1  ;;  %10504 = vmatprep.subr.bf16.mxu1 %v4703_v12 }
0x10e5   :  { %v4685_v4 = vpop.f32.mrb[133].mxu1 }
0x10e6   :  { %v10501_v5 = vpop.f32.mrb[134].mxu1 }
0x10e7   :  { %v12686_v38 = vpack.c.bf16 %v10501_v5, %v10500_v9  ;;  %v4688_v6 = vpop.f32.mrb[135].mxu1 }
0x10e8   :  { %v12688_v30 = vpack.c.bf16 %v4688_v6, %v4685_v4 }
0x10eb   :  { %10505 = vmatpush3.bf16.xpose.msra.mxu1 %v4703_v12 }
0x10ec   :  { %10526 = vmatprep.subr.bf16.mxu1 %v11549_v31 }
0x10f2   :  { %10507 = vmatmul.mubr.bf16.vlgmr.msra.gmra.mrb[136].mxu1 %v4701_v17 }
0x10f3   :  { %v10336_v44 = vpop.f32.mrb[56].mxu0  ;;  %10527 = vmatpush3.bf16.msra.mxu1 %v11549_v31  ;;  %10530 = vmatprep.mubr.msk.bf16.mxu1 %vm125_vm0, %v12002_v43 }
0x10f4   :  { %v3420_v8 = vpop.f32.mrb[57].mxu0  ;;  %10528 = vmatprep.subr.bf16.mxu1 %v11550_v11 }
0x10f5   :  { %v10337_v26 = vpop.f32.mrb[58].mxu0 }
0x10f6   :  { %v3436_v23 = vpack.c.bf16 %v10337_v26, %v10336_v44  ;;  %v3423_v46 = vpop.f32.mrb[59].mxu0 }
0x10f7   :  { %v3435_v48 = vpack.c.bf16 %v3423_v46, %v3420_v8  ;;  %10529 = vmatpush3.bf16.msra.mxu1 %v11550_v11 }
0x10f9   :  { %10354 = vmatprep.mubr.bf16.mxu0 %v3435_v48 }
0x10fa   :  { %10355 = vmatmul.mubr.bf16.vlgmr.msra.gmra.mrb[48].mxu0 %v3436_v23  ;;  %10531 = vmatmul.mubr.msk.bf16.vlgmr.msra.gmra.mrb[140].mxu1 %vm125_vm0, %v12000_v42 }
0x10fb   :  { %10391 = vmatpush3.bf16.msra.mxu0 %v12485_v18 }
0x10fc   :  { %10392 = vmatprep.subr.bf16.mxu0 %v12483_v40 }
0x10ff   :  { %10393 = vmatpush3.bf16.msra.mxu0 %v12483_v40 }
0x1100   :  { %10398 = vmatprep.subr.bf16.mxu0 %v11207_v49 }
0x1103   :  { %v3836_v51 = vpop.xlane.xlu0 %3835 }
0x1104   :  { %11391 = vrcp.f32 %v3836_v51 }
0x1105   :  { %v3839_v22 = vpop.xlane.xlu1 %3838 }
0x1106   :  { %11393 = vrcp.f32 %v3839_v22 }
0x1107   :  { %v3842_v45 = vpop.xlane.xlu0 %3841 }
0x1108   :  { %11395 = vrcp.f32 %v3842_v45 }
0x1109   :  { %v3845_v10 = vpop.xlane.xlu1 %3844 }
0x110a   :  { %11397 = vrcp.f32 %v3845_v10 }
0x110e   :  { %v11392_v25 = vpop.eup %11391 }
0x110f   :  { %v3850_v18 = vmul.f32 %v11392_v25, %v12654_v36  ;;  %v11209_v36 = vld [vmem:[%s13876_s17 + $0x190] sm:$0xff]  }
0x1110   :  { %v11394_v35 = vpop.eup %11393 }
0x1111   :  { %v3851_v20 = vmul.f32 %v11394_v35, %v12658_v52  ;;  %v11210_v52 = vld [vmem:[%s13876_s17 + $0x198] sm:$0xff]  }
0x1112   :  { %v11396_v39 = vpop.eup %11395 }
0x1113   :  { %v3854_v56 = vpack.c.bf16 %v3851_v20, %v3850_v18  ;;  %v3852_v40 = vmul.f32 %v11396_v39, %v12662_v41  ;;  %v11211_v41 = vld [vmem:[%s13876_s17 + $0x1a0] sm:$0xff]  }
0x1114   :  { %v11398_v57 = vpop.eup %11397  ;;  %v12767_v39 = vld [vmem:[%s13873_s14 + $0x20] sm:$0xff]  }
0x1115   :  { %v3853_v59 = vmul.f32 %v11398_v57, %v12666_v54  ;;  %10394 = vmatprep.mubr.msk.bf16.mxu0 %vm125_vm0, %v3854_v56  ;;  %v11212_v54 = vld [vmem:[%s13876_s17 + $0x1a8] sm:$0xff]  }
0x1117   :  { %v3855_v60 = vpack.c.bf16 %v3853_v59, %v3852_v40 }
0x1119   :  { %10395 = vmatmul.mubr.msk.bf16.vlgmr.msra.gmra.mrb[60].mxu0 %vm125_vm0, %v3855_v60 }
0x111a   :  { %10399 = vmatpush3.bf16.msra.mxu0 %v11207_v49 }
0x111b   :  { %10400 = vmatprep.subr.bf16.mxu0 %v11208_v0 }
0x111e   :  { %10401 = vmatpush3.bf16.msra.mxu0 %v11208_v0 }
0x111f   :  { %10402 = vmatprep.subr.bf16.mxu0 %v11209_v36 }
0x1122   :  { %10403 = vmatpush3.bf16.msra.mxu0 %v11209_v36  ;;  %v11215_v36 = vld [vmem:[%s13876_s17 + $0x1c0] sm:$0xff]  }
0x1123   :  { %10404 = vmatprep.subr.bf16.mxu0 %v11210_v52 }
0x1126   :  { %10405 = vmatpush3.bf16.msra.mxu0 %v11210_v52 }
0x1127   :  { %10406 = vmatprep.subr.bf16.mxu0 %v11211_v41 }
0x112a   :  { %10407 = vmatpush3.bf16.msra.mxu0 %v11211_v41 }
0x112b   :  { %10408 = vmatprep.subr.bf16.mxu0 %v11212_v54 }
0x112e   :  { %10409 = vmatpush3.bf16.msra.mxu0 %v11212_v54 }
0x112f   :  { %10410 = vmatprep.subr.bf16.mxu0 %v11213_v1 }
0x1132   :  { %10411 = vmatpush3.bf16.msra.mxu0 %v11213_v1 }
0x1133   :  { %10412 = vmatprep.subr.bf16.mxu0 %v11214_v7 }
0x1136   :  { %10413 = vmatpush3.bf16.msra.mxu0 %v11214_v7 }
0x1137   :  { %10450 = vmatprep.subr.bf16.mxu0 %v12584_v47 }
0x115e   :  { %v4290_v2 = vpop.xlane.xlu0 %4289 }
0x115f   :  { %v4300_v50 = vsub.f32 %v12670_v58, %v4290_v2 }
0x1160   :  { %v4293_v53 = vpop.xlane.xlu1 %4292 }
0x1161   :  { %v4304_v55 = vmul.f32 1.442695, %v4300_v50  ;;  %v4301_v17 = vsub.f32 %v12674_v63, %v4293_v53 }
0x1162   :  { %v4296_v32 = vpop.xlane.xlu0 %4295 }
0x1163   :  { %11399 = vpow2.f32 %v4304_v55  ;;  %v4306_v19 = vmul.f32 1.442695, %v4301_v17  ;;  %v4302_v24 = vsub.f32 %v12672_v61, %v4296_v32 }
0x1164   :  { %v4299_v27 = vpop.xlane.xlu1 %4298 }
0x1165   :  { %11401 = vpow2.f32 %v4306_v19  ;;  %v4308_v37 = vmul.f32 1.442695, %v4302_v24  ;;  %v4303_v12 = vsub.f32 %v12678_v13, %v4299_v27  ;;  %v11216_v24 = vld [vmem:[%s13876_s17 + $0x1c8] sm:$0xff]   ;;  %v11217_v27 = vld [vmem:[%s13876_s17 + $0x1d0] sm:$0xff]  }
0x1167   :  { %11403 = vpow2.f32 %v4308_v37  ;;  %v4310_v14 = vmul.f32 1.442695, %v4303_v12  ;;  %v11218_v37 = vld [vmem:[%s13876_s17 + $0x1d8] sm:$0xff]   ;;  %v11219_v12 = vld [vmem:[%s13876_s17 + $0x1e0] sm:$0xff]  }
0x1169   :  { %11405 = vpow2.f32 %v4310_v14  ;;  %v11220_v14 = vld [vmem:[%s13876_s17 + $0x1e8] sm:$0xff]  }
0x116d   :  { %v12738_v15 = vpop.eup %11399 }
0x116e   :  { %v4312_v58 = vsel %vm125_vm0, %v12738_v15, 0.0 }
0x116f   :  { %v11402_v9 = vpop.eup %11401  ;;  %4313 = vadd.xlane.f32.xlu0 %v4312_v58  ;;  %v11222_v58 = vld [vmem:[%s13876_s17 + $0x1f8] sm:$0xff]  }
0x1170   :  { %v4315_v63 = vsel %vm125_vm0, %v11402_v9, 0.0 }
0x1171   :  { %v12743_v4 = vpop.eup %11403  ;;  %4316 = vadd.xlane.f32.xlu1 %v4315_v63 }
0x1172   :  { %v4318_v61 = vsel %vm125_vm0, %v12743_v4, 0.0 }
0x1173   :  { %v11406_v5 = vpop.eup %11405  ;;  %4319 = vadd.xlane.f32.xlu0 %v4318_v61 }
0x1174   :  { %v4321_v13 = vsel %vm125_vm0, %v11406_v5, 0.0 }
0x1175   :  { %4322 = vadd.xlane.f32.xlu1 %v4321_v13 }
0x11c5   :  { %v10508_v6 = vpop.f32.mrb[136].mxu1 }
0x11c6   :  { %v4738_v31 = vpop.f32.mrb[137].mxu1  ;;  %v12750_v26 = vmul.f32 0.5, %v10508_v6 }
0x11c7   :  { %v12748_v44 = vmul.f32 0.5, %v4738_v31  ;;  %v10509_v8 = vpop.f32.mrb[138].mxu1 }
0x11c8   :  { %v4741_v11 = vpop.f32.mrb[139].mxu1  ;;  %v12756_v48 = vmul.f32 0.5, %v10509_v8  ;;  %v4763_v22 = vsel %vm125_vm0, %v12750_v26, -inf }
0x11c9   :  { %v12752_v23 = vmul.f32 0.5, %v4741_v11  ;;  %v4757_v46 = vsel %vm125_vm0, %v12748_v44, -inf }
0x11ca   :  { %4758 = vmax.xlane.f32.xlu0 %v4757_v46  ;;  %v4766_v25 = vsel %vm125_vm0, %v12756_v48, -inf }
0x11cb   :  { %v4760_v49 = vsel %vm125_vm0, %v12752_v23, -inf }
0x11cc   :  { %4761 = vmax.xlane.f32.xlu1 %v4760_v49 }
0x11cd   :  { %v10532_v51 = vpop.f32.mrb[140].mxu1 }
0x11ce   :  { %4764 = vmax.xlane.f32.xlu0 %v4763_v22  ;;  %v4945_v45 = vpop.f32.mrb[141].mxu1 }
0x11cf   :  { %v10533_v10 = vpop.f32.mrb[142].mxu1 }
0x11d0   :  { %v5012_v35 = vpack.c.bf16 %v10533_v10, %v10532_v51  ;;  %v4948_v18 = vpop.f32.mrb[143].mxu1  ;;  %4767 = vmax.xlane.f32.xlu1 %v4766_v25 }
0x11d1   :  { %v5011_v20 = vpack.c.bf16 %v4948_v18, %v4945_v45 }
0x11d3   :  { %10542 = vmatprep.subr.bf16.mxu1 %v5011_v20 }
0x11d4   :  { %10543 = vmatpush3.bf16.xpose.msra.mxu1 %v5011_v20 }
0x11d5   :  { %10544 = vmatprep.subr.bf16.mxu1 %v5012_v35 }
0x11dc   :  { %10545 = vmatpush3.bf16.xpose.msra.mxu1 %v5012_v35 }
0x11dd   :  { %10598 = vmatprep.subr.bf16.mxu1 %v12767_v39 }
0x11ec   :  { %v10396_v56 = vpop.f32.mrb[60].mxu0 }
0x11ed   :  { %v3898_v57 = vpop.f32.mrb[61].mxu0 }
0x11ee   :  { %v10397_v40 = vpop.f32.mrb[62].mxu0 }
0x11ef   :  { %v3914_v59 = vpack.c.bf16 %v10397_v40, %v10396_v56  ;;  %v3901_v60 = vpop.f32.mrb[63].mxu0  ;;  %v11552_v40 = vld [vmem:[%s13873_s14 + $0x10] sm:$0xff]  }
0x11f0   :  { %v3913_v0 = vpack.c.bf16 %v3901_v60, %v3898_v57 }
0x11f2   :  { %10414 = vmatprep.mubr.bf16.mxu0 %v3913_v0 }
0x11f3   :  { %10415 = vmatmul.mubr.bf16.vlgmr.msra.gmra.mrb[48].mxu0 %v3914_v59 }
0x11f4   :  { %10451 = vmatpush3.bf16.msra.mxu0 %v12584_v47 }
0x11f5   :  { %10452 = vmatprep.subr.bf16.mxu0 %v12582_v34 }
0x11f8   :  { %10453 = vmatpush3.bf16.msra.mxu0 %v12582_v34 }
0x11f9   :  { %10458 = vmatprep.subr.bf16.mxu0 %v11215_v36 }
0x11fc   :  { %v4314_v52 = vpop.xlane.xlu0 %4313 }
0x11fd   :  { %11407 = vrcp.f32 %v4314_v52 }
0x11fe   :  { %v4317_v41 = vpop.xlane.xlu1 %4316 }
0x11ff   :  { %11409 = vrcp.f32 %v4317_v41 }
0x1200   :  { %v4320_v54 = vpop.xlane.xlu0 %4319 }
0x1201   :  { %11411 = vrcp.f32 %v4320_v54 }
0x1202   :  { %v4323_v1 = vpop.xlane.xlu1 %4322 }
0x1203   :  { %11413 = vrcp.f32 %v4323_v1 }
0x1207   :  { %v11408_v7 = vpop.eup %11407 }
0x1208   :  { %v4328_v47 = vmul.f32 %v11408_v7, %v12738_v15  ;;  %v11221_v15 = vld [vmem:[%s13876_s17 + $0x1f0] sm:$0xff]  }
0x1209   :  { %v11410_v2 = vpop.eup %11409 }
0x120a   :  { %v4329_v50 = vmul.f32 %v11410_v2, %v11402_v9 }
0x120b   :  { %v11412_v53 = vpop.eup %11411 }
0x120c   :  { %v4332_v55 = vpack.c.bf16 %v4329_v50, %v4328_v47  ;;  %v4330_v32 = vmul.f32 %v11412_v53, %v12743_v4  ;;  %v11553_v53 = vld [vmem:[%s13873_s14 + $0x18] sm:$0xff]  }
0x120d   :  { %v11414_v17 = vpop.eup %11413 }
0x120e   :  { %v4331_v34 = vmul.f32 %v11414_v17, %v11406_v5  ;;  %10454 = vmatprep.mubr.msk.bf16.mxu0 %vm125_vm0, %v4332_v55  ;;  %v11554_v55 = vld [vmem:[%s13875_s16 + $0x10] sm:$0xff]   ;;  %v11555_v17 = vld [vmem:[%s13875_s16 + $0x18] sm:$0xff]  }
0x1210   :  { %v4333_v19 = vpack.c.bf16 %v4331_v34, %v4330_v32  ;;  %v9133_v32 = vld [vmem:[%s13877_s18] ss:$0 sm:$0xff] }
0x1212   :  { %10455 = vmatmul.mubr.msk.bf16.vlgmr.msra.gmra.mrb[64].mxu0 %vm125_vm0, %v4333_v19 }
0x1213   :  { %10459 = vmatpush3.bf16.msra.mxu0 %v11215_v36 }
0x1214   :  { %10460 = vmatprep.subr.bf16.mxu0 %v11216_v24 }
0x1217   :  { %10461 = vmatpush3.bf16.msra.mxu0 %v11216_v24 }
0x1218   :  { %10462 = vmatprep.subr.bf16.mxu0 %v11217_v27 }
0x121b   :  { %10463 = vmatpush3.bf16.msra.mxu0 %v11217_v27 }
0x121c   :  { %10464 = vmatprep.subr.bf16.mxu0 %v11218_v37 }
0x121f   :  { %10465 = vmatpush3.bf16.msra.mxu0 %v11218_v37 }
0x1220   :  { %10466 = vmatprep.subr.bf16.mxu0 %v11219_v12 }
0x1223   :  { %10467 = vmatpush3.bf16.msra.mxu0 %v11219_v12 }
0x1224   :  { %10468 = vmatprep.subr.bf16.mxu0 %v11220_v14 }
0x1227   :  { %10469 = vmatpush3.bf16.msra.mxu0 %v11220_v14 }
0x1228   :  { %10470 = vmatprep.subr.bf16.mxu0 %v11221_v15 }
0x122b   :  { %10471 = vmatpush3.bf16.msra.mxu0 %v11221_v15 }
0x122c   :  { %10472 = vmatprep.subr.bf16.mxu0 %v11222_v58 }
0x122f   :  { %10473 = vmatpush3.bf16.msra.mxu0 %v11222_v58 }
0x1230   :  { %10510 = vmatprep.subr.bf16.mxu0 %v12688_v30 }
0x1257   :  { %v4759_v9 = vpop.xlane.xlu0 %4758 }
0x1258   :  { %v4769_v63 = vsub.f32 %v12748_v44, %v4759_v9 }
0x1259   :  { %v4762_v4 = vpop.xlane.xlu1 %4761 }
0x125a   :  { %v4773_v61 = vmul.f32 1.442695, %v4769_v63  ;;  %v4770_v5 = vsub.f32 %v12752_v23, %v4762_v4 }
0x125b   :  { %v4765_v13 = vpop.xlane.xlu0 %4764 }
0x125c   :  { %11415 = vpow2.f32 %v4773_v61  ;;  %v4775_v6 = vmul.f32 1.442695, %v4770_v5  ;;  %v4771_v31 = vsub.f32 %v12750_v26, %v4765_v13 }
0x125d   :  { %v4768_v8 = vpop.xlane.xlu1 %4767 }
0x125e   :  { %11417 = vpow2.f32 %v4775_v6  ;;  %v4777_v11 = vmul.f32 1.442695, %v4771_v31  ;;  %v4772_v46 = vsub.f32 %v12756_v48, %v4768_v8 }
0x1260   :  { %11419 = vpow2.f32 %v4777_v11  ;;  %v4779_v49 = vmul.f32 1.442695, %v4772_v46 }
0x1262   :  { %11421 = vpow2.f32 %v4779_v49 }
0x1266   :  { %v11416_v51 = vpop.eup %11415 }
0x1267   :  { %v4781_v44 = vsel %vm125_vm0, %v11416_v51, 0.0 }
0x1268   :  { %v11418_v22 = vpop.eup %11417  ;;  %4782 = vadd.xlane.f32.xlu0 %v4781_v44 }
0x1269   :  { %v4784_v23 = vsel %vm125_vm0, %v11418_v22, 0.0 }
0x126a   :  { %v11420_v45 = vpop.eup %11419  ;;  %4785 = vadd.xlane.f32.xlu1 %v4784_v23 }
0x126b   :  { %v4787_v10 = vsel %vm125_vm0, %v11420_v45, 0.0 }
0x126c   :  { %v11422_v26 = vpop.eup %11421  ;;  %4788 = vadd.xlane.f32.xlu0 %v4787_v10 }
0x126d   :  { %v4790_v25 = vsel %vm125_vm0, %v11422_v26, 0.0 }
0x126e   :  { %4791 = vadd.xlane.f32.xlu1 %v4790_v25 }
0x12e5   :  { %v10456_v48 = vpop.f32.mrb[64].mxu0 }
0x12e6   :  { %v4376_v35 = vpop.f32.mrb[65].mxu0 }
0x12e7   :  { %v10457_v18 = vpop.f32.mrb[66].mxu0 }
0x12e8   :  { %v4392_v20 = vpack.c.bf16 %v10457_v18, %v10456_v48  ;;  %v4379_v56 = vpop.f32.mrb[67].mxu0  ;;  %v11556_v48 = vld [vmem:[%s13873_s14 + $0x28] sm:$0xff]  }
0x12e9   :  { %v4391_v57 = vpack.c.bf16 %v4379_v56, %v4376_v35 }
0x12eb   :  { %10474 = vmatprep.mubr.bf16.mxu0 %v4391_v57  ;;  %v11557_v57 = vld [vmem:[%s13874_s15 + $0x20] sm:$0xff]  }
0x12ec   :  { %10475 = vmatmul.mubr.bf16.vlgmr.msra.gmra.mrb[48].mxu0 %v4392_v20 }
0x12ed   :  { %10511 = vmatpush3.bf16.msra.mxu0 %v12688_v30 }
0x12ee   :  { %10512 = vmatprep.subr.bf16.mxu0 %v12686_v38 }
0x12f1   :  { %10513 = vmatpush3.bf16.msra.mxu0 %v12686_v38 }
0x12f2   :  { %10518 = vmatprep.subr.bf16.mxu0 %v11552_v40 }
0x12f5   :  { %v4783_v59 = vpop.xlane.xlu0 %4782 }
0x12f6   :  { %11423 = vrcp.f32 %v4783_v59  ;;  %v11560_v59 = vld [vmem:[%s13875_s16 + $0x20] sm:$0xff]  }
0x12f7   :  { %v4786_v60 = vpop.xlane.xlu1 %4785 }
0x12f8   :  { %11425 = vrcp.f32 %v4786_v60  ;;  %v11561_v60 = vld [vmem:[%s13875_s16 + $0x28] sm:$0xff]  }
0x12f9   :  { %v4789_v0 = vpop.xlane.xlu0 %4788 }
0x12fa   :  { %11427 = vrcp.f32 %v4789_v0 }
0x12fb   :  { %v4792_v36 = vpop.xlane.xlu1 %4791 }
0x12fc   :  { %11429 = vrcp.f32 %v4792_v36 }
0x1300   :  { %v11424_v52 = vpop.eup %11423 }
0x1301   :  { %v4797_v30 = vmul.f32 %v11424_v52, %v11416_v51 }
0x1302   :  { %v11426_v41 = vpop.eup %11425 }
0x1303   :  { %v4798_v54 = vmul.f32 %v11426_v41, %v11418_v22 }
0x1304   :  { %v11428_v1 = vpop.eup %11427 }
0x1305   :  { %v4801_v7 = vpack.c.bf16 %v4798_v54, %v4797_v30  ;;  %v4799_v2 = vmul.f32 %v11428_v1, %v11420_v45 }
0x1306   :  { %v11430_v38 = vpop.eup %11429 }
0x1307   :  { %v4800_v47 = vmul.f32 %v11430_v38, %v11422_v26  ;;  %10514 = vmatprep.mubr.msk.bf16.mxu0 %vm125_vm0, %v4801_v7 }
0x1309   :  { %v4802_v50 = vpack.c.bf16 %v4800_v47, %v4799_v2 }
0x130b   :  { %10515 = vmatmul.mubr.msk.bf16.vlgmr.msra.gmra.mrb[68].mxu0 %vm125_vm0, %v4802_v50 }
0x130c   :  { %10519 = vmatpush3.bf16.msra.mxu0 %v11552_v40  ;;  %10522 = vmatprep.mubr.msk.bf16.mxu0 %vm125_vm0, %v12002_v43  ;;  %v12875_v40 = vld [vmem:[%s13876_s17 + $0x40] sm:$0xff]  }
0x130d   :  { %10520 = vmatprep.subr.bf16.mxu0 %v11553_v53 }
0x1310   :  { %10521 = vmatpush3.bf16.msra.mxu0 %v11553_v53 }
0x1311   :  { %10534 = vmatprep.subr.bf16.mxu0 %v11554_v55 }
0x1313   :  { %10523 = vmatmul.mubr.msk.bf16.vlgmr.msra.gmra.mrb[72].mxu0 %vm125_vm0, %v12000_v42 }
0x1314   :  { %10535 = vmatpush3.bf16.msra.mxu0 %v11554_v55  ;;  %10538 = vmatprep.mubr.msk.bf16.mxu0 %vm125_vm0, %v12002_v43 }
0x1315   :  { %10536 = vmatprep.subr.bf16.mxu0 %v11555_v17 }
0x1318   :  { %10537 = vmatpush3.bf16.msra.mxu0 %v11555_v17 }
0x131b   :  { %10539 = vmatmul.mubr.msk.bf16.vlgmr.msra.gmra.mrb[76].mxu0 %vm125_vm0, %v12000_v42 }
0x13bf   :  { %v10476_v34 = vpop.f32.mrb[48].mxu0 }
0x13c0   :  { %v4492_v19 = vpop.f32.mrb[49].mxu0  ;;  %v4520_v12 = vadd.f32 %v10476_v34, %v9133_v32 }
0x13c1   :  { %v4518_v24 = vadd.f32 %v9133_v32, %v4492_v19  ;;  %v10477_v27 = vpop.f32.mrb[50].mxu0 }
0x13c2   :  { %v4495_v37 = vpop.f32.mrb[51].mxu0  ;;  %v4521_v58 = vadd.f32 %v10477_v27, %v9133_v32  ;;  %v4525_v4 = vsel %vm125_vm0, %v4520_v12, 0.0 }
0x13c3   :  { %v4519_v14 = vadd.f32 %v9133_v32, %v4495_v37  ;;  %v4522_v15 = vsel %vm125_vm0, %v4518_v24, 0.0 }
0x13c4   :  { %v4527_v5 = vsel %vm125_vm0, %v4521_v58, 0.0 }
0x13c5   :  { %v4523_v9 = vsel %vm125_vm0, %v4519_v14, 0.0  ;;  %v12901_v14 = vld [vmem:[%s13873_s14 + $0x30] sm:$0xff]  }
0x13c6   :  { %v4524_v63 = vadd.f32 %v4523_v9, %v4522_v15 }
0x13c8   :  { %v4526_v61 = vadd.f32 %v4525_v4, %v4524_v63 }
0x13ca   :  { %v12842_v13 = vadd.f32 %v4527_v5, %v4526_v61 }
0x13de   :  { %v12844_v6 = vpop.f32.mrb[68].mxu0 }
0x13df   :  { %v12846_v31 = vpop.f32.mrb[69].mxu0 }
0x13e0   :  { %v12848_v8 = vpop.f32.mrb[70].mxu0 }
0x13e1   :  { %v4861_v11 = vpack.c.bf16 %v12848_v8, %v12844_v6  ;;  %v12852_v46 = vpop.f32.mrb[71].mxu0  ;;  %v11598_v6 = vld [vmem:[%s13876_s17 + $0x98] sm:$0xff]   ;;  %v11599_v8 = vld [vmem:[%s13876_s17 + $0xa0] sm:$0xff]  }
0x13e2   :  { %v4860_v49 = vpack.c.bf16 %v12852_v46, %v12846_v31  ;;  %v11591_v31 = vld [vmem:[%s13876_s17 + $0x20] sm:$0xff]   ;;  %v11592_v46 = vld [vmem:[%s13876_s17 + $0x28] sm:$0xff]  }
0x13e6   :  { %v10524_v51 = vpop.f32.mrb[72].mxu0 }
0x13e7   :  { %v4896_v44 = vpop.f32.mrb[73].mxu0 }
0x13e8   :  { %v10525_v22 = vpop.f32.mrb[74].mxu0 }
0x13e9   :  { %v5010_v23 = vpack.c.bf16 %v10525_v22, %v10524_v51  ;;  %v4899_v45 = vpop.f32.mrb[75].mxu0 }
0x13ea   :  { %v5009_v10 = vpack.c.bf16 %v4899_v45, %v4896_v44 }
0x13ec   :  { %10546 = vmatprep.mubr.bf16.mxu1 %v5009_v10 }
0x13ed   :  { %10547 = vmatmul.mubr.bf16.vlgmr.msra.gmra.mrb[144].mxu1 %v5010_v23 }
0x13ee   :  { %v10540_v26 = vpop.f32.mrb[76].mxu0  ;;  %10599 = vmatpush3.bf16.msra.mxu1 %v12767_v39  ;;  %10602 = vmatprep.mubr.msk.bf16.mxu1 %vm125_vm0, %v12002_v43  ;;  %v11558_v39 = vld [vmem:[%s13874_s15 + $0x28] sm:$0xff]  }
0x13ef   :  { %v4994_v25 = vpop.f32.mrb[77].mxu0  ;;  %10600 = vmatprep.subr.bf16.mxu1 %v11556_v48 }
0x13f0   :  { %v10541_v35 = vpop.f32.mrb[78].mxu0 }
0x13f1   :  { %v5113_v18 = vpack.c.bf16 %v10541_v35, %v10540_v26  ;;  %v4997_v20 = vpop.f32.mrb[79].mxu0 }
0x13f2   :  { %v5112_v56 = vpack.c.bf16 %v4997_v20, %v4994_v25  ;;  %10601 = vmatpush3.bf16.msra.mxu1 %v11556_v48 }
0x13f3   :  { %10606 = vmatprep.subr.bf16.mxu1 %v11557_v57 }
0x13f4   :  { %10550 = vmatprep.subr.bf16.mxu0 %v5112_v56 }
0x13f5   :  { %10551 = vmatpush3.bf16.msra.mxu0 %v5112_v56  ;;  %10603 = vmatmul.mubr.msk.bf16.vlgmr.msra.gmra.mrb[148].mxu1 %vm125_vm0, %v12000_v42 }
0x13f6   :  { %10552 = vmatprep.subr.bf16.mxu0 %v5113_v18  ;;  %10607 = vmatpush3.bf16.msra.mxu1 %v11557_v57 }
0x13f7   :  { %10610 = vmatprep.mubr.msk.bf16.mxu1 %vm125_vm0, %v12002_v43  ;;  %10608 = vmatprep.subr.bf16.mxu1 %v11558_v39 }
0x13f9   :  { %10553 = vmatpush3.bf16.msra.mxu0 %v5113_v18 }
0x13fa   :  { %10609 = vmatpush3.bf16.msra.mxu1 %v11558_v39  ;;  %10558 = vmatprep.subr.bf16.mxu0 %v12875_v40 }
0x13fb   :  { %10614 = vmatprep.subr.bf16.mxu1 %v11560_v59 }
0x13fd   :  { %10611 = vmatmul.mubr.msk.bf16.vlgmr.msra.gmra.mrb[152].mxu1 %vm125_vm0, %v12000_v42 }
0x13fe   :  { %10615 = vmatpush3.bf16.msra.mxu1 %v11560_v59  ;;  %10618 = vmatprep.mubr.msk.bf16.mxu1 %vm125_vm0, %v12002_v43 }
0x13ff   :  { %10616 = vmatprep.subr.bf16.mxu1 %v11561_v60 }
0x1402   :  { %10617 = vmatpush3.bf16.msra.mxu1 %v11561_v60 }
0x1405   :  { %10619 = vmatmul.mubr.msk.bf16.vlgmr.msra.gmra.mrb[156].mxu1 %vm125_vm0, %v12000_v42 }
0x14c0   :  { %v12890_v0 = vpop.f32.mrb[144].mxu1 }
0x14c1   :  { %v12892_v36 = vpop.f32.mrb[145].mxu1 }
0x14c2   :  { %v12894_v52 = vpop.f32.mrb[146].mxu1 }
0x14c3   :  { %v12896_v41 = vpop.f32.mrb[147].mxu1 }
0x14c8   :  { %v10604_v30 = vpop.f32.mrb[148].mxu1 }
0x14c9   :  { %v5303_v54 = vpop.f32.mrb[149].mxu1 }
0x14ca   :  { %v10605_v1 = vpop.f32.mrb[150].mxu1 }
0x14cb   :  { %v5417_v7 = vpack.c.bf16 %v10605_v1, %v10604_v30  ;;  %v5306_v38 = vpop.f32.mrb[151].mxu1 }
0x14cc   :  { %v5416_v2 = vpack.c.bf16 %v5306_v38, %v5303_v54 }
0x14ce   :  { %10626 = vmatprep.mubr.bf16.mxu1 %v5416_v2 }
0x14d0   :  { %v10612_v47 = vpop.f32.mrb[152].mxu1 }
0x14d1   :  { %v5352_v50 = vpop.f32.mrb[153].mxu1 }
0x14d2   :  { %v10613_v53 = vpop.f32.mrb[154].mxu1 }
0x14d3   :  { %v5419_v55 = vpack.c.bf16 %v10613_v53, %v10612_v47  ;;  %v5355_v17 = vpop.f32.mrb[155].mxu1 }
0x14d4   :  { %v5418_v32 = vpack.c.bf16 %v5355_v17, %v5352_v50 }
0x14d6   :  { %10622 = vmatprep.subr.bf16.mxu1 %v5418_v32 }
0x14d7   :  { %10623 = vmatpush3.bf16.xpose.msra.mxu1 %v5418_v32 }
0x14d8   :  { %v10620_v34 = vpop.f32.mrb[156].mxu1  ;;  %10624 = vmatprep.subr.bf16.mxu1 %v5419_v55 }
0x14d9   :  { %v5401_v19 = vpop.f32.mrb[157].mxu1 }
0x14da   :  { %v10621_v24 = vpop.f32.mrb[158].mxu1 }
0x14db   :  { %v5520_v27 = vpack.c.bf16 %v10621_v24, %v10620_v34  ;;  %v5404_v37 = vpop.f32.mrb[159].mxu1 }
0x14dc   :  { %v5519_v12 = vpack.c.bf16 %v5404_v37, %v5401_v19 }
0x14df   :  { %10625 = vmatpush3.bf16.xpose.msra.mxu1 %v5419_v55 }
0x14e0   :  { %10630 = vmatprep.subr.bf16.mxu1 %v5519_v12 }
0x14e6   :  { %10627 = vmatmul.mubr.bf16.vlgmr.msra.gmra.mrb[160].mxu1 %v5417_v7 }
0x14e7   :  { %10631 = vmatpush3.bf16.msra.mxu1 %v5519_v12 }
0x14e8   :  { %10632 = vmatprep.subr.bf16.mxu1 %v5520_v27 }
0x14eb   :  { %10633 = vmatpush3.bf16.msra.mxu1 %v5520_v27 }
0x14ec   :  { %10658 = vmatprep.subr.bf16.mxu1 %v12901_v14 }
0x15b9   :  { %v10628_v15 = vpop.f32.mrb[160].mxu1 }
0x15ba   :  { %v5454_v58 = vpop.f32.mrb[161].mxu1  ;;  %v5471_v61 = vmul.f32 0.5, %v10628_v15 }
0x15bb   :  { %v5469_v9 = vmul.f32 0.5, %v5454_v58  ;;  %v10629_v63 = vpop.f32.mrb[162].mxu1 }
0x15bc   :  { %v5457_v4 = vpop.f32.mrb[163].mxu1  ;;  %v5472_v44 = vmul.f32 0.5, %v10629_v63  ;;  %v5479_v23 = vsel %vm125_vm0, %v5471_v61, -inf }
0x15bd   :  { %v5470_v5 = vmul.f32 0.5, %v5457_v4  ;;  %v5473_v51 = vsel %vm125_vm0, %v5469_v9, -inf  ;;  %v11563_v4 = vld [vmem:[%s13873_s14 + $0x38] sm:$0xff]  }
0x15be   :  { %5474 = vmax.xlane.f32.xlu0 %v5473_v51  ;;  %v5482_v45 = vsel %vm125_vm0, %v5472_v44, -inf  ;;  %v11567_v51 = vld [vmem:[%s13875_s16 + $0x38] sm:$0xff]  }
0x15bf   :  { %v5476_v22 = vsel %vm125_vm0, %v5470_v5, -inf }
0x15c0   :  { %5477 = vmax.xlane.f32.xlu1 %v5476_v22 }
0x15c2   :  { %5480 = vmax.xlane.f32.xlu0 %v5479_v23 }
0x15c4   :  { %5483 = vmax.xlane.f32.xlu1 %v5482_v45 }
0x164b   :  { %v5475_v10 = vpop.xlane.xlu0 %5474 }
0x164c   :  { %v5485_v26 = vsub.f32 %v5469_v9, %v5475_v10 }
0x164d   :  { %v5478_v25 = vpop.xlane.xlu1 %5477 }
0x164e   :  { %v5489_v48 = vmul.f32 1.442695, %v5485_v26  ;;  %v5486_v35 = vsub.f32 %v5470_v5, %v5478_v25  ;;  %v11566_v5 = vld [vmem:[%s13875_s16 + $0x30] sm:$0xff]  }
0x164f   :  { %v5481_v18 = vpop.xlane.xlu0 %5480 }
0x1650   :  { %11431 = vpow2.f32 %v5489_v48  ;;  %v5491_v20 = vmul.f32 1.442695, %v5486_v35  ;;  %v5487_v56 = vsub.f32 %v5471_v61, %v5481_v18  ;;  %v11564_v61 = vld [vmem:[%s13874_s15 + $0x30] sm:$0xff]  }
0x1651   :  { %v5484_v57 = vpop.xlane.xlu1 %5483 }
0x1652   :  { %11433 = vpow2.f32 %v5491_v20  ;;  %v5493_v39 = vmul.f32 1.442695, %v5487_v56  ;;  %v5488_v59 = vsub.f32 %v5472_v44, %v5484_v57 }
0x1654   :  { %11435 = vpow2.f32 %v5493_v39  ;;  %v5495_v60 = vmul.f32 1.442695, %v5488_v59 }
0x1656   :  { %11437 = vpow2.f32 %v5495_v60 }
0x165a   :  { %v11432_v30 = vpop.eup %11431 }
0x165b   :  { %v5497_v54 = vsel %vm125_vm0, %v11432_v30, 0.0 }
0x165c   :  { %v11434_v1 = vpop.eup %11433  ;;  %5498 = vadd.xlane.f32.xlu0 %v5497_v54 }
0x165d   :  { %v5500_v7 = vsel %vm125_vm0, %v11434_v1, 0.0 }
0x165e   :  { %v11436_v38 = vpop.eup %11435  ;;  %5501 = vadd.xlane.f32.xlu1 %v5500_v7 }
0x165f   :  { %v5503_v2 = vsel %vm125_vm0, %v11436_v38, 0.0 }
0x1660   :  { %v11438_v47 = vpop.eup %11437  ;;  %5504 = vadd.xlane.f32.xlu0 %v5503_v2 }
0x1661   :  { %v5506_v50 = vsel %vm125_vm0, %v11438_v47, 0.0 }
0x1662   :  { %5507 = vadd.xlane.f32.xlu1 %v5506_v50 }
0x16e9   :  { %v5499_v53 = vpop.xlane.xlu0 %5498 }
0x16ea   :  { %11439 = vrcp.f32 %v5499_v53  ;;  %v12957_v53 = vld [vmem:[%s13873_s14 + $0x40] sm:$0xff]  }
0x16eb   :  { %v5502_v55 = vpop.xlane.xlu1 %5501 }
0x16ec   :  { %11441 = vrcp.f32 %v5502_v55 }
0x16ed   :  { %v5505_v17 = vpop.xlane.xlu0 %5504 }
0x16ee   :  { %11443 = vrcp.f32 %v5505_v17 }
0x16ef   :  { %v5508_v32 = vpop.xlane.xlu1 %5507 }
0x16f0   :  { %11445 = vrcp.f32 %v5508_v32 }
0x16f4   :  { %v11440_v34 = vpop.eup %11439 }
0x16f5   :  { %v5513_v24 = vmul.f32 %v11440_v34, %v11432_v30 }
0x16f6   :  { %v11442_v19 = vpop.eup %11441 }
0x16f7   :  { %v5514_v27 = vmul.f32 %v11442_v19, %v11434_v1 }
0x16f8   :  { %v11444_v37 = vpop.eup %11443 }
0x16f9   :  { %v5517_v12 = vpack.c.bf16 %v5514_v27, %v5513_v24  ;;  %v5515_v58 = vmul.f32 %v11444_v37, %v11436_v38 }
0x16fa   :  { %v11446_v15 = vpop.eup %11445 }
0x16fb   :  { %v5516_v9 = vmul.f32 %v11446_v15, %v11438_v47  ;;  %10634 = vmatprep.mubr.msk.bf16.mxu1 %vm125_vm0, %v5517_v12 }
0x16fd   :  { %v5518_v63 = vpack.c.bf16 %v5516_v9, %v5515_v58 }
0x16ff   :  { %10635 = vmatmul.mubr.msk.bf16.vlgmr.msra.gmra.mrb[164].mxu1 %vm125_vm0, %v5518_v63 }
0x1700   :  { %10659 = vmatpush3.bf16.msra.mxu1 %v12901_v14  ;;  %10662 = vmatprep.mubr.msk.bf16.mxu1 %vm125_vm0, %v12002_v43  ;;  %v11565_v14 = vld [vmem:[%s13874_s15 + $0x38] sm:$0xff]  }
0x1701   :  { %10660 = vmatprep.subr.bf16.mxu1 %v11563_v4 }
0x1704   :  { %10661 = vmatpush3.bf16.msra.mxu1 %v11563_v4 }
0x1705   :  { %10666 = vmatprep.subr.bf16.mxu1 %v11564_v61 }
0x1707   :  { %10663 = vmatmul.mubr.msk.bf16.vlgmr.msra.gmra.mrb[168].mxu1 %vm125_vm0, %v12000_v42 }
0x1708   :  { %10667 = vmatpush3.bf16.msra.mxu1 %v11564_v61  ;;  %10670 = vmatprep.mubr.msk.bf16.mxu1 %vm125_vm0, %v12002_v43 }
0x1709   :  { %10668 = vmatprep.subr.bf16.mxu1 %v11565_v14 }
0x170c   :  { %10669 = vmatpush3.bf16.msra.mxu1 %v11565_v14 }
0x170d   :  { %10674 = vmatprep.subr.bf16.mxu1 %v11566_v5 }
0x170f   :  { %10671 = vmatmul.mubr.msk.bf16.vlgmr.msra.gmra.mrb[172].mxu1 %vm125_vm0, %v12000_v42 }
0x1710   :  { %10675 = vmatpush3.bf16.msra.mxu1 %v11566_v5  ;;  %10678 = vmatprep.mubr.msk.bf16.mxu1 %vm125_vm0, %v12002_v43 }
0x1711   :  { %10676 = vmatprep.subr.bf16.mxu1 %v11567_v51 }
0x1714   :  { %10677 = vmatpush3.bf16.msra.mxu1 %v11567_v51 }
0x1717   :  { %10679 = vmatmul.mubr.msk.bf16.vlgmr.msra.gmra.mrb[176].mxu1 %vm125_vm0, %v12000_v42 }
0x17d2   :  { %v12942_v44 = vpop.f32.mrb[164].mxu1 }
0x17d3   :  { %v12944_v22 = vpop.f32.mrb[165].mxu1 }
0x17d4   :  { %v12946_v23 = vpop.f32.mrb[166].mxu1 }
0x17d5   :  { %v5577_v45 = vpack.c.bf16 %v12946_v23, %v12942_v44  ;;  %v12950_v10 = vpop.f32.mrb[167].mxu1  ;;  %v11606_v44 = vld [vmem:[%s13876_s17 + $0xd8] sm:$0xff]  }
0x17d6   :  { %v5576_v26 = vpack.c.bf16 %v12950_v10, %v12944_v22  ;;  %v11601_v22 = vld [vmem:[%s13876_s17 + $0xb0] sm:$0xff]   ;;  %v11602_v10 = vld [vmem:[%s13876_s17 + $0xb8] sm:$0xff]  }
0x17da   :  { %v10664_v25 = vpop.f32.mrb[168].mxu1 }
0x17db   :  { %v5665_v48 = vpop.f32.mrb[169].mxu1 }
0x17dc   :  { %v10665_v35 = vpop.f32.mrb[170].mxu1 }
0x17dd   :  { %v5779_v18 = vpack.c.bf16 %v10665_v35, %v10664_v25  ;;  %v5668_v20 = vpop.f32.mrb[171].mxu1 }
0x17de   :  { %v5778_v56 = vpack.c.bf16 %v5668_v20, %v5665_v48 }
0x17e0   :  { %10686 = vmatprep.mubr.bf16.mxu1 %v5778_v56 }
0x17e2   :  { %v10672_v57 = vpop.f32.mrb[172].mxu1 }
0x17e3   :  { %v5714_v39 = vpop.f32.mrb[173].mxu1 }
0x17e4   :  { %v10673_v59 = vpop.f32.mrb[174].mxu1 }
0x17e5   :  { %v5781_v60 = vpack.c.bf16 %v10673_v59, %v10672_v57  ;;  %v5717_v30 = vpop.f32.mrb[175].mxu1 }
0x17e6   :  { %v5780_v54 = vpack.c.bf16 %v5717_v30, %v5714_v39 }
0x17e8   :  { %10682 = vmatprep.subr.bf16.mxu1 %v5780_v54 }
0x17e9   :  { %10683 = vmatpush3.bf16.xpose.msra.mxu1 %v5780_v54  ;;  %v5062_v54 = vmul.f32 0.5, %v12892_v36 }
0x17ea   :  { %v10680_v1 = vpop.f32.mrb[176].mxu1  ;;  %10684 = vmatprep.subr.bf16.mxu1 %v5781_v60 }
0x17eb   :  { %v5763_v7 = vpop.f32.mrb[177].mxu1 }
0x17ec   :  { %v10681_v38 = vpop.f32.mrb[178].mxu1 }
0x17ed   :  { %v5882_v2 = vpack.c.bf16 %v10681_v38, %v10680_v1  ;;  %v5766_v47 = vpop.f32.mrb[179].mxu1  ;;  %v5063_v38 = vmul.f32 0.5, %v12896_v41 }
0x17ee   :  { %v5881_v50 = vpack.c.bf16 %v5766_v47, %v5763_v7  ;;  %v5064_v47 = vmul.f32 0.5, %v12890_v0 }
0x17f0   :  { %v5072_v36 = vsel %vm125_vm0, %v5064_v47, -inf }
0x17f1   :  { %10685 = vmatpush3.bf16.xpose.msra.mxu1 %v5781_v60 }
0x17f2   :  { %10690 = vmatprep.subr.bf16.mxu1 %v5881_v50 }
0x17f8   :  { %10687 = vmatmul.mubr.bf16.vlgmr.msra.gmra.mrb[180].mxu1 %v5779_v18 }
0x17f9   :  { %10691 = vmatpush3.bf16.msra.mxu1 %v5881_v50  ;;  %v5066_v50 = vsel %vm125_vm0, %v5062_v54, -inf }
0x17fa   :  { %10692 = vmatprep.subr.bf16.mxu1 %v5882_v2 }
0x17fd   :  { %10693 = vmatpush3.bf16.msra.mxu1 %v5882_v2 }
0x17fe   :  { %10718 = vmatprep.subr.bf16.mxu1 %v12957_v53 }
0x18cb   :  { %v10688_v55 = vpop.f32.mrb[180].mxu1 }
0x18cc   :  { %v5816_v17 = vpop.f32.mrb[181].mxu1  ;;  %v5833_v24 = vmul.f32 0.5, %v10688_v55  ;;  %v5065_v55 = vmul.f32 0.5, %v12894_v52 }
0x18cd   :  { %v5831_v32 = vmul.f32 0.5, %v5816_v17  ;;  %v10689_v34 = vpop.f32.mrb[182].mxu1  ;;  %v5069_v17 = vsel %vm125_vm0, %v5063_v38, -inf }
0x18ce   :  { %v5819_v19 = vpop.f32.mrb[183].mxu1  ;;  %v5834_v12 = vmul.f32 0.5, %v10689_v34  ;;  %v5841_v58 = vsel %vm125_vm0, %v5833_v24, -inf }
0x18cf   :  { %v5832_v27 = vmul.f32 0.5, %v5819_v19  ;;  %v5835_v37 = vsel %vm125_vm0, %v5831_v32, -inf }
0x18d0   :  { %5836 = vmax.xlane.f32.xlu0 %v5835_v37  ;;  %v5844_v9 = vsel %vm125_vm0, %v5834_v12, -inf }
0x18d1   :  { %v5838_v15 = vsel %vm125_vm0, %v5832_v27, -inf }
0x18d2   :  { %5839 = vmax.xlane.f32.xlu1 %v5838_v15 }
0x18d4   :  { %5842 = vmax.xlane.f32.xlu0 %v5841_v58 }
0x18d6   :  { %5845 = vmax.xlane.f32.xlu1 %v5844_v9 }
0x195d   :  { %v5837_v63 = vpop.xlane.xlu0 %5836 }
0x195e   :  { %v5847_v4 = vsub.f32 %v5831_v32, %v5837_v63  ;;  %v5075_v32 = vsel %vm125_vm0, %v5065_v55, -inf }
0x195f   :  { %v5840_v61 = vpop.xlane.xlu1 %5839 }
0x1960   :  { %v5851_v14 = vmul.f32 1.442695, %v5847_v4  ;;  %v5848_v5 = vsub.f32 %v5832_v27, %v5840_v61 }
0x1961   :  { %v5843_v51 = vpop.xlane.xlu0 %5842 }
0x1962   :  { %11447 = vpow2.f32 %v5851_v14  ;;  %v5853_v25 = vmul.f32 1.442695, %v5848_v5  ;;  %v5849_v48 = vsub.f32 %v5833_v24, %v5843_v51 }
0x1963   :  { %v5846_v35 = vpop.xlane.xlu1 %5845 }
0x1964   :  { %11449 = vpow2.f32 %v5853_v25  ;;  %v5855_v18 = vmul.f32 1.442695, %v5849_v48  ;;  %v5850_v20 = vsub.f32 %v5834_v12, %v5846_v35 }
0x1966   :  { %11451 = vpow2.f32 %v5855_v18  ;;  %v5857_v56 = vmul.f32 1.442695, %v5850_v20 }
0x1968   :  { %11453 = vpow2.f32 %v5857_v56 }
0x196c   :  { %v11448_v57 = vpop.eup %11447 }
0x196d   :  { %v5859_v39 = vsel %vm125_vm0, %v11448_v57, 0.0 }
0x196e   :  { %v11450_v59 = vpop.eup %11449  ;;  %5860 = vadd.xlane.f32.xlu0 %v5859_v39 }
0x196f   :  { %v5862_v60 = vsel %vm125_vm0, %v11450_v59, 0.0 }
0x1970   :  { %v11452_v30 = vpop.eup %11451  ;;  %5863 = vadd.xlane.f32.xlu1 %v5862_v60 }
0x1971   :  { %v5865_v1 = vsel %vm125_vm0, %v11452_v30, 0.0 }
0x1972   :  { %v11454_v7 = vpop.eup %11453  ;;  %5866 = vadd.xlane.f32.xlu0 %v5865_v1 }
0x1973   :  { %v5868_v2 = vsel %vm125_vm0, %v11454_v7, 0.0 }
0x1974   :  { %5869 = vadd.xlane.f32.xlu1 %v5868_v2 }
0x1976   :  { %5067 = vmax.xlane.f32.xlu0 %v5066_v50  ;;  %v11571_v50 = vld [vmem:[%s13874_s15 + $0x48] sm:$0xff]  }
0x1978   :  { %5070 = vmax.xlane.f32.xlu1 %v5069_v17  ;;  %v11573_v17 = vld [vmem:[%s13875_s16 + $0x48] sm:$0xff]  }
0x197a   :  { %5073 = vmax.xlane.f32.xlu0 %v5072_v36 }
0x197c   :  { %5076 = vmax.xlane.f32.xlu1 %v5075_v32 }
0x19fb   :  { %v5861_v41 = vpop.xlane.xlu0 %5860 }
0x19fc   :  { %11455 = vrcp.f32 %v5861_v41 }
0x19fd   :  { %v5864_v34 = vpop.xlane.xlu1 %5863 }
0x19fe   :  { %11457 = vrcp.f32 %v5864_v34 }
0x19ff   :  { %v5867_v19 = vpop.xlane.xlu0 %5866 }
0x1a00   :  { %11459 = vrcp.f32 %v5867_v19 }
0x1a01   :  { %v5870_v0 = vpop.xlane.xlu1 %5869 }
0x1a02   :  { %11461 = vrcp.f32 %v5870_v0 }
0x1a03   :  { %v5068_v24 = vpop.xlane.xlu0 %5067 }
0x1a04   :  { %v5078_v27 = vsub.f32 %v5062_v54, %v5068_v24 }
0x1a05   :  { %v5071_v52 = vpop.xlane.xlu1 %5070 }
0x1a06   :  { %v11456_v37 = vpop.eup %11455  ;;  %v5082_v12 = vmul.f32 1.442695, %v5078_v27  ;;  %v5079_v15 = vsub.f32 %v5063_v38, %v5071_v52 }
0x1a07   :  { %v5074_v58 = vpop.xlane.xlu0 %5073  ;;  %v5875_v14 = vmul.f32 %v11456_v37, %v11448_v57 }
0x1a08   :  { %v11458_v9 = vpop.eup %11457  ;;  %11463 = vpow2.f32 %v5082_v12  ;;  %v5084_v63 = vmul.f32 1.442695, %v5079_v15  ;;  %v5080_v4 = vsub.f32 %v5064_v47, %v5074_v58 }
0x1a09   :  { %v5077_v61 = vpop.xlane.xlu1 %5076  ;;  %v5876_v5 = vmul.f32 %v11458_v9, %v11450_v59  ;;  %v11569_v59 = vld [vmem:[%s13873_s14 + $0x48] sm:$0xff]  }
0x1a0a   :  { %v11460_v51 = vpop.eup %11459  ;;  %11465 = vpow2.f32 %v5084_v63  ;;  %v5086_v25 = vmul.f32 1.442695, %v5080_v4  ;;  %v5081_v48 = vsub.f32 %v5065_v55, %v5077_v61  ;;  %v11572_v55 = vld [vmem:[%s13875_s16 + $0x40] sm:$0xff]   ;;  %v11574_v63 = vld [vmem:[%s13876_s17 + $0x48] sm:$0xff]   ;;  %v11575_v4 = vld [vmem:[%s13876_s17 + $0x50] sm:$0xff]  }
0x1a0b   :  { %v5879_v35 = vpack.c.bf16 %v5876_v5, %v5875_v14  ;;  %v5877_v56 = vmul.f32 %v11460_v51, %v11452_v30  ;;  %v11576_v61 = vld [vmem:[%s13876_s17 + $0x58] sm:$0xff]   ;;  %v11578_v14 = vld [vmem:[%s13876_s17 + $0x68] sm:$0xff]   ;;  %v11579_v5 = vld [vmem:[%s13876_s17 + $0x70] sm:$0xff]  }
0x1a0c   :  { %v11462_v18 = vpop.eup %11461  ;;  %11467 = vpow2.f32 %v5086_v25  ;;  %v5088_v20 = vmul.f32 1.442695, %v5081_v48  ;;  %v11580_v51 = vld [vmem:[%s13876_s17 + $0x78] sm:$0xff]   ;;  %v13037_v25 = vld [vmem:[%s13876_s17] sm:$0xff]  }
0x1a0d   :  { %v5878_v39 = vmul.f32 %v11462_v18, %v11454_v7  ;;  %10694 = vmatprep.mubr.msk.bf16.mxu1 %vm125_vm0, %v5879_v35 }
0x1a0e   :  { %11469 = vpow2.f32 %v5088_v20 }
0x1a0f   :  { %v5880_v60 = vpack.c.bf16 %v5878_v39, %v5877_v56 }
0x1a11   :  { %10695 = vmatmul.mubr.msk.bf16.vlgmr.msra.gmra.mrb[184].mxu1 %vm125_vm0, %v5880_v60 }
0x1a12   :  { %v11464_v54 = vpop.eup %11463  ;;  %10719 = vmatpush3.bf16.msra.mxu1 %v12957_v53  ;;  %10722 = vmatprep.mubr.msk.bf16.mxu1 %vm125_vm0, %v12002_v43  ;;  %v11570_v53 = vld [vmem:[%s13874_s15 + $0x40] sm:$0xff]  }
0x1a13   :  { %v5090_v57 = vsel %vm125_vm0, %v11464_v54, 0.0  ;;  %10720 = vmatprep.subr.bf16.mxu1 %v11569_v59 }
0x1a14   :  { %v11466_v30 = vpop.eup %11465  ;;  %5091 = vadd.xlane.f32.xlu0 %v5090_v57 }
0x1a15   :  { %v5093_v1 = vsel %vm125_vm0, %v11466_v30, 0.0 }
0x1a16   :  { %v11468_v7 = vpop.eup %11467  ;;  %10721 = vmatpush3.bf16.msra.mxu1 %v11569_v59  ;;  %5094 = vadd.xlane.f32.xlu1 %v5093_v1 }
0x1a17   :  { %v5096_v38 = vsel %vm125_vm0, %v11468_v7, 0.0  ;;  %10726 = vmatprep.subr.bf16.mxu1 %v11570_v53 }
0x1a18   :  { %v11470_v2 = vpop.eup %11469  ;;  %5097 = vadd.xlane.f32.xlu0 %v5096_v38 }
0x1a19   :  { %10723 = vmatmul.mubr.msk.bf16.vlgmr.msra.gmra.mrb[188].mxu1 %vm125_vm0, %v12000_v42  ;;  %v5099_v47 = vsel %vm125_vm0, %v11470_v2, 0.0 }
0x1a1a   :  { %10727 = vmatpush3.bf16.msra.mxu1 %v11570_v53  ;;  %10730 = vmatprep.mubr.msk.bf16.mxu1 %vm125_vm0, %v12002_v43 }
0x1a1b   :  { %5100 = vadd.xlane.f32.xlu1 %v5099_v47  ;;  %10728 = vmatprep.subr.bf16.mxu1 %v11571_v50 }
0x1a1e   :  { %10729 = vmatpush3.bf16.msra.mxu1 %v11571_v50 }
0x1a1f   :  { %10734 = vmatprep.subr.bf16.mxu1 %v11572_v55 }
0x1a21   :  { %10731 = vmatmul.mubr.msk.bf16.vlgmr.msra.gmra.mrb[192].mxu1 %vm125_vm0, %v12000_v42 }
0x1a22   :  { %10735 = vmatpush3.bf16.msra.mxu1 %v11572_v55  ;;  %10738 = vmatprep.mubr.msk.bf16.mxu1 %vm125_vm0, %v12002_v43 }
0x1a23   :  { %10736 = vmatprep.subr.bf16.mxu1 %v11573_v17 }
0x1a26   :  { %10737 = vmatpush3.bf16.msra.mxu1 %v11573_v17 }
0x1a29   :  { %10739 = vmatmul.mubr.msk.bf16.vlgmr.msra.gmra.mrb[196].mxu1 %vm125_vm0, %v12000_v42 }
0x1aa1   :  { %v5092_v36 = vpop.xlane.xlu0 %5091 }
0x1aa2   :  { %11471 = vrcp.f32 %v5092_v36 }
0x1aa3   :  { %v5095_v32 = vpop.xlane.xlu1 %5094 }
0x1aa4   :  { %11473 = vrcp.f32 %v5095_v32 }
0x1aa5   :  { %v5098_v41 = vpop.xlane.xlu0 %5097 }
0x1aa6   :  { %11475 = vrcp.f32 %v5098_v41 }
0x1aa8   :  { %v5101_v34 = vpop.xlane.xlu1 %5100 }
0x1aa9   :  { %11477 = vrcp.f32 %v5101_v34 }
0x1aac   :  { %v11472_v19 = vpop.eup %11471 }
0x1aad   :  { %v5106_v24 = vmul.f32 %v11472_v19, %v11464_v54  ;;  %v11582_v19 = vld [vmem:[%s13873_s14 + $0x50] sm:$0xff]  }
0x1aae   :  { %v11474_v0 = vpop.eup %11473 }
0x1aaf   :  { %v5107_v27 = vmul.f32 %v11474_v0, %v11466_v30  ;;  %v11583_v0 = vld [vmem:[%s13873_s14 + $0x58] sm:$0xff]  }
0x1ab0   :  { %v11476_v52 = vpop.eup %11475 }
0x1ab1   :  { %v5110_v37 = vpack.c.bf16 %v5107_v27, %v5106_v24  ;;  %v5108_v15 = vmul.f32 %v11476_v52, %v11468_v7  ;;  %v11584_v24 = vld [vmem:[%s13874_s15 + $0x50] sm:$0xff]   ;;  %v11585_v27 = vld [vmem:[%s13874_s15 + $0x58] sm:$0xff]  }
0x1ab2   :  { %v11586_v52 = vld [vmem:[%s13875_s16 + $0x50] sm:$0xff]  }
0x1ab3   :  { %v11478_v12 = vpop.eup %11477  ;;  %10554 = vmatprep.mubr.msk.bf16.mxu0 %vm125_vm0, %v5110_v37  ;;  %v11587_v37 = vld [vmem:[%s13875_s16 + $0x58] sm:$0xff]  }
0x1ab4   :  { %v5109_v58 = vmul.f32 %v11478_v12, %v11470_v2 }
0x1ab6   :  { %v5111_v9 = vpack.c.bf16 %v5109_v58, %v5108_v15 }
0x1ab8   :  { %10555 = vmatmul.mubr.msk.bf16.vlgmr.msra.gmra.mrb[80].mxu0 %vm125_vm0, %v5111_v9 }
0x1ab9   :  { %10559 = vmatpush3.bf16.msra.mxu0 %v12875_v40  ;;  %v11577_v40 = vld [vmem:[%s13876_s17 + $0x60] sm:$0xff]  }
0x1aba   :  { %10560 = vmatprep.subr.bf16.mxu0 %v11574_v63 }
0x1abd   :  { %10561 = vmatpush3.bf16.msra.mxu0 %v11574_v63 }
0x1abe   :  { %10562 = vmatprep.subr.bf16.mxu0 %v11575_v4 }
0x1ac1   :  { %10563 = vmatpush3.bf16.msra.mxu0 %v11575_v4 }
0x1ac2   :  { %10564 = vmatprep.subr.bf16.mxu0 %v11576_v61 }
0x1ac5   :  { %10565 = vmatpush3.bf16.msra.mxu0 %v11576_v61  ;;  %v11588_v61 = vld [vmem:[%s13876_s17 + $0x8] sm:$0xff]  }
0x1ac6   :  { %10566 = vmatprep.subr.bf16.mxu0 %v11577_v40 }
0x1ac9   :  { %10567 = vmatpush3.bf16.msra.mxu0 %v11577_v40  ;;  %v11589_v40 = vld [vmem:[%s13876_s17 + $0x10] sm:$0xff]  }
0x1aca   :  { %10568 = vmatprep.subr.bf16.mxu0 %v11578_v14 }
0x1acd   :  { %10569 = vmatpush3.bf16.msra.mxu0 %v11578_v14  ;;  %v11590_v14 = vld [vmem:[%s13876_s17 + $0x18] sm:$0xff]  }
0x1ace   :  { %10570 = vmatprep.subr.bf16.mxu0 %v11579_v5 }
0x1ad1   :  { %10571 = vmatpush3.bf16.msra.mxu0 %v11579_v5  ;;  %v11594_v5 = vld [vmem:[%s13876_s17 + $0x38] sm:$0xff]  }
0x1ad2   :  { %10572 = vmatprep.subr.bf16.mxu0 %v11580_v51 }
0x1ad5   :  { %10573 = vmatpush3.bf16.msra.mxu0 %v11580_v51  ;;  %v11595_v51 = vld [vmem:[%s13876_s17 + $0x80] sm:$0xff]  }
0x1ad6   :  { %10578 = vmatprep.subr.bf16.mxu0 %v13037_v25 }
0x1ae4   :  { %v13040_v48 = vpop.f32.mrb[184].mxu1 }
0x1ae5   :  { %v13042_v35 = vpop.f32.mrb[185].mxu1 }
0x1ae6   :  { %v13044_v18 = vpop.f32.mrb[186].mxu1 }
0x1ae7   :  { %v5939_v20 = vpack.c.bf16 %v13044_v18, %v13040_v48  ;;  %v13048_v56 = vpop.f32.mrb[187].mxu1  ;;  %v13199_v48 = vld [vmem:[%s13876_s17 + $0x100] sm:$0xff]  }
0x1ae8   :  { %v5938_v39 = vpack.c.bf16 %v13048_v56, %v13042_v35 }
0x1aec   :  { %v10724_v60 = vpop.f32.mrb[188].mxu1 }
0x1aed   :  { %v6027_v54 = vpop.f32.mrb[189].mxu1 }
0x1aee   :  { %v10725_v57 = vpop.f32.mrb[190].mxu1 }
0x1aef   :  { %v6141_v59 = vpack.c.bf16 %v10725_v57, %v10724_v60  ;;  %v6030_v30 = vpop.f32.mrb[191].mxu1  ;;  %v11597_v60 = vld [vmem:[%s13876_s17 + $0x90] sm:$0xff]  }
0x1af0   :  { %v6140_v1 = vpack.c.bf16 %v6030_v30, %v6027_v54  ;;  %v11604_v54 = vld [vmem:[%s13876_s17 + $0xc8] sm:$0xff]   ;;  %v11605_v57 = vld [vmem:[%s13876_s17 + $0xd0] sm:$0xff]  }
0x1af2   :  { %10746 = vmatprep.mubr.bf16.mxu1 %v6140_v1 }
0x1af4   :  { %v10732_v7 = vpop.f32.mrb[192].mxu1 }
0x1af5   :  { %v6076_v38 = vpop.f32.mrb[193].mxu1 }
0x1af6   :  { %v10733_v53 = vpop.f32.mrb[194].mxu1 }
0x1af7   :  { %v6143_v2 = vpack.c.bf16 %v10733_v53, %v10732_v7  ;;  %v6079_v47 = vpop.f32.mrb[195].mxu1 }
0x1af8   :  { %v6142_v50 = vpack.c.bf16 %v6079_v47, %v6076_v38 }
0x1afa   :  { %10742 = vmatprep.subr.bf16.mxu1 %v6142_v50 }
0x1afb   :  { %10743 = vmatpush3.bf16.xpose.msra.mxu1 %v6142_v50 }
0x1afc   :  { %v10740_v55 = vpop.f32.mrb[196].mxu1  ;;  %10744 = vmatprep.subr.bf16.mxu1 %v6143_v2 }
0x1afd   :  { %v6125_v17 = vpop.f32.mrb[197].mxu1 }
0x1afe   :  { %v10741_v36 = vpop.f32.mrb[198].mxu1 }
0x1aff   :  { %v13052_v32 = vpack.c.bf16 %v10741_v36, %v10740_v55  ;;  %v6128_v41 = vpop.f32.mrb[199].mxu1 }
0x1b00   :  { %v13054_v34 = vpack.c.bf16 %v6128_v41, %v6125_v17 }
0x1b03   :  { %10745 = vmatpush3.bf16.xpose.msra.mxu1 %v6143_v2  ;;  %v11608_v2 = vld [vmem:[%s13876_s17 + $0xe8] sm:$0xff]  }
0x1b04   :  { %10778 = vmatprep.subr.bf16.mxu1 %v11582_v19 }
0x1b0a   :  { %10747 = vmatmul.mubr.bf16.vlgmr.msra.gmra.mrb[200].mxu1 %v6141_v59 }
0x1b0b   :  { %10779 = vmatpush3.bf16.msra.mxu1 %v11582_v19  ;;  %10782 = vmatprep.mubr.msk.bf16.mxu1 %vm125_vm0, %v12002_v43 }
0x1b0c   :  { %10780 = vmatprep.subr.bf16.mxu1 %v11583_v0 }
0x1b0f   :  { %10781 = vmatpush3.bf16.msra.mxu1 %v11583_v0  ;;  %v11609_v0 = vld [vmem:[%s13876_s17 + $0xf0] sm:$0xff]  }
0x1b10   :  { %10786 = vmatprep.subr.bf16.mxu1 %v11584_v24 }
0x1b12   :  { %10783 = vmatmul.mubr.msk.bf16.vlgmr.msra.gmra.mrb[204].mxu1 %vm125_vm0, %v12000_v42 }
0x1b13   :  { %10787 = vmatpush3.bf16.msra.mxu1 %v11584_v24  ;;  %10790 = vmatprep.mubr.msk.bf16.mxu1 %vm125_vm0, %v12002_v43 }
0x1b14   :  { %10788 = vmatprep.subr.bf16.mxu1 %v11585_v27 }
0x1b17   :  { %10789 = vmatpush3.bf16.msra.mxu1 %v11585_v27  ;;  %v11610_v27 = vld [vmem:[%s13876_s17 + $0xf8] sm:$0xff]  }
0x1b18   :  { %10794 = vmatprep.subr.bf16.mxu1 %v11586_v52 }
0x1b1a   :  { %10791 = vmatmul.mubr.msk.bf16.vlgmr.msra.gmra.mrb[208].mxu1 %vm125_vm0, %v12000_v42 }
0x1b1b   :  { %10795 = vmatpush3.bf16.msra.mxu1 %v11586_v52  ;;  %10798 = vmatprep.mubr.msk.bf16.mxu1 %vm125_vm0, %v12002_v43 }
0x1b1c   :  { %10796 = vmatprep.subr.bf16.mxu1 %v11587_v37 }
0x1b1f   :  { %10797 = vmatpush3.bf16.msra.mxu1 %v11587_v37 }
0x1b22   :  { %10799 = vmatmul.mubr.msk.bf16.vlgmr.msra.gmra.mrb[212].mxu1 %vm125_vm0, %v12000_v42 }
0x1b8b   :  { %v10556_v12 = vpop.f32.mrb[80].mxu0 }
0x1b8c   :  { %v5154_v15 = vpop.f32.mrb[81].mxu0 }
0x1b8d   :  { %v10557_v58 = vpop.f32.mrb[82].mxu0 }
0x1b8e   :  { %v5170_v9 = vpack.c.bf16 %v10557_v58, %v10556_v12  ;;  %v5157_v63 = vpop.f32.mrb[83].mxu0 }
0x1b8f   :  { %v5169_v4 = vpack.c.bf16 %v5157_v63, %v5154_v15 }
0x1b91   :  { %10574 = vmatprep.mubr.bf16.mxu0 %v5169_v4 }
0x1b92   :  { %10575 = vmatmul.mubr.bf16.vlgmr.msra.gmra.mrb[84].mxu0 %v5170_v9 }
0x1b93   :  { %10579 = vmatpush3.bf16.msra.mxu0 %v13037_v25  ;;  %10594 = vmatprep.mubr.bf16.mxu0 %v4860_v49  ;;  %v11593_v49 = vld [vmem:[%s13876_s17 + $0x30] sm:$0xff]   ;;  %v11596_v25 = vld [vmem:[%s13876_s17 + $0x88] sm:$0xff]  }
0x1b94   :  { %10580 = vmatprep.subr.bf16.mxu0 %v11588_v61 }
0x1b97   :  { %10581 = vmatpush3.bf16.msra.mxu0 %v11588_v61 }
0x1b98   :  { %10582 = vmatprep.subr.bf16.mxu0 %v11589_v40 }
0x1b9b   :  { %10583 = vmatpush3.bf16.msra.mxu0 %v11589_v40 }
0x1b9c   :  { %10584 = vmatprep.subr.bf16.mxu0 %v11590_v14 }
0x1b9f   :  { %10585 = vmatpush3.bf16.msra.mxu0 %v11590_v14 }
0x1ba0   :  { %10586 = vmatprep.subr.bf16.mxu0 %v11591_v31 }
0x1ba3   :  { %10587 = vmatpush3.bf16.msra.mxu0 %v11591_v31  ;;  %v11615_v31 = vld [vmem:[%s13874_s15 + $0x68] sm:$0xff]  }
0x1ba4   :  { %10588 = vmatprep.subr.bf16.mxu0 %v11592_v46 }
0x1ba7   :  { %10589 = vmatpush3.bf16.msra.mxu0 %v11592_v46  ;;  %v11616_v46 = vld [vmem:[%s13875_s16 + $0x60] sm:$0xff]  }
0x1ba8   :  { %10590 = vmatprep.subr.bf16.mxu0 %v11593_v49 }
0x1bab   :  { %10591 = vmatpush3.bf16.msra.mxu0 %v11593_v49  ;;  %v11617_v49 = vld [vmem:[%s13875_s16 + $0x68] sm:$0xff]  }
0x1bac   :  { %10592 = vmatprep.subr.bf16.mxu0 %v11594_v5 }
0x1baf   :  { %10593 = vmatpush3.bf16.msra.mxu0 %v11594_v5 }
0x1bb0   :  { %10638 = vmatprep.subr.bf16.mxu0 %v11595_v51 }
0x1bb2   :  { %10595 = vmatmul.mubr.bf16.vlgmr.msra.gmra.mrb[84].mxu0 %v4861_v11  ;;  %v11600_v11 = vld [vmem:[%s13876_s17 + $0xa8] sm:$0xff]  }
0x1bb3   :  { %10639 = vmatpush3.bf16.msra.mxu0 %v11595_v51  ;;  %10654 = vmatprep.mubr.bf16.mxu0 %v5576_v26  ;;  %v11603_v26 = vld [vmem:[%s13876_s17 + $0xc0] sm:$0xff]  }
0x1bb4   :  { %10640 = vmatprep.subr.bf16.mxu0 %v11596_v25 }
0x1bb7   :  { %10641 = vmatpush3.bf16.msra.mxu0 %v11596_v25 }
0x1bb8   :  { %10642 = vmatprep.subr.bf16.mxu0 %v11597_v60 }
0x1bbb   :  { %10643 = vmatpush3.bf16.msra.mxu0 %v11597_v60 }
0x1bbc   :  { %10644 = vmatprep.subr.bf16.mxu0 %v11598_v6 }
0x1bbf   :  { %10645 = vmatpush3.bf16.msra.mxu0 %v11598_v6 }
0x1bc0   :  { %10646 = vmatprep.subr.bf16.mxu0 %v11599_v8 }
0x1bc3   :  { %10647 = vmatpush3.bf16.msra.mxu0 %v11599_v8 }
0x1bc4   :  { %10648 = vmatprep.subr.bf16.mxu0 %v11600_v11 }
0x1bc7   :  { %10649 = vmatpush3.bf16.msra.mxu0 %v11600_v11 }
0x1bc8   :  { %10650 = vmatprep.subr.bf16.mxu0 %v11601_v22 }
0x1bcb   :  { %10651 = vmatpush3.bf16.msra.mxu0 %v11601_v22 }
0x1bcc   :  { %10652 = vmatprep.subr.bf16.mxu0 %v11602_v10 }
0x1bcf   :  { %10653 = vmatpush3.bf16.msra.mxu0 %v11602_v10 }
0x1bd0   :  { %10698 = vmatprep.subr.bf16.mxu0 %v11603_v26 }
0x1bd2   :  { %10655 = vmatmul.mubr.bf16.vlgmr.msra.gmra.mrb[84].mxu0 %v5577_v45 }
0x1bd3   :  { %10699 = vmatpush3.bf16.msra.mxu0 %v11603_v26  ;;  %10714 = vmatprep.mubr.bf16.mxu0 %v5938_v39  ;;  %v11607_v39 = vld [vmem:[%s13876_s17 + $0xe0] sm:$0xff]  }
0x1bd4   :  { %10700 = vmatprep.subr.bf16.mxu0 %v11604_v54 }
0x1bd7   :  { %10701 = vmatpush3.bf16.msra.mxu0 %v11604_v54 }
0x1bd8   :  { %10702 = vmatprep.subr.bf16.mxu0 %v11605_v57 }
0x1bdb   :  { %10703 = vmatpush3.bf16.msra.mxu0 %v11605_v57 }
0x1bdc   :  { %10704 = vmatprep.subr.bf16.mxu0 %v11606_v44 }
0x1bdd   :  { %v10748_v23 = vpop.f32.mrb[200].mxu1 }
0x1bde   :  { %v6178_v45 = vpop.f32.mrb[201].mxu1  ;;  %v13164_v30 = vmul.f32 0.5, %v10748_v23 }
0x1bdf   :  { %10705 = vmatpush3.bf16.msra.mxu0 %v11606_v44  ;;  %v13159_v35 = vmul.f32 0.5, %v6178_v45  ;;  %v10749_v56 = vpop.f32.mrb[202].mxu1 }
0x1be0   :  { %10706 = vmatprep.subr.bf16.mxu0 %v11607_v39  ;;  %v6181_v59 = vpop.f32.mrb[203].mxu1  ;;  %v13170_v38 = vmul.f32 0.5, %v10749_v56  ;;  %v6203_v50 = vsel %vm125_vm0, %v13164_v30, -inf }
0x1be1   :  { %v13166_v1 = vmul.f32 0.5, %v6181_v59  ;;  %v6197_v7 = vsel %vm125_vm0, %v13159_v35, -inf }
0x1be2   :  { %6198 = vmax.xlane.f32.xlu0 %v6197_v7  ;;  %v6206_v36 = vsel %vm125_vm0, %v13170_v38, -inf }
0x1be3   :  { %10707 = vmatpush3.bf16.msra.mxu0 %v11607_v39  ;;  %v6200_v53 = vsel %vm125_vm0, %v13166_v1, -inf }
0x1be4   :  { %6201 = vmax.xlane.f32.xlu1 %v6200_v53  ;;  %10708 = vmatprep.subr.bf16.mxu0 %v11608_v2 }
0x1be5   :  { %v10784_v47 = vpop.f32.mrb[204].mxu1 }
0x1be6   :  { %6204 = vmax.xlane.f32.xlu0 %v6203_v50  ;;  %v6389_v55 = vpop.f32.mrb[205].mxu1 }
0x1be7   :  { %10709 = vmatpush3.bf16.msra.mxu0 %v11608_v2  ;;  %v10785_v17 = vpop.f32.mrb[206].mxu1 }
0x1be8   :  { %v6503_v41 = vpack.c.bf16 %v10785_v17, %v10784_v47  ;;  %v6392_v19 = vpop.f32.mrb[207].mxu1  ;;  %6207 = vmax.xlane.f32.xlu1 %v6206_v36  ;;  %10710 = vmatprep.subr.bf16.mxu0 %v11609_v0 }
0x1be9   :  { %v6502_v24 = vpack.c.bf16 %v6392_v19, %v6389_v55 }
0x1beb   :  { %10711 = vmatpush3.bf16.msra.mxu0 %v11609_v0  ;;  %10806 = vmatprep.mubr.bf16.mxu1 %v6502_v24 }
0x1bec   :  { %10712 = vmatprep.subr.bf16.mxu0 %v11610_v27 }
0x1bed   :  { %v10792_v52 = vpop.f32.mrb[208].mxu1 }
0x1bee   :  { %v6438_v37 = vpop.f32.mrb[209].mxu1 }
0x1bef   :  { %10713 = vmatpush3.bf16.msra.mxu0 %v11610_v27  ;;  %v10793_v12 = vpop.f32.mrb[210].mxu1 }
0x1bf0   :  { %10750 = vmatprep.subr.bf16.mxu0 %v13054_v34  ;;  %v6505_v15 = vpack.c.bf16 %v10793_v12, %v10792_v52  ;;  %v6441_v58 = vpop.f32.mrb[211].mxu1 }
0x1bf1   :  { %v6504_v9 = vpack.c.bf16 %v6441_v58, %v6438_v37 }
0x1bf2   :  { %10715 = vmatmul.mubr.bf16.vlgmr.msra.gmra.mrb[84].mxu0 %v5939_v20  ;;  %v11612_v20 = vld [vmem:[%s13873_s14 + $0x60] sm:$0xff]  }
0x1bf3   :  { %10751 = vmatpush3.bf16.msra.mxu0 %v13054_v34  ;;  %10802 = vmatprep.subr.bf16.mxu1 %v6504_v9  ;;  %v11614_v34 = vld [vmem:[%s13874_s15 + $0x60] sm:$0xff]  }
0x1bf4   :  { %10752 = vmatprep.subr.bf16.mxu0 %v13052_v32  ;;  %10803 = vmatpush3.bf16.xpose.msra.mxu1 %v6504_v9 }
0x1bf5   :  { %v10800_v63 = vpop.f32.mrb[212].mxu1  ;;  %10804 = vmatprep.subr.bf16.mxu1 %v6505_v15 }
0x1bf6   :  { %v6487_v4 = vpop.f32.mrb[213].mxu1 }
0x1bf7   :  { %10753 = vmatpush3.bf16.msra.mxu0 %v13052_v32  ;;  %v10801_v61 = vpop.f32.mrb[214].mxu1  ;;  %v11613_v32 = vld [vmem:[%s13873_s14 + $0x68] sm:$0xff]  }
0x1bf8   :  { %v13194_v40 = vpack.c.bf16 %v10801_v61, %v10800_v63  ;;  %v6490_v14 = vpop.f32.mrb[215].mxu1  ;;  %10758 = vmatprep.subr.bf16.mxu0 %v13199_v48 }
0x1bf9   :  { %v13202_v18 = vpack.c.bf16 %v6490_v14, %v6487_v4 }
0x1bfc   :  { %10805 = vmatpush3.bf16.xpose.msra.mxu1 %v6505_v15 }
0x1bfd   :  { %10838 = vmatprep.subr.bf16.mxu1 %v11612_v20 }
0x1c03   :  { %10807 = vmatmul.mubr.bf16.vlgmr.msra.gmra.mrb[216].mxu1 %v6503_v41 }
0x1c04   :  { %10839 = vmatpush3.bf16.msra.mxu1 %v11612_v20  ;;  %10842 = vmatprep.mubr.msk.bf16.mxu1 %vm125_vm0, %v12002_v43 }
0x1c05   :  { %10840 = vmatprep.subr.bf16.mxu1 %v11613_v32 }
0x1c08   :  { %10841 = vmatpush3.bf16.msra.mxu1 %v11613_v32 }
0x1c09   :  { %10846 = vmatprep.subr.bf16.mxu1 %v11614_v34 }
0x1c0b   :  { %10843 = vmatmul.mubr.msk.bf16.vlgmr.msra.gmra.mrb[220].mxu1 %vm125_vm0, %v12000_v42 }
0x1c0c   :  { %10847 = vmatpush3.bf16.msra.mxu1 %v11614_v34  ;;  %10850 = vmatprep.mubr.msk.bf16.mxu1 %vm125_vm0, %v12002_v43 }
0x1c0d   :  { %10848 = vmatprep.subr.bf16.mxu1 %v11615_v31 }
0x1c10   :  { %10849 = vmatpush3.bf16.msra.mxu1 %v11615_v31 }
0x1c11   :  { %10854 = vmatprep.subr.bf16.mxu1 %v11616_v46 }
0x1c13   :  { %10851 = vmatmul.mubr.msk.bf16.vlgmr.msra.gmra.mrb[224].mxu1 %vm125_vm0, %v12000_v42 }
0x1c14   :  { %10855 = vmatpush3.bf16.msra.mxu1 %v11616_v46  ;;  %10858 = vmatprep.mubr.msk.bf16.mxu1 %vm125_vm0, %v12002_v43 }
0x1c15   :  { %10856 = vmatprep.subr.bf16.mxu1 %v11617_v49 }
0x1c18   :  { %10857 = vmatpush3.bf16.msra.mxu1 %v11617_v49  ;;  %v11618_v49 = vld [vmem:[%s13873_s14 + $0x70] sm:$0xff]  }
0x1c1b   :  { %10859 = vmatmul.mubr.msk.bf16.vlgmr.msra.gmra.mrb[228].mxu1 %vm125_vm0, %v12000_v42 }
0x1c6f   :  { %v6199_v5 = vpop.xlane.xlu0 %6198 }
0x1c70   :  { %v6209_v51 = vsub.f32 %v13159_v35, %v6199_v5  ;;  %v11619_v5 = vld [vmem:[%s13873_s14 + $0x78] sm:$0xff]  }
0x1c71   :  { %v6202_v25 = vpop.xlane.xlu1 %6201 }
0x1c72   :  { %v6213_v60 = vmul.f32 1.442695, %v6209_v51  ;;  %v6210_v6 = vsub.f32 %v13166_v1, %v6202_v25  ;;  %v11620_v51 = vld [vmem:[%s13874_s15 + $0x70] sm:$0xff]   ;;  %v11621_v25 = vld [vmem:[%s13874_s15 + $0x78] sm:$0xff]  }
0x1c73   :  { %v6205_v8 = vpop.xlane.xlu0 %6204 }
0x1c74   :  { %11479 = vpow2.f32 %v6213_v60  ;;  %v6215_v11 = vmul.f32 1.442695, %v6210_v6  ;;  %v6211_v22 = vsub.f32 %v13164_v30, %v6205_v8  ;;  %v11622_v60 = vld [vmem:[%s13875_s16 + $0x70] sm:$0xff]   ;;  %v11623_v8 = vld [vmem:[%s13875_s16 + $0x78] sm:$0xff]  }
0x1c75   :  { %v6208_v10 = vpop.xlane.xlu1 %6207 }
0x1c76   :  { %11481 = vpow2.f32 %v6215_v11  ;;  %v6217_v26 = vmul.f32 1.442695, %v6211_v22  ;;  %v6212_v54 = vsub.f32 %v13170_v38, %v6208_v10 }
0x1c78   :  { %11483 = vpow2.f32 %v6217_v26  ;;  %v6219_v57 = vmul.f32 1.442695, %v6212_v54 }
0x1c7a   :  { %11485 = vpow2.f32 %v6219_v57 }
0x1c7e   :  { %v13238_v44 = vpop.eup %11479 }
0x1c7f   :  { %v6221_v23 = vsel %vm125_vm0, %v13238_v44, 0.0 }
0x1c80   :  { %v13242_v45 = vpop.eup %11481  ;;  %6222 = vadd.xlane.f32.xlu0 %v6221_v23 }
0x1c81   :  { %v6224_v35 = vsel %vm125_vm0, %v13242_v45, 0.0 }
0x1c82   :  { %v13246_v56 = vpop.eup %11483  ;;  %6225 = vadd.xlane.f32.xlu1 %v6224_v35 }
0x1c83   :  { %v6227_v39 = vsel %vm125_vm0, %v13246_v56, 0.0 }
0x1c84   :  { %v13250_v59 = vpop.eup %11485  ;;  %6228 = vadd.xlane.f32.xlu0 %v6227_v39 }
0x1c85   :  { %v6230_v30 = vsel %vm125_vm0, %v13250_v59, 0.0 }
0x1c86   :  { %6231 = vadd.xlane.f32.xlu1 %v6230_v30 }
0x1cd6   :  { %v10808_v1 = vpop.f32.mrb[216].mxu1 }
0x1cd7   :  { %v6540_v7 = vpop.f32.mrb[217].mxu1  ;;  %v13256_v47 = vmul.f32 0.5, %v10808_v1 }
0x1cd8   :  { %v13254_v38 = vmul.f32 0.5, %v6540_v7  ;;  %v10809_v53 = vpop.f32.mrb[218].mxu1 }
0x1cd9   :  { %v6543_v2 = vpop.f32.mrb[219].mxu1  ;;  %v13262_v17 = vmul.f32 0.5, %v10809_v53  ;;  %v6565_v19 = vsel %vm125_vm0, %v13256_v47, -inf  ;;  %v11630_v53 = vld [vmem:[%s13876_s17 + $0x138] sm:$0xff]  }
0x1cda   :  { %v13258_v50 = vmul.f32 0.5, %v6543_v2  ;;  %v6559_v55 = vsel %vm125_vm0, %v13254_v38, -inf }
0x1cdb   :  { %6560 = vmax.xlane.f32.xlu0 %v6559_v55  ;;  %v6568_v27 = vsel %vm125_vm0, %v13262_v17, -inf }
0x1cdc   :  { %v6562_v36 = vsel %vm125_vm0, %v13258_v50, -inf }
0x1cdd   :  { %6563 = vmax.xlane.f32.xlu1 %v6562_v36 }
0x1cde   :  { %v10844_v41 = vpop.f32.mrb[220].mxu1 }
0x1cdf   :  { %6566 = vmax.xlane.f32.xlu0 %v6565_v19  ;;  %v6751_v0 = vpop.f32.mrb[221].mxu1 }
0x1ce0   :  { %v10845_v24 = vpop.f32.mrb[222].mxu1 }
0x1ce1   :  { %v6865_v52 = vpack.c.bf16 %v10845_v24, %v10844_v41  ;;  %v6754_v37 = vpop.f32.mrb[223].mxu1  ;;  %6569 = vmax.xlane.f32.xlu1 %v6568_v27 }
0x1ce2   :  { %v6864_v12 = vpack.c.bf16 %v6754_v37, %v6751_v0 }
0x1ce4   :  { %10866 = vmatprep.mubr.bf16.mxu1 %v6864_v12 }
0x1ce6   :  { %v10852_v15 = vpop.f32.mrb[224].mxu1 }
0x1ce7   :  { %v6800_v58 = vpop.f32.mrb[225].mxu1 }
0x1ce8   :  { %v10853_v9 = vpop.f32.mrb[226].mxu1 }
0x1ce9   :  { %v6867_v63 = vpack.c.bf16 %v10853_v9, %v10852_v15  ;;  %v6803_v4 = vpop.f32.mrb[227].mxu1 }
0x1cea   :  { %v6866_v61 = vpack.c.bf16 %v6803_v4, %v6800_v58 }
0x1cec   :  { %10862 = vmatprep.subr.bf16.mxu1 %v6866_v61 }
0x1ced   :  { %10863 = vmatpush3.bf16.xpose.msra.mxu1 %v6866_v61 }
0x1cee   :  { %v10860_v14 = vpop.f32.mrb[228].mxu1  ;;  %10864 = vmatprep.subr.bf16.mxu1 %v6867_v63 }
0x1cef   :  { %v6849_v20 = vpop.f32.mrb[229].mxu1 }
0x1cf0   :  { %v10861_v32 = vpop.f32.mrb[230].mxu1 }
0x1cf1   :  { %v13270_v34 = vpack.c.bf16 %v10861_v32, %v10860_v14  ;;  %v6852_v31 = vpop.f32.mrb[231].mxu1 }
0x1cf2   :  { %v13272_v46 = vpack.c.bf16 %v6852_v31, %v6849_v20 }
0x1cf5   :  { %10865 = vmatpush3.bf16.xpose.msra.mxu1 %v6867_v63 }
0x1cf6   :  { %10898 = vmatprep.subr.bf16.mxu1 %v11618_v49 }
0x1cfc   :  { %10867 = vmatmul.mubr.bf16.vlgmr.msra.gmra.mrb[232].mxu1 %v6865_v52 }
0x1cfd   :  { %10899 = vmatpush3.bf16.msra.mxu1 %v11618_v49  ;;  %10902 = vmatprep.mubr.msk.bf16.mxu1 %vm125_vm0, %v12002_v43 }
0x1cfe   :  { %10900 = vmatprep.subr.bf16.mxu1 %v11619_v5 }
0x1d01   :  { %10901 = vmatpush3.bf16.msra.mxu1 %v11619_v5 }
0x1d02   :  { %10906 = vmatprep.subr.bf16.mxu1 %v11620_v51 }
0x1d04   :  { %10903 = vmatmul.mubr.msk.bf16.vlgmr.msra.gmra.mrb[236].mxu1 %vm125_vm0, %v12000_v42 }
0x1d05   :  { %10907 = vmatpush3.bf16.msra.mxu1 %v11620_v51  ;;  %10910 = vmatprep.mubr.msk.bf16.mxu1 %vm125_vm0, %v12002_v43 }
0x1d06   :  { %10908 = vmatprep.subr.bf16.mxu1 %v11621_v25 }
0x1d09   :  { %10909 = vmatpush3.bf16.msra.mxu1 %v11621_v25 }
0x1d0a   :  { %10914 = vmatprep.subr.bf16.mxu1 %v11622_v60 }
0x1d0c   :  { %10911 = vmatmul.mubr.msk.bf16.vlgmr.msra.gmra.mrb[240].mxu1 %vm125_vm0, %v12000_v42 }
0x1d0d   :  { %v6223_v6 = vpop.xlane.xlu0 %6222  ;;  %10915 = vmatpush3.bf16.msra.mxu1 %v11622_v60  ;;  %10918 = vmatprep.mubr.msk.bf16.mxu1 %vm125_vm0, %v12002_v43 }
0x1d0e   :  { %11487 = vrcp.f32 %v6223_v6  ;;  %10916 = vmatprep.subr.bf16.mxu1 %v11623_v8 }
0x1d0f   :  { %v6226_v11 = vpop.xlane.xlu1 %6225 }
0x1d10   :  { %11489 = vrcp.f32 %v6226_v11 }
0x1d11   :  { %v6229_v22 = vpop.xlane.xlu0 %6228  ;;  %10917 = vmatpush3.bf16.msra.mxu1 %v11623_v8 }
0x1d12   :  { %11491 = vrcp.f32 %v6229_v22 }
0x1d13   :  { %v6232_v10 = vpop.xlane.xlu1 %6231 }
0x1d14   :  { %11493 = vrcp.f32 %v6232_v10  ;;  %10919 = vmatmul.mubr.msk.bf16.vlgmr.msra.gmra.mrb[244].mxu1 %vm125_vm0, %v12000_v42  ;;  %v11624_v42 = vld [vmem:[%s13876_s17 + $0x108] sm:$0xff]  }
0x1d18   :  { %v11488_v26 = vpop.eup %11487 }
0x1d19   :  { %v6237_v43 = vmul.f32 %v11488_v26, %v13238_v44  ;;  %v11625_v44 = vld [vmem:[%s13876_s17 + $0x110] sm:$0xff]  }
0x1d1a   :  { %v11490_v54 = vpop.eup %11489 }
0x1d1b   :  { %v6238_v57 = vmul.f32 %v11490_v54, %v13242_v45  ;;  %v11626_v45 = vld [vmem:[%s13876_s17 + $0x118] sm:$0xff]  }
0x1d1c   :  { %v11492_v23 = vpop.eup %11491 }
0x1d1d   :  { %v6241_v35 = vpack.c.bf16 %v6238_v57, %v6237_v43  ;;  %v6239_v30 = vmul.f32 %v11492_v23, %v13246_v56  ;;  %v11628_v56 = vld [vmem:[%s13876_s17 + $0x128] sm:$0xff]  }
0x1d1e   :  { %v11494_v39 = vpop.eup %11493 }
0x1d1f   :  { %v6240_v1 = vmul.f32 %v11494_v39, %v13250_v59  ;;  %10754 = vmatprep.mubr.msk.bf16.mxu0 %vm125_vm0, %v6241_v35  ;;  %v11629_v59 = vld [vmem:[%s13876_s17 + $0x130] sm:$0xff]  }
0x1d21   :  { %v6242_v7 = vpack.c.bf16 %v6240_v1, %v6239_v30 }
0x1d23   :  { %10755 = vmatmul.mubr.msk.bf16.vlgmr.msra.gmra.mrb[88].mxu0 %vm125_vm0, %v6242_v7 }
0x1d24   :  { %10759 = vmatpush3.bf16.msra.mxu0 %v13199_v48  ;;  %v11627_v48 = vld [vmem:[%s13876_s17 + $0x120] sm:$0xff]  }
0x1d25   :  { %10760 = vmatprep.subr.bf16.mxu0 %v11624_v42 }
0x1d28   :  { %10761 = vmatpush3.bf16.msra.mxu0 %v11624_v42 }
0x1d29   :  { %10762 = vmatprep.subr.bf16.mxu0 %v11625_v44 }
0x1d2c   :  { %10763 = vmatpush3.bf16.msra.mxu0 %v11625_v44 }
0x1d2d   :  { %10764 = vmatprep.subr.bf16.mxu0 %v11626_v45 }
0x1d30   :  { %10765 = vmatpush3.bf16.msra.mxu0 %v11626_v45 }
0x1d31   :  { %10766 = vmatprep.subr.bf16.mxu0 %v11627_v48 }
0x1d34   :  { %10767 = vmatpush3.bf16.msra.mxu0 %v11627_v48 }
0x1d35   :  { %10768 = vmatprep.subr.bf16.mxu0 %v11628_v56 }
0x1d38   :  { %10769 = vmatpush3.bf16.msra.mxu0 %v11628_v56 }
0x1d39   :  { %10770 = vmatprep.subr.bf16.mxu0 %v11629_v59 }
0x1d3c   :  { %10771 = vmatpush3.bf16.msra.mxu0 %v11629_v59 }
0x1d3d   :  { %10772 = vmatprep.subr.bf16.mxu0 %v11630_v53 }
0x1d40   :  { %10773 = vmatpush3.bf16.msra.mxu0 %v11630_v53 }
0x1d41   :  { %10810 = vmatprep.subr.bf16.mxu0 %v13202_v18 }
0x1d68   :  { %v6561_v2 = vpop.xlane.xlu0 %6560 }
0x1d69   :  { %v6571_v55 = vsub.f32 %v13254_v38, %v6561_v2 }
0x1d6a   :  { %v6564_v36 = vpop.xlane.xlu1 %6563 }
0x1d6b   :  { %v6575_v41 = vmul.f32 1.442695, %v6571_v55  ;;  %v6572_v19 = vsub.f32 %v13258_v50, %v6564_v36 }
0x1d6c   :  { %v6567_v0 = vpop.xlane.xlu0 %6566 }
0x1d6d   :  { %11495 = vpow2.f32 %v6575_v41  ;;  %v6577_v24 = vmul.f32 1.442695, %v6572_v19  ;;  %v6573_v27 = vsub.f32 %v13256_v47, %v6567_v0  ;;  %v11631_v19 = vld [vmem:[%s13876_s17 + $0x140] sm:$0xff]  }
0x1d6e   :  { %v6570_v52 = vpop.xlane.xlu1 %6569 }
0x1d6f   :  { %11497 = vpow2.f32 %v6577_v24  ;;  %v6579_v37 = vmul.f32 1.442695, %v6573_v27  ;;  %v6574_v12 = vsub.f32 %v13262_v17, %v6570_v52 }
0x1d71   :  { %11499 = vpow2.f32 %v6579_v37  ;;  %v6581_v15 = vmul.f32 1.442695, %v6574_v12 }
0x1d73   :  { %11501 = vpow2.f32 %v6581_v15 }
0x1d77   :  { %v13337_v58 = vpop.eup %11495 }
0x1d78   :  { %v6583_v38 = vsel %vm125_vm0, %v13337_v58, 0.0 }
0x1d79   :  { %v13341_v9 = vpop.eup %11497  ;;  %6584 = vadd.xlane.f32.xlu0 %v6583_v38 }
0x1d7a   :  { %v6586_v50 = vsel %vm125_vm0, %v13341_v9, 0.0 }
0x1d7b   :  { %v13345_v47 = vpop.eup %11499  ;;  %6587 = vadd.xlane.f32.xlu1 %v6586_v50 }
0x1d7c   :  { %v6589_v17 = vsel %vm125_vm0, %v13345_v47, 0.0 }
0x1d7d   :  { %v13349_v63 = vpop.eup %11501  ;;  %6590 = vadd.xlane.f32.xlu0 %v6589_v17 }
0x1d7e   :  { %v6592_v4 = vsel %vm125_vm0, %v13349_v63, 0.0 }
0x1d7f   :  { %6593 = vadd.xlane.f32.xlu1 %v6592_v4 }
0x1dcf   :  { %v10868_v61 = vpop.f32.mrb[232].mxu1 }
0x1dd0   :  { %v6902_v14 = vpop.f32.mrb[233].mxu1  ;;  %v13355_v49 = vmul.f32 0.5, %v10868_v61 }
0x1dd1   :  { %v13353_v20 = vmul.f32 0.5, %v6902_v14  ;;  %v10869_v32 = vpop.f32.mrb[234].mxu1  ;;  %v11632_v14 = vld [vmem:[%s13876_s17 + $0x148] sm:$0xff]  }
0x1dd2   :  { %v6905_v31 = vpop.f32.mrb[235].mxu1  ;;  %v13361_v25 = vmul.f32 0.5, %v10869_v32  ;;  %v6927_v8 = vsel %vm125_vm0, %v13355_v49, -inf  ;;  %v11637_v32 = vld [vmem:[%s13876_s17 + $0x170] sm:$0xff]  }
0x1dd3   :  { %v13357_v5 = vmul.f32 0.5, %v6905_v31  ;;  %v6921_v51 = vsel %vm125_vm0, %v13353_v20, -inf  ;;  %v11638_v31 = vld [vmem:[%s13876_s17 + $0x178] sm:$0xff]  }
0x1dd4   :  { %6922 = vmax.xlane.f32.xlu0 %v6921_v51  ;;  %v6930_v10 = vsel %vm125_vm0, %v13361_v25, -inf }
0x1dd5   :  { %v6924_v60 = vsel %vm125_vm0, %v13357_v5, -inf }
0x1dd6   :  { %6925 = vmax.xlane.f32.xlu1 %v6924_v60 }
0x1dd7   :  { %v10904_v6 = vpop.f32.mrb[236].mxu1 }
0x1dd8   :  { %6928 = vmax.xlane.f32.xlu0 %v6927_v8  ;;  %v7113_v11 = vpop.f32.mrb[237].mxu1 }
0x1dd9   :  { %v10905_v22 = vpop.f32.mrb[238].mxu1 }
0x1dda   :  { %v7227_v26 = vpack.c.bf16 %v10905_v22, %v10904_v6  ;;  %v7116_v54 = vpop.f32.mrb[239].mxu1  ;;  %6931 = vmax.xlane.f32.xlu1 %v6930_v10 }
0x1ddb   :  { %v7226_v43 = vpack.c.bf16 %v7116_v54, %v7113_v11 }
0x1ddd   :  { %10926 = vmatprep.mubr.bf16.mxu1 %v7226_v43 }
0x1ddf   :  { %v10912_v57 = vpop.f32.mrb[240].mxu1 }
0x1de0   :  { %v7162_v23 = vpop.f32.mrb[241].mxu1 }
0x1de1   :  { %v10913_v35 = vpop.f32.mrb[242].mxu1 }
0x1de2   :  { %v7229_v39 = vpack.c.bf16 %v10913_v35, %v10912_v57  ;;  %v7165_v30 = vpop.f32.mrb[243].mxu1 }
0x1de3   :  { %v7228_v1 = vpack.c.bf16 %v7165_v30, %v7162_v23 }
0x1de5   :  { %10922 = vmatprep.subr.bf16.mxu1 %v7228_v1 }
0x1de6   :  { %10923 = vmatpush3.bf16.xpose.msra.mxu1 %v7228_v1 }
0x1de7   :  { %v10920_v7 = vpop.f32.mrb[244].mxu1  ;;  %10924 = vmatprep.subr.bf16.mxu1 %v7229_v39 }
0x1de8   :  { %v7211_v42 = vpop.f32.mrb[245].mxu1 }
0x1de9   :  { %v10921_v44 = vpop.f32.mrb[246].mxu1 }
0x1dea   :  { %v13369_v45 = vpack.c.bf16 %v10921_v44, %v10920_v7  ;;  %v7214_v48 = vpop.f32.mrb[247].mxu1 }
0x1deb   :  { %v13371_v56 = vpack.c.bf16 %v7214_v48, %v7211_v42 }
0x1dee   :  { %10925 = vmatpush3.bf16.xpose.msra.mxu1 %v7229_v39 }
0x1df5   :  { %10927 = vmatmul.mubr.bf16.vlgmr.msra.gmra.mrb[248].mxu1 %v7227_v26 }
0x1df6   :  { %v10756_v59 = vpop.f32.mrb[88].mxu0 }
0x1df7   :  { %v6285_v53 = vpop.f32.mrb[89].mxu0 }
0x1df8   :  { %v10757_v2 = vpop.f32.mrb[90].mxu0 }
0x1df9   :  { %v6301_v55 = vpack.c.bf16 %v10757_v2, %v10756_v59  ;;  %v6288_v36 = vpop.f32.mrb[91].mxu0 }
0x1dfa   :  { %v6300_v41 = vpack.c.bf16 %v6288_v36, %v6285_v53 }
0x1dfc   :  { %10774 = vmatprep.mubr.bf16.mxu0 %v6300_v41 }
0x1dfd   :  { %10775 = vmatmul.mubr.bf16.vlgmr.msra.gmra.mrb[84].mxu0 %v6301_v55 }
0x1dfe   :  { %10811 = vmatpush3.bf16.msra.mxu0 %v13202_v18 }
0x1dff   :  { %10812 = vmatprep.subr.bf16.mxu0 %v13194_v40 }
0x1e02   :  { %10813 = vmatpush3.bf16.msra.mxu0 %v13194_v40 }
0x1e03   :  { %10818 = vmatprep.subr.bf16.mxu0 %v11631_v19 }
0x1e06   :  { %v6585_v0 = vpop.xlane.xlu0 %6584 }
0x1e07   :  { %11503 = vrcp.f32 %v6585_v0 }
0x1e08   :  { %v6588_v24 = vpop.xlane.xlu1 %6587 }
0x1e09   :  { %11505 = vrcp.f32 %v6588_v24 }
0x1e0a   :  { %v6591_v27 = vpop.xlane.xlu0 %6590 }
0x1e0b   :  { %11507 = vrcp.f32 %v6591_v27 }
0x1e0c   :  { %v6594_v52 = vpop.xlane.xlu1 %6593 }
0x1e0d   :  { %11509 = vrcp.f32 %v6594_v52 }
0x1e11   :  { %v11504_v37 = vpop.eup %11503 }
0x1e12   :  { %v6599_v18 = vmul.f32 %v11504_v37, %v13337_v58  ;;  %v11633_v58 = vld [vmem:[%s13876_s17 + $0x150] sm:$0xff]  }
0x1e13   :  { %v11506_v12 = vpop.eup %11505 }
0x1e14   :  { %v6600_v15 = vmul.f32 %v11506_v12, %v13341_v9  ;;  %v11634_v9 = vld [vmem:[%s13876_s17 + $0x158] sm:$0xff]  }
0x1e15   :  { %v11508_v40 = vpop.eup %11507 }
0x1e16   :  { %v6603_v38 = vpack.c.bf16 %v6600_v15, %v6599_v18  ;;  %v6601_v17 = vmul.f32 %v11508_v40, %v13345_v47  ;;  %v11635_v47 = vld [vmem:[%s13876_s17 + $0x160] sm:$0xff]  }
0x1e17   :  { %v11510_v50 = vpop.eup %11509  ;;  %v11639_v15 = vld [vmem:[%s13876_s17 + $0x180] sm:$0xff]  }
0x1e18   :  { %v6602_v4 = vmul.f32 %v11510_v50, %v13349_v63  ;;  %10814 = vmatprep.mubr.msk.bf16.mxu0 %vm125_vm0, %v6603_v38  ;;  %v11636_v63 = vld [vmem:[%s13876_s17 + $0x168] sm:$0xff]  }
0x1e1a   :  { %v6604_v61 = vpack.c.bf16 %v6602_v4, %v6601_v17 }
0x1e1c   :  { %10815 = vmatmul.mubr.msk.bf16.vlgmr.msra.gmra.mrb[92].mxu0 %vm125_vm0, %v6604_v61 }
0x1e1d   :  { %10819 = vmatpush3.bf16.msra.mxu0 %v11631_v19 }
0x1e1e   :  { %10820 = vmatprep.subr.bf16.mxu0 %v11632_v14 }
0x1e21   :  { %10821 = vmatpush3.bf16.msra.mxu0 %v11632_v14 }
0x1e22   :  { %10822 = vmatprep.subr.bf16.mxu0 %v11633_v58 }
0x1e25   :  { %10823 = vmatpush3.bf16.msra.mxu0 %v11633_v58 }
0x1e26   :  { %10824 = vmatprep.subr.bf16.mxu0 %v11634_v9 }
0x1e29   :  { %10825 = vmatpush3.bf16.msra.mxu0 %v11634_v9 }
0x1e2a   :  { %10826 = vmatprep.subr.bf16.mxu0 %v11635_v47 }
0x1e2d   :  { %10827 = vmatpush3.bf16.msra.mxu0 %v11635_v47 }
0x1e2e   :  { %10828 = vmatprep.subr.bf16.mxu0 %v11636_v63 }
0x1e31   :  { %10829 = vmatpush3.bf16.msra.mxu0 %v11636_v63 }
0x1e32   :  { %10830 = vmatprep.subr.bf16.mxu0 %v11637_v32 }
0x1e35   :  { %10831 = vmatpush3.bf16.msra.mxu0 %v11637_v32 }
0x1e36   :  { %10832 = vmatprep.subr.bf16.mxu0 %v11638_v31 }
0x1e39   :  { %10833 = vmatpush3.bf16.msra.mxu0 %v11638_v31  ;;  %v11640_v31 = vld [vmem:[%s13876_s17 + $0x188] sm:$0xff]  }
0x1e3a   :  { %10870 = vmatprep.subr.bf16.mxu0 %v13272_v46 }
0x1e61   :  { %v6923_v51 = vpop.xlane.xlu0 %6922 }
0x1e62   :  { %v6933_v60 = vsub.f32 %v13353_v20, %v6923_v51  ;;  %v11641_v51 = vld [vmem:[%s13876_s17 + $0x190] sm:$0xff]  }
0x1e63   :  { %v6926_v6 = vpop.xlane.xlu1 %6925 }
0x1e64   :  { %v6937_v8 = vmul.f32 1.442695, %v6933_v60  ;;  %v6934_v11 = vsub.f32 %v13357_v5, %v6926_v6  ;;  %v11642_v60 = vld [vmem:[%s13876_s17 + $0x198] sm:$0xff]   ;;  %v11643_v6 = vld [vmem:[%s13876_s17 + $0x1a0] sm:$0xff]  }
0x1e65   :  { %v6929_v22 = vpop.xlane.xlu0 %6928 }
0x1e66   :  { %11511 = vpow2.f32 %v6937_v8  ;;  %v6939_v10 = vmul.f32 1.442695, %v6934_v11  ;;  %v6935_v26 = vsub.f32 %v13355_v49, %v6929_v22  ;;  %v11644_v8 = vld [vmem:[%s13876_s17 + $0x1a8] sm:$0xff]   ;;  %v11645_v11 = vld [vmem:[%s13876_s17 + $0x1b0] sm:$0xff]   ;;  %v11646_v22 = vld [vmem:[%s13876_s17 + $0x1b8] sm:$0xff]  }
0x1e67   :  { %v6932_v54 = vpop.xlane.xlu1 %6931 }
0x1e68   :  { %11513 = vpow2.f32 %v6939_v10  ;;  %v6941_v43 = vmul.f32 1.442695, %v6935_v26  ;;  %v6936_v57 = vsub.f32 %v13361_v25, %v6932_v54 }
0x1e6a   :  { %11515 = vpow2.f32 %v6941_v43  ;;  %v6943_v23 = vmul.f32 1.442695, %v6936_v57 }
0x1e6c   :  { %11517 = vpow2.f32 %v6943_v23 }
0x1e70   :  { %v11512_v35 = vpop.eup %11511 }
0x1e71   :  { %v6945_v20 = vsel %vm125_vm0, %v11512_v35, 0.0 }
0x1e72   :  { %v11514_v39 = vpop.eup %11513  ;;  %6946 = vadd.xlane.f32.xlu0 %v6945_v20 }
0x1e73   :  { %v6948_v5 = vsel %vm125_vm0, %v11514_v39, 0.0 }
0x1e74   :  { %v11516_v30 = vpop.eup %11515  ;;  %6949 = vadd.xlane.f32.xlu1 %v6948_v5 }
0x1e75   :  { %v6951_v1 = vsel %vm125_vm0, %v11516_v30, 0.0 }
0x1e76   :  { %v11518_v49 = vpop.eup %11517  ;;  %6952 = vadd.xlane.f32.xlu0 %v6951_v1 }
0x1e77   :  { %v6954_v7 = vsel %vm125_vm0, %v11518_v49, 0.0 }
0x1e78   :  { %6955 = vadd.xlane.f32.xlu1 %v6954_v7 }
0x1ec8   :  { %v10928_v25 = vpop.f32.mrb[248].mxu1 }
0x1ec9   :  { %v7264_v42 = vpop.f32.mrb[249].mxu1  ;;  %v13417_v53 = vmul.f32 0.5, %v10928_v25 }
0x1eca   :  { %v13415_v44 = vmul.f32 0.5, %v7264_v42  ;;  %v10929_v48 = vpop.f32.mrb[250].mxu1 }
0x1ecb   :  { %v7267_v59 = vpop.f32.mrb[251].mxu1  ;;  %v13423_v36 = vmul.f32 0.5, %v10929_v48  ;;  %v7289_v19 = vsel %vm125_vm0, %v13417_v53, -inf }
0x1ecc   :  { %v13419_v2 = vmul.f32 0.5, %v7267_v59  ;;  %v7283_v55 = vsel %vm125_vm0, %v13415_v44, -inf }
0x1ecd   :  { %7284 = vmax.xlane.f32.xlu0 %v7283_v55  ;;  %v7292_v0 = vsel %vm125_vm0, %v13423_v36, -inf }
0x1ece   :  { %v7286_v41 = vsel %vm125_vm0, %v13419_v2, -inf }
0x1ecf   :  { %7287 = vmax.xlane.f32.xlu1 %v7286_v41 }
0x1ed1   :  { %7290 = vmax.xlane.f32.xlu0 %v7289_v19 }
0x1ed3   :  { %7293 = vmax.xlane.f32.xlu1 %v7292_v0 }
0x1eef   :  { %v10816_v24 = vpop.f32.mrb[92].mxu0 }
0x1ef0   :  { %v6647_v27 = vpop.f32.mrb[93].mxu0 }
0x1ef1   :  { %v10817_v52 = vpop.f32.mrb[94].mxu0 }
0x1ef2   :  { %v6663_v37 = vpack.c.bf16 %v10817_v52, %v10816_v24  ;;  %v6650_v12 = vpop.f32.mrb[95].mxu0  ;;  %v11647_v24 = vld [vmem:[%s13876_s17 + $0x1c0] sm:$0xff]  }
0x1ef3   :  { %v6662_v18 = vpack.c.bf16 %v6650_v12, %v6647_v27 }
0x1ef5   :  { %10834 = vmatprep.mubr.bf16.mxu0 %v6662_v18 }
0x1ef6   :  { %10835 = vmatmul.mubr.bf16.vlgmr.msra.gmra.mrb[84].mxu0 %v6663_v37 }
0x1ef7   :  { %10871 = vmatpush3.bf16.msra.mxu0 %v13272_v46 }
0x1ef8   :  { %10872 = vmatprep.subr.bf16.mxu0 %v13270_v34 }
0x1efb   :  { %10873 = vmatpush3.bf16.msra.mxu0 %v13270_v34 }
0x1efc   :  { %10878 = vmatprep.subr.bf16.mxu0 %v11639_v15 }
0x1eff   :  { %v6947_v40 = vpop.xlane.xlu0 %6946 }
0x1f00   :  { %11519 = vrcp.f32 %v6947_v40 }
0x1f01   :  { %v6950_v38 = vpop.xlane.xlu1 %6949 }
0x1f02   :  { %11521 = vrcp.f32 %v6950_v38 }
0x1f03   :  { %v6953_v50 = vpop.xlane.xlu0 %6952 }
0x1f04   :  { %11523 = vrcp.f32 %v6953_v50 }
0x1f05   :  { %v6956_v17 = vpop.xlane.xlu1 %6955 }
0x1f06   :  { %11525 = vrcp.f32 %v6956_v17 }
0x1f0a   :  { %v11520_v4 = vpop.eup %11519 }
0x1f0b   :  { %v6961_v46 = vmul.f32 %v11520_v4, %v11512_v35 }
0x1f0c   :  { %v11522_v61 = vpop.eup %11521 }
0x1f0d   :  { %v6962_v14 = vmul.f32 %v11522_v61, %v11514_v39 }
0x1f0e   :  { %v11524_v58 = vpop.eup %11523 }
0x1f0f   :  { %v6965_v9 = vpack.c.bf16 %v6962_v14, %v6961_v46  ;;  %v6963_v47 = vmul.f32 %v11524_v58, %v11516_v30  ;;  %v11648_v46 = vld [vmem:[%s13876_s17 + $0x1c8] sm:$0xff]   ;;  %v11649_v14 = vld [vmem:[%s13876_s17 + $0x1d0] sm:$0xff]   ;;  %v11650_v58 = vld [vmem:[%s13876_s17 + $0x1d8] sm:$0xff]  }
0x1f10   :  { %v11526_v34 = vpop.eup %11525 }
0x1f11   :  { %v6964_v63 = vmul.f32 %v11526_v34, %v11518_v49  ;;  %10874 = vmatprep.mubr.msk.bf16.mxu0 %vm125_vm0, %v6965_v9  ;;  %v11651_v9 = vld [vmem:[%s13876_s17 + $0x1e0] sm:$0xff]   ;;  %v11652_v34 = vld [vmem:[%s13876_s17 + $0x1e8] sm:$0xff]  }
0x1f13   :  { %v6966_v32 = vpack.c.bf16 %v6964_v63, %v6963_v47  ;;  %v11653_v47 = vld [vmem:[%s13876_s17 + $0x1f0] sm:$0xff]   ;;  %v11654_v63 = vld [vmem:[%s13876_s17 + $0x1f8] sm:$0xff]  }
0x1f15   :  { %10875 = vmatmul.mubr.msk.bf16.vlgmr.msra.gmra.mrb[96].mxu0 %vm125_vm0, %v6966_v32 }
0x1f16   :  { %10879 = vmatpush3.bf16.msra.mxu0 %v11639_v15 }
0x1f17   :  { %10880 = vmatprep.subr.bf16.mxu0 %v11640_v31 }
0x1f1a   :  { %10881 = vmatpush3.bf16.msra.mxu0 %v11640_v31 }
0x1f1b   :  { %10882 = vmatprep.subr.bf16.mxu0 %v11641_v51 }
0x1f1e   :  { %10883 = vmatpush3.bf16.msra.mxu0 %v11641_v51 }
0x1f1f   :  { %10884 = vmatprep.subr.bf16.mxu0 %v11642_v60 }
0x1f22   :  { %10885 = vmatpush3.bf16.msra.mxu0 %v11642_v60 }
0x1f23   :  { %10886 = vmatprep.subr.bf16.mxu0 %v11643_v6 }
0x1f26   :  { %10887 = vmatpush3.bf16.msra.mxu0 %v11643_v6 }
0x1f27   :  { %10888 = vmatprep.subr.bf16.mxu0 %v11644_v8 }
0x1f2a   :  { %10889 = vmatpush3.bf16.msra.mxu0 %v11644_v8 }
0x1f2b   :  { %10890 = vmatprep.subr.bf16.mxu0 %v11645_v11 }
0x1f2e   :  { %10891 = vmatpush3.bf16.msra.mxu0 %v11645_v11  ;;  %v7462_v11 = vld [vmem:[%s13878_s19] sm:$0xff] }
0x1f2f   :  { %10892 = vmatprep.subr.bf16.mxu0 %v11646_v22 }
0x1f32   :  { %10893 = vmatpush3.bf16.msra.mxu0 %v11646_v22  ;;  %v7466_v22 = vld [vmem:[%s13878_s19 + $0x20] sm:$0xff] }
0x1f33   :  { %10930 = vmatprep.subr.bf16.mxu0 %v13371_v56 }
0x1f5a   :  { %v7285_v10 = vpop.xlane.xlu0 %7284 }
0x1f5b   :  { %v7295_v26 = vsub.f32 %v13415_v44, %v7285_v10  ;;  %v9199_v10 = vcombine.high %v7462_v11, %v7466_v22 }
0x1f5c   :  { %v7288_v54 = vpop.xlane.xlu1 %7287 }
0x1f5d   :  { %v7299_v43 = vmul.f32 1.442695, %v7295_v26  ;;  %v7296_v57 = vsub.f32 %v13419_v2, %v7288_v54  ;;  %v9198_v26 = vcombine.low %v7462_v11, %v7466_v22  ;;  %7603 = vmatprep.subr.bf16.mxu1 %v9199_v10  ;;  %v7470_v54 = vld [vmem:[%s13878_s19 + $0x40] sm:$0xff] }
0x1f5e   :  { %v7291_v23 = vpop.xlane.xlu0 %7290 }
0x1f5f   :  { %11527 = vpow2.f32 %v7299_v43  ;;  %v7301_v35 = vmul.f32 1.442695, %v7296_v57  ;;  %v7297_v20 = vsub.f32 %v13417_v53, %v7291_v23  ;;  %7604 = vmatpush1.bf16.msra.mxu1 %v9198_v26  ;;  %v7474_v43 = vld [vmem:[%s13878_s19 + $0x60] sm:$0xff]  ;;  %v7464_v26 = vld [vmem:[%s13878_s19 + $0x10] sm:$0xff] }
0x1f60   :  { %v7294_v39 = vpop.xlane.xlu1 %7293  ;;  %v9206_v57 = vcombine.low %v7470_v54, %v7474_v43  ;;  %v9207_v23 = vcombine.high %v7470_v54, %v7474_v43  ;;  %v7468_v54 = vld [vmem:[%s13878_s19 + $0x30] sm:$0xff] }
0x1f61   :  { %11529 = vpow2.f32 %v7301_v35  ;;  %v7303_v5 = vmul.f32 1.442695, %v7297_v20  ;;  %v7298_v30 = vsub.f32 %v13423_v36, %v7294_v39  ;;  %v11684_v35 = vmov 0   ;;  %v13514_v20 = vld [vmem:[%s13878_s19 + $0x8] sm:$0xff] }
0x1f62   :  { %7635 = vmatprep.mubr.bf16.mxu1 %v11684_v35  ;;  %7605 = vmatprep.subr.bf16.mxu1 %v9207_v23  ;;  %v13519_v39 = vld [vmem:[%s13878_s19 + $0x28] sm:$0xff]  ;;  %v7472_v23 = vld [vmem:[%s13878_s19 + $0x50] sm:$0xff] }
0x1f63   :  { %11531 = vpow2.f32 %v7303_v5  ;;  %v7305_v1 = vmul.f32 1.442695, %v7298_v30  ;;  %7606 = vmatpush1.bf16.msra.mxu1 %v9206_v57  ;;  %v9200_v5 = vcombine.low %v13514_v20, %v13519_v39  ;;  %v9201_v30 = vcombine.high %v13514_v20, %v13519_v39  ;;  %v7465_v20 = vld [vmem:[%s13878_s19 + $0x18] sm:$0xff] }
0x1f64   :  { %v9203_v57 = vcombine.high %v7464_v26, %v7468_v54  ;;  %v7469_v39 = vld [vmem:[%s13878_s19 + $0x38] sm:$0xff] }
0x1f65   :  { %11533 = vpow2.f32 %v7305_v1  ;;  %7644 = vmatprep.subr.bf16.mxu1 %v9201_v30  ;;  %v11223_v1 = vld [vmem:[%s13880_s21 + $0x40] sm:$0xff]   ;;  %v7476_v30 = vld [vmem:[%s13878_s19 + $0x70] sm:$0xff] }
0x1f69   :  { %v11528_v49 = vpop.eup %11527 }
0x1f6a   :  { %v7307_v7 = vsel %vm125_vm0, %v11528_v49, 0.0 }
0x1f6b   :  { %v11530_v25 = vpop.eup %11529  ;;  %7308 = vadd.xlane.f32.xlu0 %v7307_v7  ;;  %v11225_v7 = vld [vmem:[%s13880_s21 + $0x48] sm:$0xff]  }
0x1f6c   :  { %v7310_v42 = vsel %vm125_vm0, %v11530_v25, 0.0 }
0x1f6d   :  { %v11532_v44 = vpop.eup %11531  ;;  %7311 = vadd.xlane.f32.xlu1 %v7310_v42  ;;  %v11227_v42 = vld [vmem:[%s13880_s21 + $0x50] sm:$0xff]  }
0x1f6e   :  { %v7313_v48 = vsel %vm125_vm0, %v11532_v44, 0.0 }
0x1f6f   :  { %v11534_v59 = vpop.eup %11533  ;;  %7314 = vadd.xlane.f32.xlu0 %v7313_v48  ;;  %v11231_v48 = vld [vmem:[%s13880_s21 + $0x58] sm:$0xff]  }
0x1f70   :  { %v7316_v53 = vsel %vm125_vm0, %v11534_v59, 0.0 }
0x1f71   :  { %7317 = vadd.xlane.f32.xlu1 %v7316_v53  ;;  %v11235_v53 = vld [vmem:[%s13880_s21 + $0x60] sm:$0xff]  }
0x1fe8   :  { %v10876_v2 = vpop.f32.mrb[96].mxu0 }
0x1fe9   :  { %v7009_v55 = vpop.f32.mrb[97].mxu0 }
0x1fea   :  { %v10877_v36 = vpop.f32.mrb[98].mxu0 }
0x1feb   :  { %v7025_v41 = vpack.c.bf16 %v10877_v36, %v10876_v2  ;;  %v7012_v19 = vpop.f32.mrb[99].mxu0  ;;  %v11237_v2 = vld [vmem:[%s13880_s21 + $0x20] sm:$0xff]   ;;  %v11241_v36 = vld [vmem:[%s13880_s21 + $0x28] sm:$0xff]  }
0x1fec   :  { %v7024_v0 = vpack.c.bf16 %v7012_v19, %v7009_v55  ;;  %v11239_v55 = vld [vmem:[%s13880_s21 + $0x68] sm:$0xff]   ;;  %v4529_v19 = vrot.slane %v12842_v13, 4 }
0x1fee   :  { %10894 = vmatprep.mubr.bf16.mxu0 %v7024_v0 }
0x1fef   :  { %10895 = vmatmul.mubr.bf16.vlgmr.msra.gmra.mrb[84].mxu0 %v7025_v41 }
0x1ff0   :  { %10931 = vmatpush3.bf16.msra.mxu0 %v13371_v56 }
0x1ff1   :  { %10932 = vmatprep.subr.bf16.mxu0 %v13369_v45 }
0x1ff4   :  { %10933 = vmatpush3.bf16.msra.mxu0 %v13369_v45 }
0x1ff5   :  { %10938 = vmatprep.subr.bf16.mxu0 %v11647_v24 }
0x1ff8   :  { %v7309_v27 = vpop.xlane.xlu0 %7308 }
0x1ff9   :  { %11535 = vrcp.f32 %v7309_v27 }
0x1ffa   :  { %v7312_v52 = vpop.xlane.xlu1 %7311 }
0x1ffb   :  { %11537 = vrcp.f32 %v7312_v52 }
0x1ffc   :  { %v7315_v37 = vpop.xlane.xlu0 %7314 }
0x1ffd   :  { %11539 = vrcp.f32 %v7315_v37 }
0x1ffe   :  { %v7318_v12 = vpop.xlane.xlu1 %7317 }
0x1fff   :  { %11541 = vrcp.f32 %v7318_v12 }
0x2003   :  { %v11536_v18 = vpop.eup %11535 }
0x2004   :  { %v7323_v56 = vmul.f32 %v11536_v18, %v11528_v49  ;;  %v11224_v49 = vld [vmem:[%s13880_s21] sm:$0xff]  }
0x2005   :  { %v11538_v15 = vpop.eup %11537 }
0x2006   :  { %v7324_v40 = vmul.f32 %v11538_v15, %v11530_v25  ;;  %v11226_v25 = vld [vmem:[%s13880_s21 + $0x8] sm:$0xff]   ;;  %v4530_v15 = vadd.f32 %v4529_v19, %v12842_v13  ;;  %v11240_v19 = vld [vmem:[%s13880_s21 + $0xd8] sm:$0xff]  }
0x2007   :  { %v11540_v38 = vpop.eup %11539 }
0x2008   :  { %v7327_v50 = vpack.c.bf16 %v7324_v40, %v7323_v56  ;;  %v7325_v17 = vmul.f32 %v11540_v38, %v11532_v44  ;;  %v11229_v44 = vld [vmem:[%s13880_s21 + $0x10] sm:$0xff]  }
0x2009   :  { %v11542_v45 = vpop.eup %11541 }
0x200a   :  { %v7326_v4 = vmul.f32 %v11542_v45, %v11534_v59  ;;  %10934 = vmatprep.mubr.msk.bf16.mxu0 %vm125_vm0, %v7327_v50  ;;  %v11233_v59 = vld [vmem:[%s13880_s21 + $0x18] sm:$0xff]  }
0x200c   :  { %v7328_v61 = vpack.c.bf16 %v7326_v4, %v7325_v17  ;;  %v4531_v17 = vrot.slane %v4530_v15, 2 }
0x200e   :  { %10935 = vmatmul.mubr.msk.bf16.vlgmr.msra.gmra.mrb[100].mxu0 %vm125_vm0, %v7328_v61 }
0x200f   :  { %10939 = vmatpush3.bf16.msra.mxu0 %v11647_v24  ;;  %v11655_v24 = vld [vmem:[%s13877_s18] ss:$0 sm:$0xff] }
0x2010   :  { %10940 = vmatprep.subr.bf16.mxu0 %v11648_v46 }
0x2013   :  { %10941 = vmatpush3.bf16.msra.mxu0 %v11648_v46 }
0x2014   :  { %10942 = vmatprep.subr.bf16.mxu0 %v11649_v14 }
0x2017   :  { %10943 = vmatpush3.bf16.msra.mxu0 %v11649_v14  ;;  %v4532_v14 = vadd.f32 %v4531_v17, %v4530_v15  ;;  %v11249_v15 = vld [vmem:[%s13880_s21 + $0x38] sm:$0xff]  }
0x2018   :  { %10944 = vmatprep.subr.bf16.mxu0 %v11650_v58  ;;  %v11257_v17 = vld [vmem:[%s13880_s21 + $0xb8] sm:$0xff]  }
0x201b   :  { %10945 = vmatpush3.bf16.msra.mxu0 %v11650_v58 }
0x201c   :  { %10946 = vmatprep.subr.bf16.mxu0 %v11651_v9 }
0x201f   :  { %10947 = vmatpush3.bf16.msra.mxu0 %v11651_v9 }
0x2020   :  { %10948 = vmatprep.subr.bf16.mxu0 %v11652_v34 }
0x2023   :  { %10949 = vmatpush3.bf16.msra.mxu0 %v11652_v34  ;;  %v4533_v34 = vrot.slane %v4532_v14, 1 }
0x2024   :  { %10950 = vmatprep.subr.bf16.mxu0 %v11653_v47 }
0x2025   :  { %v4534_v13 = vadd.f32 %v4533_v34, %v4532_v14 }
0x2027   :  { %10951 = vmatpush3.bf16.msra.mxu0 %v11653_v47 }
0x2028   :  { %10952 = vmatprep.subr.bf16.mxu0 %v11654_v63 }
0x202b   :  { %10953 = vmatpush3.bf16.msra.mxu0 %v11654_v63 }
0x202c   :  { %9814 = vmatprep.subr.bf16.mxu0 %v11223_v1  ;;  %v9202_v1 = vcombine.low %v7464_v26, %v7468_v54  ;;  %v11256_v26 = vld [vmem:[%s13880_s21 + $0x148] sm:$0xff]  }
0x20e1   :  { %v10936_v32 = vpop.f32.mrb[100].mxu0 }
0x20e2   :  { %v7371_v31 = vpop.f32.mrb[101].mxu0 }
0x20e3   :  { %v10937_v51 = vpop.f32.mrb[102].mxu0 }
0x20e4   :  { %v7387_v60 = vpack.c.bf16 %v10937_v51, %v10936_v32  ;;  %v7374_v6 = vpop.f32.mrb[103].mxu0  ;;  %v4536_v51 = vmul.f32 0.03125, %v4534_v13 }
0x20e5   :  { %v7386_v8 = vpack.c.bf16 %v7374_v6, %v7371_v31  ;;  %v7471_v6 = vld [vmem:[%s13878_s19 + $0x48] sm:$0xff] }
0x20e7   :  { %10954 = vmatprep.mubr.bf16.mxu0 %v7386_v8  ;;  %v7475_v8 = vld [vmem:[%s13878_s19 + $0x68] sm:$0xff] }
0x20e8   :  { %10955 = vmatmul.mubr.bf16.vlgmr.msra.gmra.mrb[84].mxu0 %v7387_v60  ;;  %v9209_v10 = vcombine.high %v7471_v6, %v7475_v8  ;;  %v9208_v43 = vcombine.low %v7471_v6, %v7475_v8 }
0x20e9   :  { %9815 = vmatpush3.bf16.msra.mxu0 %v11224_v49  ;;  %v9211_v49 = vcombine.high %v7472_v23, %v7476_v30 }
0x20ea   :  { %9816 = vmatprep.subr.bf16.mxu0 %v11225_v7  ;;  %v9205_v7 = vcombine.high %v7465_v20, %v7469_v39 }
0x20ed   :  { %9817 = vmatpush3.bf16.msra.mxu0 %v11226_v25  ;;  %v7473_v25 = vld [vmem:[%s13878_s19 + $0x58] sm:$0xff] }
0x20ee   :  { %9818 = vmatprep.subr.bf16.mxu0 %v11227_v42  ;;  %v7477_v42 = vld [vmem:[%s13878_s19 + $0x78] sm:$0xff] }
0x20f1   :  { %9819 = vmatpush3.bf16.msra.mxu0 %v11229_v44  ;;  %v9204_v44 = vcombine.low %v7465_v20, %v7469_v39 }
0x20f2   :  { %9820 = vmatprep.subr.bf16.mxu0 %v11231_v48  ;;  %v9213_v48 = vcombine.high %v7473_v25, %v7477_v42 }
0x20f5   :  { %9821 = vmatpush3.bf16.msra.mxu0 %v11233_v59  ;;  %v9212_v59 = vcombine.low %v7473_v25, %v7477_v42 }
0x20f6   :  { %9822 = vmatprep.subr.bf16.mxu0 %v11235_v53  ;;  %v11228_v53 = vld [vmem:[%s13880_s21 + $0xc0] sm:$0xff]  }
0x20f9   :  { %9823 = vmatpush3.bf16.msra.mxu0 %v11237_v2  ;;  %v11230_v2 = vld [vmem:[%s13880_s21 + $0x80] sm:$0xff]  }
0x20fa   :  { %9824 = vmatprep.subr.bf16.mxu0 %v11239_v55  ;;  %v11232_v55 = vld [vmem:[%s13880_s21 + $0xc8] sm:$0xff]  }
0x20fd   :  { %9825 = vmatpush3.bf16.msra.mxu0 %v11241_v36  ;;  %v11236_v36 = vld [vmem:[%s13880_s21 + $0xd0] sm:$0xff]  }
0x21bb   :  { %v10956_v41 = vpop.f32.mrb[84].mxu0 }
0x21bc   :  { %v7422_v0 = vpop.f32.mrb[85].mxu0  ;;  %v7443_v12 = vadd.f32 %v11655_v24, %v10956_v41  ;;  %v11238_v41 = vld [vmem:[%s13880_s21 + $0x90] sm:$0xff]  }
0x21bd   :  { %v7441_v27 = vadd.f32 %v11655_v24, %v7422_v0  ;;  %v10957_v52 = vpop.f32.mrb[86].mxu0  ;;  %v11242_v0 = vld [vmem:[%s13880_s21 + $0x98] sm:$0xff]  }
0x21be   :  { %v7425_v37 = vpop.f32.mrb[87].mxu0  ;;  %v7444_v40 = vadd.f32 %v11655_v24, %v10957_v52  ;;  %v7448_v45 = vsel %vm125_vm0, %v7443_v12, 0.0  ;;  %v11245_v52 = vld [vmem:[%s13880_s21 + $0x30] sm:$0xff]   ;;  %v11247_v12 = vld [vmem:[%s13880_s21 + $0x78] sm:$0xff]  }
0x21bf   :  { %v7442_v18 = vadd.f32 %v11655_v24, %v7425_v37  ;;  %v7445_v56 = vsel %vm125_vm0, %v7441_v27, 0.0  ;;  %v11243_v24 = vld [vmem:[%s13880_s21 + $0x70] sm:$0xff]   ;;  %v11244_v27 = vld [vmem:[%s13880_s21 + $0xe0] sm:$0xff]  }
0x21c0   :  { %v7450_v61 = vsel %vm125_vm0, %v7444_v40, 0.0  ;;  %v11246_v37 = vld [vmem:[%s13880_s21 + $0xa0] sm:$0xff]   ;;  %9826 = vmatprep.subr.bf16.mxu0 %v11243_v24  ;;  %v11251_v40 = vld [vmem:[%s13880_s21 + $0xf0] sm:$0xff]   ;;  %v7510_v24 = vsub.s32 7, %v11965_v62 }
0x21c1   :  { %v7446_v38 = vsel %vm125_vm0, %v7442_v18, 0.0  ;;  %9827 = vmatpush3.bf16.msra.mxu0 %v11245_v52  ;;  %v11248_v18 = vld [vmem:[%s13880_s21 + $0xe8] sm:$0xff]   ;;  %v11267_v52 = vld [vmem:[%s13880_s21 + $0x160] sm:$0xff]  }
0x21c2   :  { %v7447_v50 = vadd.f32 %v7446_v38, %v7445_v56  ;;  %v11250_v56 = vld [vmem:[%s13880_s21 + $0xa8] sm:$0xff]   ;;  %9828 = vmatprep.subr.bf16.mxu0 %v11247_v12  ;;  %v11252_v38 = vld [vmem:[%s13880_s21 + $0x140] sm:$0xff]  }
0x21c4   :  { %v7449_v4 = vadd.f32 %v7448_v45, %v7447_v50  ;;  %v11253_v50 = vld [vmem:[%s13880_s21 + $0xb0] sm:$0xff]   ;;  %v11255_v45 = vld [vmem:[%s13880_s21 + $0xf8] sm:$0xff]  }
0x21c5   :  { %9829 = vmatpush3.bf16.msra.mxu0 %v11249_v15 }
0x21c6   :  { %v7451_v46 = vadd.f32 %v7450_v61, %v7449_v4  ;;  %9858 = vmatprep.subr.bf16.mxu0 %v11252_v38  ;;  %v11260_v4 = vld [vmem:[%s13880_s21 + $0x1c0] sm:$0xff]   ;;  %v7498_v38 = vsub.s32 4, %v11965_v62 }
0x21c7   :  { %v13679_v61 = vld [vmem:[%s13879_s20] sm:$0xff]  ;;  %s8714_s20 = sshll.u32 %s11686_s9, 4  ;;  %s8715_s20 = int_to_ptr.vmem [resolvable:$true] %s8714_s20 }
0x21c8   :  { %v7452_v58 = vrot.slane %v7451_v46, 4  ;;  %v7487_v14 = vrot.slane %v13679_v61, %v11981_v16  ;;  %v7511_v15 = vrot.slane %v13679_v61, %v7510_v24  ;;  %s11658_s14 = scalar_lea.vmem %s8715_s20, 1024  ;;  %p11663_p1 = scmp.lt.s32.totalorder %s8715_s20, %s8715_s20 }
0x21c9   :  { %p11659_p0 = scmp.ne.s32.totalorder %s8715_s20, %s11658_s14  ;;  %p11664_p2 = scmp.lt.s32.totalorder %s11658_s14, %s11658_s14 }
0x21ca   :  { %v7453_v9 = vadd.f32 %v7452_v58, %v7451_v46  ;;  %v7483_v46 = vrot.slane %v13679_v61, %v11977_v3 }
0x21cb   :  { %p11665_p3 = por %p11664_p2, %p11663_p1 }
0x21cc   :  { %v7454_v47 = vrot.slane %v7453_v9, 2 }
0x21cd   :  { %p11666_p4 = pnand %p11665_p3, %p11659_p0 }
0x21ce   :  { %v7455_v63 = vadd.f32 %v7454_v47, %v7453_v9  ;;  %v7490_v47 = vsub.s32 2, %v11965_v62 }
0x21d0   :  { %v7456_v32 = vrot.slane %v7455_v63, 1  ;;  %v7491_v6 = vrot.slane %v13679_v61, %v7490_v47 }
0x21d2   :  { %v7457_v31 = vadd.f32 %v7456_v32, %v7455_v63  ;;  %v7494_v32 = vsub.s32 3, %v11965_v62 }
0x21d4   :  { %v7458_v60 = vmul.f32 0.03125, %v7457_v31 }
0x21d6   :  { %v7460_v11 = vsel %vm7459_vm3, %v4536_v51, %v7458_v60 }
0x21d7   :  { %v7461_v22 = vpack.c.bf16 %v7460_v11, %v7460_v11  ;;  %v7495_v11 = vrot.slane %v13679_v61, %v7494_v32 }
0x21d9   :  { %9214 = vmatmul.mubr.msk.bf16.vlgmr.msra.gmra.mrb[252].mxu1 %vm125_vm0, %v7461_v22 }
0x21da   :  { %7645 = vmatpush1.bf16.msra.mxu1 %v9200_v5  ;;  %7676 = vmatprep.mubr.bf16.mxu1 %v11684_v35  ;;  %v9210_v5 = vcombine.low %v7472_v23, %v7476_v30 }
0x21db   :  { %7646 = vmatprep.subr.bf16.mxu1 %v9209_v10 }
0x21de   :  { %7647 = vmatpush1.bf16.msra.mxu1 %v9208_v43 }
0x21df   :  { %7685 = vmatprep.subr.bf16.mxu1 %v9203_v57 }
0x21e1   :  { %9215 = vmatmul.mubr.msk.bf16.vlgmr.msra.gmra.mrb[0].mxu1 %vm125_vm0, %v7461_v22 }
0x21e2   :  { %7686 = vmatpush1.bf16.msra.mxu1 %v9202_v1  ;;  %7717 = vmatprep.mubr.bf16.mxu1 %v11684_v35  ;;  %v11258_v1 = vld [vmem:[%s13880_s21 + $0x108] sm:$0xff]  }
0x21e3   :  { %7687 = vmatprep.subr.bf16.mxu1 %v9211_v49  ;;  %v7502_v49 = vsub.s32 5, %v11965_v62 }
0x21e5   :  { %v7503_v42 = vrot.slane %v13679_v61, %v7502_v49  ;;  %v11285_v49 = vld [vmem:[%s13880_s21 + $0x1f8] sm:$0xff]  }
0x21e6   :  { %7688 = vmatpush1.bf16.msra.mxu1 %v9210_v5  ;;  %v11259_v5 = vld [vmem:[%s13880_s21 + $0x150] sm:$0xff]  }
0x21e7   :  { %7726 = vmatprep.subr.bf16.mxu1 %v9205_v7 }
0x21e9   :  { %9216 = vmatmul.mubr.msk.bf16.vlgmr.msra.gmra.mrb[4].mxu1 %vm125_vm0, %v7461_v22 }
0x21ea   :  { %7727 = vmatpush1.bf16.msra.mxu1 %v9204_v44  ;;  %7758 = vmatprep.mubr.bf16.mxu1 %v11684_v35  ;;  %v11234_v35 = vld [vmem:[%s13880_s21 + $0x88] sm:$0xff]   ;;  %v11261_v44 = vld [vmem:[%s13880_s21 + $0x110] sm:$0xff]  }
0x21eb   :  { %7728 = vmatprep.subr.bf16.mxu1 %v9213_v48  ;;  %v11262_v48 = vld [vmem:[%s13880_s21 + $0x180] sm:$0xff]  }
0x21ee   :  { %7729 = vmatpush1.bf16.msra.mxu1 %v9212_v59 }
0x21ef   :  { %9836 = vmatprep.subr.bf16.mxu1 %v11228_v53  ;;  %v11263_v53 = vld [vmem:[%s13880_s21 + $0x158] sm:$0xff]  }
0x21f1   :  { %9217 = vmatmul.mubr.msk.bf16.vlgmr.msra.gmra.mrb[8].mxu1 %vm125_vm0, %v7461_v22  ;;  %v11254_v22 = vld [vmem:[%s13880_s21 + $0x100] sm:$0xff]  }
0x21f2   :  { %9837 = vmatpush3.bf16.msra.mxu1 %v11230_v2  ;;  %v11264_v2 = vld [vmem:[%s13880_s21 + $0x1c8] sm:$0xff]  }
0x21f3   :  { %9838 = vmatprep.subr.bf16.mxu1 %v11232_v55 }
0x21f6   :  { %9839 = vmatpush3.bf16.msra.mxu1 %v11234_v35 }
0x21f7   :  { %9840 = vmatprep.subr.bf16.mxu1 %v11236_v36 }
0x21fa   :  { %9841 = vmatpush3.bf16.msra.mxu1 %v11238_v41 }
0x21fb   :  { %9842 = vmatprep.subr.bf16.mxu1 %v11240_v19  ;;  %v11265_v19 = vld [vmem:[%s13880_s21 + $0x118] sm:$0xff]  }
0x21fe   :  { %9843 = vmatpush3.bf16.msra.mxu1 %v11242_v0  ;;  %v11266_v0 = vld [vmem:[%s13880_s21 + $0x188] sm:$0xff]  }
0x21ff   :  { %9844 = vmatprep.subr.bf16.mxu1 %v11244_v27 }
0x2202   :  { %9845 = vmatpush3.bf16.msra.mxu1 %v11246_v37  ;;  %v11268_v37 = vld [vmem:[%s13880_s21 + $0x1d0] sm:$0xff]  }
0x2203   :  { %9846 = vmatprep.subr.bf16.mxu1 %v11248_v18 }
0x2206   :  { %9847 = vmatpush3.bf16.msra.mxu1 %v11250_v56  ;;  %v11269_v56 = vld [vmem:[%s13880_s21 + $0x120] sm:$0xff]  }
0x2207   :  { %9848 = vmatprep.subr.bf16.mxu1 %v11251_v40  ;;  %v11270_v40 = vld [vmem:[%s13880_s21 + $0x190] sm:$0xff]  }
0x220a   :  { %9849 = vmatpush3.bf16.msra.mxu1 %v11253_v50  ;;  %v11271_v50 = vld [vmem:[%s13880_s21 + $0x168] sm:$0xff]  }
0x220b   :  { %9850 = vmatprep.subr.bf16.mxu1 %v11255_v45  ;;  %v11272_v45 = vld [vmem:[%s13880_s21 + $0x1d8] sm:$0xff]  }
0x220e   :  { %9851 = vmatpush3.bf16.msra.mxu1 %v11257_v17 }
0x220f   :  { %9880 = vmatprep.subr.bf16.mxu1 %v11260_v4 }
0x22ac   :  { %v7637_v58 = vpop.f32.mrb[252].mxu1 }
0x22ad   :  { %v7638_v9 = vadd.f32 %v7637_v58, %v7483_v46  ;;  %v7639_v34 = vpop.f32.mrb[253].mxu1  ;;  %v11273_v58 = vld [vmem:[%s13880_s21 + $0x128] sm:$0xff]  }
0x22ae   :  { %v7640_v63 = vadd.f32 %v7639_v34, %v7487_v14  ;;  %v7641_v13 = vpop.f32.mrb[254].mxu1  ;;  %v7499_v34 = vrot.slane %v13679_v61, %v7498_v38 }
0x22af   :  { %v7767_v31 = vmax.f32 %v7638_v9, 0.0  ;;  %v7642_v51 = vpop.f32.mrb[255].mxu1  ;;  %v11274_v9 = vld [vmem:[%s13880_s21 + $0x198] sm:$0xff]   ;;  %v11276_v13 = vld [vmem:[%s13880_s21 + $0x1e0] sm:$0xff]  }
0x22b0   :  { %v7768_v60 = vmax.f32 %v7640_v63, 0.0  ;;  %v11275_v63 = vld [vmem:[%s13880_s21 + $0x170] sm:$0xff]  }
0x22b1   :  { %v7775_v10 = vpack.c.bf16 %v7767_v31, %v7767_v31  ;;  %v11277_v51 = vld [vmem:[%s13880_s21 + $0x130] sm:$0xff]  }
0x22b2   :  { %v7776_v8 = vpack.c.bf16 %v7768_v60, %v7768_v60  ;;  %v11278_v60 = vld [vmem:[%s13880_s21 + $0x1a0] sm:$0xff]  }
0x22b4   :  { %v7678_v54 = vpop.f32.mrb[0].mxu1  ;;  %8334 = vmatprep.mubr.bf16.mxu0 %v7776_v8  ;;  %v7506_v8 = vsub.s32 6, %v11965_v62 }
0x22b5   :  { %v7679_v43 = vadd.f32 %v7678_v54, %v7491_v6  ;;  %v7680_v57 = vpop.f32.mrb[1].mxu1  ;;  %8335 = vmatmul.mubr.bf16.vlgmr.msra.gmra.mrb[104].mxu0 %v7775_v10  ;;  %v11281_v10 = vld [vmem:[%s13880_s21 + $0x138] sm:$0xff]  }
0x22b6   :  { %v7681_v23 = vadd.f32 %v7680_v57, %v7495_v11  ;;  %9859 = vmatpush3.bf16.msra.mxu0 %v11254_v22  ;;  %v7682_v30 = vpop.f32.mrb[2].mxu1  ;;  %v11279_v11 = vld [vmem:[%s13880_s21 + $0x178] sm:$0xff]   ;;  %v11280_v22 = vld [vmem:[%s13880_s21 + $0x1e8] sm:$0xff]   ;;  %v11283_v57 = vld [vmem:[%s13880_s21 + $0x1f0] sm:$0xff]  }
0x22b7   :  { %v7769_v20 = vmax.f32 %v7679_v43, 0.0  ;;  %v7683_v39 = vpop.f32.mrb[3].mxu1  ;;  %9860 = vmatprep.subr.bf16.mxu0 %v11256_v26  ;;  %v11282_v26 = vld [vmem:[%s13880_s21 + $0x1a8] sm:$0xff]   ;;  %v7507_v43 = vrot.slane %v13679_v61, %v7506_v8  ;;  %v11286_v61 = vld [vmem:[%s13880_s21 + $0x1b8] sm:$0xff]  }
0x22b8   :  { %v7770_v7 = vmax.f32 %v7681_v23, 0.0  ;;  %v11284_v23 = vld [vmem:[%s13880_s21 + $0x1b0] sm:$0xff]  }
0x22b9   :  { %v7777_v59 = vpack.c.bf16 %v7769_v20, %v7769_v20 }
0x22ba   :  { %v7778_v25 = vpack.c.bf16 %v7770_v7, %v7770_v7  ;;  %9861 = vmatpush3.bf16.msra.mxu0 %v11258_v1 }
0x22bb   :  { %9862 = vmatprep.subr.bf16.mxu0 %v11259_v5 }
0x22bc   :  { %v7719_v55 = vpop.f32.mrb[4].mxu1  ;;  %8374 = vmatprep.mubr.bf16.mxu1 %v7778_v25 }
0x22bd   :  { %v7721_v35 = vpop.f32.mrb[5].mxu1  ;;  %8375 = vmatmul.mubr.bf16.vlgmr.msra.gmra.mrb[12].mxu1 %v7777_v59  ;;  %v7720_v6 = vadd.f32 %v7719_v55, %v7499_v34 }
0x22be   :  { %v7722_v36 = vadd.f32 %v7721_v35, %v7503_v42  ;;  %9863 = vmatpush3.bf16.msra.mxu0 %v11261_v44  ;;  %9881 = vmatpush3.bf16.msra.mxu1 %v11262_v48  ;;  %v7723_v41 = vpop.f32.mrb[6].mxu1  ;;  %v9218_v44 = vld [vmem:[%s13881_s22] ss:$0 sm:$0xff]  ;;  %v11685_v35 = vmov 1966171168  }
0x22bf   :  { %v7724_v27 = vpop.f32.mrb[7].mxu1  ;;  %9864 = vmatprep.subr.bf16.mxu0 %v11263_v53  ;;  %9882 = vmatprep.subr.bf16.mxu1 %v11264_v2  ;;  %v7771_v54 = vmax.f32 %v7720_v6, 0.0 }
0x22c0   :  { %v7772_v12 = vmax.f32 %v7722_v36, 0.0  ;;  %v8466_v36 = vunpack.c.l.s4 %v11685_v35  ;;  %v11656_v27 = vld [vmem:[%s13901_s26 + $0x1] sm:$0x1] }
0x22c1   :  { %v7779_v30 = vpack.c.bf16 %v7771_v54, %v7771_v54 }
0x22c2   :  { %v7780_v18 = vpack.c.bf16 %v7772_v12, %v7772_v12  ;;  %9865 = vmatpush3.bf16.msra.mxu0 %v11265_v19  ;;  %9883 = vmatpush3.bf16.msra.mxu1 %v11266_v0  ;;  %v8467_v41 = vunpack.c.0.s8 %v8466_v36 }
0x22c3   :  { %9866 = vmatprep.subr.bf16.mxu0 %v11267_v52  ;;  %9884 = vmatprep.subr.bf16.mxu1 %v11268_v37  ;;  %v11657_v52 = vld [vmem:[%s13901_s26] sm:$0x1] }
0x22c4   :  { %v7760_v17 = vpop.f32.mrb[8].mxu1  ;;  %8414 = vmatprep.mubr.bf16.mxu0 %v7780_v18  ;;  %v8464_v37 = vcombine.low %v11657_v52, %v11656_v27  ;;  %v8470_v12 = vsub.s32 %v8467_v41, %v11965_v62  ;;  %v9287_v62 = vld [vmem:[%s13904_s7 + $0x20] sm:$0xff] }
0x22c5   :  { %v7762_v4 = vpop.f32.mrb[9].mxu1  ;;  %v7761_v1 = vadd.f32 %v7760_v17, %v7507_v43 }
0x22c6   :  { %v7763_v46 = vadd.f32 %v7762_v4, %v7511_v15  ;;  %9867 = vmatpush3.bf16.msra.mxu0 %v11269_v56  ;;  %9885 = vmatpush3.bf16.msra.mxu1 %v11270_v40  ;;  %v7764_v14 = vpop.f32.mrb[10].mxu1  ;;  %v8471_v56 = vrot.slane %v8464_v37, %v8470_v12 }
0x22c7   :  { %v7765_v47 = vpop.f32.mrb[11].mxu1  ;;  %9868 = vmatprep.subr.bf16.mxu0 %v11271_v50  ;;  %9886 = vmatprep.subr.bf16.mxu1 %v11272_v45  ;;  %v7773_v20 = vmax.f32 %v7761_v1, 0.0 }
0x22c8   :  { %v7774_v32 = vmax.f32 %v7763_v46, 0.0  ;;  %v8478_v45 = vrot.slane %v8471_v56, %v8470_v12 }
0x22c9   :  { %v7781_v39 = vpack.c.bf16 %v7773_v20, %v7773_v20 }
0x22ca   :  { %v7782_v31 = vpack.c.bf16 %v7774_v32, %v7774_v32  ;;  %9869 = vmatpush3.bf16.msra.mxu0 %v11273_v58  ;;  %9887 = vmatpush3.bf16.msra.mxu1 %v11274_v9  ;;  %v9288_v58 = vld [vmem:[%s13904_s7 + $0x28] sm:$0xff]  ;;  %v8481_v9 = vld [vmem:[%s13904_s7] sm:$0xff]  ;;  %v9289_v32 = vld [vmem:[%s13904_s7 + $0x30] sm:$0xff] }
0x22cb   :  { %9870 = vmatprep.subr.bf16.mxu0 %v11275_v63  ;;  %9888 = vmatprep.subr.bf16.mxu1 %v11276_v13  ;;  %v8482_v63 = vld [vmem:[%s13904_s7 + $0x8] sm:$0xff]  ;;  %v8483_v13 = vld [vmem:[%s13904_s7 + $0x10] sm:$0xff] }
0x22cc   :  { %8454 = vmatprep.mubr.bf16.mxu1 %v7782_v31 }
0x22ce   :  { %9871 = vmatpush3.bf16.msra.mxu0 %v11277_v51  ;;  %9889 = vmatpush3.bf16.msra.mxu1 %v11278_v60 }
0x22cf   :  { %9872 = vmatprep.subr.bf16.mxu0 %v11279_v11  ;;  %9890 = vmatprep.subr.bf16.mxu1 %v11280_v22  ;;  %v8484_v11 = vld [vmem:[%s13904_s7 + $0x18] sm:$0xff] }
0x22d2   :  { %9873 = vmatpush3.bf16.msra.mxu0 %v11281_v10  ;;  %9891 = vmatpush3.bf16.msra.mxu1 %v11282_v26 }
0x22d3   :  { %9892 = vmatprep.subr.bf16.mxu1 %v11283_v57  ;;  %10987 = vmatprep.subr.bf16.mxu0 %v11863_v21 }
0x22d5   :  { %8415 = vmatmul.mubr.bf16.vlgmr.msra.gmra.mrb[108].mxu0 %v7779_v30 }
0x22d6   :  { %9893 = vmatpush3.bf16.msra.mxu1 %v11284_v23  ;;  %10989 = vmatpush3.bf16.msra.mxu0 %v11863_v21 }
0x22d7   :  { %9894 = vmatprep.subr.bf16.mxu1 %v11285_v49  ;;  %10991 = vmatprep.subr.bf16.mxu0 %v11886_v28 }
0x22da   :  { %9895 = vmatpush3.bf16.msra.mxu1 %v11286_v61  ;;  %10993 = vmatpush3.bf16.msra.mxu0 %v11886_v28 }
0x22db   :  { %10995 = vmatprep.subr.bf16.mxu1 %v11888_v29 }
0x22dd   :  { %8455 = vmatmul.mubr.bf16.vlgmr.msra.gmra.mrb[16].mxu1 %v7781_v39 }
0x22de   :  { %10997 = vmatpush3.bf16.msra.mxu1 %v11888_v29 }
0x22df   :  { %10999 = vmatprep.subr.bf16.mxu1 %v11903_v33 }
0x22e2   :  { %11001 = vmatpush3.bf16.msra.mxu1 %v11903_v33 }
0x2388   :  { %v9830_v5 = vpop.f32.mrb[104].mxu0 }
0x2389   :  { %v9831_v7 = vpop.f32.mrb[105].mxu0 }
0x238a   :  { %v9832_v21 = vadd.f32 %v9831_v7, %v9830_v5  ;;  %v9833_v25 = vpop.f32.mrb[106].mxu0 }
0x238b   :  { %v9834_v42 = vpop.f32.mrb[107].mxu0 }
0x238c   :  { %v8337_v59 = vadd.f32 %v9832_v21, %v9218_v44 }
0x2390   :  { %v9852_v28 = vpop.f32.mrb[12].mxu1 }
0x2391   :  { %v9853_v48 = vpop.f32.mrb[13].mxu1 }
0x2392   :  { %v9854_v53 = vadd.f32 %v9853_v48, %v9852_v28  ;;  %v9855_v2 = vpop.f32.mrb[14].mxu1 }
0x2393   :  { %v9856_v55 = vpop.f32.mrb[15].mxu1 }
0x2394   :  { %v8377_v29 = vadd.f32 %v9854_v53, %v8337_v59 }
0x23a8   :  { %v9874_v33 = vpop.f32.mrb[108].mxu0 }
0x23a9   :  { %v9875_v19 = vpop.f32.mrb[109].mxu0 }
0x23aa   :  { %v9876_v0 = vadd.f32 %v9875_v19, %v9874_v33  ;;  %v9877_v24 = vpop.f32.mrb[110].mxu0 }
0x23ab   :  { %v9878_v18 = vpop.f32.mrb[111].mxu0 }
0x23ac   :  { %v8417_v15 = vadd.f32 %v9876_v0, %v8377_v29 }
0x23b0   :  { %v9896_v40 = vpop.f32.mrb[16].mxu1 }
0x23b1   :  { %v9897_v38 = vpop.f32.mrb[17].mxu1 }
0x23b2   :  { %v9898_v50 = vadd.f32 %v9897_v38, %v9896_v40  ;;  %v9899_v17 = vpop.f32.mrb[18].mxu1 }
0x23b3   :  { %v9900_v4 = vpop.f32.mrb[19].mxu1 }
0x23b4   :  { %v8457_v46 = vadd.f32 %v9898_v50, %v8417_v15 }
0x23b6   :  { %v8480_v14 = vadd.f32 %v8478_v45, %v8457_v46 }
0x23b8   :  { %v8488_v34 = vrot.slane %v8480_v14, %v11977_v3  ;;  %v8602_v47 = vrot.slane %v8480_v14, %v11981_v16  ;;  %v9290_v3 = vld [vmem:[%s13904_s7 + $0x38] sm:$0xff] }
0x23ba   :  { %v8604_v31 = vmul.f32 %v9288_v58, %v8602_v47  ;;  %v8489_v51 = vmul.f32 %v8488_v34, %v8481_v9  ;;  %v8603_v60 = vmul.f32 %v9287_v62, %v8602_v47  ;;  %v8490_v6 = vmul.f32 %v8488_v34, %v8482_v63 }
0x23bb   :  { %v8491_v16 = vmul.f32 %v8488_v34, %v8483_v13  ;;  %v8605_v8 = vmul.f32 %v9289_v32, %v8602_v47  ;;  %v8606_v22 = vmul.f32 %v9290_v3, %v8602_v47  ;;  %v8492_v10 = vmul.f32 %v8488_v34, %v8484_v11 }
0x23bc   :  { %10966 = vmatprep.mubr.msk.f32.mxu0 %vm125_vm0, %v8489_v51  ;;  %10980 = vmatprep.mubr.msk.f32.mxu1 %vm125_vm0, %v8603_v60 }
0x23bd   :  { %10967 = vmatmul.mubr.msk.f32.vlgmr.msra.gmra.mrb[112].mxu0 %vm125_vm0, %v8490_v6  ;;  %10981 = vmatmul.mubr.msk.f32.vlgmr.msra.gmra.mrb[20].mxu1 %vm125_vm0, %v8604_v31 }
0x23be   :  { %10969 = vmatprep.mubr.msk.f32.mxu0 %vm125_vm0, %v8491_v16  ;;  %10983 = vmatprep.mubr.msk.f32.mxu1 %vm125_vm0, %v8605_v8 }
0x23c1   :  { %10970 = vmatmul.mubr.msk.f32.gmra.mrb[114].mxu0 %vm125_vm0, %v8492_v10  ;;  %10984 = vmatmul.mubr.msk.f32.gmra.mrb[22].mxu1 %vm125_vm0, %v8606_v22 }
0x2490   :  { %v10968_v26 = vpop.f32.mrb[112].mxu0  ;;  %v10982_v54 = vpop.f32.mrb[20].mxu1 }
0x2491   :  { %8591 = vst.msk [vmem:[#allocation2 + $0x8] sm:$0xff] %vm125_vm0, %v10968_v26  ;;  %8706 = vst.msk [vmem:[#allocation2 + $0x28] sm:$0xff] %vm125_vm0, %v10982_v54  ;;  %v8571_v43 = vpop.f32.mrb[113].mxu0  ;;  %v8685_v57 = vpop.f32.mrb[21].mxu1 }
0x2492   :  { %8590 = vst.msk [vmem:[#allocation2] sm:$0xff] %vm125_vm0, %v8571_v43  ;;  %8705 = vst.msk [vmem:[#allocation2 + $0x20] sm:$0xff] %vm125_vm0, %v8685_v57 }
0x2494   :  { %v10971_v23 = vpop.f32.mrb[114].mxu0  ;;  %v10985_v30 = vpop.f32.mrb[22].mxu1 }
0x2495   :  { %8593 = vst.msk [vmem:[#allocation2 + $0x18] sm:$0xff] %vm125_vm0, %v10971_v23  ;;  %8708 = vst.msk [vmem:[#allocation2 + $0x38] sm:$0xff] %vm125_vm0, %v10985_v30  ;;  %v8581_v1 = vpop.f32.mrb[115].mxu0  ;;  %v8695_v49 = vpop.f32.mrb[23].mxu1 }
0x2496   :  { %8592 = vst.msk [vmem:[#allocation2 + $0x10] sm:$0xff] %vm125_vm0, %v8581_v1  ;;  %8707 = vst.msk [vmem:[#allocation2 + $0x30] sm:$0xff] %vm125_vm0, %v8695_v49 }
0x2497   :  { %11669 = shalt.err (!%p11666_p4)
}
0x2498   :  { %s11670_s24 = scalar_lea.hbm %s13882_s23, 1024 }
0x2499   :  { %p11671_p5 = scmp.ne.s32.totalorder %s13882_s23, %s11670_s24  ;;  %p11674_p6 = scmp.lt.u32.totalorder %s11670_s24, %s13882_s23 }
0x249b   :  { %p11676_p7 = pnand %p11674_p6, %p11671_p5 }
0x249d   :  { %11679 = shalt.err (!%p11676_p7)
}
0x249e   :  { %s11687_s13 = smov 128   ;;  %s11688_s6 = smov 8  }
0x249f   :  { %8720 = dma.vmem_to_hbm [thread:$0]  %s8715_s20, 1024, %s13882_s23, [#allocation3], %s11687_s13, %s11687_s13, %s11688_s6  }
0x24a0   :  { %11680 = dma.done.wait [#allocation3], 1024  }
0x24a1   :  { %11681 = vsyncadd [#allocation3], 4294966272 }
0x24a2   :  { %8724 = vsyncpa [#allocation3], 1 }

</bundles_post_ra>
